<compile_context>
chip_gen: v6e
topology: v6e:2x2x1
jax: 0.10.0
libtpu: 0.0.40
codegen_flags: <defaults>
</compile_context>

<pallas_src>
import functools

import jax
import jax.numpy as jnp
from jax.experimental import pallas as pl
from jax.experimental.pallas import tpu as pltpu

LANE = 128

# Keep f32 through the MXU for exact parity with the PyTorch reference.
# Flip to jnp.bfloat16 on v5e/v6e for ~2x MXU throughput (f32 accumulation is
# preserved via preferred_element_type); accept the small numeric drift.
MXU_DTYPE = jnp.float32


# ----------------------------------------------------------------------------
# sizing helpers (per-generation)
# ----------------------------------------------------------------------------
def _round_up(n, m):
    return ((n + m - 1) // m) * m


def _vmem_limit_bytes():
    """Scoped-VMEM cap ~= 75% of physical VMEM (48 MiB v7x, 96 MiB v5e/v6e)."""
    cap = 64 * 1024 * 1024
    try:
        info = pltpu.get_tpu_info()
        cap = int(getattr(info, "vmem_capacity_bytes", cap) or cap)
    except Exception:
        pass
    return max(48 * 1024 * 1024, min((cap * 3) // 4, 100 * 1024 * 1024))


def _pick_lane_chunk(n, target=4096):
    if n % LANE != 0:
        return n
    best = LANE
    m = LANE
    while m <= min(n, target):
        if n % m == 0:
            best = m
        m += LANE
    return best


def _fused_row_tile(h, w, cin, cp, vmem_limit):
    """Largest divisor th of h whose scratch + temporaries fit the VMEM budget."""
    xp_bytes = (h + 6) * (w + 2) * cin * 4
    wt_bytes = (9 * cin * cp + 9 * cp * cp + 9 * cp + 4 * cp + 6 * cp + 2) * 4
    fixed = 2 * xp_bytes + 2 * wt_bytes
    budget = max(vmem_limit - fixed - (8 << 20), vmem_limit // 4)

    def need(th):
        scratch = ((th + 4) + (th + 2)) * (w + 2) * cp * 4
        temps = 5 * (th + 4) * w * cp * 4          # y1 / q / att compiler temporaries
        out = 2 * th * w * cin * 4
        return scratch + temps + out

    def legal(th):
        return (th * w) % 8 == 0 or th == h

    for th in range(h, 0, -1):
        if h % th == 0 and legal(th) and need(th) <= budget:
            return th
    for th in range(1, h + 1):
        if h % th == 0 and legal(th):
            return th
    return h


# ----------------------------------------------------------------------------
# Kernel 1: uncertainty context (prob @ f, reduced over hw) fused with the
#           key / value 1x1 conv+BN+ReLU chains; scale folded into key.
# ----------------------------------------------------------------------------
def _context_kv_kernel(m_ref, f_ref, wk1_ref, tk1_ref, wk2_ref, tk2_ref,
                       wv1_ref, tv1_ref, wv2_ref, tv2_ref,
                       key_ref, val_ref, acc_ref, *, scale):
    ki = pl.program_id(1)

    @pl.when(ki == 0)
    def _():
        acc_ref[...] = jnp.zeros_like(acc_ref)

    p = jax.nn.sigmoid(m_ref[...]) - 0.5                 # (1, THW)
    fg = jnp.clip(p, 0.0, 1.0)
    bg = jnp.clip(-p, 0.0, 1.0)
    cg = 0.5 - jnp.abs(p)
    prob = jnp.concatenate([fg, bg, cg], axis=0)         # (3, THW)
    acc_ref[...] += jnp.dot(prob, f_ref[...], preferred_element_type=jnp.float32)

    @pl.when(ki == pl.num_programs(1) - 1)
    def _():
        ctx = acc_ref[...]                               # (3, c)
        kf = jnp.maximum(jnp.dot(ctx, wk1_ref[...],
                                 preferred_element_type=jnp.float32) + tk1_ref[...], 0.0)
        k2 = jnp.maximum(jnp.dot(kf, wk2_ref[...],
                                 preferred_element_type=jnp.float32) + tk2_ref[...], 0.0)
        key_ref[...] = k2 * scale                        # fold channel**-0.5 into key
        vf = jnp.maximum(jnp.dot(ctx, wv1_ref[...],
                                 preferred_element_type=jnp.float32) + tv1_ref[...], 0.0)
        val_ref[...] = jnp.maximum(jnp.dot(vf, wv2_ref[...],
                                           preferred_element_type=jnp.float32)
                                   + tv2_ref[...], 0.0)


def context_key_value(map_flat, f, wk1, tk1, wk2, tk2, wv1, tv1, wv2, tv2,
                      scale, vmem_limit):
    b, _, hw = map_flat.shape
    c = f.shape[-1]
    cp = wk2.shape[-1]
    thw = _pick_lane_chunk(hw)
    n_chunks = hw // thw

    def full(a):
        return pl.BlockSpec(a.shape, lambda bi, ki, _n=a.ndim: (0,) * _n)

    kern = functools.partial(_context_kv_kernel, scale=scale)
    return pl.pallas_call(
        kern,
        out_shape=(jax.ShapeDtypeStruct((b, 3, cp), jnp.float32),
                   jax.ShapeDtypeStruct((b, 3, cp), jnp.float32)),
        grid=(b, n_chunks),
        in_specs=[
            pl.BlockSpec((None, 1, thw), lambda bi, ki: (bi, 0, ki)),
            pl.BlockSpec((None, thw, c), lambda bi, ki: (bi, ki, 0)),
            full(wk1), full(tk1), full(wk2), full(tk2),
            full(wv1), full(tv1), full(wv2), full(tv2),
        ],
        out_specs=(pl.BlockSpec((None, 3, cp), lambda bi, ki: (bi, 0, 0)),
                   pl.BlockSpec((None, 3, cp), lambda bi, ki: (bi, 0, 0))),
        scratch_shapes=[pltpu.VMEM((3, c), jnp.float32)],
        compiler_params=pltpu.CompilerParams(
            dimension_semantics=("parallel", "arbitrary"),
            vmem_limit_bytes=vmem_limit),
    )(map_flat, f, wk1, tk1, wk2, tk2, wv1, tv1, wv2, tv2)


# ----------------------------------------------------------------------------
# Kernel 2: fused query conv1 -> conv2 -> 3-slot attention -> conv_out1 gate
#           -> x * gate.  Row-halo recompute; all intermediates stay in VMEM.
# ----------------------------------------------------------------------------
def _fused_query_attn_gate_kernel(xp_ref, wq1_ref, tq1_ref, wq2_ref, tq2_ref,
                                  key_ref, val_ref, wg_ref, tg_ref,
                                  o_ref, q1_ref, att_ref, *, h, w, th):
    cin = xp_ref.shape[-1]
    cp = wq1_ref.shape[-1]
    r0 = pl.program_id(1) * th
    n1 = th + 4            # q1 rows (2-row halo each side)
    n2 = th + 2            # query / attention rows (1-row halo each side)

    # ---- conv_query[0]: 3x3 conv + BN + ReLU over the 2-row-halo window ----
    acc1 = None
    for di in range(3):
        for dj in range(3):
            patch = xp_ref[pl.ds(r0 + di, n1), dj:dj + w, :].reshape(n1 * w, cin)
            d = jnp.dot(patch.astype(MXU_DTYPE),
                        wq1_ref[di * 3 + dj].astype(MXU_DTYPE),
                        preferred_element_type=jnp.float32)
            acc1 = d if acc1 is None else acc1 + d
    y1 = jnp.maximum(acc1 + tq1_ref[...], 0.0)                     # (n1*w, cp)
    row1 = jax.lax.broadcasted_iota(jnp.int32, (n1, 1, 1), 0) + (r0 - 2)
    ok1 = (row1 >= 0) & (row1 < h)                                 # halo rows outside image -> 0
    zcol1 = jnp.zeros((n1, 1, cp), jnp.float32)
    q1_ref[:, 0:1, :] = zcol1
    q1_ref[:, w + 1:w + 2, :] = zcol1
    q1_ref[:, 1:w + 1, :] = jnp.where(ok1, y1.reshape(n1, w, cp), 0.0)

    # ---- conv_query[1] + attention over the 3 uncertainty-context slots ----
    acc2 = None
    for di in range(3):
        for dj in range(3):
            patch = q1_ref[pl.ds(di, n2), dj:dj + w, :].reshape(n2 * w, cp)
            d = jnp.dot(patch.astype(MXU_DTYPE),
                        wq2_ref[di * 3 + dj].astype(MXU_DTYPE),
                        preferred_element_type=jnp.float32)
            acc2 = d if acc2 is None else acc2 + d
    q = jnp.maximum(acc2 + tq2_ref[...], 0.0)                      # (n2*w, cp)

    sim = jnp.dot(q, key_ref[...].T, preferred_element_type=jnp.float32)   # (n2*w, 3)
    m = jnp.max(sim, axis=-1, keepdims=True)
    e = jnp.exp(sim - m)
    p = e / jnp.sum(e, axis=-1, keepdims=True)
    att = jnp.dot(p, val_ref[...], preferred_element_type=jnp.float32)     # (n2*w, cp)

    row2 = jax.lax.broadcasted_iota(jnp.int32, (n2, 1, 1), 0) + (r0 - 1)
    ok2 = (row2 >= 0) & (row2 < h)
    zcol2 = jnp.zeros((n2, 1, cp), jnp.float32)
    att_ref[:, 0:1, :] = zcol2
    att_ref[:, w + 1:w + 2, :] = zcol2
    att_ref[:, 1:w + 1, :] = jnp.where(ok2, att.reshape(n2, w, cp), 0.0)

    # ---- conv_out1 (3x3 -> 1 channel gate, BN + ReLU) + residual multiply --
    accg = None
    for di in range(3):
        for dj in range(3):
            patch = att_ref[pl.ds(di, th), dj:dj + w, :].reshape(th * w, cp)
            d = jnp.dot(patch.astype(MXU_DTYPE),
                        wg_ref[di * 3 + dj].astype(MXU_DTYPE),
                        preferred_element_type=jnp.float32)
            accg = d if accg is None else accg + d
    gate = jnp.maximum(accg + tg_ref[...], 0.0)                    # (th*w, 1)

    x_tile = xp_ref[pl.ds(r0 + 3, th), 1:w + 1, :].reshape(th * w, cin)
    o_ref[...] = x_tile.astype(jnp.float32) * gate


def fused_query_attention_gate(xp, wq1, tq1, wq2, tq2, key_s, val, wg, tg,
                               h, w, vmem_limit):
    # TODO(synk): xp stays VMEM-resident per batch; for very large images on
    # v7x switch this input to pl.ANY + manual row-halo make_async_copy.
    b = xp.shape[0]
    cin = xp.shape[-1]
    cp = wq1.shape[-1]
    th = _fused_row_tile(h, w, cin, cp, vmem_limit)
    n_rt = h // th
    kern = functools.partial(_fused_query_attn_gate_kernel, h=h, w=w, th=th)
    return pl.pallas_call(
        kern,
        out_shape=jax.ShapeDtypeStruct((b, h * w, cin), jnp.float32),
        grid=(b, n_rt),
        in_specs=[
            pl.BlockSpec((None, h + 6, w + 2, cin), lambda bi, ri: (bi, 0, 0, 0)),
            pl.BlockSpec(wq1.shape, lambda bi, ri: (0, 0, 0)),
            pl.BlockSpec(tq1.shape, lambda bi, ri: (0, 0)),
            pl.BlockSpec(wq2.shape, lambda bi, ri: (0, 0, 0)),
            pl.BlockSpec(tq2.shape, lambda bi, ri: (0, 0)),
            pl.BlockSpec((None, 3, cp), lambda bi, ri: (bi, 0, 0)),
            pl.BlockSpec((None, 3, cp), lambda bi, ri: (bi, 0, 0)),
            pl.BlockSpec(wg.shape, lambda bi, ri: (0, 0, 0)),
            pl.BlockSpec(tg.shape, lambda bi, ri: (0, 0)),
        ],
        out_specs=pl.BlockSpec((None, th * w, cin), lambda bi, ri: (bi, ri, 0)),
        scratch_shapes=[pltpu.VMEM((th + 4, w + 2, cp), jnp.float32),
                        pltpu.VMEM((th + 2, w + 2, cp), jnp.float32)],
        compiler_params=pltpu.CompilerParams(
            dimension_semantics=("parallel", "parallel"),
            vmem_limit_bytes=vmem_limit),
    )(xp, wq1, tq1, wq2, tq2, key_s, val, wg, tg)


# ----------------------------------------------------------------------------
# weight prep (fold BN scale, transpose to matmul layout, zero-pad channels)
# ----------------------------------------------------------------------------
def _fold_bn(gamma, beta, mean, var, eps=1e-5):
    s = gamma / jnp.sqrt(var + eps)
    return s, beta - mean * s


def prep_conv3x3(p, cin_in, cout_pad):
    w, s, t = p["w"], p["s"], p["t"]
    cout, cin_t = w.shape[0], w.shape[1]
    wm = jnp.transpose(w, (2, 3, 1, 0)).reshape(9, cin_t, cout) * s[None, None, :]
    wm = jnp.pad(wm, ((0, 0), (0, cin_in - cin_t), (0, cout_pad - cout)))
    tt = jnp.pad(t, (0, cout_pad - cout)).reshape(1, cout_pad)
    return wm, tt


def prep_conv1x1(p, cin_in, cout_pad):
    w, s, t = p["w"], p["s"], p["t"]
    cout, cin_t = w.shape[0], w.shape[1]
    wm = jnp.transpose(w.reshape(cout, cin_t)) * s[None, :]
    wm = jnp.pad(wm, ((0, cin_in - cin_t), (0, cout_pad - cout)))
    tt = jnp.pad(t, (0, cout_pad - cout)).reshape(1, cout_pad)
    return wm, tt


def make_conv_bn(key, cin, cout, ksize):
    # conv helper assumed to be Conv2d(bias=False) + BatchNorm + optional ReLU
    k1, k2, k3, k4, k5 = jax.random.split(key, 5)
    w = 0.1 * jax.random.normal(k1, (cout, cin, ksize, ksize), jnp.float32)
    gamma = 0.5 + 0.5 * jax.random.uniform(k2, (cout,), jnp.float32)
    beta = 0.1 * jax.random.normal(k3, (cout,), jnp.float32)
    mean = 0.1 * jax.random.normal(k4, (cout,), jnp.float32)
    var = 0.8 + 0.4 * jax.random.uniform(k5, (cout,), jnp.float32)
    s, t = _fold_bn(gamma, beta, mean, var)
    return {"w": w, "s": s, "t": t}


def init_uaca_params(key, in_channels, out_channels):
    ks = jax.random.split(key, 7)
    return {
        "channel": out_channels,
        "query": [make_conv_bn(ks[0], in_channels, out_channels, 3),
                  make_conv_bn(ks[1], out_channels, out_channels, 3)],
        "key":   [make_conv_bn(ks[2], in_channels, out_channels, 1),
                  make_conv_bn(ks[3], out_channels, out_channels, 1)],
        "value": [make_conv_bn(ks[4], in_channels, out_channels, 1),
                  make_conv_bn(ks[5], out_channels, out_channels, 1)],
        "out1":  make_conv_bn(ks[6], out_channels, 1, 3),
    }


# ----------------------------------------------------------------------------
# XLA glue: bilinear upsample of the (tiny) map, align_corners=False
# ----------------------------------------------------------------------------
def bilinear_resize_nchw(m, out_h, out_w):
    # TODO(synk): matches F.interpolate(align_corners=False) for the clamped
    # upsampling path used here; extreme downsampling edge cases untested.
    b, c, ih, iw = m.shape
    if (ih, iw) == (out_h, out_w):
        return m
    sy, sx = ih / out_h, iw / out_w
    ys = jnp.maximum((jnp.arange(out_h, dtype=jnp.float32) + 0.5) * sy - 0.5, 0.0)
    xs = jnp.maximum((jnp.arange(out_w, dtype=jnp.float32) + 0.5) * sx - 0.5, 0.0)
    y0 = jnp.floor(ys).astype(jnp.int32)
    x0 = jnp.floor(xs).astype(jnp.int32)
    y1 = jnp.minimum(y0 + 1, ih - 1)
    x1 = jnp.minimum(x0 + 1, iw - 1)
    wy = (ys - y0.astype(jnp.float32))[None, None, :, None]
    wx = (xs - x0.astype(jnp.float32))[None, None, None, :]
    rows = m[:, :, y0, :] * (1.0 - wy) + m[:, :, y1, :] * wy
    return rows[:, :, :, x0] * (1.0 - wx) + rows[:, :, :, x1] * wx


# ----------------------------------------------------------------------------
# UACA forward
# ----------------------------------------------------------------------------
def uaca_forward(params, x, map_):
    b, c, h, w = x.shape
    C = params["channel"]
    Cp = _round_up(C, LANE)        # lane-dense padded channel count (zeros propagate)
    hw = h * w
    vmem_limit = _vmem_limit_bytes()

    # map upsample (XLA, tiny tensor)
    map_r = bilinear_resize_nchw(map_, h, w).reshape(b, 1, hw)

    # reproduce torch's x.view(b, h*w, -1) on NCHW memory (intentional quirk)
    f = x.reshape(b, hw, c)

    # fused: context = prob @ f (reduced over hw) + key/value 1x1 conv chains
    wk1, tk1 = prep_conv1x1(params["key"][0], c, Cp)
    wk2, tk2 = prep_conv1x1(params["key"][1], Cp, Cp)
    wv1, tv1 = prep_conv1x1(params["value"][0], c, Cp)
    wv2, tv2 = prep_conv1x1(params["value"][1], Cp, Cp)
    key_s, value = context_key_value(map_r, f, wk1, tk1, wk2, tk2,
                                     wv1, tv1, wv2, tv2,
                                     float(C) ** (-0.5), vmem_limit)   # (b,3,Cp) each

    # query path + attention + gate + residual multiply, all fused per row tile
    x_nhwc = jnp.transpose(x, (0, 2, 3, 1))                            # (b,h,w,c)
    xp = jnp.pad(x_nhwc, ((0, 0), (3, 3), (1, 1), (0, 0)))             # halo pad (small-channel input only)

    wq1, tq1 = prep_conv3x3(params["query"][0], c, Cp)
    wq2, tq2 = prep_conv3x3(params["query"][1], Cp, Cp)
    wg, tg = prep_conv3x3(params["out1"], Cp, 1)                       # 1-column gate weights

    out_hwc = fused_query_attention_gate(xp, wq1, tq1, wq2, tq2,
                                         key_s, value, wg, tg,
                                         h, w, vmem_limit)             # (b,hw,c)
    return jnp.transpose(out_hwc.reshape(b, h, w, c), (0, 3, 1, 2))    # back to NCHW


# ----------------------------------------------------------------------------
if __name__ == "__main__":
    key = jax.random.PRNGKey(0)
    b, c_in, c_out, h, w = 2, 4, 8, 16, 16
    kx, km, kp = jax.random.split(key, 3)
    x = jax.random.normal(kx, (b, c_in, h, w), jnp.float32)
    map_small = jax.random.normal(km, (b, 1, h // 2, w // 2), jnp.float32)

    params = init_uaca_params(kp, c_in, c_out)
    fwd = jax.jit(lambda xx, mm: uaca_forward(params, xx, mm))
    out = jax.block_until_ready(fwd(x, map_small))

    assert out.shape == (b, c_in, h, w)
    assert bool(jnp.all(jnp.isfinite(out)))
    print("KERNEL_OK")
</pallas_src>

<mosaic_0001>
module attributes {stable_mosaic.version = 11 : i64} {
  func.func @_context_kv_kernel(%arg0: i32, %arg1: i32, %arg2: memref<1x1x256xf32, #tpu.memory_space<vmem>>, %arg3: memref<1x256x4xf32, #tpu.memory_space<vmem>>, %arg4: memref<4x128xf32, #tpu.memory_space<vmem>>, %arg5: memref<1x128xf32, #tpu.memory_space<vmem>>, %arg6: memref<128x128xf32, #tpu.memory_space<vmem>>, %arg7: memref<1x128xf32, #tpu.memory_space<vmem>>, %arg8: memref<4x128xf32, #tpu.memory_space<vmem>>, %arg9: memref<1x128xf32, #tpu.memory_space<vmem>>, %arg10: memref<128x128xf32, #tpu.memory_space<vmem>>, %arg11: memref<1x128xf32, #tpu.memory_space<vmem>>, %arg12: memref<1x3x128xf32, #tpu.memory_space<vmem>>, %arg13: memref<1x3x128xf32, #tpu.memory_space<vmem>>, %arg14: memref<3x4xf32, #tpu.memory_space<vmem>>) attributes {dimension_semantics = [#tpu.dimension_semantics<parallel>, #tpu.dimension_semantics<arbitrary>], iteration_bounds = array<i64: 2, 1>, scalar_prefetch = 0 : i64, scratch_operands = 1 : i64, tpu.core_type = #tpu.core_type<tc>, window_params = [{transform_indices = @transform_0, window_bounds = array<i64: 1, 1, 256>}, {transform_indices = @transform_1, window_bounds = array<i64: 1, 256, 4>}, {pipeline_mode = #tpu.pipeline_mode<synchronous>, transform_indices = @transform_2, window_bounds = array<i64: 4, 128>}, {pipeline_mode = #tpu.pipeline_mode<synchronous>, transform_indices = @transform_3, window_bounds = array<i64: 1, 128>}, {pipeline_mode = #tpu.pipeline_mode<synchronous>, transform_indices = @transform_4, window_bounds = array<i64: 128, 128>}, {pipeline_mode = #tpu.pipeline_mode<synchronous>, transform_indices = @transform_5, window_bounds = array<i64: 1, 128>}, {pipeline_mode = #tpu.pipeline_mode<synchronous>, transform_indices = @transform_6, window_bounds = array<i64: 4, 128>}, {pipeline_mode = #tpu.pipeline_mode<synchronous>, transform_indices = @transform_7, window_bounds = array<i64: 1, 128>}, {pipeline_mode = #tpu.pipeline_mode<synchronous>, transform_indices = @transform_8, window_bounds = array<i64: 128, 128>}, {pipeline_mode = #tpu.pipeline_mode<synchronous>, transform_indices = @transform_9, window_bounds = array<i64: 1, 128>}, {transform_indices = @transform_10, window_bounds = array<i64: 1, 3, 128>}, {transform_indices = @transform_11, window_bounds = array<i64: 1, 3, 128>}]} {
    %c0_i32 = arith.constant 0 : i32
    %0 = arith.cmpi eq, %arg1, %c0_i32 : i32
    %1 = arith.extui %0 : i1 to i32
    %c0_i32_0 = arith.constant 0 : i32
    %2 = arith.cmpi ne, %1, %c0_i32_0 : i32
    scf.if %2 {
      %cst_20 = arith.constant 0.000000e+00 : f32
      %35 = vector.broadcast %cst_20 : f32 to vector<3x4xf32>
      %c0_21 = arith.constant 0 : index
      %c0_22 = arith.constant 0 : index
      %36 = vector.load %arg14[%c0_21, %c0_22] : memref<3x4xf32, #tpu.memory_space<vmem>>, vector<3x4xf32>
      tpu.vector_store %arg14[%c0_21, %c0_22], %35 {strides = array<i32>} : memref<3x4xf32, #tpu.memory_space<vmem>>, vector<3x4xf32>,
    } else {
    }
    %c0 = arith.constant 0 : index
    %c0_1 = arith.constant 0 : index
    %c0_2 = arith.constant 0 : index
    %3 = vector.load %arg2[%c0, %c0_1, %c0_2] : memref<1x1x256xf32, #tpu.memory_space<vmem>>, vector<1x1x256xf32>
    %4 = vector.shape_cast %3 : vector<1x1x256xf32> to vector<1x256xf32>
    %5 = arith.negf %4 : vector<1x256xf32>
    %6 = math.exp %5 : vector<1x256xf32>
    %cst = arith.constant 1.000000e+00 : f32
    %7 = vector.broadcast %cst : f32 to vector<1x256xf32>
    %8 = arith.addf %7, %6 : vector<1x256xf32>
    %9 = arith.divf %7, %8 : vector<1x256xf32>
    %cst_3 = arith.constant 5.000000e-01 : f32
    %10 = vector.broadcast %cst_3 : f32 to vector<1x256xf32>
    %11 = arith.subf %9, %10 : vector<1x256xf32>
    %cst_4 = arith.constant 0.000000e+00 : f32
    %cst_5 = arith.constant 1.000000e+00 : f32
    %12 = vector.broadcast %cst_4 : f32 to vector<1x256xf32>
    %13 = arith.maximumf %12, %11 : vector<1x256xf32>
    %14 = vector.broadcast %cst_5 : f32 to vector<1x256xf32>
    %15 = arith.minimumf %14, %13 : vector<1x256xf32>
    %cst_6 = arith.constant 0.000000e+00 : f32
    %16 = vector.broadcast %cst_6 : f32 to vector<1x256xf32>
    %17 = arith.subf %16, %11 : vector<1x256xf32>
    %cst_7 = arith.constant 0.000000e+00 : f32
    %cst_8 = arith.constant 1.000000e+00 : f32
    %18 = vector.broadcast %cst_7 : f32 to vector<1x256xf32>
    %19 = arith.maximumf %18, %17 : vector<1x256xf32>
    %20 = vector.broadcast %cst_8 : f32 to vector<1x256xf32>
    %21 = arith.minimumf %20, %19 : vector<1x256xf32>
    %22 = math.absf %11 : vector<1x256xf32>
    %cst_9 = arith.constant 5.000000e-01 : f32
    %23 = vector.broadcast %cst_9 : f32 to vector<1x256xf32>
    %24 = arith.subf %23, %22 : vector<1x256xf32>
    %25 = tpu.concatenate %15, %21, %24 in 0 : vector<1x256xf32>, vector<1x256xf32>, vector<1x256xf32> -> vector<3x256xf32>
    %c0_10 = arith.constant 0 : index
    %c0_11 = arith.constant 0 : index
    %26 = vector.load %arg14[%c0_10, %c0_11] : memref<3x4xf32, #tpu.memory_space<vmem>>, vector<3x4xf32>
    %c0_12 = arith.constant 0 : index
    %c0_13 = arith.constant 0 : index
    %c0_14 = arith.constant 0 : index
    %27 = vector.load %arg3[%c0_12, %c0_13, %c0_14] : memref<1x256x4xf32, #tpu.memory_space<vmem>>, vector<1x256x4xf32>
    %28 = vector.shape_cast %27 : vector<1x256x4xf32> to vector<256x4xf32>
    %cst_15 = arith.constant dense<0.000000e+00> : vector<3x4xf32>
    %29 = tpu.matmul %25, %28, %cst_15 {dimension_numbers = #tpu.dot_dimension_numbers<[1], [0], [0], [1], [0, 0, 1, 1], [], []>} : vector<3x256xf32>, vector<256x4xf32>, vector<3x4xf32> -> vector<3x4xf32>
    %30 = arith.addf %26, %29 : vector<3x4xf32>
    %c0_16 = arith.constant 0 : index
    %c0_17 = arith.constant 0 : index
    %31 = vector.load %arg14[%c0_16, %c0_17] : memref<3x4xf32, #tpu.memory_space<vmem>>, vector<3x4xf32>
    tpu.vector_store %arg14[%c0_16, %c0_17], %30 {strides = array<i32>} : memref<3x4xf32, #tpu.memory_space<vmem>>, vector<3x4xf32>,
    %c0_i32_18 = arith.constant 0 : i32
    %32 = arith.cmpi eq, %arg1, %c0_i32_18 : i32
    %33 = arith.extui %32 : i1 to i32
    %c0_i32_19 = arith.constant 0 : i32
    %34 = arith.cmpi ne, %33, %c0_i32_19 : i32
    scf.if %34 {
      %c0_20 = arith.constant 0 : index
      %c0_21 = arith.constant 0 : index
      %35 = vector.load %arg14[%c0_20, %c0_21] : memref<3x4xf32, #tpu.memory_space<vmem>>, vector<3x4xf32>
      %c0_22 = arith.constant 0 : index
      %c0_23 = arith.constant 0 : index
      %36 = vector.load %arg4[%c0_22, %c0_23] : memref<4x128xf32, #tpu.memory_space<vmem>>, vector<4x128xf32>
      %cst_24 = arith.constant dense<0.000000e+00> : vector<3x128xf32>
      %37 = tpu.matmul %35, %36, %cst_24 {dimension_numbers = #tpu.dot_dimension_numbers<[1], [0], [0], [1], [0, 0, 1, 1], [], []>} : vector<3x4xf32>, vector<4x128xf32>, vector<3x128xf32> -> vector<3x128xf32>
      %c0_25 = arith.constant 0 : index
      %c0_26 = arith.constant 0 : index
      %38 = vector.load %arg5[%c0_25, %c0_26] : memref<1x128xf32, #tpu.memory_space<vmem>>, vector<1x128xf32>
      %39 = vector.broadcast %38 : vector<1x128xf32> to vector<3x128xf32>
      %40 = arith.addf %37, %39 : vector<3x128xf32>
      %cst_27 = arith.constant 0.000000e+00 : f32
      %41 = vector.broadcast %cst_27 : f32 to vector<3x128xf32>
      %42 = arith.maximumf %40, %41 : vector<3x128xf32>
      %c0_28 = arith.constant 0 : index
      %c0_29 = arith.constant 0 : index
      %43 = vector.load %arg6[%c0_28, %c0_29] : memref<128x128xf32, #tpu.memory_space<vmem>>, vector<128x128xf32>
      %cst_30 = arith.constant dense<0.000000e+00> : vector<3x128xf32>
      %44 = tpu.matmul %42, %43, %cst_30 {dimension_numbers = #tpu.dot_dimension_numbers<[1], [0], [0], [1], [0, 0, 1, 1], [], []>} : vector<3x128xf32>, vector<128x128xf32>, vector<3x128xf32> -> vector<3x128xf32>
      %c0_31 = arith.constant 0 : index
      %c0_32 = arith.constant 0 : index
      %45 = vector.load %arg7[%c0_31, %c0_32] : memref<1x128xf32, #tpu.memory_space<vmem>>, vector<1x128xf32>
      %46 = vector.broadcast %45 : vector<1x128xf32> to vector<3x128xf32>
      %47 = arith.addf %44, %46 : vector<3x128xf32>
      %cst_33 = arith.constant 0.000000e+00 : f32
      %48 = vector.broadcast %cst_33 : f32 to vector<3x128xf32>
      %49 = arith.maximumf %47, %48 : vector<3x128xf32>
      %cst_34 = arith.constant 0.353553385 : f32
      %50 = vector.broadcast %cst_34 : f32 to vector<3x128xf32>
      %51 = arith.mulf %49, %50 : vector<3x128xf32>
      %c0_35 = arith.constant 0 : index
      %c0_36 = arith.constant 0 : index
      %c0_37 = arith.constant 0 : index
      %52 = vector.load %arg12[%c0_35, %c0_36, %c0_37] : memref<1x3x128xf32, #tpu.memory_space<vmem>>, vector<1x3x128xf32>
      %53 = vector.shape_cast %52 : vector<1x3x128xf32> to vector<3x128xf32>
      %54 = vector.shape_cast %51 : vector<3x128xf32> to vector<1x3x128xf32>
      tpu.vector_store %arg12[%c0_35, %c0_36, %c0_37], %54 {strides = array<i32>} : memref<1x3x128xf32, #tpu.memory_space<vmem>>, vector<1x3x128xf32>,
      %c0_38 = arith.constant 0 : index
      %c0_39 = arith.constant 0 : index
      %55 = vector.load %arg8[%c0_38, %c0_39] : memref<4x128xf32, #tpu.memory_space<vmem>>, vector<4x128xf32>
      %cst_40 = arith.constant dense<0.000000e+00> : vector<3x128xf32>
      %56 = tpu.matmul %35, %55, %cst_40 {dimension_numbers = #tpu.dot_dimension_numbers<[1], [0], [0], [1], [0, 0, 1, 1], [], []>} : vector<3x4xf32>, vector<4x128xf32>, vector<3x128xf32> -> vector<3x128xf32>
      %c0_41 = arith.constant 0 : index
      %c0_42 = arith.constant 0 : index
      %57 = vector.load %arg9[%c0_41, %c0_42] : memref<1x128xf32, #tpu.memory_space<vmem>>, vector<1x128xf32>
      %58 = vector.broadcast %57 : vector<1x128xf32> to vector<3x128xf32>
      %59 = arith.addf %56, %58 : vector<3x128xf32>
      %cst_43 = arith.constant 0.000000e+00 : f32
      %60 = vector.broadcast %cst_43 : f32 to vector<3x128xf32>
      %61 = arith.maximumf %59, %60 : vector<3x128xf32>
      %c0_44 = arith.constant 0 : index
      %c0_45 = arith.constant 0 : index
      %62 = vector.load %arg10[%c0_44, %c0_45] : memref<128x128xf32, #tpu.memory_space<vmem>>, vector<128x128xf32>
      %cst_46 = arith.constant dense<0.000000e+00> : vector<3x128xf32>
      %63 = tpu.matmul %61, %62, %cst_46 {dimension_numbers = #tpu.dot_dimension_numbers<[1], [0], [0], [1], [0, 0, 1, 1], [], []>} : vector<3x128xf32>, vector<128x128xf32>, vector<3x128xf32> -> vector<3x128xf32>
      %c0_47 = arith.constant 0 : index
      %c0_48 = arith.constant 0 : index
      %64 = vector.load %arg11[%c0_47, %c0_48] : memref<1x128xf32, #tpu.memory_space<vmem>>, vector<1x128xf32>
      %65 = vector.broadcast %64 : vector<1x128xf32> to vector<3x128xf32>
      %66 = arith.addf %63, %65 : vector<3x128xf32>
      %cst_49 = arith.constant 0.000000e+00 : f32
      %67 = vector.broadcast %cst_49 : f32 to vector<3x128xf32>
      %68 = arith.maximumf %66, %67 : vector<3x128xf32>
      %c0_50 = arith.constant 0 : index
      %c0_51 = arith.constant 0 : index
      %c0_52 = arith.constant 0 : index
      %69 = vector.load %arg13[%c0_50, %c0_51, %c0_52] : memref<1x3x128xf32, #tpu.memory_space<vmem>>, vector<1x3x128xf32>
      %70 = vector.shape_cast %69 : vector<1x3x128xf32> to vector<3x128xf32>
      %71 = vector.shape_cast %68 : vector<3x128xf32> to vector<1x3x128xf32>
      tpu.vector_store %arg13[%c0_50, %c0_51, %c0_52], %71 {strides = array<i32>} : memref<1x3x128xf32, #tpu.memory_space<vmem>>, vector<1x3x128xf32>,
    } else {
    }
    return
  }
  func.func @transform_0(%arg0: i32, %arg1: i32) -> (i32, i32, i32) {
    %c0_i32 = arith.constant 0 : i32
    %c0_i32_0 = arith.constant 0 : i32
    return %arg0, %c0_i32, %arg1 : i32, i32, i32
  }
  func.func @transform_1(%arg0: i32, %arg1: i32) -> (i32, i32, i32) {
    %c0_i32 = arith.constant 0 : i32
    %c0_i32_0 = arith.constant 0 : i32
    return %arg0, %arg1, %c0_i32 : i32, i32, i32
  }
  func.func @transform_2(%arg0: i32, %arg1: i32) -> (i32, i32) {
    %c0_i32 = arith.constant 0 : i32
    %c0_i32_0 = arith.constant 0 : i32
    %c0_i32_1 = arith.constant 0 : i32
    return %c0_i32, %c0_i32_0 : i32, i32
  }
  func.func @transform_3(%arg0: i32, %arg1: i32) -> (i32, i32) {
    %c0_i32 = arith.constant 0 : i32
    %c0_i32_0 = arith.constant 0 : i32
    %c0_i32_1 = arith.constant 0 : i32
    return %c0_i32, %c0_i32_0 : i32, i32
  }
  func.func @transform_4(%arg0: i32, %arg1: i32) -> (i32, i32) {
    %c0_i32 = arith.constant 0 : i32
    %c0_i32_0 = arith.constant 0 : i32
    %c0_i32_1 = arith.constant 0 : i32
    return %c0_i32, %c0_i32_0 : i32, i32
  }
  func.func @transform_5(%arg0: i32, %arg1: i32) -> (i32, i32) {
    %c0_i32 = arith.constant 0 : i32
    %c0_i32_0 = arith.constant 0 : i32
    %c0_i32_1 = arith.constant 0 : i32
    return %c0_i32, %c0_i32_0 : i32, i32
  }
  func.func @transform_6(%arg0: i32, %arg1: i32) -> (i32, i32) {
    %c0_i32 = arith.constant 0 : i32
    %c0_i32_0 = arith.constant 0 : i32
    %c0_i32_1 = arith.constant 0 : i32
    return %c0_i32, %c0_i32_0 : i32, i32
  }
  func.func @transform_7(%arg0: i32, %arg1: i32) -> (i32, i32) {
    %c0_i32 = arith.constant 0 : i32
    %c0_i32_0 = arith.constant 0 : i32
    %c0_i32_1 = arith.constant 0 : i32
    return %c0_i32, %c0_i32_0 : i32, i32
  }
  func.func @transform_8(%arg0: i32, %arg1: i32) -> (i32, i32) {
    %c0_i32 = arith.constant 0 : i32
    %c0_i32_0 = arith.constant 0 : i32
    %c0_i32_1 = arith.constant 0 : i32
    return %c0_i32, %c0_i32_0 : i32, i32
  }
  func.func @transform_9(%arg0: i32, %arg1: i32) -> (i32, i32) {
    %c0_i32 = arith.constant 0 : i32
    %c0_i32_0 = arith.constant 0 : i32
    %c0_i32_1 = arith.constant 0 : i32
    return %c0_i32, %c0_i32_0 : i32, i32
  }
  func.func @transform_10(%arg0: i32, %arg1: i32) -> (i32, i32, i32) {
    %c0_i32 = arith.constant 0 : i32
    %c0_i32_0 = arith.constant 0 : i32
    %c0_i32_1 = arith.constant 0 : i32
    return %arg0, %c0_i32, %c0_i32_0 : i32, i32, i32
  }
  func.func @transform_11(%arg0: i32, %arg1: i32) -> (i32, i32, i32) {
    %c0_i32 = arith.constant 0 : i32
    %c0_i32_0 = arith.constant 0 : i32
    %c0_i32_1 = arith.constant 0 : i32
    return %arg0, %c0_i32, %c0_i32_0 : i32, i32, i32
  }
}

module attributes {stable_mosaic.version = 11 : i64} {
  func.func @_fused_query_attn_gate_kernel(%arg0: i32, %arg1: i32, %arg2: memref<1x22x18x4xf32, #tpu.memory_space<vmem>>, %arg3: memref<9x4x128xf32, #tpu.memory_space<vmem>>, %arg4: memref<1x128xf32, #tpu.memory_space<vmem>>, %arg5: memref<9x128x128xf32, #tpu.memory_space<vmem>>, %arg6: memref<1x128xf32, #tpu.memory_space<vmem>>, %arg7: memref<1x3x128xf32, #tpu.memory_space<vmem>>, %arg8: memref<1x3x128xf32, #tpu.memory_space<vmem>>, %arg9: memref<9x128x1xf32, #tpu.memory_space<vmem>>, %arg10: memref<1x1xf32, #tpu.memory_space<vmem>>, %arg11: memref<1x256x4xf32, #tpu.memory_space<vmem>>, %arg12: memref<20x18x128xf32, #tpu.memory_space<vmem>>, %arg13: memref<18x18x128xf32, #tpu.memory_space<vmem>>) attributes {dimension_semantics = [#tpu.dimension_semantics<parallel>, #tpu.dimension_semantics<parallel>], iteration_bounds = array<i64: 2, 1>, scalar_prefetch = 0 : i64, scratch_operands = 2 : i64, tpu.core_type = #tpu.core_type<tc>, window_params = [{transform_indices = @transform_0, window_bounds = array<i64: 1, 22, 18, 4>}, {pipeline_mode = #tpu.pipeline_mode<synchronous>, transform_indices = @transform_1, window_bounds = array<i64: 9, 4, 128>}, {pipeline_mode = #tpu.pipeline_mode<synchronous>, transform_indices = @transform_2, window_bounds = array<i64: 1, 128>}, {pipeline_mode = #tpu.pipeline_mode<synchronous>, transform_indices = @transform_3, window_bounds = array<i64: 9, 128, 128>}, {pipeline_mode = #tpu.pipeline_mode<synchronous>, transform_indices = @transform_4, window_bounds = array<i64: 1, 128>}, {transform_indices = @transform_5, window_bounds = array<i64: 1, 3, 128>}, {transform_indices = @transform_6, window_bounds = array<i64: 1, 3, 128>}, {pipeline_mode = #tpu.pipeline_mode<synchronous>, transform_indices = @transform_7, window_bounds = array<i64: 9, 128, 1>}, {pipeline_mode = #tpu.pipeline_mode<synchronous>, transform_indices = @transform_8, window_bounds = array<i64: 1, 1>}, {transform_indices = @transform_9, window_bounds = array<i64: 1, 256, 4>}]} {
    %c16_i32 = arith.constant 16 : i32
    %0 = arith.muli %arg1, %c16_i32 : i32
    %c0_i32 = arith.constant 0 : i32
    %1 = arith.addi %0, %c0_i32 : i32
    %c0 = arith.constant 0 : index
    %2 = arith.index_cast %1 : i32 to index
    %c0_0 = arith.constant 0 : index
    %c0_1 = arith.constant 0 : index
    %3 = vector.load %arg2[%c0, %2, %c0_0, %c0_1] : memref<1x22x18x4xf32, #tpu.memory_space<vmem>>, vector<1x20x16x4xf32>
    %4 = vector.shape_cast %3 : vector<1x20x16x4xf32> to vector<20x16x4xf32>
    %5 = vector.shape_cast %4 : vector<20x16x4xf32> to vector<320x4xf32>
    %c0_2 = arith.constant 0 : index
    %c0_3 = arith.constant 0 : index
    %c0_4 = arith.constant 0 : index
    %6 = vector.load %arg3[%c0_2, %c0_3, %c0_4] : memref<9x4x128xf32, #tpu.memory_space<vmem>>, vector<1x4x128xf32>
    %7 = vector.shape_cast %6 : vector<1x4x128xf32> to vector<4x128xf32>
    %cst = arith.constant dense<0.000000e+00> : vector<320x128xf32>
    %8 = tpu.matmul %5, %7, %cst {dimension_numbers = #tpu.dot_dimension_numbers<[1], [0], [0], [1], [0, 0, 1, 1], [], []>} : vector<320x4xf32>, vector<4x128xf32>, vector<320x128xf32> -> vector<320x128xf32>
    %c0_i32_5 = arith.constant 0 : i32
    %9 = arith.addi %0, %c0_i32_5 : i32
    %c0_6 = arith.constant 0 : index
    %10 = arith.index_cast %9 : i32 to index
    %c1 = arith.constant 1 : index
    %c0_7 = arith.constant 0 : index
    %11 = vector.load %arg2[%c0_6, %10, %c1, %c0_7] : memref<1x22x18x4xf32, #tpu.memory_space<vmem>>, vector<1x20x16x4xf32>
    %12 = vector.shape_cast %11 : vector<1x20x16x4xf32> to vector<20x16x4xf32>
    %13 = vector.shape_cast %12 : vector<20x16x4xf32> to vector<320x4xf32>
    %c1_8 = arith.constant 1 : index
    %c0_9 = arith.constant 0 : index
    %c0_10 = arith.constant 0 : index
    %14 = vector.load %arg3[%c1_8, %c0_9, %c0_10] : memref<9x4x128xf32, #tpu.memory_space<vmem>>, vector<1x4x128xf32>
    %15 = vector.shape_cast %14 : vector<1x4x128xf32> to vector<4x128xf32>
    %cst_11 = arith.constant dense<0.000000e+00> : vector<320x128xf32>
    %16 = tpu.matmul %13, %15, %cst_11 {dimension_numbers = #tpu.dot_dimension_numbers<[1], [0], [0], [1], [0, 0, 1, 1], [], []>} : vector<320x4xf32>, vector<4x128xf32>, vector<320x128xf32> -> vector<320x128xf32>
    %17 = arith.addf %8, %16 : vector<320x128xf32>
    %c0_i32_12 = arith.constant 0 : i32
    %18 = arith.addi %0, %c0_i32_12 : i32
    %c0_13 = arith.constant 0 : index
    %19 = arith.index_cast %18 : i32 to index
    %c2 = arith.constant 2 : index
    %c0_14 = arith.constant 0 : index
    %20 = vector.load %arg2[%c0_13, %19, %c2, %c0_14] : memref<1x22x18x4xf32, #tpu.memory_space<vmem>>, vector<1x20x16x4xf32>
    %21 = vector.shape_cast %20 : vector<1x20x16x4xf32> to vector<20x16x4xf32>
    %22 = vector.shape_cast %21 : vector<20x16x4xf32> to vector<320x4xf32>
    %c2_15 = arith.constant 2 : index
    %c0_16 = arith.constant 0 : index
    %c0_17 = arith.constant 0 : index
    %23 = vector.load %arg3[%c2_15, %c0_16, %c0_17] : memref<9x4x128xf32, #tpu.memory_space<vmem>>, vector<1x4x128xf32>
    %24 = vector.shape_cast %23 : vector<1x4x128xf32> to vector<4x128xf32>
    %cst_18 = arith.constant dense<0.000000e+00> : vector<320x128xf32>
    %25 = tpu.matmul %22, %24, %cst_18 {dimension_numbers = #tpu.dot_dimension_numbers<[1], [0], [0], [1], [0, 0, 1, 1], [], []>} : vector<320x4xf32>, vector<4x128xf32>, vector<320x128xf32> -> vector<320x128xf32>
    %26 = arith.addf %17, %25 : vector<320x128xf32>
    %c1_i32 = arith.constant 1 : i32
    %27 = arith.addi %0, %c1_i32 : i32
    %c0_19 = arith.constant 0 : index
    %28 = arith.index_cast %27 : i32 to index
    %c0_20 = arith.constant 0 : index
    %c0_21 = arith.constant 0 : index
    %29 = vector.load %arg2[%c0_19, %28, %c0_20, %c0_21] : memref<1x22x18x4xf32, #tpu.memory_space<vmem>>, vector<1x20x16x4xf32>
    %30 = vector.shape_cast %29 : vector<1x20x16x4xf32> to vector<20x16x4xf32>
    %31 = vector.shape_cast %30 : vector<20x16x4xf32> to vector<320x4xf32>
    %c3 = arith.constant 3 : index
    %c0_22 = arith.constant 0 : index
    %c0_23 = arith.constant 0 : index
    %32 = vector.load %arg3[%c3, %c0_22, %c0_23] : memref<9x4x128xf32, #tpu.memory_space<vmem>>, vector<1x4x128xf32>
    %33 = vector.shape_cast %32 : vector<1x4x128xf32> to vector<4x128xf32>
    %cst_24 = arith.constant dense<0.000000e+00> : vector<320x128xf32>
    %34 = tpu.matmul %31, %33, %cst_24 {dimension_numbers = #tpu.dot_dimension_numbers<[1], [0], [0], [1], [0, 0, 1, 1], [], []>} : vector<320x4xf32>, vector<4x128xf32>, vector<320x128xf32> -> vector<320x128xf32>
    %35 = arith.addf %26, %34 : vector<320x128xf32>
    %c1_i32_25 = arith.constant 1 : i32
    %36 = arith.addi %0, %c1_i32_25 : i32
    %c0_26 = arith.constant 0 : index
    %37 = arith.index_cast %36 : i32 to index
    %c1_27 = arith.constant 1 : index
    %c0_28 = arith.constant 0 : index
    %38 = vector.load %arg2[%c0_26, %37, %c1_27, %c0_28] : memref<1x22x18x4xf32, #tpu.memory_space<vmem>>, vector<1x20x16x4xf32>
    %39 = vector.shape_cast %38 : vector<1x20x16x4xf32> to vector<20x16x4xf32>
    %40 = vector.shape_cast %39 : vector<20x16x4xf32> to vector<320x4xf32>
    %c4 = arith.constant 4 : index
    %c0_29 = arith.constant 0 : index
    %c0_30 = arith.constant 0 : index
    %41 = vector.load %arg3[%c4, %c0_29, %c0_30] : memref<9x4x128xf32, #tpu.memory_space<vmem>>, vector<1x4x128xf32>
    %42 = vector.shape_cast %41 : vector<1x4x128xf32> to vector<4x128xf32>
    %cst_31 = arith.constant dense<0.000000e+00> : vector<320x128xf32>
    %43 = tpu.matmul %40, %42, %cst_31 {dimension_numbers = #tpu.dot_dimension_numbers<[1], [0], [0], [1], [0, 0, 1, 1], [], []>} : vector<320x4xf32>, vector<4x128xf32>, vector<320x128xf32> -> vector<320x128xf32>
    %44 = arith.addf %35, %43 : vector<320x128xf32>
    %c1_i32_32 = arith.constant 1 : i32
    %45 = arith.addi %0, %c1_i32_32 : i32
    %c0_33 = arith.constant 0 : index
    %46 = arith.index_cast %45 : i32 to index
    %c2_34 = arith.constant 2 : index
    %c0_35 = arith.constant 0 : index
    %47 = vector.load %arg2[%c0_33, %46, %c2_34, %c0_35] : memref<1x22x18x4xf32, #tpu.memory_space<vmem>>, vector<1x20x16x4xf32>
    %48 = vector.shape_cast %47 : vector<1x20x16x4xf32> to vector<20x16x4xf32>
    %49 = vector.shape_cast %48 : vector<20x16x4xf32> to vector<320x4xf32>
    %c5 = arith.constant 5 : index
    %c0_36 = arith.constant 0 : index
    %c0_37 = arith.constant 0 : index
    %50 = vector.load %arg3[%c5, %c0_36, %c0_37] : memref<9x4x128xf32, #tpu.memory_space<vmem>>, vector<1x4x128xf32>
    %51 = vector.shape_cast %50 : vector<1x4x128xf32> to vector<4x128xf32>
    %cst_38 = arith.constant dense<0.000000e+00> : vector<320x128xf32>
    %52 = tpu.matmul %49, %51, %cst_38 {dimension_numbers = #tpu.dot_dimension_numbers<[1], [0], [0], [1], [0, 0, 1, 1], [], []>} : vector<320x4xf32>, vector<4x128xf32>, vector<320x128xf32> -> vector<320x128xf32>
    %53 = arith.addf %44, %52 : vector<320x128xf32>
    %c2_i32 = arith.constant 2 : i32
    %54 = arith.addi %0, %c2_i32 : i32
    %c0_39 = arith.constant 0 : index
    %55 = arith.index_cast %54 : i32 to index
    %c0_40 = arith.constant 0 : index
    %c0_41 = arith.constant 0 : index
    %56 = vector.load %arg2[%c0_39, %55, %c0_40, %c0_41] : memref<1x22x18x4xf32, #tpu.memory_space<vmem>>, vector<1x20x16x4xf32>
    %57 = vector.shape_cast %56 : vector<1x20x16x4xf32> to vector<20x16x4xf32>
    %58 = vector.shape_cast %57 : vector<20x16x4xf32> to vector<320x4xf32>
    %c6 = arith.constant 6 : index
    %c0_42 = arith.constant 0 : index
    %c0_43 = arith.constant 0 : index
    %59 = vector.load %arg3[%c6, %c0_42, %c0_43] : memref<9x4x128xf32, #tpu.memory_space<vmem>>, vector<1x4x128xf32>
    %60 = vector.shape_cast %59 : vector<1x4x128xf32> to vector<4x128xf32>
    %cst_44 = arith.constant dense<0.000000e+00> : vector<320x128xf32>
    %61 = tpu.matmul %58, %60, %cst_44 {dimension_numbers = #tpu.dot_dimension_numbers<[1], [0], [0], [1], [0, 0, 1, 1], [], []>} : vector<320x4xf32>, vector<4x128xf32>, vector<320x128xf32> -> vector<320x128xf32>
    %62 = arith.addf %53, %61 : vector<320x128xf32>
    %c2_i32_45 = arith.constant 2 : i32
    %63 = arith.addi %0, %c2_i32_45 : i32
    %c0_46 = arith.constant 0 : index
    %64 = arith.index_cast %63 : i32 to index
    %c1_47 = arith.constant 1 : index
    %c0_48 = arith.constant 0 : index
    %65 = vector.load %arg2[%c0_46, %64, %c1_47, %c0_48] : memref<1x22x18x4xf32, #tpu.memory_space<vmem>>, vector<1x20x16x4xf32>
    %66 = vector.shape_cast %65 : vector<1x20x16x4xf32> to vector<20x16x4xf32>
    %67 = vector.shape_cast %66 : vector<20x16x4xf32> to vector<320x4xf32>
    %c7 = arith.constant 7 : index
    %c0_49 = arith.constant 0 : index
    %c0_50 = arith.constant 0 : index
    %68 = vector.load %arg3[%c7, %c0_49, %c0_50] : memref<9x4x128xf32, #tpu.memory_space<vmem>>, vector<1x4x128xf32>
    %69 = vector.shape_cast %68 : vector<1x4x128xf32> to vector<4x128xf32>
    %cst_51 = arith.constant dense<0.000000e+00> : vector<320x128xf32>
    %70 = tpu.matmul %67, %69, %cst_51 {dimension_numbers = #tpu.dot_dimension_numbers<[1], [0], [0], [1], [0, 0, 1, 1], [], []>} : vector<320x4xf32>, vector<4x128xf32>, vector<320x128xf32> -> vector<320x128xf32>
    %71 = arith.addf %62, %70 : vector<320x128xf32>
    %c2_i32_52 = arith.constant 2 : i32
    %72 = arith.addi %0, %c2_i32_52 : i32
    %c0_53 = arith.constant 0 : index
    %73 = arith.index_cast %72 : i32 to index
    %c2_54 = arith.constant 2 : index
    %c0_55 = arith.constant 0 : index
    %74 = vector.load %arg2[%c0_53, %73, %c2_54, %c0_55] : memref<1x22x18x4xf32, #tpu.memory_space<vmem>>, vector<1x20x16x4xf32>
    %75 = vector.shape_cast %74 : vector<1x20x16x4xf32> to vector<20x16x4xf32>
    %76 = vector.shape_cast %75 : vector<20x16x4xf32> to vector<320x4xf32>
    %c8 = arith.constant 8 : index
    %c0_56 = arith.constant 0 : index
    %c0_57 = arith.constant 0 : index
    %77 = vector.load %arg3[%c8, %c0_56, %c0_57] : memref<9x4x128xf32, #tpu.memory_space<vmem>>, vector<1x4x128xf32>
    %78 = vector.shape_cast %77 : vector<1x4x128xf32> to vector<4x128xf32>
    %cst_58 = arith.constant dense<0.000000e+00> : vector<320x128xf32>
    %79 = tpu.matmul %76, %78, %cst_58 {dimension_numbers = #tpu.dot_dimension_numbers<[1], [0], [0], [1], [0, 0, 1, 1], [], []>} : vector<320x4xf32>, vector<4x128xf32>, vector<320x128xf32> -> vector<320x128xf32>
    %80 = arith.addf %71, %79 : vector<320x128xf32>
    %c0_59 = arith.constant 0 : index
    %c0_60 = arith.constant 0 : index
    %81 = vector.load %arg4[%c0_59, %c0_60] : memref<1x128xf32, #tpu.memory_space<vmem>>, vector<1x128xf32>
    %82 = vector.broadcast %81 : vector<1x128xf32> to vector<320x128xf32>
    %83 = arith.addf %80, %82 : vector<320x128xf32>
    %cst_61 = arith.constant 0.000000e+00 : f32
    %84 = vector.broadcast %cst_61 : f32 to vector<320x128xf32>
    %85 = arith.maximumf %83, %84 : vector<320x128xf32>
    %86 = tpu.iota {dimensions = array<i32: 0>} : vector<20x1x1xi32>
    %c2_i32_62 = arith.constant 2 : i32
    %87 = arith.subi %0, %c2_i32_62 : i32
    %88 = vector.broadcast %87 : i32 to vector<20x1x1xi32>
    %89 = arith.addi %86, %88 : vector<20x1x1xi32>
    %c0_i32_63 = arith.constant 0 : i32
    %90 = vector.broadcast %c0_i32_63 : i32 to vector<20x1x1xi32>
    %91 = arith.cmpi sge, %89, %90 : vector<20x1x1xi32>
    %c16_i32_64 = arith.constant 16 : i32
    %92 = vector.broadcast %c16_i32_64 : i32 to vector<20x1x1xi32>
    %93 = arith.cmpi slt, %89, %92 : vector<20x1x1xi32>
    %94 = arith.andi %91, %93 : vector<20x1x1xi1>
    %cst_65 = arith.constant 0.000000e+00 : f32
    %95 = vector.broadcast %cst_65 : f32 to vector<20x1x128xf32>
    %c0_66 = arith.constant 0 : index
    %c0_67 = arith.constant 0 : index
    %c0_68 = arith.constant 0 : index
    %96 = vector.load %arg12[%c0_66, %c0_67, %c0_68] : memref<20x18x128xf32, #tpu.memory_space<vmem>>, vector<20x1x128xf32>
    tpu.vector_store %arg12[%c0_66, %c0_67, %c0_68], %95 {strides = array<i32>} : memref<20x18x128xf32, #tpu.memory_space<vmem>>, vector<20x1x128xf32>,
    %c0_69 = arith.constant 0 : index
    %c17 = arith.constant 17 : index
    %c0_70 = arith.constant 0 : index
    %97 = vector.load %arg12[%c0_69, %c17, %c0_70] : memref<20x18x128xf32, #tpu.memory_space<vmem>>, vector<20x1x128xf32>
    tpu.vector_store %arg12[%c0_69, %c17, %c0_70], %95 {strides = array<i32>} : memref<20x18x128xf32, #tpu.memory_space<vmem>>, vector<20x1x128xf32>,
    %98 = vector.shape_cast %85 : vector<320x128xf32> to vector<20x16x128xf32>
    %cst_71 = arith.constant 0.000000e+00 : f32
    %99 = vector.shape_cast %94 : vector<20x1x1xi1> to vector<20x1x1xi1>
    %100 = vector.broadcast %99 : vector<20x1x1xi1> to vector<20x16x128xi1>
    %101 = vector.broadcast %cst_71 : f32 to vector<20x16x128xf32>
    %102 = arith.select %100, %98, %101 : vector<20x16x128xi1>, vector<20x16x128xf32>
    %c0_72 = arith.constant 0 : index
    %c1_73 = arith.constant 1 : index
    %c0_74 = arith.constant 0 : index
    %103 = vector.load %arg12[%c0_72, %c1_73, %c0_74] : memref<20x18x128xf32, #tpu.memory_space<vmem>>, vector<20x16x128xf32>
    tpu.vector_store %arg12[%c0_72, %c1_73, %c0_74], %102 {strides = array<i32>} : memref<20x18x128xf32, #tpu.memory_space<vmem>>, vector<20x16x128xf32>,
    %c0_75 = arith.constant 0 : index
    %c0_76 = arith.constant 0 : index
    %c0_77 = arith.constant 0 : index
    %104 = vector.load %arg12[%c0_75, %c0_76, %c0_77] : memref<20x18x128xf32, #tpu.memory_space<vmem>>, vector<18x16x128xf32>
    %105 = vector.shape_cast %104 : vector<18x16x128xf32> to vector<288x128xf32>
    %c0_78 = arith.constant 0 : index
    %c0_79 = arith.constant 0 : index
    %c0_80 = arith.constant 0 : index
    %106 = vector.load %arg5[%c0_78, %c0_79, %c0_80] : memref<9x128x128xf32, #tpu.memory_space<vmem>>, vector<1x128x128xf32>
    %107 = vector.shape_cast %106 : vector<1x128x128xf32> to vector<128x128xf32>
    %cst_81 = arith.constant dense<0.000000e+00> : vector<288x128xf32>
    %108 = tpu.matmul %105, %107, %cst_81 {dimension_numbers = #tpu.dot_dimension_numbers<[1], [0], [0], [1], [0, 0, 1, 1], [], []>} : vector<288x128xf32>, vector<128x128xf32>, vector<288x128xf32> -> vector<288x128xf32>
    %c0_82 = arith.constant 0 : index
    %c1_83 = arith.constant 1 : index
    %c0_84 = arith.constant 0 : index
    %109 = vector.load %arg12[%c0_82, %c1_83, %c0_84] : memref<20x18x128xf32, #tpu.memory_space<vmem>>, vector<18x16x128xf32>
    %110 = vector.shape_cast %109 : vector<18x16x128xf32> to vector<288x128xf32>
    %c1_85 = arith.constant 1 : index
    %c0_86 = arith.constant 0 : index
    %c0_87 = arith.constant 0 : index
    %111 = vector.load %arg5[%c1_85, %c0_86, %c0_87] : memref<9x128x128xf32, #tpu.memory_space<vmem>>, vector<1x128x128xf32>
    %112 = vector.shape_cast %111 : vector<1x128x128xf32> to vector<128x128xf32>
    %cst_88 = arith.constant dense<0.000000e+00> : vector<288x128xf32>
    %113 = tpu.matmul %110, %112, %cst_88 {dimension_numbers = #tpu.dot_dimension_numbers<[1], [0], [0], [1], [0, 0, 1, 1], [], []>} : vector<288x128xf32>, vector<128x128xf32>, vector<288x128xf32> -> vector<288x128xf32>
    %114 = arith.addf %108, %113 : vector<288x128xf32>
    %c0_89 = arith.constant 0 : index
    %c2_90 = arith.constant 2 : index
    %c0_91 = arith.constant 0 : index
    %115 = vector.load %arg12[%c0_89, %c2_90, %c0_91] : memref<20x18x128xf32, #tpu.memory_space<vmem>>, vector<18x16x128xf32>
    %116 = vector.shape_cast %115 : vector<18x16x128xf32> to vector<288x128xf32>
    %c2_92 = arith.constant 2 : index
    %c0_93 = arith.constant 0 : index
    %c0_94 = arith.constant 0 : index
    %117 = vector.load %arg5[%c2_92, %c0_93, %c0_94] : memref<9x128x128xf32, #tpu.memory_space<vmem>>, vector<1x128x128xf32>
    %118 = vector.shape_cast %117 : vector<1x128x128xf32> to vector<128x128xf32>
    %cst_95 = arith.constant dense<0.000000e+00> : vector<288x128xf32>
    %119 = tpu.matmul %116, %118, %cst_95 {dimension_numbers = #tpu.dot_dimension_numbers<[1], [0], [0], [1], [0, 0, 1, 1], [], []>} : vector<288x128xf32>, vector<128x128xf32>, vector<288x128xf32> -> vector<288x128xf32>
    %120 = arith.addf %114, %119 : vector<288x128xf32>
    %c1_96 = arith.constant 1 : index
    %c0_97 = arith.constant 0 : index
    %c0_98 = arith.constant 0 : index
    %121 = vector.load %arg12[%c1_96, %c0_97, %c0_98] : memref<20x18x128xf32, #tpu.memory_space<vmem>>, vector<18x16x128xf32>
    %122 = vector.shape_cast %121 : vector<18x16x128xf32> to vector<288x128xf32>
    %c3_99 = arith.constant 3 : index
    %c0_100 = arith.constant 0 : index
    %c0_101 = arith.constant 0 : index
    %123 = vector.load %arg5[%c3_99, %c0_100, %c0_101] : memref<9x128x128xf32, #tpu.memory_space<vmem>>, vector<1x128x128xf32>
    %124 = vector.shape_cast %123 : vector<1x128x128xf32> to vector<128x128xf32>
    %cst_102 = arith.constant dense<0.000000e+00> : vector<288x128xf32>
    %125 = tpu.matmul %122, %124, %cst_102 {dimension_numbers = #tpu.dot_dimension_numbers<[1], [0], [0], [1], [0, 0, 1, 1], [], []>} : vector<288x128xf32>, vector<128x128xf32>, vector<288x128xf32> -> vector<288x128xf32>
    %126 = arith.addf %120, %125 : vector<288x128xf32>
    %c1_103 = arith.constant 1 : index
    %c1_104 = arith.constant 1 : index
    %c0_105 = arith.constant 0 : index
    %127 = vector.load %arg12[%c1_103, %c1_104, %c0_105] : memref<20x18x128xf32, #tpu.memory_space<vmem>>, vector<18x16x128xf32>
    %128 = vector.shape_cast %127 : vector<18x16x128xf32> to vector<288x128xf32>
    %c4_106 = arith.constant 4 : index
    %c0_107 = arith.constant 0 : index
    %c0_108 = arith.constant 0 : index
    %129 = vector.load %arg5[%c4_106, %c0_107, %c0_108] : memref<9x128x128xf32, #tpu.memory_space<vmem>>, vector<1x128x128xf32>
    %130 = vector.shape_cast %129 : vector<1x128x128xf32> to vector<128x128xf32>
    %cst_109 = arith.constant dense<0.000000e+00> : vector<288x128xf32>
    %131 = tpu.matmul %128, %130, %cst_109 {dimension_numbers = #tpu.dot_dimension_numbers<[1], [0], [0], [1], [0, 0, 1, 1], [], []>} : vector<288x128xf32>, vector<128x128xf32>, vector<288x128xf32> -> vector<288x128xf32>
    %132 = arith.addf %126, %131 : vector<288x128xf32>
    %c1_110 = arith.constant 1 : index
    %c2_111 = arith.constant 2 : index
    %c0_112 = arith.constant 0 : index
    %133 = vector.load %arg12[%c1_110, %c2_111, %c0_112] : memref<20x18x128xf32, #tpu.memory_space<vmem>>, vector<18x16x128xf32>
    %134 = vector.shape_cast %133 : vector<18x16x128xf32> to vector<288x128xf32>
    %c5_113 = arith.constant 5 : index
    %c0_114 = arith.constant 0 : index
    %c0_115 = arith.constant 0 : index
    %135 = vector.load %arg5[%c5_113, %c0_114, %c0_115] : memref<9x128x128xf32, #tpu.memory_space<vmem>>, vector<1x128x128xf32>
    %136 = vector.shape_cast %135 : vector<1x128x128xf32> to vector<128x128xf32>
    %cst_116 = arith.constant dense<0.000000e+00> : vector<288x128xf32>
    %137 = tpu.matmul %134, %136, %cst_116 {dimension_numbers = #tpu.dot_dimension_numbers<[1], [0], [0], [1], [0, 0, 1, 1], [], []>} : vector<288x128xf32>, vector<128x128xf32>, vector<288x128xf32> -> vector<288x128xf32>
    %138 = arith.addf %132, %137 : vector<288x128xf32>
    %c2_117 = arith.constant 2 : index
    %c0_118 = arith.constant 0 : index
    %c0_119 = arith.constant 0 : index
    %139 = vector.load %arg12[%c2_117, %c0_118, %c0_119] : memref<20x18x128xf32, #tpu.memory_space<vmem>>, vector<18x16x128xf32>
    %140 = vector.shape_cast %139 : vector<18x16x128xf32> to vector<288x128xf32>
    %c6_120 = arith.constant 6 : index
    %c0_121 = arith.constant 0 : index
    %c0_122 = arith.constant 0 : index
    %141 = vector.load %arg5[%c6_120, %c0_121, %c0_122] : memref<9x128x128xf32, #tpu.memory_space<vmem>>, vector<1x128x128xf32>
    %142 = vector.shape_cast %141 : vector<1x128x128xf32> to vector<128x128xf32>
    %cst_123 = arith.constant dense<0.000000e+00> : vector<288x128xf32>
    %143 = tpu.matmul %140, %142, %cst_123 {dimension_numbers = #tpu.dot_dimension_numbers<[1], [0], [0], [1], [0, 0, 1, 1], [], []>} : vector<288x128xf32>, vector<128x128xf32>, vector<288x128xf32> -> vector<288x128xf32>
    %144 = arith.addf %138, %143 : vector<288x128xf32>
    %c2_124 = arith.constant 2 : index
    %c1_125 = arith.constant 1 : index
    %c0_126 = arith.constant 0 : index
    %145 = vector.load %arg12[%c2_124, %c1_125, %c0_126] : memref<20x18x128xf32, #tpu.memory_space<vmem>>, vector<18x16x128xf32>
    %146 = vector.shape_cast %145 : vector<18x16x128xf32> to vector<288x128xf32>
    %c7_127 = arith.constant 7 : index
    %c0_128 = arith.constant 0 : index
    %c0_129 = arith.constant 0 : index
    %147 = vector.load %arg5[%c7_127, %c0_128, %c0_129] : memref<9x128x128xf32, #tpu.memory_space<vmem>>, vector<1x128x128xf32>
    %148 = vector.shape_cast %147 : vector<1x128x128xf32> to vector<128x128xf32>
    %cst_130 = arith.constant dense<0.000000e+00> : vector<288x128xf32>
    %149 = tpu.matmul %146, %148, %cst_130 {dimension_numbers = #tpu.dot_dimension_numbers<[1], [0], [0], [1], [0, 0, 1, 1], [], []>} : vector<288x128xf32>, vector<128x128xf32>, vector<288x128xf32> -> vector<288x128xf32>
    %150 = arith.addf %144, %149 : vector<288x128xf32>
    %c2_131 = arith.constant 2 : index
    %c2_132 = arith.constant 2 : index
    %c0_133 = arith.constant 0 : index
    %151 = vector.load %arg12[%c2_131, %c2_132, %c0_133] : memref<20x18x128xf32, #tpu.memory_space<vmem>>, vector<18x16x128xf32>
    %152 = vector.shape_cast %151 : vector<18x16x128xf32> to vector<288x128xf32>
    %c8_134 = arith.constant 8 : index
    %c0_135 = arith.constant 0 : index
    %c0_136 = arith.constant 0 : index
    %153 = vector.load %arg5[%c8_134, %c0_135, %c0_136] : memref<9x128x128xf32, #tpu.memory_space<vmem>>, vector<1x128x128xf32>
    %154 = vector.shape_cast %153 : vector<1x128x128xf32> to vector<128x128xf32>
    %cst_137 = arith.constant dense<0.000000e+00> : vector<288x128xf32>
    %155 = tpu.matmul %152, %154, %cst_137 {dimension_numbers = #tpu.dot_dimension_numbers<[1], [0], [0], [1], [0, 0, 1, 1], [], []>} : vector<288x128xf32>, vector<128x128xf32>, vector<288x128xf32> -> vector<288x128xf32>
    %156 = arith.addf %150, %155 : vector<288x128xf32>
    %c0_138 = arith.constant 0 : index
    %c0_139 = arith.constant 0 : index
    %157 = vector.load %arg6[%c0_138, %c0_139] : memref<1x128xf32, #tpu.memory_space<vmem>>, vector<1x128xf32>
    %158 = vector.broadcast %157 : vector<1x128xf32> to vector<288x128xf32>
    %159 = arith.addf %156, %158 : vector<288x128xf32>
    %cst_140 = arith.constant 0.000000e+00 : f32
    %160 = vector.broadcast %cst_140 : f32 to vector<288x128xf32>
    %161 = arith.maximumf %159, %160 : vector<288x128xf32>
    %c0_141 = arith.constant 0 : index
    %c0_142 = arith.constant 0 : index
    %c0_143 = arith.constant 0 : index
    %162 = vector.load %arg7[%c0_141, %c0_142, %c0_143] : memref<1x3x128xf32, #tpu.memory_space<vmem>>, vector<1x3x128xf32>
    %163 = vector.shape_cast %162 : vector<1x3x128xf32> to vector<3x128xf32>
    %164 = tpu.transpose %163, [1, 0] : vector<3x128xf32> -> vector<128x3xf32>
    %cst_144 = arith.constant dense<0.000000e+00> : vector<288x3xf32>
    %165 = tpu.matmul %161, %164, %cst_144 {dimension_numbers = #tpu.dot_dimension_numbers<[1], [0], [0], [1], [0, 0, 1, 1], [], []>} : vector<288x128xf32>, vector<128x3xf32>, vector<288x3xf32> -> vector<288x3xf32>
    %cst_145 = arith.constant dense<0xFF800000> : vector<288xf32>
    %166 = vector.multi_reduction <maximumf>, %165, %cst_145 [1] : vector<288x3xf32> to vector<288xf32>
    %167 = vector.shape_cast %166 : vector<288xf32> to vector<288x1xf32>
    %168 = vector.broadcast %167 : vector<288x1xf32> to vector<288x3xf32>
    %169 = arith.subf %165, %168 : vector<288x3xf32>
    %170 = math.exp %169 : vector<288x3xf32>
    %cst_146 = arith.constant dense<0.000000e+00> : vector<288xf32>
    %171 = vector.multi_reduction <add>, %170, %cst_146 [1] : vector<288x3xf32> to vector<288xf32>
    %172 = vector.shape_cast %171 : vector<288xf32> to vector<288x1xf32>
    %173 = vector.broadcast %172 : vector<288x1xf32> to vector<288x3xf32>
    %174 = arith.divf %170, %173 : vector<288x3xf32>
    %c0_147 = arith.constant 0 : index
    %c0_148 = arith.constant 0 : index
    %c0_149 = arith.constant 0 : index
    %175 = vector.load %arg8[%c0_147, %c0_148, %c0_149] : memref<1x3x128xf32, #tpu.memory_space<vmem>>, vector<1x3x128xf32>
    %176 = vector.shape_cast %175 : vector<1x3x128xf32> to vector<3x128xf32>
    %cst_150 = arith.constant dense<0.000000e+00> : vector<288x128xf32>
    %177 = tpu.matmul %174, %176, %cst_150 {dimension_numbers = #tpu.dot_dimension_numbers<[1], [0], [0], [1], [0, 0, 1, 1], [], []>} : vector<288x3xf32>, vector<3x128xf32>, vector<288x128xf32> -> vector<288x128xf32>
    %178 = tpu.iota {dimensions = array<i32: 0>} : vector<18x1x1xi32>
    %c1_i32_151 = arith.constant 1 : i32
    %179 = arith.subi %0, %c1_i32_151 : i32
    %180 = vector.broadcast %179 : i32 to vector<18x1x1xi32>
    %181 = arith.addi %178, %180 : vector<18x1x1xi32>
    %c0_i32_152 = arith.constant 0 : i32
    %182 = vector.broadcast %c0_i32_152 : i32 to vector<18x1x1xi32>
    %183 = arith.cmpi sge, %181, %182 : vector<18x1x1xi32>
    %c16_i32_153 = arith.constant 16 : i32
    %184 = vector.broadcast %c16_i32_153 : i32 to vector<18x1x1xi32>
    %185 = arith.cmpi slt, %181, %184 : vector<18x1x1xi32>
    %186 = arith.andi %183, %185 : vector<18x1x1xi1>
    %cst_154 = arith.constant 0.000000e+00 : f32
    %187 = vector.broadcast %cst_154 : f32 to vector<18x1x128xf32>
    %c0_155 = arith.constant 0 : index
    %c0_156 = arith.constant 0 : index
    %c0_157 = arith.constant 0 : index
    %188 = vector.load %arg13[%c0_155, %c0_156, %c0_157] : memref<18x18x128xf32, #tpu.memory_space<vmem>>, vector<18x1x128xf32>
    tpu.vector_store %arg13[%c0_155, %c0_156, %c0_157], %187 {strides = array<i32>} : memref<18x18x128xf32, #tpu.memory_space<vmem>>, vector<18x1x128xf32>,
    %c0_158 = arith.constant 0 : index
    %c17_159 = arith.constant 17 : index
    %c0_160 = arith.constant 0 : index
    %189 = vector.load %arg13[%c0_158, %c17_159, %c0_160] : memref<18x18x128xf32, #tpu.memory_space<vmem>>, vector<18x1x128xf32>
    tpu.vector_store %arg13[%c0_158, %c17_159, %c0_160], %187 {strides = array<i32>} : memref<18x18x128xf32, #tpu.memory_space<vmem>>, vector<18x1x128xf32>,
    %190 = vector.shape_cast %177 : vector<288x128xf32> to vector<18x16x128xf32>
    %cst_161 = arith.constant 0.000000e+00 : f32
    %191 = vector.shape_cast %186 : vector<18x1x1xi1> to vector<18x1x1xi1>
    %192 = vector.broadcast %191 : vector<18x1x1xi1> to vector<18x16x128xi1>
    %193 = vector.broadcast %cst_161 : f32 to vector<18x16x128xf32>
    %194 = arith.select %192, %190, %193 : vector<18x16x128xi1>, vector<18x16x128xf32>
    %c0_162 = arith.constant 0 : index
    %c1_163 = arith.constant 1 : index
    %c0_164 = arith.constant 0 : index
    %195 = vector.load %arg13[%c0_162, %c1_163, %c0_164] : memref<18x18x128xf32, #tpu.memory_space<vmem>>, vector<18x16x128xf32>
    tpu.vector_store %arg13[%c0_162, %c1_163, %c0_164], %194 {strides = array<i32>} : memref<18x18x128xf32, #tpu.memory_space<vmem>>, vector<18x16x128xf32>,
    %c0_165 = arith.constant 0 : index
    %c0_166 = arith.constant 0 : index
    %c0_167 = arith.constant 0 : index
    %196 = vector.load %arg13[%c0_165, %c0_166, %c0_167] : memref<18x18x128xf32, #tpu.memory_space<vmem>>, vector<16x16x128xf32>
    %197 = vector.shape_cast %196 : vector<16x16x128xf32> to vector<256x128xf32>
    %c0_168 = arith.constant 0 : index
    %c0_169 = arith.constant 0 : index
    %c0_170 = arith.constant 0 : index
    %198 = vector.load %arg9[%c0_168, %c0_169, %c0_170] : memref<9x128x1xf32, #tpu.memory_space<vmem>>, vector<1x128x1xf32>
    %199 = vector.shape_cast %198 : vector<1x128x1xf32> to vector<128x1xf32>
    %cst_171 = arith.constant dense<0.000000e+00> : vector<256x1xf32>
    %200 = tpu.matmul %197, %199, %cst_171 {dimension_numbers = #tpu.dot_dimension_numbers<[1], [0], [0], [1], [0, 0, 1, 1], [], []>} : vector<256x128xf32>, vector<128x1xf32>, vector<256x1xf32> -> vector<256x1xf32>
    %c0_172 = arith.constant 0 : index
    %c1_173 = arith.constant 1 : index
    %c0_174 = arith.constant 0 : index
    %201 = vector.load %arg13[%c0_172, %c1_173, %c0_174] : memref<18x18x128xf32, #tpu.memory_space<vmem>>, vector<16x16x128xf32>
    %202 = vector.shape_cast %201 : vector<16x16x128xf32> to vector<256x128xf32>
    %c1_175 = arith.constant 1 : index
    %c0_176 = arith.constant 0 : index
    %c0_177 = arith.constant 0 : index
    %203 = vector.load %arg9[%c1_175, %c0_176, %c0_177] : memref<9x128x1xf32, #tpu.memory_space<vmem>>, vector<1x128x1xf32>
    %204 = vector.shape_cast %203 : vector<1x128x1xf32> to vector<128x1xf32>
    %cst_178 = arith.constant dense<0.000000e+00> : vector<256x1xf32>
    %205 = tpu.matmul %202, %204, %cst_178 {dimension_numbers = #tpu.dot_dimension_numbers<[1], [0], [0], [1], [0, 0, 1, 1], [], []>} : vector<256x128xf32>, vector<128x1xf32>, vector<256x1xf32> -> vector<256x1xf32>
    %206 = arith.addf %200, %205 : vector<256x1xf32>
    %c0_179 = arith.constant 0 : index
    %c2_180 = arith.constant 2 : index
    %c0_181 = arith.constant 0 : index
    %207 = vector.load %arg13[%c0_179, %c2_180, %c0_181] : memref<18x18x128xf32, #tpu.memory_space<vmem>>, vector<16x16x128xf32>
    %208 = vector.shape_cast %207 : vector<16x16x128xf32> to vector<256x128xf32>
    %c2_182 = arith.constant 2 : index
    %c0_183 = arith.constant 0 : index
    %c0_184 = arith.constant 0 : index
    %209 = vector.load %arg9[%c2_182, %c0_183, %c0_184] : memref<9x128x1xf32, #tpu.memory_space<vmem>>, vector<1x128x1xf32>
    %210 = vector.shape_cast %209 : vector<1x128x1xf32> to vector<128x1xf32>
    %cst_185 = arith.constant dense<0.000000e+00> : vector<256x1xf32>
    %211 = tpu.matmul %208, %210, %cst_185 {dimension_numbers = #tpu.dot_dimension_numbers<[1], [0], [0], [1], [0, 0, 1, 1], [], []>} : vector<256x128xf32>, vector<128x1xf32>, vector<256x1xf32> -> vector<256x1xf32>
    %212 = arith.addf %206, %211 : vector<256x1xf32>
    %c1_186 = arith.constant 1 : index
    %c0_187 = arith.constant 0 : index
    %c0_188 = arith.constant 0 : index
    %213 = vector.load %arg13[%c1_186, %c0_187, %c0_188] : memref<18x18x128xf32, #tpu.memory_space<vmem>>, vector<16x16x128xf32>
    %214 = vector.shape_cast %213 : vector<16x16x128xf32> to vector<256x128xf32>
    %c3_189 = arith.constant 3 : index
    %c0_190 = arith.constant 0 : index
    %c0_191 = arith.constant 0 : index
    %215 = vector.load %arg9[%c3_189, %c0_190, %c0_191] : memref<9x128x1xf32, #tpu.memory_space<vmem>>, vector<1x128x1xf32>
    %216 = vector.shape_cast %215 : vector<1x128x1xf32> to vector<128x1xf32>
    %cst_192 = arith.constant dense<0.000000e+00> : vector<256x1xf32>
    %217 = tpu.matmul %214, %216, %cst_192 {dimension_numbers = #tpu.dot_dimension_numbers<[1], [0], [0], [1], [0, 0, 1, 1], [], []>} : vector<256x128xf32>, vector<128x1xf32>, vector<256x1xf32> -> vector<256x1xf32>
    %218 = arith.addf %212, %217 : vector<256x1xf32>
    %c1_193 = arith.constant 1 : index
    %c1_194 = arith.constant 1 : index
    %c0_195 = arith.constant 0 : index
    %219 = vector.load %arg13[%c1_193, %c1_194, %c0_195] : memref<18x18x128xf32, #tpu.memory_space<vmem>>, vector<16x16x128xf32>
    %220 = vector.shape_cast %219 : vector<16x16x128xf32> to vector<256x128xf32>
    %c4_196 = arith.constant 4 : index
    %c0_197 = arith.constant 0 : index
    %c0_198 = arith.constant 0 : index
    %221 = vector.load %arg9[%c4_196, %c0_197, %c0_198] : memref<9x128x1xf32, #tpu.memory_space<vmem>>, vector<1x128x1xf32>
    %222 = vector.shape_cast %221 : vector<1x128x1xf32> to vector<128x1xf32>
    %cst_199 = arith.constant dense<0.000000e+00> : vector<256x1xf32>
    %223 = tpu.matmul %220, %222, %cst_199 {dimension_numbers = #tpu.dot_dimension_numbers<[1], [0], [0], [1], [0, 0, 1, 1], [], []>} : vector<256x128xf32>, vector<128x1xf32>, vector<256x1xf32> -> vector<256x1xf32>
    %224 = arith.addf %218, %223 : vector<256x1xf32>
    %c1_200 = arith.constant 1 : index
    %c2_201 = arith.constant 2 : index
    %c0_202 = arith.constant 0 : index
    %225 = vector.load %arg13[%c1_200, %c2_201, %c0_202] : memref<18x18x128xf32, #tpu.memory_space<vmem>>, vector<16x16x128xf32>
    %226 = vector.shape_cast %225 : vector<16x16x128xf32> to vector<256x128xf32>
    %c5_203 = arith.constant 5 : index
    %c0_204 = arith.constant 0 : index
    %c0_205 = arith.constant 0 : index
    %227 = vector.load %arg9[%c5_203, %c0_204, %c0_205] : memref<9x128x1xf32, #tpu.memory_space<vmem>>, vector<1x128x1xf32>
    %228 = vector.shape_cast %227 : vector<1x128x1xf32> to vector<128x1xf32>
    %cst_206 = arith.constant dense<0.000000e+00> : vector<256x1xf32>
    %229 = tpu.matmul %226, %228, %cst_206 {dimension_numbers = #tpu.dot_dimension_numbers<[1], [0], [0], [1], [0, 0, 1, 1], [], []>} : vector<256x128xf32>, vector<128x1xf32>, vector<256x1xf32> -> vector<256x1xf32>
    %230 = arith.addf %224, %229 : vector<256x1xf32>
    %c2_207 = arith.constant 2 : index
    %c0_208 = arith.constant 0 : index
    %c0_209 = arith.constant 0 : index
    %231 = vector.load %arg13[%c2_207, %c0_208, %c0_209] : memref<18x18x128xf32, #tpu.memory_space<vmem>>, vector<16x16x128xf32>
    %232 = vector.shape_cast %231 : vector<16x16x128xf32> to vector<256x128xf32>
    %c6_210 = arith.constant 6 : index
    %c0_211 = arith.constant 0 : index
    %c0_212 = arith.constant 0 : index
    %233 = vector.load %arg9[%c6_210, %c0_211, %c0_212] : memref<9x128x1xf32, #tpu.memory_space<vmem>>, vector<1x128x1xf32>
    %234 = vector.shape_cast %233 : vector<1x128x1xf32> to vector<128x1xf32>
    %cst_213 = arith.constant dense<0.000000e+00> : vector<256x1xf32>
    %235 = tpu.matmul %232, %234, %cst_213 {dimension_numbers = #tpu.dot_dimension_numbers<[1], [0], [0], [1], [0, 0, 1, 1], [], []>} : vector<256x128xf32>, vector<128x1xf32>, vector<256x1xf32> -> vector<256x1xf32>
    %236 = arith.addf %230, %235 : vector<256x1xf32>
    %c2_214 = arith.constant 2 : index
    %c1_215 = arith.constant 1 : index
    %c0_216 = arith.constant 0 : index
    %237 = vector.load %arg13[%c2_214, %c1_215, %c0_216] : memref<18x18x128xf32, #tpu.memory_space<vmem>>, vector<16x16x128xf32>
    %238 = vector.shape_cast %237 : vector<16x16x128xf32> to vector<256x128xf32>
    %c7_217 = arith.constant 7 : index
    %c0_218 = arith.constant 0 : index
    %c0_219 = arith.constant 0 : index
    %239 = vector.load %arg9[%c7_217, %c0_218, %c0_219] : memref<9x128x1xf32, #tpu.memory_space<vmem>>, vector<1x128x1xf32>
    %240 = vector.shape_cast %239 : vector<1x128x1xf32> to vector<128x1xf32>
    %cst_220 = arith.constant dense<0.000000e+00> : vector<256x1xf32>
    %241 = tpu.matmul %238, %240, %cst_220 {dimension_numbers = #tpu.dot_dimension_numbers<[1], [0], [0], [1], [0, 0, 1, 1], [], []>} : vector<256x128xf32>, vector<128x1xf32>, vector<256x1xf32> -> vector<256x1xf32>
    %242 = arith.addf %236, %241 : vector<256x1xf32>
    %c2_221 = arith.constant 2 : index
    %c2_222 = arith.constant 2 : index
    %c0_223 = arith.constant 0 : index
    %243 = vector.load %arg13[%c2_221, %c2_222, %c0_223] : memref<18x18x128xf32, #tpu.memory_space<vmem>>, vector<16x16x128xf32>
    %244 = vector.shape_cast %243 : vector<16x16x128xf32> to vector<256x128xf32>
    %c8_224 = arith.constant 8 : index
    %c0_225 = arith.constant 0 : index
    %c0_226 = arith.constant 0 : index
    %245 = vector.load %arg9[%c8_224, %c0_225, %c0_226] : memref<9x128x1xf32, #tpu.memory_space<vmem>>, vector<1x128x1xf32>
    %246 = vector.shape_cast %245 : vector<1x128x1xf32> to vector<128x1xf32>
    %cst_227 = arith.constant dense<0.000000e+00> : vector<256x1xf32>
    %247 = tpu.matmul %244, %246, %cst_227 {dimension_numbers = #tpu.dot_dimension_numbers<[1], [0], [0], [1], [0, 0, 1, 1], [], []>} : vector<256x128xf32>, vector<128x1xf32>, vector<256x1xf32> -> vector<256x1xf32>
    %248 = arith.addf %242, %247 : vector<256x1xf32>
    %c0_228 = arith.constant 0 : index
    %c0_229 = arith.constant 0 : index
    %249 = vector.load %arg10[%c0_228, %c0_229] : memref<1x1xf32, #tpu.memory_space<vmem>>, vector<1x1xf32>
    %250 = vector.broadcast %249 : vector<1x1xf32> to vector<256x1xf32>
    %251 = arith.addf %248, %250 : vector<256x1xf32>
    %cst_230 = arith.constant 0.000000e+00 : f32
    %252 = vector.broadcast %cst_230 : f32 to vector<256x1xf32>
    %253 = arith.maximumf %251, %252 : vector<256x1xf32>
    %c3_i32 = arith.constant 3 : i32
    %254 = arith.addi %0, %c3_i32 : i32
    %c0_231 = arith.constant 0 : index
    %255 = arith.index_cast %254 : i32 to index
    %c1_232 = arith.constant 1 : index
    %c0_233 = arith.constant 0 : index
    %256 = vector.load %arg2[%c0_231, %255, %c1_232, %c0_233] : memref<1x22x18x4xf32, #tpu.memory_space<vmem>>, vector<1x16x16x4xf32>
    %257 = vector.shape_cast %256 : vector<1x16x16x4xf32> to vector<16x16x4xf32>
    %258 = vector.shape_cast %257 : vector<16x16x4xf32> to vector<256x4xf32>
    %259 = vector.broadcast %253 : vector<256x1xf32> to vector<256x4xf32>
    %260 = arith.mulf %258, %259 : vector<256x4xf32>
    %c0_234 = arith.constant 0 : index
    %c0_235 = arith.constant 0 : index
    %c0_236 = arith.constant 0 : index
    %261 = vector.load %arg11[%c0_234, %c0_235, %c0_236] : memref<1x256x4xf32, #tpu.memory_space<vmem>>, vector<1x256x4xf32>
    %262 = vector.shape_cast %261 : vector<1x256x4xf32> to vector<256x4xf32>
    %263 = vector.shape_cast %260 : vector<256x4xf32> to vector<1x256x4xf32>
    tpu.vector_store %arg11[%c0_234, %c0_235, %c0_236], %263 {strides = array<i32>} : memref<1x256x4xf32, #tpu.memory_space<vmem>>, vector<1x256x4xf32>,
    return
  }
  func.func @transform_0(%arg0: i32, %arg1: i32) -> (i32, i32, i32, i32) {
    %c0_i32 = arith.constant 0 : i32
    %c0_i32_0 = arith.constant 0 : i32
    %c0_i32_1 = arith.constant 0 : i32
    %c0_i32_2 = arith.constant 0 : i32
    return %arg0, %c0_i32, %c0_i32_0, %c0_i32_1 : i32, i32, i32, i32
  }
  func.func @transform_1(%arg0: i32, %arg1: i32) -> (i32, i32, i32) {
    %c0_i32 = arith.constant 0 : i32
    %c0_i32_0 = arith.constant 0 : i32
    %c0_i32_1 = arith.constant 0 : i32
    %c0_i32_2 = arith.constant 0 : i32
    return %c0_i32, %c0_i32_0, %c0_i32_1 : i32, i32, i32
  }
  func.func @transform_2(%arg0: i32, %arg1: i32) -> (i32, i32) {
    %c0_i32 = arith.constant 0 : i32
    %c0_i32_0 = arith.constant 0 : i32
    %c0_i32_1 = arith.constant 0 : i32
    return %c0_i32, %c0_i32_0 : i32, i32
  }
  func.func @transform_3(%arg0: i32, %arg1: i32) -> (i32, i32, i32) {
    %c0_i32 = arith.constant 0 : i32
    %c0_i32_0 = arith.constant 0 : i32
    %c0_i32_1 = arith.constant 0 : i32
    %c0_i32_2 = arith.constant 0 : i32
    return %c0_i32, %c0_i32_0, %c0_i32_1 : i32, i32, i32
  }
  func.func @transform_4(%arg0: i32, %arg1: i32) -> (i32, i32) {
    %c0_i32 = arith.constant 0 : i32
    %c0_i32_0 = arith.constant 0 : i32
    %c0_i32_1 = arith.constant 0 : i32
    return %c0_i32, %c0_i32_0 : i32, i32
  }
  func.func @transform_5(%arg0: i32, %arg1: i32) -> (i32, i32, i32) {
    %c0_i32 = arith.constant 0 : i32
    %c0_i32_0 = arith.constant 0 : i32
    %c0_i32_1 = arith.constant 0 : i32
    return %arg0, %c0_i32, %c0_i32_0 : i32, i32, i32
  }
  func.func @transform_6(%arg0: i32, %arg1: i32) -> (i32, i32, i32) {
    %c0_i32 = arith.constant 0 : i32
    %c0_i32_0 = arith.constant 0 : i32
    %c0_i32_1 = arith.constant 0 : i32
    return %arg0, %c0_i32, %c0_i32_0 : i32, i32, i32
  }
  func.func @transform_7(%arg0: i32, %arg1: i32) -> (i32, i32, i32) {
    %c0_i32 = arith.constant 0 : i32
    %c0_i32_0 = arith.constant 0 : i32
    %c0_i32_1 = arith.constant 0 : i32
    %c0_i32_2 = arith.constant 0 : i32
    return %c0_i32, %c0_i32_0, %c0_i32_1 : i32, i32, i32
  }
  func.func @transform_8(%arg0: i32, %arg1: i32) -> (i32, i32) {
    %c0_i32 = arith.constant 0 : i32
    %c0_i32_0 = arith.constant 0 : i32
    %c0_i32_1 = arith.constant 0 : i32
    return %c0_i32, %c0_i32_0 : i32, i32
  }
  func.func @transform_9(%arg0: i32, %arg1: i32) -> (i32, i32, i32) {
    %c0_i32 = arith.constant 0 : i32
    %c0_i32_0 = arith.constant 0 : i32
    return %arg0, %arg1, %c0_i32 : i32, i32, i32
  }
}

</mosaic_0001>

<bundles_post_ra>
// kernel: _lambda_.2
= control target key start
LH: loop header
LB: loop body
LE: loop exit
PB: predicated region body
PF: predicated region fallthrough
CT: control target
= control target key end

     0   :  { %s1392_s17 = smov 0   ;;  %s1394_s18 = smov 0   ;;  %s1631_s0 = inlined_call_operand.vmem [shape: f32[2,1,256], index: 0, kind: input, shape index: {}]   ;;  %s1632_s1 = inlined_call_operand.vmem [shape: f32[2,256,4], index: 1, kind: input, shape index: {}]   ;;  %s1633_s2 = inlined_call_operand.vmem [shape: f32[4,128], index: 2, kind: input, shape index: {}]   ;;  %s1634_s3 = inlined_call_operand.vmem [shape: f32[1,128], index: 3, kind: input, shape index: {}]   ;;  %s1635_s4 = inlined_call_operand.vmem [shape: f32[128,128], index: 4, kind: input, shape index: {}]   ;;  %s1636_s5 = inlined_call_operand.vmem [shape: f32[1,128], index: 5, kind: input, shape index: {}]   ;;  %s1637_s6 = inlined_call_operand.vmem [shape: f32[4,128], index: 6, kind: input, shape index: {}]   ;;  %s1638_s7 = inlined_call_operand.vmem [shape: f32[1,128], index: 7, kind: input, shape index: {}]   ;;  %s1639_s8 = inlined_call_operand.vmem [shape: f32[128,128], index: 8, kind: input, shape index: {}]   ;;  %s1640_s9 = inlined_call_operand.vmem [shape: f32[1,128], index: 9, kind: input, shape index: {}]   ;;  %s1641_s10 = inlined_call_operand.vmem [shape: f32[2,3,128], index: 10, kind: output, shape index: {0}]   ;;  %s1642_s11 = inlined_call_operand.vmem [shape: f32[2,3,128], index: 11, kind: output, shape index: {1}]  }
   0x1   :  { %s1396_s19 = smov 0  }
   0x2 LB: > { %s34_s20 = sadd.s32 1, %s1324_s18  ;;  %p1104_p0 = scmp.ge.s32.totalorder %s1328_s19, 1  ;;  %s1328_s19 = sphi %s1396_s19, %s22_s19   ;;  %s1324_s18 = sphi %s1394_s18, %s1644_s18   ;;  %s1320_s17 = sphi %s1392_s17, %s1643_s17  }
   0x3   : > { %p36_p1 = scmp.ge.s32.totalorder %s34_s20, 2  ;;  %p375_p2 = scmp.lt.s32.totalorder %s1328_s19, 3 }
   0x5   : > { %s1646_s20 = smov (%p36_p1, %s34_s20), 0  ;;  %p376_p3 = pnand %p1104_p0, %p375_p2 }
   0x6   : > { %p431_p4 = scmp.lt.s32.totalorder (!%p376_p3), %s1320_s17, 1 }
   0x7   : > { %379 = sbr.rel (%p376_p3) target bundleno = 699 (0x2bb), region = 60 }
   0xc   : > { %s1648_s17 = smov (!%p431_p4, %s1320_s17), 1  ;;  %v479_v36 = vlaneseq  ;;  %vm511_vm0 = vcmask 1040384   ;;  %vm514_vm1 = vcmask 1041408   ;;  %vm461_vm2 = vcmask 26624   ;;  %v627_v60 = vld [vmem:[%s1633_s2] sm:$0xf] }
   0xd   : > { %s1122_s21 = sshll.u32 %s1648_s17, 8  ;;  %s1105_s25 = sshll.u32 %s1648_s17, 1  ;;  %v1330_v59 = vmov 0.0   ;;  %vm639_vm3 = vcmask 1043456   ;;  %vm1331_vm4 = vmmov 0   ;;  %v729_v61 = vld [vmem:[%s1635_s4 + $0x78] sm:$0xff] }
   0xe   : > { %s1416_s24 = scalar_lea.vmem %s1632_s1, %s1122_s21  ;;  %s437_s28 = scalar_lea.vmem %s1631_s0, %s1105_s25  ;;  %v480_v37 = vshrl.u32 %v479_v36, 7  ;;  %462 = vst.msk [vmem:[#allocation2] sm:$0x7] %vm461_vm2, %v1330_v59  ;;  %1201 = vmatprep.subr.mxu1 %v1330_v59  ;;  %1233 = vmatprep.mubr.msk.f32.mxu1 %vm1331_vm4, %v1330_v59  ;;  %v728_v62 = vld [vmem:[%s1635_s4 + $0x70] sm:$0xff]  ;;  %v727_v63 = vld [vmem:[%s1635_s4 + $0x68] sm:$0xff]  ;;  %vm635_vm5 = vcmask 31744  }
   0xf   : > { %v549_v0 = vld [vmem:[%s1416_s24 + $0xf8] sm:$0xff]  ;;  %v548_v2 = vld [vmem:[%s1416_s24 + $0xf0] sm:$0xff]  ;;  %v547_v4 = vld [vmem:[%s1416_s24 + $0xe8] sm:$0xff]  ;;  %1202 = vmatpush3.msra.mxu1 %v729_v61 }
  0x10   : > { %v533_v1 = vld [vmem:[%s1416_s24 + $0x78] sm:$0xff]  ;;  %1123 = vmatprep.subr.mxu0 %v549_v0  ;;  %v532_v3 = vld [vmem:[%s1416_s24 + $0x70] sm:$0xff]  ;;  %v531_v5 = vld [vmem:[%s1416_s24 + $0x68] sm:$0xff]  ;;  %v485_v40 = vsub.s32 1, %v480_v37  ;;  %v481_v44 = vsub.s32 0, %v480_v37  ;;  %1203 = vmatprep.subr.mxu1 %v1330_v59 }
  0x11   : > { %1124 = vmatpush3.msra.mxu0 %v533_v1  ;;  %v546_v6 = vld [vmem:[%s1416_s24 + $0xe0] sm:$0xff]  ;;  %v545_v8 = vld [vmem:[%s1416_s24 + $0xd8] sm:$0xff]  ;;  %v544_v10 = vld [vmem:[%s1416_s24 + $0xd0] sm:$0xff]  ;;  %1204 = vmatpush3.msra.mxu1 %v728_v62 }
  0x12   : > { %1125 = vmatprep.subr.mxu0 %v548_v2  ;;  %v530_v7 = vld [vmem:[%s1416_s24 + $0x60] sm:$0xff]  ;;  %v529_v9 = vld [vmem:[%s1416_s24 + $0x58] sm:$0xff]  ;;  %v528_v11 = vld [vmem:[%s1416_s24 + $0x50] sm:$0xff]  ;;  %1205 = vmatprep.subr.mxu1 %v1330_v59 }
  0x13   : > { %1126 = vmatpush3.msra.mxu0 %v532_v3  ;;  %v543_v12 = vld [vmem:[%s1416_s24 + $0xc8] sm:$0xff]  ;;  %v463_v13 = vld [vmem:[%s437_s28] sm:$0x3]  ;;  %v541_v18 = vld [vmem:[%s1416_s24 + $0xb8] sm:$0xff]  ;;  %1206 = vmatpush3.msra.mxu1 %v727_v63  ;;  %s1108_s28 = sshll.u32 %s1648_s17, 2 }
  0x14   : > { %1127 = vmatprep.subr.mxu0 %v547_v4  ;;  %v527_v14 = vld [vmem:[%s1416_s24 + $0x48] sm:$0xff]  ;;  %v1110_v15 = vmul.f32 -1.442695, %v463_v13  ;;  %v542_v16 = vld [vmem:[%s1416_s24 + $0xc0] sm:$0xff]  ;;  %v525_v19 = vld [vmem:[%s1416_s24 + $0x38] sm:$0xff]  ;;  %1207 = vmatprep.subr.mxu1 %v1330_v59  ;;  %s452_s12 = scalar_lea.vmem %s1641_s10, %s1108_s28  ;;  %s456_s21 = scalar_lea.vmem %s1642_s11, %s1108_s28 }
  0x15   : > { %1128 = vmatpush3.msra.mxu0 %v531_v5  ;;  %v526_v17 = vld [vmem:[%s1416_s24 + $0x40] sm:$0xff]  ;;  %v540_v20 = vld [vmem:[%s1416_s24 + $0xb0] sm:$0xff]  ;;  %v539_v22 = vld [vmem:[%s1416_s24 + $0xa8] sm:$0xff] }
  0x16   : > { %1129 = vmatprep.subr.mxu0 %v546_v6  ;;  %1302 = vpow2.f32 %v1110_v15  ;;  %v524_v21 = vld [vmem:[%s1416_s24 + $0x30] sm:$0xff]  ;;  %v523_v23 = vld [vmem:[%s1416_s24 + $0x28] sm:$0xff]  ;;  %v538_v24 = vld [vmem:[%s1416_s24 + $0xa0] sm:$0xff] }
  0x17   : > { %1130 = vmatpush3.msra.mxu0 %v530_v7  ;;  %v522_v25 = vld [vmem:[%s1416_s24 + $0x20] sm:$0xff]  ;;  %v537_v26 = vld [vmem:[%s1416_s24 + $0x98] sm:$0xff]  ;;  %v536_v28 = vld [vmem:[%s1416_s24 + $0x90] sm:$0xff] }
  0x18   : > { %1131 = vmatprep.subr.mxu0 %v545_v8  ;;  %v521_v27 = vld [vmem:[%s1416_s24 + $0x18] sm:$0xff]  ;;  %v520_v29 = vld [vmem:[%s1416_s24 + $0x10] sm:$0xff]  ;;  %v535_v31 = vld [vmem:[%s1416_s24 + $0x88] sm:$0xff] }
  0x19   : > { %1132 = vmatpush3.msra.mxu0 %v529_v9  ;;  %v519_v32 = vld [vmem:[%s1416_s24 + $0x8] sm:$0xff]  ;;  %v534_v34 = vld [vmem:[%s1416_s24 + $0x80] sm:$0xff]  ;;  %v725_v1 = vld [vmem:[%s1635_s4 + $0x58] sm:$0xff] }
  0x1a   : > { %1133 = vmatprep.subr.mxu0 %v544_v10  ;;  %v518_v35 = vld [vmem:[%s1416_s24] sm:$0xff]  ;;  %v724_v2 = vld [vmem:[%s1635_s4 + $0x50] sm:$0xff]  ;;  %v723_v3 = vld [vmem:[%s1635_s4 + $0x48] sm:$0xff] }
  0x1b   : > { %1134 = vmatpush3.msra.mxu0 %v528_v11  ;;  %v726_v0 = vld [vmem:[%s1635_s4 + $0x60] sm:$0xff]  ;;  %v721_v5 = vld [vmem:[%s1635_s4 + $0x38] sm:$0xff]  ;;  %v720_v6 = vld [vmem:[%s1635_s4 + $0x30] sm:$0xff] }
  0x1c   : > { %1135 = vmatprep.subr.mxu0 %v543_v12  ;;  %1208 = vmatpush3.msra.mxu1 %v726_v0  ;;  %v722_v4 = vld [vmem:[%s1635_s4 + $0x40] sm:$0xff]  ;;  %v719_v7 = vld [vmem:[%s1635_s4 + $0x28] sm:$0xff]  ;;  %v717_v9 = vld [vmem:[%s1635_s4 + $0x18] sm:$0xff] }
  0x1d   : > { %1136 = vmatpush3.msra.mxu0 %v527_v14  ;;  %1209 = vmatprep.subr.mxu1 %v1330_v59  ;;  %v718_v8 = vld [vmem:[%s1635_s4 + $0x20] sm:$0xff]  ;;  %v716_v10 = vld [vmem:[%s1635_s4 + $0x10] sm:$0xff]  ;;  %v897_v37 = vld [vmem:[%s1639_s8 + $0x28] sm:$0xff] }
  0x1e   : > { %1137 = vmatprep.subr.mxu0 %v542_v16  ;;  %1210 = vmatpush3.msra.mxu1 %v725_v1  ;;  %v517_v12 = vld [vmem:[#allocation2] sm:$0x7]  ;;  %v898_v36 = vld [vmem:[%s1639_s8 + $0x30] sm:$0xff] }
  0x1f   : > { %1138 = vmatpush3.msra.mxu0 %v526_v17  ;;  %1211 = vmatprep.subr.mxu1 %v1330_v59  ;;  %v810_v16 = vld [vmem:[%s1637_s6] sm:$0xf] }
  0x20   : > { %1139 = vmatprep.subr.mxu0 %v541_v18  ;;  %1212 = vmatpush3.msra.mxu1 %v724_v2  ;;  %v715_v18 = vld [vmem:[%s1635_s4 + $0x8] sm:$0xff] }
  0x21   : > { %1140 = vmatpush3.msra.mxu0 %v525_v19  ;;  %1213 = vmatprep.subr.mxu1 %v1330_v59  ;;  %v714_v19 = vld [vmem:[%s1635_s4] sm:$0xff] }
  0x22   : > { %1141 = vmatprep.subr.mxu0 %v540_v20  ;;  %1214 = vmatpush3.msra.mxu1 %v723_v3  ;;  %v1112_v20 = vld [vmem:[%s1634_s3] ss:$0 sm:$0xff] }
  0x23   : > { %1142 = vmatpush3.msra.mxu0 %v524_v21  ;;  %v1303_v30 = vpop.eup %1302  ;;  %1215 = vmatprep.subr.mxu1 %v1330_v59 }
  0x24   : > { %1143 = vmatprep.subr.mxu0 %v539_v22  ;;  %v467_v33 = vadd.f32 1.0, %v1303_v30  ;;  %1216 = vmatpush3.msra.mxu1 %v722_v4  ;;  %v904_v30 = vld [vmem:[%s1639_s8 + $0x60] sm:$0xff] }
  0x25   : > { %1144 = vmatpush3.msra.mxu0 %v523_v23  ;;  %1217 = vmatprep.subr.mxu1 %v1330_v59 }
  0x26   : > { %1145 = vmatprep.subr.mxu0 %v538_v24  ;;  %1304 = vrcp.f32 %v467_v33  ;;  %1218 = vmatpush3.msra.mxu1 %v721_v5  ;;  %v901_v33 = vld [vmem:[%s1639_s8 + $0x48] sm:$0xff] }
  0x27   : > { %1146 = vmatpush3.msra.mxu0 %v522_v25  ;;  %1219 = vmatprep.subr.mxu1 %v1330_v59  ;;  %v907_v25 = vld [vmem:[%s1639_s8 + $0x78] sm:$0xff] }
  0x28   : > { %1147 = vmatprep.subr.mxu0 %v537_v26  ;;  %1220 = vmatpush3.msra.mxu1 %v720_v6 }
  0x29   : > { %1148 = vmatpush3.msra.mxu0 %v521_v27  ;;  %1221 = vmatprep.subr.mxu1 %v1330_v59  ;;  %v906_v27 = vld [vmem:[%s1639_s8 + $0x70] sm:$0xff] }
  0x2a   : > { %1149 = vmatprep.subr.mxu0 %v536_v28  ;;  %1222 = vmatpush3.msra.mxu1 %v719_v7 }
  0x2b   : > { %1150 = vmatpush3.msra.mxu0 %v520_v29  ;;  %1223 = vmatprep.subr.mxu1 %v1330_v59  ;;  %v905_v29 = vld [vmem:[%s1639_s8 + $0x68] sm:$0xff] }
  0x2c   : > { %1151 = vmatprep.subr.mxu0 %v535_v31  ;;  %1224 = vmatpush3.msra.mxu1 %v718_v8  ;;  %v903_v31 = vld [vmem:[%s1639_s8 + $0x58] sm:$0xff] }
  0x2d   : > { %1152 = vmatpush3.msra.mxu0 %v519_v32  ;;  %1225 = vmatprep.subr.mxu1 %v1330_v59  ;;  %v902_v32 = vld [vmem:[%s1639_s8 + $0x50] sm:$0xff] }
  0x2e   : > { %1153 = vmatprep.subr.mxu0 %v534_v34  ;;  %1226 = vmatpush3.msra.mxu1 %v717_v9  ;;  %v900_v34 = vld [vmem:[%s1639_s8 + $0x40] sm:$0xff] }
  0x2f   : > { %1154 = vmatpush3.msra.mxu0 %v518_v35  ;;  %1227 = vmatprep.subr.mxu1 %v1330_v59  ;;  %v899_v35 = vld [vmem:[%s1639_s8 + $0x38] sm:$0xff] }
  0x30   : > { %1196 = vmatprep.subr.mxu0 %v1330_v59  ;;  %1228 = vmatpush3.msra.mxu1 %v716_v10 }
  0x31   : > { %1229 = vmatprep.subr.mxu1 %v1330_v59 }
  0x32   : > { %1230 = vmatpush3.msra.mxu1 %v715_v18 }
  0x33   : > { %v1305_v38 = vpop.eup %1304  ;;  %1231 = vmatprep.subr.mxu1 %v1330_v59 }
  0x34   : > { %v1111_v39 = vadd.f32 -0.5, %v1305_v38  ;;  %1232 = vmatpush3.msra.mxu1 %v714_v19  ;;  %v896_v38 = vld [vmem:[%s1639_s8 + $0x20] sm:$0xff] }
  0x35   : > { %1241 = vmatprep.subr.mxu1 %v1330_v59 }
  0x36   : > { %v471_v41 = vmax.f32 %v1111_v39, 0.0  ;;  %v473_v42 = vsub.f32 0.0, %v1111_v39  ;;  %v476_v43 = vand.u32 2147483647, %v1111_v39  ;;  %v895_v39 = vld [vmem:[%s1639_s8 + $0x18] sm:$0xff] }
  0x38   : > { %v472_v45 = vmin.f32 %v471_v41, 1.0  ;;  %v474_v46 = vmax.f32 %v473_v42, 0.0  ;;  %v477_v47 = vsub.f32 0.5, %v476_v43  ;;  %v894_v41 = vld [vmem:[%s1639_s8 + $0x10] sm:$0xff]  ;;  %v893_v43 = vld [vmem:[%s1639_s8 + $0x8] sm:$0xff] }
  0x3a   : > { %v475_v48 = vmin.f32 %v474_v46, 1.0  ;;  %v486_v49 = vrot.slane %v472_v45, %v485_v40  ;;  %v482_v50 = vrot.slane %v472_v45, %v481_v44  ;;  %v508_v51 = vrot.slane %v477_v47, %v485_v40  ;;  %v1115_v46 = vld [vmem:[%s1636_s5] ss:$0 sm:$0xff] }
  0x3b   : > { %v504_v52 = vrot.slane %v477_v47, %v481_v44 }
  0x3c   : > { %v497_v53 = vrot.slane %v475_v48, %v485_v40  ;;  %v493_v54 = vrot.slane %v475_v48, %v481_v44  ;;  %v1116_v40 = vld [vmem:[%s1638_s7] ss:$0 sm:$0xff] }
  0x3d   : > { %v892_v44 = vld [vmem:[%s1639_s8] sm:$0xff] }
  0x3e   : > { %v513_v55 = vsel %vm511_vm0, %v486_v49, %v497_v53  ;;  %v512_v56 = vsel %vm511_vm0, %v482_v50, %v493_v54 }
  0x3f   : > { %v516_v57 = vsel %vm514_vm1, %v513_v55, %v508_v51  ;;  %v515_v58 = vsel %vm514_vm1, %v512_v56, %v504_v52  ;;  %v1119_v52 = vld [vmem:[%s1640_s9] ss:$0 sm:$0xff] }
  0x40   : > { %614 = vmatprep.mubr.f32.mxu0 %v516_v57 }
  0x41   : > { %615 = vmatmul.mubr.f32.vlgmr.msra.gmra.mxu0 %v515_v58 }
  0x42   : > { %1197 = vmatpush3.msk.msra.mxu0 %vm639_vm3, %v627_v60  ;;  %1198 = vmatprep.mubr.msk.f32.mxu0 %vm1331_vm4, %v1330_v59 }
  0x43   : > { %1236 = vmatprep.subr.mxu0 %v1330_v59 }
 0x101   : > { %v1155_v11 = vpop.f32.mrf.mxu0 }
 0x103   : > { %v1156_v13 = vpop.f32.mrf.mxu0 }
 0x104   : > { %v1157_v14 = vadd.f32 %v1156_v13, %v1155_v11 }
 0x106   : > { %v620_v15 = vadd.f32 %v1157_v14, %v517_v12 }
 0x108   : > { %622 = vst.msk [vmem:[#allocation2] sm:$0x7] %vm461_vm2, %v620_v15 }
 0x10f   : > { %v626_v17 = vld [vmem:[#allocation2] sm:$0x7] }
 0x110   : > { %1199 = vmatmul.mubr.msk.f32.vlgmr.msra.gmra.mxu0 %vm635_vm5, %v626_v17 }
 0x111   : > { %1237 = vmatpush3.msk.msra.mxu0 %vm639_vm3, %v810_v16  ;;  %1238 = vmatprep.mubr.msk.f32.mxu0 %vm1331_vm4, %v1330_v59 }
 0x114   : > { %1239 = vmatmul.mubr.msk.f32.vlgmr.msra.gmra.mxu0 %vm635_vm5, %v626_v17 }
 0x1d0   : > { %v709_v21 = vpop.f32.mrf.mxu0 }
 0x1d1   : > { %v710_v22 = vadd.f32 %v1112_v20, %v709_v21 }
 0x1d2   : > { %v1200_v23 = vpop.f32.mrf.mxu0 }
 0x1d3   : > { %v713_v24 = vmax.f32 %v710_v22, 0.0 }
 0x1d4   : > { %v887_v26 = vpop.f32.mrf.mxu0 }
 0x1d5   : > { %1234 = vmatmul.mubr.f32.vlgmr.msra.gmra.mxu1 %v713_v24  ;;  %v888_v42 = vadd.f32 %v1116_v40, %v887_v26 }
 0x1d6   : > { %1242 = vmatpush3.msra.mxu1 %v907_v25  ;;  %v1240_v28 = vpop.f32.mrf.mxu0  ;;  %1273 = vmatprep.mubr.msk.f32.mxu1 %vm1331_vm4, %v1330_v59 }
 0x1d7   : > { %1243 = vmatprep.subr.mxu1 %v1330_v59  ;;  %v891_v45 = vmax.f32 %v888_v42, 0.0 }
 0x1d8   : > { %1244 = vmatpush3.msra.mxu1 %v906_v27 }
 0x1d9   : > { %1245 = vmatprep.subr.mxu1 %v1330_v59 }
 0x1da   : > { %1246 = vmatpush3.msra.mxu1 %v905_v29 }
 0x1db   : > { %1247 = vmatprep.subr.mxu1 %v1330_v59 }
 0x1dc   : > { %1248 = vmatpush3.msra.mxu1 %v904_v30 }
 0x1dd   : > { %1249 = vmatprep.subr.mxu1 %v1330_v59 }
 0x1de   : > { %1250 = vmatpush3.msra.mxu1 %v903_v31 }
 0x1df   : > { %1251 = vmatprep.subr.mxu1 %v1330_v59 }
 0x1e0   : > { %1252 = vmatpush3.msra.mxu1 %v902_v32 }
 0x1e1   : > { %1253 = vmatprep.subr.mxu1 %v1330_v59 }
 0x1e2   : > { %1254 = vmatpush3.msra.mxu1 %v901_v33 }
 0x1e3   : > { %1255 = vmatprep.subr.mxu1 %v1330_v59 }
 0x1e4   : > { %1256 = vmatpush3.msra.mxu1 %v900_v34 }
 0x1e5   : > { %1257 = vmatprep.subr.mxu1 %v1330_v59 }
 0x1e6   : > { %1258 = vmatpush3.msra.mxu1 %v899_v35 }
 0x1e7   : > { %1259 = vmatprep.subr.mxu1 %v1330_v59 }
 0x1e8   : > { %1260 = vmatpush3.msra.mxu1 %v898_v36 }
 0x1e9   : > { %1261 = vmatprep.subr.mxu1 %v1330_v59 }
 0x1ea   : > { %1262 = vmatpush3.msra.mxu1 %v897_v37 }
 0x1eb   : > { %1263 = vmatprep.subr.mxu1 %v1330_v59 }
 0x1ec   : > { %1264 = vmatpush3.msra.mxu1 %v896_v38 }
 0x1ed   : > { %1265 = vmatprep.subr.mxu1 %v1330_v59 }
 0x1ee   : > { %1266 = vmatpush3.msra.mxu1 %v895_v39 }
 0x1ef   : > { %1267 = vmatprep.subr.mxu1 %v1330_v59 }
 0x1f0   : > { %1268 = vmatpush3.msra.mxu1 %v894_v41 }
 0x1f1   : > { %1269 = vmatprep.subr.mxu1 %v1330_v59 }
 0x1f2   : > { %1270 = vmatpush3.msra.mxu1 %v893_v43 }
 0x1f3   : > { %1271 = vmatprep.subr.mxu1 %v1330_v59 }
 0x1f4   : > { %1272 = vmatpush3.msra.mxu1 %v892_v44 }
 0x1f5   : > { %1274 = vmatmul.mubr.f32.vlgmr.msra.gmra.mxu1 %v891_v45 }
 0x295   : > { %v803_v47 = vpop.f32.mrf.mxu1 }
 0x296   : > { %v804_v48 = vadd.f32 %v1115_v46, %v803_v47 }
 0x297   : > { %v1235_v49 = vpop.f32.mrf.mxu1 }
 0x298   : > { %v807_v50 = vmax.f32 %v804_v48, 0.0 }
 0x29a   : > { %v808_v51 = vmul.f32 0.35355338, %v807_v50 }
 0x29c   : > { %809 = vst [vmem:[%s452_s12] sm:$0x7] %v808_v51 }
 0x2b5   : > { %v981_v53 = vpop.f32.mrf.mxu1 }
 0x2b6   : > { %v982_v54 = vadd.f32 %v1119_v52, %v981_v53 }
 0x2b7   : > { %v1275_v55 = vpop.f32.mrf.mxu1 }
 0x2b8   : > { %v985_v56 = vmax.f32 %v982_v54, 0.0 }
 0x2ba   : > { %986 = vst [vmem:[%s456_s21] sm:$0x7] %v985_v56 }
 0x2bb PF: > { %s22_s19 = sadd.s32 1, %s1328_s19   ;;  %s1643_s17 = smov %s1324_s18 }
 0x2bc   : > { %p19_p5 = scmp.ge.s32.totalorder %s22_s19, 4   ;;  %s1644_s18 = smov %s1646_s20 }
 0x2be   :  { %21 = sbr.rel (!%p19_p5) target bundleno = 2 (0x2), region = 113 }

// kernel: _lambda_.3
= control target key start
LH: loop header
LB: loop body
LE: loop exit
PB: predicated region body
PF: predicated region fallthrough
CT: control target
= control target key end

     0   :  { %s16976_s11 = smov 0   ;;  %s16978_s12 = smov 0   ;;  %s22480_s0 = inlined_call_operand.vmem [shape: f32[2,22,18,4], index: 0, kind: input, shape index: {}]   ;;  %s22481_s1 = inlined_call_operand.vmem [shape: f32[9,4,128], index: 1, kind: input, shape index: {}]   ;;  %s22482_s2 = inlined_call_operand.vmem [shape: f32[1,128], index: 2, kind: input, shape index: {}]   ;;  %s22483_s3 = inlined_call_operand.vmem [shape: f32[9,128,128], index: 3, kind: input, shape index: {}]   ;;  %s22484_s4 = inlined_call_operand.vmem [shape: f32[1,128], index: 4, kind: input, shape index: {}]   ;;  %s22485_s5 = inlined_call_operand.vmem [shape: f32[2,3,128], index: 5, kind: input, shape index: {}]   ;;  %s22486_s6 = inlined_call_operand.vmem [shape: f32[2,3,128], index: 6, kind: input, shape index: {}]   ;;  %s22487_s7 = inlined_call_operand.vmem [shape: f32[9,128,1], index: 7, kind: input, shape index: {}]   ;;  %s22488_s8 = inlined_call_operand.<no memory space> [shape: f32[1,1], index: 8, kind: input, shape index: {}]   ;;  %s22489_s9 = inlined_call_operand.vmem [shape: f32[2,256,4], index: 9, kind: output, shape index: {}]  }
   0x1   :  { %v14_v0 = vstv %s22488_s8  ;;  %s16980_s13 = smov 0  }
   0x2   :  { %15 = vst [vmem:[#allocation4] sm:$0x1] %v14_v0 }
   0x3 LB: > { %s33_s8 = sadd.s32 1, %s16915_s12  ;;  %p12256_p0 = scmp.ge.s32.totalorder %s16919_s13, 1  ;;  %s16919_s13 = sphi %s16980_s13, %s21_s13   ;;  %s16915_s12 = sphi %s16978_s12, %s23047_s12   ;;  %s16911_s11 = sphi %s16976_s11, %s23046_s11  }
   0x4   : > { %p35_p1 = scmp.ge.s32.totalorder %s33_s8, 2  ;;  %p321_p2 = scmp.lt.s32.totalorder %s16919_s13, 3 }
   0x6   : > { %s23049_s8 = smov (%p35_p1, %s33_s8), 0  ;;  %p322_p3 = pnand %p12256_p0, %p321_p2 }
   0x8   : > { %325 = sbr.rel (%p322_p3) target bundleno = 2472 (0x9a8), region = 56 }
   0xd   : > { %v12262_v1 = vld [vmem:[%s22481_s1 + $0x4] sm:$0xf]  ;;  %vm599_vm0 = vcmask 1043456   ;;  %p369_p4 = scmp.lt.s32.totalorder %s16911_s11, 1  ;;  %v435_v2 = vld [vmem:[%s22481_s1] sm:$0xf] }
   0xe   : > { %14553 = vmatprep.subr.msk.mxu0 %vm599_vm0, %v12262_v1  ;;  %16717 = vmatprep.subr.msk.mxu1 %vm599_vm0, %v435_v2  ;;  %v12427_v3 = vld [vmem:[%s22481_s1 + $0xc] sm:$0xf]  ;;  %vm478_vm1 = vcmask 31744   ;;  %v17026_v7 = vld [vmem:[%s22481_s1 + $0x8] sm:$0xf]  ;;  %vm8140_vm2 = vcmask 23552  }
   0xf   : > { %14554 = vmatpush3.msk.msra.mxu0 %vm599_vm0, %v12262_v1  ;;  %s23051_s11 = smov (!%p369_p4, %s16911_s11), 1  ;;  %16718 = vmatpush3.msk.msra.mxu1 %vm599_vm0, %v435_v2  ;;  %v12591_v0 = vld [vmem:[%s22481_s1 + $0x14] sm:$0xf]  ;;  %vm8646_vm3 = vcmask 1042432  }
  0x10   : > { %14615 = vmatprep.subr.msk.mxu0 %vm599_vm0, %v435_v2  ;;  %s16719_s20 = smul.u32 528, %s23051_s11  ;;  %14739 = vmatprep.subr.msk.mxu1 %vm599_vm0, %v12427_v3  ;;  %s12258_s19 = sshll.u32 %s23051_s11, 2 }
  0x11   : > { %s377_s22 = scalar_lea.vmem %s22485_s5, %s12258_s19  ;;  %s381_s28 = scalar_lea.vmem %s22486_s6, %s12258_s19 }
  0x12   : > { %s17015_s23 = scalar_lea.vmem %s22480_s0, %s16719_s20 }
  0x13   : > { %v436_v4 = vld [vmem:[%s17015_s23 + $0x1] sm:$0xff]  ;;  %v437_v5 = vld [vmem:[%s17015_s23 + $0x9] sm:$0xff]  ;;  %v17020_v6 = vld [vmem:[%s17015_s23 + $0x19] sm:$0xff] }
  0x14   : > { %14555 = vmatprep.mubr.msk.f32.mxu0 %vm478_vm1, %v436_v4  ;;  %v17033_v8 = vld [vmem:[%s17015_s23 + $0x21] sm:$0xff]  ;;  %v17036_v9 = vld [vmem:[%s17015_s23 + $0x31] sm:$0xff]  ;;  %v17056_v13 = vld [vmem:[%s17015_s23 + $0x39] sm:$0xff] }
  0x15   : > { %14556 = vmatmul.mubr.msk.f32.vlgmr.msra.gmra.mxu0 %vm478_vm1, %v437_v5  ;;  %v17041_v10 = vld [vmem:[%s17015_s23 + $0xa8] sm:$0xff]  ;;  %v17044_v11 = vld [vmem:[%s17015_s23 + $0xb0] sm:$0xff]  ;;  %v17051_v12 = vld [vmem:[%s17015_s23 + $0xc0] sm:$0xff] }
  0x16   : > { %14616 = vmatpush3.msk.msra.mxu0 %vm599_vm0, %v435_v2  ;;  %14558 = vmatprep.mubr.msk.f32.mxu0 %vm478_vm1, %v17020_v6  ;;  %v17061_v14 = vld [vmem:[%s17015_s23 + $0x49] sm:$0xff]  ;;  %v17070_v16 = vld [vmem:[%s17015_s23 + $0xd8] sm:$0xff]  ;;  %v17082_v18 = vld [vmem:[%s17015_s23 + $0x61] sm:$0xff] }
  0x17   : > { %14677 = vmatprep.subr.msk.mxu0 %vm599_vm0, %v17026_v7  ;;  %14638 = vmatprep.mubr.msk.f32.mxu1 %vm478_vm1, %v17041_v10  ;;  %v17066_v15 = vld [vmem:[%s17015_s23 + $0xc8] sm:$0xff]  ;;  %v17077_v17 = vld [vmem:[%s17015_s23 + $0x51] sm:$0xff]  ;;  %v17087_v19 = vld [vmem:[%s17015_s23 + $0xe0] sm:$0xff] }
  0x18   : > { %14639 = vmatmul.mubr.msk.f32.vlgmr.msra.gmra.mxu1 %vm478_vm1, %v17044_v11  ;;  %v17090_v20 = vld [vmem:[%s17015_s23 + $0xf0] sm:$0xff]  ;;  %v17102_v22 = vld [vmem:[%s17015_s23 + $0x79] sm:$0xff]  ;;  %v17110_v24 = vld [vmem:[%s17015_s23 + $0x108] sm:$0xff] }
  0x19   : > { %14559 = vmatmul.mubr.msk.f32.gmra.mxu0 %vm478_vm1, %v17033_v8  ;;  %14641 = vmatprep.mubr.msk.f32.mxu1 %vm478_vm1, %v17051_v12  ;;  %v17097_v21 = vld [vmem:[%s17015_s23 + $0x69] sm:$0xff]  ;;  %v17107_v23 = vld [vmem:[%s17015_s23 + $0xf8] sm:$0xff]  ;;  %v17117_v25 = vld [vmem:[%s17015_s23 + $0x81] sm:$0xff] }
  0x1a   : > { %14561 = vmatprep.mubr.msk.f32.mxu0 %vm478_vm1, %v17036_v9  ;;  %14740 = vmatpush3.msk.msra.mxu1 %vm599_vm0, %v12427_v3  ;;  %v17122_v26 = vld [vmem:[%s17015_s23 + $0x91] sm:$0xff]  ;;  %v17130_v28 = vld [vmem:[%s17015_s23 + $0x120] sm:$0xff]  ;;  %v17142_v30 = vld [vmem:[%s17015_s23 + $0xa9] sm:$0xff] }
  0x1b   : > { %v17127_v27 = vld [vmem:[%s17015_s23 + $0x110] sm:$0xff]  ;;  %v17137_v29 = vld [vmem:[%s17015_s23 + $0x99] sm:$0xff]  ;;  %v17147_v31 = vld [vmem:[%s17015_s23 + $0x128] sm:$0xff]  ;;  %14863 = vmatprep.subr.msk.mxu1 %vm599_vm0, %v12591_v0 }
  0x1c   : > { %14642 = vmatmul.mubr.msk.f32.gmra.mxu1 %vm478_vm1, %v17066_v15  ;;  %v17150_v32 = vld [vmem:[%s17015_s23 + $0x138] sm:$0xff]  ;;  %v17162_v34 = vld [vmem:[%s17015_s23 + $0xc1] sm:$0xff]  ;;  %v17170_v36 = vld [vmem:[%s17015_s23 + $0x150] sm:$0xff] }
  0x1d   : > { %14562 = vmatmul.mubr.msk.f32.gmra.mxu0 %vm478_vm1, %v17056_v13  ;;  %14644 = vmatprep.mubr.msk.f32.mxu1 %vm478_vm1, %v17070_v16  ;;  %v17157_v33 = vld [vmem:[%s17015_s23 + $0xb1] sm:$0xff]  ;;  %v17167_v35 = vld [vmem:[%s17015_s23 + $0x140] sm:$0xff]  ;;  %v17177_v37 = vld [vmem:[%s17015_s23 + $0xc9] sm:$0xff] }
  0x1e   : > { %14564 = vmatprep.mubr.msk.f32.mxu0 %vm478_vm1, %v17061_v14  ;;  %v17182_v38 = vld [vmem:[%s17015_s23 + $0xd9] sm:$0xff]  ;;  %v17190_v40 = vld [vmem:[%s17015_s23 + $0x168] sm:$0xff]  ;;  %v17202_v42 = vld [vmem:[%s17015_s23 + $0xf1] sm:$0xff] }
  0x1f   : > { %v17187_v39 = vld [vmem:[%s17015_s23 + $0x158] sm:$0xff]  ;;  %v17197_v41 = vld [vmem:[%s17015_s23 + $0xe1] sm:$0xff]  ;;  %v17207_v43 = vld [vmem:[%s17015_s23 + $0x170] sm:$0xff] }
  0x20   : > { %14645 = vmatmul.mubr.msk.f32.gmra.mxu1 %vm478_vm1, %v17087_v19  ;;  %v17210_v44 = vld [vmem:[%s17015_s23 + $0x180] sm:$0xff]  ;;  %v17222_v46 = vld [vmem:[%s17015_s23 + $0x109] sm:$0xff]  ;;  %v17230_v48 = vld [vmem:[%s17015_s23 + $0x198] sm:$0xff] }
  0x21   : > { %14565 = vmatmul.mubr.msk.f32.gmra.mxu0 %vm478_vm1, %v17077_v17  ;;  %14647 = vmatprep.mubr.msk.f32.mxu1 %vm478_vm1, %v17090_v20  ;;  %v17217_v45 = vld [vmem:[%s17015_s23 + $0xf9] sm:$0xff]  ;;  %v17227_v47 = vld [vmem:[%s17015_s23 + $0x188] sm:$0xff]  ;;  %v17237_v49 = vld [vmem:[%s17015_s23 + $0x111] sm:$0xff] }
  0x22   : > { %14567 = vmatprep.mubr.msk.f32.mxu0 %vm478_vm1, %v17082_v18  ;;  %22526 = vst [vmem:[#allocation5_spill] sm:$0xff] %v17237_v49  ;;  %v17242_v50 = vld [vmem:[%s17015_s23 + $0x121] sm:$0xff]  ;;  %v17250_v52 = vld [vmem:[%s17015_s23 + $0x1b0] sm:$0xff]  ;;  %v17262_v54 = vld [vmem:[%s17015_s23 + $0x139] sm:$0xff] }
  0x23   : > { %22527 = vst [vmem:[#allocation6_spill] sm:$0xff] %v17242_v50  ;;  %v17247_v51 = vld [vmem:[%s17015_s23 + $0x1a0] sm:$0xff]  ;;  %v17257_v53 = vld [vmem:[%s17015_s23 + $0x129] sm:$0xff]  ;;  %22529 = vst [vmem:[#allocation8_spill] sm:$0xff] %v17262_v54 }
  0x24   : > { %14648 = vmatmul.mubr.msk.f32.gmra.mxu1 %vm478_vm1, %v17107_v23  ;;  %22528 = vst [vmem:[#allocation7_spill] sm:$0xff] %v17257_v53  ;;  %v17267_v55 = vld [vmem:[%s17015_s23 + $0x1b8] sm:$0xff]  ;;  %v17270_v56 = vld [vmem:[%s17015_s23 + $0x1c8] sm:$0xff]  ;;  %v17287_v59 = vld [vmem:[%s17015_s23 + $0x1d0] sm:$0xff] }
  0x25   : > { %14568 = vmatmul.mubr.msk.f32.gmra.mxu0 %vm478_vm1, %v17097_v21  ;;  %14650 = vmatprep.mubr.msk.f32.mxu1 %vm478_vm1, %v17110_v24  ;;  %v17277_v57 = vld [vmem:[%s17015_s23 + $0x141] sm:$0xff]  ;;  %v17282_v58 = vld [vmem:[%s17015_s23 + $0x151] sm:$0xff]  ;;  %v17294_v60 = vld [vmem:[%s17015_s23 + $0x159] sm:$0xff] }
  0x26   : > { %14570 = vmatprep.mubr.msk.f32.mxu0 %vm478_vm1, %v17102_v22  ;;  %22530 = vst [vmem:[#allocation9_spill] sm:$0xff] %v17277_v57  ;;  %22531 = vst [vmem:[#allocation10_spill] sm:$0xff] %v17282_v58  ;;  %v397_v61 = vld [vmem:[%s17015_s23 + $0x18] sm:$0xff]  ;;  %v17300_v62 = vld [vmem:[%s17015_s23 + $0x169] sm:$0xff] }
  0x27   : > { %22532 = vst [vmem:[#allocation11_spill] sm:$0xff] %v17294_v60  ;;  %22533 = vst [vmem:[#allocation12_spill] sm:$0xff] %v17300_v62  ;;  %v398_v63 = vld [vmem:[%s17015_s23 + $0x20] sm:$0xff]  ;;  %v17312_v1 = vld [vmem:[%s17015_s23 + $0x171] sm:$0xff] }
  0x28   : > { %14651 = vmatmul.mubr.msk.f32.gmra.mxu1 %vm478_vm1, %v17127_v27  ;;  %22534 = vst [vmem:[#allocation13_spill] sm:$0xff] %v17312_v1  ;;  %v17315_v2 = vld [vmem:[%s17015_s23 + $0x30] sm:$0xff]  ;;  %v17319_v3 = vld [vmem:[%s17015_s23 + $0x181] sm:$0xff]  ;;  %v17328_v4 = vld [vmem:[%s17015_s23 + $0x38] sm:$0xff] }
  0x29   : > { %14571 = vmatmul.mubr.msk.f32.gmra.mxu0 %vm478_vm1, %v17117_v25  ;;  %14653 = vmatprep.mubr.msk.f32.mxu1 %vm478_vm1, %v17130_v28  ;;  %22535 = vst [vmem:[#allocation14_spill] sm:$0xff] %v17319_v3  ;;  %v17333_v5 = vld [vmem:[%s17015_s23 + $0x189] sm:$0xff] }
  0x2a   : > { %14573 = vmatprep.mubr.msk.f32.mxu0 %vm478_vm1, %v17122_v26  ;;  %22536 = vst [vmem:[#allocation15_spill] sm:$0xff] %v17333_v5 }
  0x2c   : > { %14654 = vmatmul.mubr.msk.f32.gmra.mxu1 %vm478_vm1, %v17147_v31 }
  0x2d   : > { %14574 = vmatmul.mubr.msk.f32.gmra.mxu0 %vm478_vm1, %v17137_v29  ;;  %14656 = vmatprep.mubr.msk.f32.mxu1 %vm478_vm1, %v17150_v32 }
  0x2e   : > { %14576 = vmatprep.mubr.msk.f32.mxu0 %vm478_vm1, %v17142_v30 }
  0x30   : > { %14657 = vmatmul.mubr.msk.f32.gmra.mxu1 %vm478_vm1, %v17167_v35 }
  0x31   : > { %14577 = vmatmul.mubr.msk.f32.gmra.mxu0 %vm478_vm1, %v17157_v33  ;;  %14659 = vmatprep.mubr.msk.f32.mxu1 %vm478_vm1, %v17170_v36 }
  0x32   : > { %14579 = vmatprep.mubr.msk.f32.mxu0 %vm478_vm1, %v17162_v34 }
  0x34   : > { %14660 = vmatmul.mubr.msk.f32.gmra.mxu1 %vm478_vm1, %v17187_v39 }
  0x35   : > { %14580 = vmatmul.mubr.msk.f32.gmra.mxu0 %vm478_vm1, %v17177_v37  ;;  %14662 = vmatprep.mubr.msk.f32.mxu1 %vm478_vm1, %v17190_v40 }
  0x36   : > { %14582 = vmatprep.mubr.msk.f32.mxu0 %vm478_vm1, %v17182_v38 }
  0x38   : > { %14663 = vmatmul.mubr.msk.f32.gmra.mxu1 %vm478_vm1, %v17207_v43 }
  0x39   : > { %14583 = vmatmul.mubr.msk.f32.gmra.mxu0 %vm478_vm1, %v17197_v41  ;;  %14665 = vmatprep.mubr.msk.f32.mxu1 %vm478_vm1, %v17210_v44 }
  0x3a   : > { %14585 = vmatprep.mubr.msk.f32.mxu0 %vm478_vm1, %v17202_v42 }
  0x3c   : > { %14666 = vmatmul.mubr.msk.f32.gmra.mxu1 %vm478_vm1, %v17227_v47 }
  0x3d   : > { %14586 = vmatmul.mubr.msk.f32.gmra.mxu0 %vm478_vm1, %v17217_v45  ;;  %14668 = vmatprep.mubr.msk.f32.mxu1 %vm478_vm1, %v17230_v48 }
  0x3e   : > { %14588 = vmatprep.mubr.msk.f32.mxu0 %vm478_vm1, %v17222_v46 }
  0x40   : > { %14669 = vmatmul.mubr.msk.f32.gmra.mxu1 %vm478_vm1, %v17247_v51 }
  0x41   : > { %14589 = vmatmul.mubr.msk.f32.gmra.mxu0 %vm478_vm1, %v17237_v49  ;;  %14671 = vmatprep.mubr.msk.f32.mxu1 %vm478_vm1, %v17250_v52  ;;  %v396_v49 = vld [vmem:[%s17015_s23 + $0x8] sm:$0xff] }
  0x42   : > { %14591 = vmatprep.mubr.msk.f32.mxu0 %vm478_vm1, %v17242_v50  ;;  %v395_v50 = vld [vmem:[%s17015_s23] sm:$0xff] }
  0x44   : > { %14672 = vmatmul.mubr.msk.f32.gmra.mxu1 %vm478_vm1, %v17267_v55 }
  0x45   : > { %14592 = vmatmul.mubr.msk.f32.gmra.mxu0 %vm478_vm1, %v17257_v53  ;;  %14674 = vmatprep.mubr.msk.f32.mxu1 %vm478_vm1, %v17270_v56  ;;  %v17396_v53 = vld [vmem:[%s17015_s23 + $0x90] sm:$0xff] }
  0x46   : > { %14594 = vmatprep.mubr.msk.f32.mxu0 %vm478_vm1, %v17262_v54  ;;  %v17381_v54 = vld [vmem:[%s17015_s23 + $0x1c9] sm:$0xff] }
  0x47   : > { %22541 = vst [vmem:[#allocation20_spill] sm:$0xff] %v17381_v54 }
  0x48   : > { %14675 = vmatmul.mubr.msk.f32.gmra.mxu1 %vm478_vm1, %v17287_v59 }
  0x49   : > { %14595 = vmatmul.mubr.msk.f32.gmra.mxu0 %vm478_vm1, %v17277_v57  ;;  %14741 = vmatprep.mubr.msk.f32.mxu1 %vm478_vm1, %v397_v61  ;;  %v17376_v57 = vld [vmem:[%s17015_s23 + $0x78] sm:$0xff] }
  0x4a   : > { %14597 = vmatprep.mubr.msk.f32.mxu0 %vm478_vm1, %v17282_v58  ;;  %v17361_v58 = vld [vmem:[%s17015_s23 + $0x1b1] sm:$0xff] }
  0x4b   : > { %22539 = vst [vmem:[#allocation18_spill] sm:$0xff] %v17361_v58 }
  0x4c   : > { %14742 = vmatmul.mubr.msk.f32.vlgmr.msra.gmra.mxu1 %vm478_vm1, %v398_v63 }
  0x4d   : > { %14598 = vmatmul.mubr.msk.f32.gmra.mxu0 %vm478_vm1, %v17294_v60  ;;  %14744 = vmatprep.mubr.msk.f32.mxu1 %vm478_vm1, %v17315_v2  ;;  %v17341_v60 = vld [vmem:[%s17015_s23 + $0x199] sm:$0xff] }
  0x4e   : > { %14600 = vmatprep.mubr.msk.f32.mxu0 %vm478_vm1, %v17300_v62  ;;  %14864 = vmatpush3.msk.msra.mxu1 %vm599_vm0, %v12591_v0  ;;  %v17336_v62 = vld [vmem:[%s17015_s23 + $0x48] sm:$0xff]  ;;  %22537 = vst [vmem:[#allocation16_spill] sm:$0xff] %v17341_v60  ;;  %v17348_v0 = vld [vmem:[%s17015_s23 + $0x50] sm:$0xff] }
  0x50   : > { %14745 = vmatmul.mubr.msk.f32.gmra.mxu1 %vm478_vm1, %v17328_v4 }
  0x51   : > { %14601 = vmatmul.mubr.msk.f32.gmra.mxu0 %vm478_vm1, %v17312_v1  ;;  %14747 = vmatprep.mubr.msk.f32.mxu1 %vm478_vm1, %v17336_v62  ;;  %v17356_v1 = vld [vmem:[%s17015_s23 + $0x60] sm:$0xff] }
  0x52   : > { %14603 = vmatprep.mubr.msk.f32.mxu0 %vm478_vm1, %v17319_v3  ;;  %v17353_v3 = vld [vmem:[%s17015_s23 + $0x1a1] sm:$0xff] }
  0x53   : > { %22538 = vst [vmem:[#allocation17_spill] sm:$0xff] %v17353_v3 }
  0x54   : > { %14748 = vmatmul.mubr.msk.f32.gmra.mxu1 %vm478_vm1, %v17348_v0 }
  0x55   : > { %14604 = vmatmul.mubr.msk.f32.gmra.mxu0 %vm478_vm1, %v17333_v5  ;;  %14750 = vmatprep.mubr.msk.f32.mxu1 %vm478_vm1, %v17356_v1  ;;  %v17368_v5 = vld [vmem:[%s17015_s23 + $0x68] sm:$0xff] }
  0x56   : > { %14606 = vmatprep.mubr.msk.f32.mxu0 %vm478_vm1, %v17341_v60  ;;  %v17373_v60 = vld [vmem:[%s17015_s23 + $0x1b9] sm:$0xff] }
  0x57   : > { %22540 = vst [vmem:[#allocation19_spill] sm:$0xff] %v17373_v60 }
  0x58   : > { %14751 = vmatmul.mubr.msk.f32.gmra.mxu1 %vm478_vm1, %v17368_v5 }
  0x59   : > { %14607 = vmatmul.mubr.msk.f32.gmra.mxu0 %vm478_vm1, %v17353_v3  ;;  %14753 = vmatprep.mubr.msk.f32.mxu1 %vm478_vm1, %v17376_v57  ;;  %v17388_v3 = vld [vmem:[%s17015_s23 + $0x80] sm:$0xff] }
  0x5a   : > { %14609 = vmatprep.mubr.msk.f32.mxu0 %vm478_vm1, %v17361_v58  ;;  %v17393_v58 = vld [vmem:[%s17015_s23 + $0x1d1] sm:$0xff] }
  0x5c   : > { %14754 = vmatmul.mubr.msk.f32.gmra.mxu1 %vm478_vm1, %v17388_v3 }
  0x5d   : > { %14610 = vmatmul.mubr.msk.f32.gmra.mxu0 %vm478_vm1, %v17373_v60  ;;  %14756 = vmatprep.mubr.msk.f32.mxu1 %vm478_vm1, %v17396_v53  ;;  %v17406_v60 = vld [vmem:[%s17015_s23 + $0x98] sm:$0xff] }
  0x5e   : > { %14612 = vmatprep.mubr.msk.f32.mxu0 %vm478_vm1, %v17381_v54  ;;  %v12509_v54 = vld [vmem:[%s22481_s1 + $0x10] sm:$0xf] }
  0x60   : > { %14757 = vmatmul.mubr.msk.f32.gmra.mxu1 %vm478_vm1, %v17406_v60 }
  0x61   : > { %14613 = vmatmul.mubr.msk.f32.gmra.mxu0 %vm478_vm1, %v17393_v58  ;;  %14759 = vmatprep.mubr.msk.f32.mxu1 %vm478_vm1, %v17041_v10  ;;  %v1257_v10 = vld [vmem:[%s17015_s23 + $0xa] sm:$0xff] }
  0x62   : > { %14617 = vmatprep.mubr.msk.f32.mxu0 %vm478_vm1, %v395_v50  ;;  %v1275_v50 = vld [vmem:[%s17015_s23 + $0xe2] sm:$0xff] }
  0x64   : > { %14760 = vmatmul.mubr.msk.f32.gmra.mxu1 %vm478_vm1, %v17044_v11  ;;  %v1258_v11 = vld [vmem:[%s17015_s23 + $0x1a] sm:$0xff] }
  0x65   : > { %14618 = vmatmul.mubr.msk.f32.vlgmr.msra.gmra.mxu0 %vm478_vm1, %v396_v49  ;;  %14762 = vmatprep.mubr.msk.f32.mxu1 %vm478_vm1, %v17051_v12  ;;  %v17478_v12 = vld [vmem:[%s22481_s1 + $0x18] sm:$0xf] }
  0x66   : > { %14678 = vmatpush3.msk.msra.mxu0 %vm599_vm0, %v17026_v7  ;;  %14620 = vmatprep.mubr.msk.f32.mxu0 %vm478_vm1, %v397_v61  ;;  %v1256_v7 = vld [vmem:[%s17015_s23 + $0x2] sm:$0xff]  ;;  %v1274_v49 = vld [vmem:[%s17015_s23 + $0xda] sm:$0xff] }
  0x67   : > { %14801 = vmatprep.subr.msk.mxu0 %vm599_vm0, %v12509_v54  ;;  %v1282_v61 = vld [vmem:[%s17015_s23 + $0x13a] sm:$0xff] }
  0x68   : > { %14763 = vmatmul.mubr.msk.f32.gmra.mxu1 %vm478_vm1, %v17066_v15  ;;  %v1259_v15 = vld [vmem:[%s17015_s23 + $0x22] sm:$0xff] }
  0x69   : > { %14621 = vmatmul.mubr.msk.f32.gmra.mxu0 %vm478_vm1, %v398_v63  ;;  %14765 = vmatprep.mubr.msk.f32.mxu1 %vm478_vm1, %v17070_v16  ;;  %v1260_v16 = vld [vmem:[%s17015_s23 + $0x32] sm:$0xff]  ;;  %v1283_v63 = vld [vmem:[%s17015_s23 + $0x142] sm:$0xff] }
  0x6a   : > { %14623 = vmatprep.mubr.msk.f32.mxu0 %vm478_vm1, %v17315_v2 }
  0x6c   : > { %14766 = vmatmul.mubr.msk.f32.gmra.mxu1 %vm478_vm1, %v17087_v19  ;;  %v1261_v19 = vld [vmem:[%s17015_s23 + $0x3a] sm:$0xff] }
  0x6d   : > { %14624 = vmatmul.mubr.msk.f32.gmra.mxu0 %vm478_vm1, %v17328_v4  ;;  %14768 = vmatprep.mubr.msk.f32.mxu1 %vm478_vm1, %v17090_v20  ;;  %v1262_v20 = vld [vmem:[%s17015_s23 + $0x4a] sm:$0xff] }
  0x6e   : > { %14626 = vmatprep.mubr.msk.f32.mxu0 %vm478_vm1, %v17336_v62 }
  0x70   : > { %14769 = vmatmul.mubr.msk.f32.gmra.mxu1 %vm478_vm1, %v17107_v23  ;;  %v1263_v23 = vld [vmem:[%s17015_s23 + $0x52] sm:$0xff] }
  0x71   : > { %14627 = vmatmul.mubr.msk.f32.gmra.mxu0 %vm478_vm1, %v17348_v0  ;;  %14771 = vmatprep.mubr.msk.f32.mxu1 %vm478_vm1, %v17110_v24  ;;  %v1264_v24 = vld [vmem:[%s17015_s23 + $0x62] sm:$0xff] }
  0x72   : > { %14629 = vmatprep.mubr.msk.f32.mxu0 %vm478_vm1, %v17356_v1 }
  0x74   : > { %14772 = vmatmul.mubr.msk.f32.gmra.mxu1 %vm478_vm1, %v17127_v27  ;;  %v1265_v27 = vld [vmem:[%s17015_s23 + $0x6a] sm:$0xff] }
  0x75   : > { %14630 = vmatmul.mubr.msk.f32.gmra.mxu0 %vm478_vm1, %v17368_v5  ;;  %14774 = vmatprep.mubr.msk.f32.mxu1 %vm478_vm1, %v17130_v28  ;;  %v1266_v28 = vld [vmem:[%s17015_s23 + $0x7a] sm:$0xff] }
  0x76   : > { %14632 = vmatprep.mubr.msk.f32.mxu0 %vm478_vm1, %v17376_v57 }
  0x78   : > { %14775 = vmatmul.mubr.msk.f32.gmra.mxu1 %vm478_vm1, %v17147_v31  ;;  %v1267_v31 = vld [vmem:[%s17015_s23 + $0x82] sm:$0xff] }
  0x79   : > { %14633 = vmatmul.mubr.msk.f32.gmra.mxu0 %vm478_vm1, %v17388_v3  ;;  %14777 = vmatprep.mubr.msk.f32.mxu1 %vm478_vm1, %v17150_v32  ;;  %v1268_v32 = vld [vmem:[%s17015_s23 + $0x92] sm:$0xff] }
  0x7a   : > { %14635 = vmatprep.mubr.msk.f32.mxu0 %vm478_vm1, %v17396_v53 }
  0x7c   : > { %14778 = vmatmul.mubr.msk.f32.gmra.mxu1 %vm478_vm1, %v17167_v35  ;;  %v17525_v35 = vld [vmem:[%s17015_s23 + $0x1e0] sm:$0xff] }
  0x7d   : > { %14636 = vmatmul.mubr.msk.f32.gmra.mxu0 %vm478_vm1, %v17406_v60  ;;  %14780 = vmatprep.mubr.msk.f32.mxu1 %vm478_vm1, %v17170_v36  ;;  %v1269_v36 = vld [vmem:[%s17015_s23 + $0x9a] sm:$0xff] }
  0x7e   : > { %14679 = vmatprep.mubr.msk.f32.mxu0 %vm478_vm1, %v1256_v7  ;;  %v1284_v7 = vld [vmem:[%s17015_s23 + $0x152] sm:$0xff] }
  0x80   : > { %14781 = vmatmul.mubr.msk.f32.gmra.mxu1 %vm478_vm1, %v17187_v39  ;;  %v1270_v39 = vld [vmem:[%s17015_s23 + $0xaa] sm:$0xff] }
  0x81   : > { %14680 = vmatmul.mubr.msk.f32.vlgmr.msra.gmra.mxu0 %vm478_vm1, %v1257_v10  ;;  %14783 = vmatprep.mubr.msk.f32.mxu1 %vm478_vm1, %v17190_v40  ;;  %v17535_v40 = vld [vmem:[%s17015_s23 + $0x1e8] sm:$0xff]  ;;  %v1285_v10 = vld [vmem:[%s17015_s23 + $0x15a] sm:$0xff] }
  0x82   : > { %14802 = vmatpush3.msk.msra.mxu0 %vm599_vm0, %v12509_v54  ;;  %14682 = vmatprep.mubr.msk.f32.mxu0 %vm478_vm1, %v1258_v11  ;;  %v1278_v54 = vld [vmem:[%s17015_s23 + $0x10a] sm:$0xff] }
  0x83   : > { %14925 = vmatprep.subr.msk.mxu0 %vm599_vm0, %v17478_v12 }
  0x84   : > { %14784 = vmatmul.mubr.msk.f32.gmra.mxu1 %vm478_vm1, %v17207_v43  ;;  %v1271_v43 = vld [vmem:[%s17015_s23 + $0xb2] sm:$0xff] }
  0x85   : > { %14683 = vmatmul.mubr.msk.f32.gmra.mxu0 %vm478_vm1, %v1259_v15  ;;  %14786 = vmatprep.mubr.msk.f32.mxu1 %vm478_vm1, %v17210_v44  ;;  %v1272_v44 = vld [vmem:[%s17015_s23 + $0xc2] sm:$0xff] }
  0x86   : > { %14685 = vmatprep.mubr.msk.f32.mxu0 %vm478_vm1, %v1260_v16 }
  0x88   : > { %14787 = vmatmul.mubr.msk.f32.gmra.mxu1 %vm478_vm1, %v17227_v47  ;;  %v12755_v47 = vld [vmem:[%s22481_s1 + $0x1c] sm:$0xf] }
  0x89   : > { %14686 = vmatmul.mubr.msk.f32.gmra.mxu0 %vm478_vm1, %v1261_v19  ;;  %14789 = vmatprep.mubr.msk.f32.mxu1 %vm478_vm1, %v17230_v48  ;;  %v1273_v48 = vld [vmem:[%s17015_s23 + $0xca] sm:$0xff] }
  0x8a   : > { %14688 = vmatprep.mubr.msk.f32.mxu0 %vm478_vm1, %v1262_v20  ;;  %14987 = vmatprep.subr.msk.mxu1 %vm599_vm0, %v12755_v47 }
  0x8c   : > { %14790 = vmatmul.mubr.msk.f32.gmra.mxu1 %vm478_vm1, %v17247_v51  ;;  %v1276_v51 = vld [vmem:[%s17015_s23 + $0xf2] sm:$0xff] }
  0x8d   : > { %14689 = vmatmul.mubr.msk.f32.gmra.mxu0 %vm478_vm1, %v1263_v23  ;;  %14792 = vmatprep.mubr.msk.f32.mxu1 %vm478_vm1, %v17250_v52  ;;  %v1277_v52 = vld [vmem:[%s17015_s23 + $0xfa] sm:$0xff] }
  0x8e   : > { %14691 = vmatprep.mubr.msk.f32.mxu0 %vm478_vm1, %v1264_v24 }
  0x90   : > { %14793 = vmatmul.mubr.msk.f32.gmra.mxu1 %vm478_vm1, %v17267_v55  ;;  %v1279_v55 = vld [vmem:[%s17015_s23 + $0x112] sm:$0xff] }
  0x91   : > { %14692 = vmatmul.mubr.msk.f32.gmra.mxu0 %vm478_vm1, %v1265_v27  ;;  %14795 = vmatprep.mubr.msk.f32.mxu1 %vm478_vm1, %v17270_v56  ;;  %v1280_v56 = vld [vmem:[%s17015_s23 + $0x122] sm:$0xff] }
  0x92   : > { %14694 = vmatprep.mubr.msk.f32.mxu0 %vm478_vm1, %v1266_v28 }
  0x94   : > { %14796 = vmatmul.mubr.msk.f32.gmra.mxu1 %vm478_vm1, %v17287_v59  ;;  %v1281_v59 = vld [vmem:[%s17015_s23 + $0x12a] sm:$0xff] }
  0x95   : > { %14695 = vmatmul.mubr.msk.f32.gmra.mxu0 %vm478_vm1, %v1267_v31  ;;  %14798 = vmatprep.mubr.msk.f32.mxu1 %vm478_vm1, %v17525_v35 }
  0x96   : > { %14697 = vmatprep.mubr.msk.f32.mxu0 %vm478_vm1, %v1268_v32 }
  0x98   : > { %14799 = vmatmul.mubr.msk.f32.gmra.mxu1 %vm478_vm1, %v17535_v40 }
  0x99   : > { %14698 = vmatmul.mubr.msk.f32.gmra.mxu0 %vm478_vm1, %v1269_v36  ;;  %14865 = vmatprep.mubr.msk.f32.mxu1 %vm478_vm1, %v1258_v11  ;;  %v1286_v11 = vld [vmem:[%s17015_s23 + $0x16a] sm:$0xff] }
  0x9a   : > { %14700 = vmatprep.mubr.msk.f32.mxu0 %vm478_vm1, %v1270_v39 }
  0x9c   : > { %14866 = vmatmul.mubr.msk.f32.vlgmr.msra.gmra.mxu1 %vm478_vm1, %v1259_v15  ;;  %v1287_v15 = vld [vmem:[%s17015_s23 + $0x172] sm:$0xff] }
  0x9d   : > { %14701 = vmatmul.mubr.msk.f32.gmra.mxu0 %vm478_vm1, %v1271_v43  ;;  %14868 = vmatprep.mubr.msk.f32.mxu1 %vm478_vm1, %v1260_v16  ;;  %v1288_v16 = vld [vmem:[%s17015_s23 + $0x182] sm:$0xff] }
  0x9e   : > { %14703 = vmatprep.mubr.msk.f32.mxu0 %vm478_vm1, %v1272_v44  ;;  %14988 = vmatpush3.msk.msra.mxu1 %vm599_vm0, %v12755_v47 }
  0xa0   : > { %14869 = vmatmul.mubr.msk.f32.gmra.mxu1 %vm478_vm1, %v1261_v19  ;;  %v1289_v19 = vld [vmem:[%s17015_s23 + $0x18a] sm:$0xff] }
  0xa1   : > { %14704 = vmatmul.mubr.msk.f32.gmra.mxu0 %vm478_vm1, %v1273_v48  ;;  %14871 = vmatprep.mubr.msk.f32.mxu1 %vm478_vm1, %v1262_v20  ;;  %v1290_v20 = vld [vmem:[%s17015_s23 + $0x19a] sm:$0xff] }
  0xa2   : > { %14706 = vmatprep.mubr.msk.f32.mxu0 %vm478_vm1, %v1274_v49 }
  0xa4   : > { %14872 = vmatmul.mubr.msk.f32.gmra.mxu1 %vm478_vm1, %v1263_v23  ;;  %v1291_v23 = vld [vmem:[%s17015_s23 + $0x1a2] sm:$0xff] }
  0xa5   : > { %14707 = vmatmul.mubr.msk.f32.gmra.mxu0 %vm478_vm1, %v1275_v50  ;;  %14874 = vmatprep.mubr.msk.f32.mxu1 %vm478_vm1, %v1264_v24  ;;  %v1292_v24 = vld [vmem:[%s17015_s23 + $0x1b2] sm:$0xff] }
  0xa6   : > { %14709 = vmatprep.mubr.msk.f32.mxu0 %vm478_vm1, %v1276_v51 }
  0xa8   : > { %14875 = vmatmul.mubr.msk.f32.gmra.mxu1 %vm478_vm1, %v1265_v27  ;;  %v1293_v27 = vld [vmem:[%s17015_s23 + $0x1ba] sm:$0xff] }
  0xa9   : > { %14710 = vmatmul.mubr.msk.f32.gmra.mxu0 %vm478_vm1, %v1277_v52  ;;  %14877 = vmatprep.mubr.msk.f32.mxu1 %vm478_vm1, %v1266_v28  ;;  %v1294_v28 = vld [vmem:[%s17015_s23 + $0x1ca] sm:$0xff] }
  0xaa   : > { %14712 = vmatprep.mubr.msk.f32.mxu0 %vm478_vm1, %v1278_v54 }
  0xac   : > { %14878 = vmatmul.mubr.msk.f32.gmra.mxu1 %vm478_vm1, %v1267_v31  ;;  %v1295_v31 = vld [vmem:[%s17015_s23 + $0x1d2] sm:$0xff] }
  0xad   : > { %14713 = vmatmul.mubr.msk.f32.gmra.mxu0 %vm478_vm1, %v1279_v55  ;;  %14880 = vmatprep.mubr.msk.f32.mxu1 %vm478_vm1, %v1268_v32  ;;  %v17628_v32 = vld [vmem:[%s22481_s1 + $0x20] sm:$0xf] }
  0xae   : > { %14715 = vmatprep.mubr.msk.f32.mxu0 %vm478_vm1, %v1280_v56 }
  0xb0   : > { %14881 = vmatmul.mubr.msk.f32.gmra.mxu1 %vm478_vm1, %v1269_v36 }
  0xb1   : > { %14716 = vmatmul.mubr.msk.f32.gmra.mxu0 %vm478_vm1, %v1281_v59  ;;  %14883 = vmatprep.mubr.msk.f32.mxu1 %vm478_vm1, %v1270_v39 }
  0xb2   : > { %14718 = vmatprep.mubr.msk.f32.mxu0 %vm478_vm1, %v1282_v61 }
  0xb4   : > { %14884 = vmatmul.mubr.msk.f32.gmra.mxu1 %vm478_vm1, %v1271_v43 }
  0xb5   : > { %14719 = vmatmul.mubr.msk.f32.gmra.mxu0 %vm478_vm1, %v1283_v63  ;;  %14886 = vmatprep.mubr.msk.f32.mxu1 %vm478_vm1, %v1272_v44 }
  0xb6   : > { %14721 = vmatprep.mubr.msk.f32.mxu0 %vm478_vm1, %v1284_v7 }
  0xb8   : > { %14887 = vmatmul.mubr.msk.f32.gmra.mxu1 %vm478_vm1, %v1273_v48 }
  0xb9   : > { %14722 = vmatmul.mubr.msk.f32.gmra.mxu0 %vm478_vm1, %v1285_v10  ;;  %14889 = vmatprep.mubr.msk.f32.mxu1 %vm478_vm1, %v1274_v49 }
  0xba   : > { %14724 = vmatprep.mubr.msk.f32.mxu0 %vm478_vm1, %v1286_v11 }
  0xbc   : > { %14890 = vmatmul.mubr.msk.f32.gmra.mxu1 %vm478_vm1, %v1275_v50  ;;  %v12590_v50 = vld [vmem:[%s17015_s23 + $0x1ea] sm:$0xff] }
  0xbd   : > { %14725 = vmatmul.mubr.msk.f32.gmra.mxu0 %vm478_vm1, %v1287_v15  ;;  %14892 = vmatprep.mubr.msk.f32.mxu1 %vm478_vm1, %v1276_v51 }
  0xbe   : > { %14727 = vmatprep.mubr.msk.f32.mxu0 %vm478_vm1, %v1288_v16 }
  0xc0   : > { %14893 = vmatmul.mubr.msk.f32.gmra.mxu1 %vm478_vm1, %v1277_v52 }
  0xc1   : > { %14728 = vmatmul.mubr.msk.f32.gmra.mxu0 %vm478_vm1, %v1289_v19  ;;  %14895 = vmatprep.mubr.msk.f32.mxu1 %vm478_vm1, %v1278_v54 }
  0xc2   : > { %14730 = vmatprep.mubr.msk.f32.mxu0 %vm478_vm1, %v1290_v20 }
  0xc4   : > { %14896 = vmatmul.mubr.msk.f32.gmra.mxu1 %vm478_vm1, %v1279_v55  ;;  %v12716_v55 = vld [vmem:[%s17015_s23 + $0x39] sm:$0xff] }
  0xc5   : > { %14731 = vmatmul.mubr.msk.f32.gmra.mxu0 %vm478_vm1, %v1291_v23  ;;  %14898 = vmatprep.mubr.msk.f32.mxu1 %vm478_vm1, %v1280_v56 }
  0xc6   : > { %14733 = vmatprep.mubr.msk.f32.mxu0 %vm478_vm1, %v1292_v24 }
  0xc8   : > { %14899 = vmatmul.mubr.msk.f32.gmra.mxu1 %vm478_vm1, %v1281_v59 }
  0xc9   : > { %14734 = vmatmul.mubr.msk.f32.gmra.mxu0 %vm478_vm1, %v1293_v27  ;;  %14901 = vmatprep.mubr.msk.f32.mxu1 %vm478_vm1, %v1282_v61 }
  0xca   : > { %14736 = vmatprep.mubr.msk.f32.mxu0 %vm478_vm1, %v1294_v28 }
  0xcc   : > { %14902 = vmatmul.mubr.msk.f32.gmra.mxu1 %vm478_vm1, %v1283_v63  ;;  %v12718_v63 = vld [vmem:[%s17015_s23 + $0x51] sm:$0xff] }
  0xcd   : > { %14737 = vmatmul.mubr.msk.f32.gmra.mxu0 %vm478_vm1, %v1295_v31  ;;  %14904 = vmatprep.mubr.msk.f32.mxu1 %vm478_vm1, %v1284_v7 }
  0xce   : > { %14803 = vmatprep.mubr.msk.f32.mxu0 %vm478_vm1, %v17020_v6 }
  0xd0   : > { %14905 = vmatmul.mubr.msk.f32.gmra.mxu1 %vm478_vm1, %v1285_v10 }
  0xd1   : > { %14804 = vmatmul.mubr.msk.f32.vlgmr.msra.gmra.mxu0 %vm478_vm1, %v17033_v8  ;;  %14907 = vmatprep.mubr.msk.f32.mxu1 %vm478_vm1, %v1286_v11 }
  0xd2   : > { %14926 = vmatpush3.msk.msra.mxu0 %vm599_vm0, %v17478_v12  ;;  %14806 = vmatprep.mubr.msk.f32.mxu0 %vm478_vm1, %v17036_v9 }
  0xd3   : > { %15049 = vmatprep.subr.msk.mxu0 %vm599_vm0, %v17628_v32 }
  0xd4   : > { %14908 = vmatmul.mubr.msk.f32.gmra.mxu1 %vm478_vm1, %v1287_v15 }
  0xd5   : > { %v14557_v6 = vpop.f32.mrf.mxu0  ;;  %14807 = vmatmul.mubr.msk.f32.gmra.mxu0 %vm478_vm1, %v17056_v13  ;;  %14910 = vmatprep.mubr.msk.f32.mxu1 %vm478_vm1, %v1288_v16 }
  0xd6   : > { %14809 = vmatprep.mubr.msk.f32.mxu0 %vm478_vm1, %v17061_v14  ;;  %v22542_v6 = vld [vmem:[#allocation5_spill] sm:$0xff] }
  0xd7   : > { %v669_v8 = vpop.f32.mrf.mxu0 }
  0xd8   : > { %v14640_v12 = vpop.f32.mrf.mxu1  ;;  %14911 = vmatmul.mubr.msk.f32.gmra.mxu1 %vm478_vm1, %v1289_v19  ;;  %v12723_v8 = vld [vmem:[%s17015_s23 + $0x91] sm:$0xff] }
  0xd9   : > { %v14560_v9 = vpop.f32.mrf.mxu0  ;;  %14810 = vmatmul.mubr.msk.f32.gmra.mxu0 %vm478_vm1, %v17077_v17  ;;  %14913 = vmatprep.mubr.msk.f32.mxu1 %vm478_vm1, %v1290_v20  ;;  %v12721_v20 = vld [vmem:[%s17015_s23 + $0x79] sm:$0xff] }
  0xda   : > { %14812 = vmatprep.mubr.msk.f32.mxu0 %vm478_vm1, %v17082_v18  ;;  %v1127_v13 = vpop.f32.mrf.mxu1  ;;  %v22543_v9 = vld [vmem:[#allocation6_spill] sm:$0xff] }
  0xdb   : > { %v679_v36 = vpop.f32.mrf.mxu0 }
  0xdc   : > { %v14643_v17 = vpop.f32.mrf.mxu1  ;;  %14914 = vmatmul.mubr.msk.f32.gmra.mxu1 %vm478_vm1, %v1291_v23 }
  0xdd   : > { %v17652_v14 = vpop.f32.mrf.mxu0  ;;  %14813 = vmatmul.mubr.msk.f32.gmra.mxu0 %vm478_vm1, %v17097_v21  ;;  %14916 = vmatprep.mubr.msk.f32.mxu1 %vm478_vm1, %v1292_v24 }
  0xde   : > { %14815 = vmatprep.mubr.msk.f32.mxu0 %vm478_vm1, %v17102_v22  ;;  %v1137_v18 = vpop.f32.mrf.mxu1 }
  0xdf   : > { %v17658_v39 = vpop.f32.mrf.mxu0 }
  0xe0   : > { %v14646_v21 = vpop.f32.mrf.mxu1  ;;  %14917 = vmatmul.mubr.msk.f32.gmra.mxu1 %vm478_vm1, %v1293_v27 }
  0xe1   : > { %v17662_v43 = vpop.f32.mrf.mxu0  ;;  %14816 = vmatmul.mubr.msk.f32.gmra.mxu0 %vm478_vm1, %v17117_v25  ;;  %14919 = vmatprep.mubr.msk.f32.mxu1 %vm478_vm1, %v1294_v28  ;;  %v12589_v25 = vld [vmem:[%s17015_s23 + $0x1e2] sm:$0xff] }
  0xe2   : > { %14818 = vmatprep.mubr.msk.f32.mxu0 %vm478_vm1, %v17122_v26  ;;  %v17671_v44 = vpop.f32.mrf.mxu1 }
  0xe3   : > { %v17668_v22 = vpop.f32.mrf.mxu0 }
  0xe4   : > { %v17681_v26 = vpop.f32.mrf.mxu1  ;;  %14920 = vmatmul.mubr.msk.f32.gmra.mxu1 %vm478_vm1, %v1295_v31 }
  0xe5   : > { %v17674_v47 = vpop.f32.mrf.mxu0  ;;  %14819 = vmatmul.mubr.msk.f32.gmra.mxu0 %vm478_vm1, %v17137_v29  ;;  %14922 = vmatprep.mubr.msk.f32.mxu1 %vm478_vm1, %v12589_v25  ;;  %v12715_v29 = vld [vmem:[%s17015_s23 + $0x31] sm:$0xff]  ;;  %v22544_v25 = vld [vmem:[#allocation7_spill] sm:$0xff] }
  0xe6   : > { %14821 = vmatprep.mubr.msk.f32.mxu0 %vm478_vm1, %v17142_v30  ;;  %v17686_v49 = vpop.f32.mrf.mxu1 }
  0xe7   : > { %v17683_v48 = vpop.f32.mrf.mxu0 }
  0xe8   : > { %v17697_v30 = vpop.f32.mrf.mxu1  ;;  %14923 = vmatmul.mubr.msk.f32.gmra.mxu1 %vm478_vm1, %v12590_v50  ;;  %v12725_v50 = vld [vmem:[%s17015_s23 + $0xa9] sm:$0xff] }
  0xe9   : > { %v17690_v51 = vpop.f32.mrf.mxu0  ;;  %14822 = vmatmul.mubr.msk.f32.gmra.mxu0 %vm478_vm1, %v17157_v33  ;;  %14989 = vmatprep.mubr.msk.f32.mxu1 %vm478_vm1, %v12715_v29  ;;  %v12717_v33 = vld [vmem:[%s17015_s23 + $0x49] sm:$0xff] }
  0xea   : > { %14824 = vmatprep.mubr.msk.f32.mxu0 %vm478_vm1, %v17162_v34  ;;  %v17702_v54 = vpop.f32.mrf.mxu1 }
  0xeb   : > { %v17699_v52 = vpop.f32.mrf.mxu0 }
  0xec   : > { %v17713_v34 = vpop.f32.mrf.mxu1  ;;  %14990 = vmatmul.mubr.msk.f32.vlgmr.msra.gmra.mxu1 %vm478_vm1, %v12716_v55  ;;  %v22545_v55 = vld [vmem:[#allocation8_spill] sm:$0xff] }
  0xed   : > { %v17706_v56 = vpop.f32.mrf.mxu0  ;;  %14825 = vmatmul.mubr.msk.f32.gmra.mxu0 %vm478_vm1, %v17177_v37  ;;  %14992 = vmatprep.mubr.msk.f32.mxu1 %vm478_vm1, %v12717_v33  ;;  %v12719_v37 = vld [vmem:[%s17015_s23 + $0x61] sm:$0xff] }
  0xee   : > { %14827 = vmatprep.mubr.msk.f32.mxu0 %vm478_vm1, %v17182_v38  ;;  %v17718_v61 = vpop.f32.mrf.mxu1 }
  0xef   : > { %v17715_v59 = vpop.f32.mrf.mxu0 }
  0xf0   : > { %v17729_v38 = vpop.f32.mrf.mxu1  ;;  %14993 = vmatmul.mubr.msk.f32.gmra.mxu1 %vm478_vm1, %v12718_v63 }
  0xf1   : > { %v14578_v7 = vpop.f32.mrf.mxu0  ;;  %14828 = vmatmul.mubr.msk.f32.gmra.mxu0 %vm478_vm1, %v17197_v41  ;;  %14995 = vmatprep.mubr.msk.f32.mxu1 %vm478_vm1, %v12719_v37  ;;  %v12720_v41 = vld [vmem:[%s17015_s23 + $0x69] sm:$0xff]  ;;  %v12726_v37 = vld [vmem:[%s17015_s23 + $0xb1] sm:$0xff] }
  0xf2   : > { %v17725_v10 = vadd.f32 %v14640_v12, %v14578_v7  ;;  %14830 = vmatprep.mubr.msk.f32.mxu0 %vm478_vm1, %v17202_v42  ;;  %v17734_v16 = vpop.f32.mrf.mxu1 }
  0xf3   : > { %v739_v11 = vpop.f32.mrf.mxu0 }
  0xf4   : > { %v17732_v15 = vadd.f32 %v1127_v13, %v739_v11  ;;  %v17745_v23 = vpop.f32.mrf.mxu1  ;;  %14996 = vmatmul.mubr.msk.f32.gmra.mxu1 %vm478_vm1, %v12720_v41  ;;  %v22546_v11 = vld [vmem:[#allocation9_spill] sm:$0xff]  ;;  %v12727_v41 = vld [vmem:[%s17015_s23 + $0xc1] sm:$0xff] }
  0xf5   : > { %v14581_v19 = vpop.f32.mrf.mxu0  ;;  %14831 = vmatmul.mubr.msk.f32.gmra.mxu0 %vm478_vm1, %v17217_v45  ;;  %14998 = vmatprep.mubr.msk.f32.mxu1 %vm478_vm1, %v12721_v20  ;;  %v12722_v45 = vld [vmem:[%s17015_s23 + $0x81] sm:$0xff]  ;;  %v22547_v20 = vld [vmem:[#allocation10_spill] sm:$0xff] }
  0xf6   : > { %v17741_v42 = vadd.f32 %v14643_v17, %v14581_v19  ;;  %14833 = vmatprep.mubr.msk.f32.mxu0 %vm478_vm1, %v17222_v46  ;;  %v17750_v28 = vpop.f32.mrf.mxu1 }
  0xf7   : > { %v749_v24 = vpop.f32.mrf.mxu0 }
  0xf8   : > { %v17748_v27 = vadd.f32 %v1137_v18, %v749_v24  ;;  %v17761_v12 = vpop.f32.mrf.mxu1  ;;  %14999 = vmatmul.mubr.msk.f32.gmra.mxu1 %vm478_vm1, %v12722_v45  ;;  %v12724_v18 = vld [vmem:[%s17015_s23 + $0x99] sm:$0xff] }
  0xf9   : > { %v14584_v31 = vpop.f32.mrf.mxu0  ;;  %14834 = vmatmul.mubr.msk.f32.gmra.mxu0 %vm478_vm1, %v22542_v6  ;;  %15001 = vmatprep.mubr.msk.f32.mxu1 %vm478_vm1, %v12723_v8  ;;  %v12728_v6 = vld [vmem:[%s17015_s23 + $0xc9] sm:$0xff]  ;;  %v22548_v8 = vld [vmem:[#allocation11_spill] sm:$0xff] }
  0xfa   : > { %v17757_v46 = vadd.f32 %v14646_v21, %v14584_v31  ;;  %14836 = vmatprep.mubr.msk.f32.mxu0 %vm478_vm1, %v22543_v9  ;;  %v17767_v17 = vpop.f32.mrf.mxu1  ;;  %v12729_v9 = vld [vmem:[%s17015_s23 + $0xd9] sm:$0xff] }
  0xfb   : > { %v759_v36 = vpop.f32.mrf.mxu0 }
  0xfc   : > { %v17765_v13 = vadd.f32 %v17671_v44, %v759_v36  ;;  %v17779_v33 = vpop.f32.mrf.mxu1  ;;  %15002 = vmatmul.mubr.msk.f32.gmra.mxu1 %vm478_vm1, %v12724_v18  ;;  %v22549_v18 = vld [vmem:[#allocation12_spill] sm:$0xff] }
  0xfd   : > { %v14587_v21 = vpop.f32.mrf.mxu0  ;;  %14837 = vmatmul.mubr.msk.f32.gmra.mxu0 %vm478_vm1, %v22544_v25  ;;  %15004 = vmatprep.mubr.msk.f32.mxu1 %vm478_vm1, %v12725_v50 }
  0xfe   : > { %v17775_v29 = vadd.f32 %v17681_v26, %v14587_v21  ;;  %14839 = vmatprep.mubr.msk.f32.mxu0 %vm478_vm1, %v22545_v55  ;;  %v17785_v7 = vpop.f32.mrf.mxu1  ;;  %v12730_v55 = vld [vmem:[%s17015_s23 + $0xe1] sm:$0xff] }
  0xff   : > { %v769_v44 = vpop.f32.mrf.mxu0 }
 0x100   : > { %v17783_v63 = vadd.f32 %v17686_v49, %v769_v44  ;;  %v17797_v24 = vpop.f32.mrf.mxu1  ;;  %15005 = vmatmul.mubr.msk.f32.gmra.mxu1 %vm478_vm1, %v12726_v37  ;;  %v22550_v37 = vld [vmem:[#allocation13_spill] sm:$0xff] }
 0x101   : > { %v14590_v26 = vpop.f32.mrf.mxu0  ;;  %14840 = vmatmul.mubr.msk.f32.gmra.mxu0 %vm478_vm1, %v22546_v11  ;;  %15007 = vmatprep.mubr.msk.f32.mxu1 %vm478_vm1, %v12727_v41  ;;  %v22551_v11 = vld [vmem:[#allocation14_spill] sm:$0xff] }
 0x102   : > { %v17793_v19 = vadd.f32 %v17697_v30, %v14590_v26  ;;  %14842 = vmatprep.mubr.msk.f32.mxu0 %vm478_vm1, %v22547_v20  ;;  %v17803_v31 = vpop.f32.mrf.mxu1 }
 0x103   : > { %v779_v49 = vpop.f32.mrf.mxu0 }
 0x104   : > { %v17801_v45 = vadd.f32 %v17702_v54, %v779_v49  ;;  %v14673_v21 = vpop.f32.mrf.mxu1  ;;  %15008 = vmatmul.mubr.msk.f32.gmra.mxu1 %vm478_vm1, %v12728_v6  ;;  %v12732_v6 = vld [vmem:[%s17015_s23 + $0xf9] sm:$0xff] }
 0x105   : > { %v14593_v30 = vpop.f32.mrf.mxu0  ;;  %14843 = vmatmul.mubr.msk.f32.gmra.mxu0 %vm478_vm1, %v22548_v8  ;;  %15010 = vmatprep.mubr.msk.f32.mxu1 %vm478_vm1, %v12729_v9  ;;  %v22552_v8 = vld [vmem:[#allocation15_spill] sm:$0xff] }
 0x106   : > { %v17811_v36 = vadd.f32 %v17713_v34, %v14593_v30  ;;  %14845 = vmatprep.mubr.msk.f32.mxu0 %vm478_vm1, %v22549_v18  ;;  %v1237_v50 = vpop.f32.mrf.mxu1  ;;  %v12731_v34 = vld [vmem:[%s17015_s23 + $0xf1] sm:$0xff]  ;;  %v22553_v18 = vld [vmem:[#allocation16_spill] sm:$0xff] }
 0x107   : > { %v789_v54 = vpop.f32.mrf.mxu0 }
 0x108   : > { %v17817_v25 = vadd.f32 %v17718_v61, %v789_v54  ;;  %v14676_v41 = vpop.f32.mrf.mxu1  ;;  %15011 = vmatmul.mubr.msk.f32.gmra.mxu1 %vm478_vm1, %v12730_v55  ;;  %v12734_v55 = vld [vmem:[%s17015_s23 + $0x111] sm:$0xff] }
 0x109   : > { %v14596_v44 = vpop.f32.mrf.mxu0  ;;  %14846 = vmatmul.mubr.msk.f32.gmra.mxu0 %vm478_vm1, %v22550_v37  ;;  %15013 = vmatprep.mubr.msk.f32.mxu1 %vm478_vm1, %v12731_v34  ;;  %v22554_v37 = vld [vmem:[#allocation17_spill] sm:$0xff] }
 0x10a   : > { %v17825_v26 = vadd.f32 %v17729_v38, %v14596_v44  ;;  %14848 = vmatprep.mubr.msk.f32.mxu0 %vm478_vm1, %v22551_v11  ;;  %v1247_v49 = vpop.f32.mrf.mxu1  ;;  %v12733_v38 = vld [vmem:[%s17015_s23 + $0x109] sm:$0xff]  ;;  %v22555_v11 = vld [vmem:[#allocation18_spill] sm:$0xff] }
 0x10b   : > { %v799_v20 = vpop.f32.mrf.mxu0 }
 0x10c   : > { %v17831_v61 = vadd.f32 %v17734_v16, %v799_v20  ;;  %v14743_v21 = vpop.f32.mrf.mxu1  ;;  %15014 = vmatmul.mubr.msk.f32.gmra.mxu1 %vm478_vm1, %v12732_v6  ;;  %v12736_v6 = vld [vmem:[%s17015_s23 + $0x129] sm:$0xff] }
 0x10d   : > { %v14599_v30 = vpop.f32.mrf.mxu0  ;;  %14849 = vmatmul.mubr.msk.f32.gmra.mxu0 %vm478_vm1, %v22552_v8  ;;  %15016 = vmatprep.mubr.msk.f32.mxu1 %vm478_vm1, %v12733_v38  ;;  %v12737_v8 = vld [vmem:[%s17015_s23 + $0x139] sm:$0xff] }
 0x10e   : > { %v17839_v9 = vadd.f32 %v17745_v23, %v14599_v30  ;;  %14851 = vmatprep.mubr.msk.f32.mxu0 %vm478_vm1, %v22553_v18  ;;  %v1960_v50 = vpop.f32.mrf.mxu1  ;;  %v12735_v23 = vld [vmem:[%s17015_s23 + $0x121] sm:$0xff]  ;;  %v22559_v18 = vld [vmem:[#allocation20_spill] sm:$0xff] }
 0x10f   : > { %v809_v54 = vpop.f32.mrf.mxu0 }
 0x110   : > { %v17845_v16 = vadd.f32 %v17750_v28, %v809_v54  ;;  %v14746_v41 = vpop.f32.mrf.mxu1  ;;  %15017 = vmatmul.mubr.msk.f32.gmra.mxu1 %vm478_vm1, %v12734_v55  ;;  %v12507_v54 = vld [vmem:[%s17015_s23 + $0x1e1] sm:$0xff] }
 0x111   : > { %v14602_v44 = vpop.f32.mrf.mxu0  ;;  %14852 = vmatmul.mubr.msk.f32.gmra.mxu0 %vm478_vm1, %v22554_v37  ;;  %15019 = vmatprep.mubr.msk.f32.mxu1 %vm478_vm1, %v12735_v23  ;;  %v12739_v37 = vld [vmem:[%s17015_s23 + $0x151] sm:$0xff] }
 0x112   : > { %v17853_v34 = vadd.f32 %v17761_v12, %v14602_v44  ;;  %14854 = vmatprep.mubr.msk.f32.mxu0 %vm478_vm1, %v22555_v11  ;;  %v1970_v49 = vpop.f32.mrf.mxu1  ;;  %v22557_v12 = vld [vmem:[#allocation19_spill] sm:$0xff]  ;;  %v12508_v11 = vld [vmem:[%s17015_s23 + $0x1e9] sm:$0xff] }
 0x113   : > { %v819_v28 = vpop.f32.mrf.mxu0  ;;  %v12738_v44 = vld [vmem:[%s17015_s23 + $0x141] sm:$0xff] }
 0x114   : > { %v17859_v20 = vadd.f32 %v17767_v17, %v819_v28  ;;  %v17871_v17 = vpop.f32.mrf.mxu1  ;;  %15020 = vmatmul.mubr.msk.f32.gmra.mxu1 %vm478_vm1, %v12736_v6  ;;  %v12741_v6 = vld [vmem:[%s17015_s23 + $0x169] sm:$0xff] }
 0x115   : > { %v14605_v30 = vpop.f32.mrf.mxu0  ;;  %14855 = vmatmul.mubr.msk.f32.gmra.mxu0 %vm478_vm1, %v22557_v12  ;;  %15022 = vmatprep.mubr.msk.f32.mxu1 %vm478_vm1, %v12737_v8  ;;  %v12742_v8 = vld [vmem:[%s17015_s23 + $0x171] sm:$0xff] }
 0x116   : > { %22556 = vst [vmem:[#allocation5_spill] sm:$0xff] %v17859_v20  ;;  %v17867_v38 = vadd.f32 %v17779_v33, %v14605_v30  ;;  %14857 = vmatprep.mubr.msk.f32.mxu0 %vm478_vm1, %v22559_v18  ;;  %v17878_v55 = vpop.f32.mrf.mxu1 }
 0x117   : > { %v829_v21 = vpop.f32.mrf.mxu0  ;;  %22561 = vst [vmem:[#allocation8_spill] sm:$0xff] %v17878_v55 }
 0x118   : > { %22558 = vst [vmem:[#allocation6_spill] sm:$0xff] %v17867_v38  ;;  %v17876_v50 = vadd.f32 %v17785_v7, %v829_v21  ;;  %v17890_v7 = vpop.f32.mrf.mxu1  ;;  %15023 = vmatmul.mubr.msk.f32.gmra.mxu1 %vm478_vm1, %v12738_v44  ;;  %v12743_v21 = vld [vmem:[%s17015_s23 + $0x181] sm:$0xff] }
 0x119   : > { %v14608_v33 = vpop.f32.mrf.mxu0  ;;  %14858 = vmatmul.mubr.msk.f32.gmra.mxu0 %vm478_vm1, %v17393_v58  ;;  %15025 = vmatprep.mubr.msk.f32.mxu1 %vm478_vm1, %v12739_v37  ;;  %v12740_v58 = vld [vmem:[%s17015_s23 + $0x159] sm:$0xff] }
 0x11a   : > { %22560 = vst [vmem:[#allocation7_spill] sm:$0xff] %v17876_v50  ;;  %v17886_v23 = vadd.f32 %v17797_v24, %v14608_v33  ;;  %14860 = vmatprep.mubr.msk.f32.mxu0 %vm478_vm1, %v12507_v54  ;;  %v17896_v49 = vpop.f32.mrf.mxu1  ;;  %v12744_v33 = vld [vmem:[%s17015_s23 + $0x189] sm:$0xff] }
 0x11b   : > { %v839_v41 = vpop.f32.mrf.mxu0  ;;  %22564 = vst [vmem:[#allocation11_spill] sm:$0xff] %v17896_v49 }
 0x11c   : > { %22562 = vst [vmem:[#allocation9_spill] sm:$0xff] %v17886_v23  ;;  %v17894_v28 = vadd.f32 %v17803_v31, %v839_v41  ;;  %v17904_v30 = vpop.f32.mrf.mxu1  ;;  %15026 = vmatmul.mubr.msk.f32.gmra.mxu1 %vm478_vm1, %v12740_v58  ;;  %v12747_v58 = vld [vmem:[%s17015_s23 + $0x1b1] sm:$0xff] }
 0x11d   : > { %v14611_v24 = vpop.f32.mrf.mxu0  ;;  %14861 = vmatmul.mubr.msk.f32.gmra.mxu0 %vm478_vm1, %v12508_v11  ;;  %15028 = vmatprep.mubr.msk.f32.mxu1 %vm478_vm1, %v12741_v6  ;;  %v12746_v11 = vld [vmem:[%s17015_s23 + $0x1a1] sm:$0xff]  ;;  %v12748_v6 = vld [vmem:[%s17015_s23 + $0x1b9] sm:$0xff] }
 0x11e   : > { %22563 = vst [vmem:[#allocation10_spill] sm:$0xff] %v17894_v28  ;;  %14927 = vmatprep.mubr.msk.f32.mxu0 %vm478_vm1, %v17315_v2  ;;  %v17907_v31 = vpop.f32.mrf.mxu1  ;;  %v12655_v23 = vld [vmem:[%s17015_s23 + $0x138] sm:$0xff] }
 0x11f   : > { %v849_v12 = vpop.f32.mrf.mxu0  ;;  %22565 = vst [vmem:[#allocation12_spill] sm:$0xff] %v17907_v31 }
 0x120   : > { %v17918_v2 = vpop.f32.mrf.mxu1  ;;  %15029 = vmatmul.mubr.msk.f32.gmra.mxu1 %vm478_vm1, %v12742_v8  ;;  %v12749_v8 = vld [vmem:[%s17015_s23 + $0x1c9] sm:$0xff] }
 0x121   : > { %v14614_v18 = vpop.f32.mrf.mxu0  ;;  %14928 = vmatmul.mubr.msk.f32.vlgmr.msra.gmra.mxu0 %vm478_vm1, %v17328_v4  ;;  %15031 = vmatprep.mubr.msk.f32.mxu1 %vm478_vm1, %v12743_v21 }
 0x122   : > { %15050 = vmatpush3.msk.msra.mxu0 %vm599_vm0, %v17628_v32  ;;  %14930 = vmatprep.mubr.msk.f32.mxu0 %vm478_vm1, %v17336_v62  ;;  %v17921_v44 = vpop.f32.mrf.mxu1  ;;  %v12745_v32 = vld [vmem:[%s17015_s23 + $0x199] sm:$0xff]  ;;  %v12643_v18 = vld [vmem:[%s17015_s23 + $0xa8] sm:$0xff] }
 0x123   : > { %v859_v54 = vpop.f32.mrf.mxu0  ;;  %22566 = vst [vmem:[#allocation13_spill] sm:$0xff] %v17921_v44 }
 0x124   : > { %v17930_v37 = vpop.f32.mrf.mxu1  ;;  %15032 = vmatmul.mubr.msk.f32.gmra.mxu1 %vm478_vm1, %v12744_v33  ;;  %v12750_v54 = vld [vmem:[%s17015_s23 + $0x1d1] sm:$0xff] }
 0x125   : > { %v14619_v4 = vpop.f32.mrf.mxu0  ;;  %14931 = vmatmul.mubr.msk.f32.gmra.mxu0 %vm478_vm1, %v17348_v0  ;;  %15034 = vmatprep.mubr.msk.f32.mxu1 %vm478_vm1, %v12745_v32  ;;  %v12645_v32 = vld [vmem:[%s17015_s23 + $0xc0] sm:$0xff] }
 0x126   : > { %14933 = vmatprep.mubr.msk.f32.mxu0 %vm478_vm1, %v17356_v1  ;;  %v17937_v0 = vpop.f32.mrf.mxu1 }
 0x127   : > { %v1057_v62 = vpop.f32.mrf.mxu0  ;;  %22567 = vst [vmem:[#allocation14_spill] sm:$0xff] %v17937_v0 }
 0x128   : > { %v17942_v24 = vpop.f32.mrf.mxu1  ;;  %15035 = vmatmul.mubr.msk.f32.gmra.mxu1 %vm478_vm1, %v12746_v11 }
 0x129   : > { %v14622_v41 = vpop.f32.mrf.mxu0  ;;  %14934 = vmatmul.mubr.msk.f32.gmra.mxu0 %vm478_vm1, %v17368_v5  ;;  %15037 = vmatprep.mubr.msk.f32.mxu1 %vm478_vm1, %v12747_v58 }
 0x12a   : > { %14936 = vmatprep.mubr.msk.f32.mxu0 %vm478_vm1, %v17376_v57  ;;  %v17949_v5 = vpop.f32.mrf.mxu1 }
 0x12b   : > { %v1067_v1 = vpop.f32.mrf.mxu0  ;;  %22568 = vst [vmem:[#allocation15_spill] sm:$0xff] %v17949_v5 }
 0x12c   : > { %v17955_v21 = vpop.f32.mrf.mxu1  ;;  %15038 = vmatmul.mubr.msk.f32.gmra.mxu1 %vm478_vm1, %v12748_v6  ;;  %v12647_v1 = vld [vmem:[%s17015_s23 + $0xd8] sm:$0xff] }
 0x12d   : > { %v14625_v12 = vpop.f32.mrf.mxu0  ;;  %14937 = vmatmul.mubr.msk.f32.gmra.mxu0 %vm478_vm1, %v17388_v3  ;;  %15040 = vmatprep.mubr.msk.f32.mxu1 %vm478_vm1, %v12749_v8 }
 0x12e   : > { %14939 = vmatprep.mubr.msk.f32.mxu0 %vm478_vm1, %v17396_v53  ;;  %v17962_v3 = vpop.f32.mrf.mxu1  ;;  %v12644_v53 = vld [vmem:[%s17015_s23 + $0xb0] sm:$0xff] }
 0x12f   : > { %v1077_v57 = vpop.f32.mrf.mxu0  ;;  %22569 = vst [vmem:[#allocation16_spill] sm:$0xff] %v17962_v3 }
 0x130   : > { %v17967_v62 = vpop.f32.mrf.mxu1  ;;  %15041 = vmatmul.mubr.msk.f32.gmra.mxu1 %vm478_vm1, %v12750_v54  ;;  %v12648_v54 = vld [vmem:[%s17015_s23 + $0xe0] sm:$0xff] }
 0x131   : > { %v14628_v33 = vpop.f32.mrf.mxu0  ;;  %14940 = vmatmul.mubr.msk.f32.gmra.mxu0 %vm478_vm1, %v17406_v60  ;;  %v12646_v60 = vld [vmem:[%s17015_s23 + $0xc8] sm:$0xff] }
 0x132   : > { %14942 = vmatprep.mubr.msk.f32.mxu0 %vm478_vm1, %v12643_v18  ;;  %v17973_v41 = vpop.f32.mrf.mxu1  ;;  %v1093_v20 = vadd.f32 %v14628_v33, %v17662_v43  ;;  %v12659_v43 = vld [vmem:[%s17015_s23 + $0x168] sm:$0xff] }
 0x133   : > { %v1087_v4 = vpop.f32.mrf.mxu0  ;;  %22570 = vst [vmem:[#allocation17_spill] sm:$0xff] %v17973_v41 }
 0x134   : > { %v17980_v6 = vpop.f32.mrf.mxu1 }
 0x135   : > { %v17970_v11 = vpop.f32.mrf.mxu0  ;;  %14943 = vmatmul.mubr.msk.f32.gmra.mxu0 %vm478_vm1, %v12644_v53 }
 0x136   : > { %14945 = vmatprep.mubr.msk.f32.mxu0 %vm478_vm1, %v12645_v32  ;;  %v17985_v18 = vpop.f32.mrf.mxu1  ;;  %v12649_v32 = vld [vmem:[%s17015_s23 + $0xf0] sm:$0xff] }
 0x137   : > { %v17977_v58 = vpop.f32.mrf.mxu0  ;;  %22571 = vst [vmem:[#allocation18_spill] sm:$0xff] %v17985_v18 }
 0x138   : > { %v17992_v41 = vpop.f32.mrf.mxu1 }
 0x139   : > { %v17982_v8 = vpop.f32.mrf.mxu0  ;;  %14946 = vmatmul.mubr.msk.f32.gmra.mxu0 %vm478_vm1, %v12646_v60  ;;  %v12650_v60 = vld [vmem:[%s17015_s23 + $0xf8] sm:$0xff] }
 0x13a   : > { %14948 = vmatprep.mubr.msk.f32.mxu0 %vm478_vm1, %v12647_v1  ;;  %v17997_v5 = vpop.f32.mrf.mxu1  ;;  %v12651_v1 = vld [vmem:[%s17015_s23 + $0x108] sm:$0xff] }
 0x13b   : > { %v17989_v53 = vpop.f32.mrf.mxu0  ;;  %22572 = vst [vmem:[#allocation19_spill] sm:$0xff] %v17997_v5  ;;  %v12653_v5 = vld [vmem:[%s17015_s23 + $0x120] sm:$0xff] }
 0x13c   : > { %v18004_v0 = vpop.f32.mrf.mxu1 }
 0x13d   : > { %v17994_v3 = vpop.f32.mrf.mxu0  ;;  %14949 = vmatmul.mubr.msk.f32.gmra.mxu0 %vm478_vm1, %v12648_v54  ;;  %v12652_v54 = vld [vmem:[%s17015_s23 + $0x110] sm:$0xff] }
 0x13e   : > { %14951 = vmatprep.mubr.msk.f32.mxu0 %vm478_vm1, %v12649_v32  ;;  %v18007_v31 = vpop.f32.mrf.mxu1 }
 0x13f   : > { %v18001_v18 = vpop.f32.mrf.mxu0  ;;  %22573 = vst [vmem:[#allocation20_spill] sm:$0xff] %v18007_v31 }
 0x140   : > { %v18012_v55 = vpop.f32.mrf.mxu1 }
 0x141   : > { %v14681_v44 = vpop.f32.mrf.mxu0  ;;  %14952 = vmatmul.mubr.msk.f32.gmra.mxu0 %vm478_vm1, %v12650_v60 }
 0x142   : > { %14954 = vmatprep.mubr.msk.f32.mxu0 %vm478_vm1, %v12651_v1  ;;  %v18015_v28 = vpop.f32.mrf.mxu1  ;;  %v12654_v44 = vld [vmem:[%s17015_s23 + $0x128] sm:$0xff]  ;;  %v1083_v1 = vadd.f32 %v14625_v12, %v17652_v14 }
 0x143   : > { %v1487_v49 = vpop.f32.mrf.mxu0  ;;  %22574 = vst [vmem:[#allocation21_spill] sm:$0xff] %v18015_v28 }
 0x144   : > { %v18020_v31 = vpop.f32.mrf.mxu1 }
 0x145   : > { %v14684_v32 = vpop.f32.mrf.mxu0  ;;  %14955 = vmatmul.mubr.msk.f32.gmra.mxu0 %vm478_vm1, %v12652_v54 }
 0x146   : > { %14957 = vmatprep.mubr.msk.f32.mxu0 %vm478_vm1, %v12653_v5  ;;  %v18024_v50 = vpop.f32.mrf.mxu1  ;;  %v1078_v32 = vadd.f32 %v1077_v57, %v17658_v39  ;;  %v12656_v5 = vld [vmem:[%s17015_s23 + $0x140] sm:$0xff] }
 0x147   : > { %v1497_v60 = vpop.f32.mrf.mxu0  ;;  %22575 = vst [vmem:[#allocation22_spill] sm:$0xff] %v18024_v50  ;;  %v12821_v50 = vld [vmem:[%s17015_s23 + $0x152] sm:$0xff] }
 0x148   : > { %v12657_v60 = vld [vmem:[%s17015_s23 + $0x150] sm:$0xff]  ;;  %v18030_v38 = vpop.f32.mrf.mxu1 }
 0x149   : > { %v14687_v49 = vpop.f32.mrf.mxu0  ;;  %14958 = vmatmul.mubr.msk.f32.gmra.mxu0 %vm478_vm1, %v12654_v44 }
 0x14a   : > { %v1691_v54 = vadd.f32 %v14687_v49, %v1083_v1  ;;  %14960 = vmatprep.mubr.msk.f32.mxu0 %vm478_vm1, %v12655_v23  ;;  %v18039_v39 = vpop.f32.mrf.mxu1  ;;  %v1088_v23 = vadd.f32 %v1087_v4, %v17668_v22  ;;  %v12658_v1 = vld [vmem:[%s17015_s23 + $0x158] sm:$0xff] }
 0x14b   : > { %v1507_v28 = vpop.f32.mrf.mxu0  ;;  %22576 = vst [vmem:[#allocation23_spill] sm:$0xff] %v18039_v39  ;;  %v22595_v39 = vld [vmem:[#allocation8_spill] sm:$0xff] }
 0x14c   : > { %v18033_v14 = vadd.f32 %v1507_v28, %v1078_v32  ;;  %v18036_v12 = vadd.f32 %v17871_v17, %v1691_v54  ;;  %v18045_v28 = vpop.f32.mrf.mxu1  ;;  %v1103_v17 = vadd.f32 %v17970_v11, %v17674_v47  ;;  %v12661_v11 = vld [vmem:[%s17015_s23 + $0x180] sm:$0xff] }
 0x14d   : > { %v14690_v44 = vpop.f32.mrf.mxu0  ;;  %14961 = vmatmul.mubr.msk.f32.gmra.mxu0 %vm478_vm1, %v12656_v5  ;;  %v12660_v5 = vld [vmem:[%s17015_s23 + $0x170] sm:$0xff] }
 0x14e   : > { %v1693_v57 = vadd.f32 %v14690_v44, %v1093_v20  ;;  %14963 = vmatprep.mubr.msk.f32.mxu0 %vm478_vm1, %v12657_v60  ;;  %v18055_v22 = vpop.f32.mrf.mxu1  ;;  %v1098_v20 = vadd.f32 %v17977_v58, %v17683_v48  ;;  %v1108_v58 = vadd.f32 %v17989_v53, %v17699_v52  ;;  %v1118_v53 = vadd.f32 %v18001_v18, %v17715_v59  ;;  %v12666_v18 = vld [vmem:[%s17015_s23 + $0x1b8] sm:$0xff] }
 0x14f   : > { %v1517_v49 = vpop.f32.mrf.mxu0  ;;  %22577 = vst [vmem:[#allocation24_spill] sm:$0xff] %v18055_v22 }
 0x150   : > { %v18049_v33 = vadd.f32 %v1517_v49, %v1088_v23  ;;  %v18052_v32 = vadd.f32 %v17890_v7, %v1693_v57  ;;  %v18062_v60 = vpop.f32.mrf.mxu1  ;;  %v1113_v7 = vadd.f32 %v17982_v8, %v17690_v51  ;;  %v12662_v49 = vld [vmem:[%s17015_s23 + $0x188] sm:$0xff]  ;;  %v12663_v8 = vld [vmem:[%s17015_s23 + $0x198] sm:$0xff] }
 0x151   : > { %v14693_v54 = vpop.f32.mrf.mxu0  ;;  %14964 = vmatmul.mubr.msk.f32.gmra.mxu0 %vm478_vm1, %v12658_v1 }
 0x152   : > { %v1695_v4 = vadd.f32 %v14693_v54, %v1103_v17  ;;  %14966 = vmatprep.mubr.msk.f32.mxu0 %vm478_vm1, %v12659_v43  ;;  %v18072_v48 = vpop.f32.mrf.mxu1 }
 0x153   : > { %v1527_v47 = vpop.f32.mrf.mxu0  ;;  %22578 = vst [vmem:[#allocation25_spill] sm:$0xff] %v18072_v48  ;;  %v12813_v48 = vld [vmem:[%s17015_s23 + $0xf2] sm:$0xff] }
 0x154   : > { %v18066_v44 = vadd.f32 %v1527_v47, %v1098_v20  ;;  %v18069_v23 = vadd.f32 %v17904_v30, %v1695_v4  ;;  %v14797_v43 = vpop.f32.mrf.mxu1  ;;  %v1123_v30 = vadd.f32 %v17994_v3, %v17706_v56  ;;  %v12665_v56 = vld [vmem:[%s17015_s23 + $0x1b0] sm:$0xff] }
 0x155   : > { %v14696_v57 = vpop.f32.mrf.mxu0  ;;  %14967 = vmatmul.mubr.msk.f32.gmra.mxu0 %vm478_vm1, %v12660_v5  ;;  %v12664_v5 = vld [vmem:[%s17015_s23 + $0x1a0] sm:$0xff] }
 0x156   : > { %v1697_v1 = vadd.f32 %v14696_v57, %v1113_v7  ;;  %14969 = vmatprep.mubr.msk.f32.mxu0 %vm478_vm1, %v12661_v11  ;;  %v2140_v52 = vpop.f32.mrf.mxu1 }
 0x157   : > { %v1537_v51 = vpop.f32.mrf.mxu0 }
 0x158   : > { %v18081_v17 = vadd.f32 %v1537_v51, %v1108_v58  ;;  %v18084_v54 = vadd.f32 %v17918_v2, %v1697_v1  ;;  %v14800_v3 = vpop.f32.mrf.mxu1  ;;  %v12667_v1 = vld [vmem:[%s17015_s23 + $0x1c8] sm:$0xff] }
 0x159   : > { %v14699_v20 = vpop.f32.mrf.mxu0  ;;  %14970 = vmatmul.mubr.msk.f32.gmra.mxu0 %vm478_vm1, %v12662_v49 }
 0x15a   : > { %v1699_v4 = vadd.f32 %v14699_v20, %v1123_v30  ;;  %14972 = vmatprep.mubr.msk.f32.mxu0 %vm478_vm1, %v12663_v8  ;;  %v2150_v57 = vpop.f32.mrf.mxu1 }
 0x15b   : > { %v1547_v47 = vpop.f32.mrf.mxu0 }
 0x15c   : > { %v18092_v11 = vadd.f32 %v1547_v47, %v1118_v53  ;;  %v18095_v2 = vadd.f32 %v17930_v37, %v1699_v4  ;;  %v14867_v49 = vpop.f32.mrf.mxu1  ;;  %v12671_v47 = vld [vmem:[%s17015_s23 + $0x1f8] sm:$0xff] }
 0x15d   : > { %v14702_v7 = vpop.f32.mrf.mxu0  ;;  %14973 = vmatmul.mubr.msk.f32.gmra.mxu0 %vm478_vm1, %v12664_v5 }
 0x15e   : > { %v1701_v59 = vadd.f32 %v14702_v7, %v17725_v10  ;;  %14975 = vmatprep.mubr.msk.f32.mxu0 %vm478_vm1, %v12665_v56  ;;  %v2900_v43 = vpop.f32.mrf.mxu1  ;;  %v12668_v10 = vld [vmem:[%s17015_s23 + $0x1d0] sm:$0xff] }
 0x15f   : > { %v1557_v58 = vpop.f32.mrf.mxu0 }
 0x160   : > { %v18103_v51 = vadd.f32 %v1557_v58, %v17732_v15  ;;  %v18106_v8 = vadd.f32 %v17942_v24, %v1701_v59  ;;  %v14870_v52 = vpop.f32.mrf.mxu1  ;;  %v12797_v59 = vld [vmem:[%s17015_s23 + $0x32] sm:$0xff] }
 0x161   : > { %v14705_v37 = vpop.f32.mrf.mxu0  ;;  %14976 = vmatmul.mubr.msk.f32.gmra.mxu0 %vm478_vm1, %v12666_v18 }
 0x162   : > { %v1703_v30 = vadd.f32 %v14705_v37, %v17741_v42  ;;  %14978 = vmatprep.mubr.msk.f32.mxu0 %vm478_vm1, %v12667_v1  ;;  %v2910_v4 = vpop.f32.mrf.mxu1  ;;  %v12798_v1 = vld [vmem:[%s17015_s23 + $0x3a] sm:$0xff]  ;;  %v12799_v37 = vld [vmem:[%s17015_s23 + $0x4a] sm:$0xff] }
 0x163   : > { %v1567_v20 = vpop.f32.mrf.mxu0 }
 0x164   : > { %v18113_v53 = vadd.f32 %v1567_v20, %v17748_v27  ;;  %v18116_v15 = vadd.f32 %v17955_v21, %v1703_v30  ;;  %v18123_v56 = vpop.f32.mrf.mxu1  ;;  %v12800_v20 = vld [vmem:[%s17015_s23 + $0x52] sm:$0xff] }
 0x165   : > { %v14708_v24 = vpop.f32.mrf.mxu0  ;;  %14979 = vmatmul.mubr.msk.f32.gmra.mxu0 %vm478_vm1, %v12668_v10 }
 0x166   : > { %v1705_v5 = vadd.f32 %v14708_v24, %v17757_v46  ;;  %14981 = vmatprep.mubr.msk.f32.mxu0 %vm478_vm1, %v17525_v35  ;;  %v18133_v7 = vpop.f32.mrf.mxu1  ;;  %v12672_v46 = vld [vmem:[%s17015_s23 + $0x200] sm:$0xff] }
 0x167   : > { %v1577_v42 = vpop.f32.mrf.mxu0  ;;  %v12801_v24 = vld [vmem:[%s17015_s23 + $0x62] sm:$0xff] }
 0x168   : > { %v18126_v27 = vadd.f32 %v1577_v42, %v17765_v13  ;;  %v18129_v21 = vadd.f32 %v17967_v62, %v1705_v5  ;;  %v18139_v13 = vpop.f32.mrf.mxu1 }
 0x169   : > { %v14711_v3 = vpop.f32.mrf.mxu0  ;;  %14982 = vmatmul.mubr.msk.f32.gmra.mxu0 %vm478_vm1, %v17535_v40 }
 0x16a   : > { %v1707_v35 = vadd.f32 %v14711_v3, %v17775_v29  ;;  %14984 = vmatprep.mubr.msk.f32.mxu0 %vm478_vm1, %v12671_v47  ;;  %v18148_v40 = vpop.f32.mrf.mxu1  ;;  %v12802_v3 = vld [vmem:[%s17015_s23 + $0x6a] sm:$0xff] }
 0x16b   : > { %v1587_v57 = vpop.f32.mrf.mxu0 }
 0x16c   : > { %v18142_v62 = vadd.f32 %v1587_v57, %v17783_v63  ;;  %v18145_v18 = vadd.f32 %v17980_v6, %v1707_v35  ;;  %v18154_v43 = vpop.f32.mrf.mxu1 }
 0x16d   : > { %v14714_v58 = vpop.f32.mrf.mxu0  ;;  %14985 = vmatmul.mubr.msk.f32.gmra.mxu0 %vm478_vm1, %v12672_v46  ;;  %v12803_v46 = vld [vmem:[%s17015_s23 + $0x7a] sm:$0xff] }
 0x16e   : > { %v1709_v29 = vadd.f32 %v14714_v58, %v17793_v19  ;;  %15051 = vmatprep.mubr.msk.f32.mxu0 %vm478_vm1, %v12797_v59  ;;  %v18163_v10 = vpop.f32.mrf.mxu1  ;;  %v12894_v59 = vld [vmem:[%s22483_s3 + $0xf0] sm:$0xff] }
 0x16f   : > { %v1597_v49 = vpop.f32.mrf.mxu0 }
 0x170   : > { %v18157_v63 = vadd.f32 %v1597_v49, %v17801_v45  ;;  %v18160_v6 = vadd.f32 %v17992_v41, %v1709_v29  ;;  %v12895_v45 = vld [vmem:[%s22483_s3 + $0xf8] sm:$0xff]  ;;  %v18172_v41 = vpop.f32.mrf.mxu1 }
 0x171   : > { %v14717_v30 = vpop.f32.mrf.mxu0  ;;  %15052 = vmatmul.mubr.msk.f32.vlgmr.msra.gmra.mxu0 %vm478_vm1, %v12798_v1  ;;  %15111 = vmatprep.subr.mxu1 %v12895_v45  ;;  %v12805_v1 = vld [vmem:[%s17015_s23 + $0x92] sm:$0xff] }
 0x172   : > { %v1711_v19 = vadd.f32 %v14717_v30, %v17811_v36  ;;  %15054 = vmatprep.mubr.msk.f32.mxu0 %vm478_vm1, %v12799_v37  ;;  %15112 = vmatpush3.msra.mxu1 %v12895_v45  ;;  %v18181_v42 = vpop.f32.mrf.mxu1 }
 0x173   : > { %v1607_v52 = vpop.f32.mrf.mxu0  ;;  %15113 = vmatprep.subr.mxu1 %v12894_v59 }
 0x174   : > { %v18175_v4 = vadd.f32 %v1607_v52, %v17817_v25  ;;  %v18178_v5 = vadd.f32 %v18004_v0, %v1711_v19  ;;  %v18187_v25 = vpop.f32.mrf.mxu1  ;;  %15114 = vmatpush3.msra.mxu1 %v12894_v59  ;;  %v12807_v52 = vld [vmem:[%s17015_s23 + $0xaa] sm:$0xff] }
 0x175   : > { %v14720_v36 = vpop.f32.mrf.mxu0  ;;  %15055 = vmatmul.mubr.msk.f32.gmra.mxu0 %vm478_vm1, %v12800_v20 }
 0x176   : > { %22579 = vst [vmem:[#allocation26_spill] sm:$0xff] %v18175_v4  ;;  %v1713_v47 = vadd.f32 %v14720_v36, %v17825_v26  ;;  %15057 = vmatprep.mubr.msk.f32.mxu0 %vm478_vm1, %v12801_v24  ;;  %v18199_v26 = vpop.f32.mrf.mxu1  ;;  %v22582_v36 = vld [vmem:[#allocation5_spill] sm:$0xff] }
 0x177   : > { %v1617_v35 = vpop.f32.mrf.mxu0 }
 0x178   : > { %v18190_v0 = vadd.f32 %v1617_v35, %v17831_v61  ;;  %v18193_v57 = vadd.f32 %v18012_v55, %v1713_v47  ;;  %v12804_v61 = vld [vmem:[%s17015_s23 + $0x82] sm:$0xff]  ;;  %v18205_v49 = vpop.f32.mrf.mxu1 }
 0x179   : > { %v14723_v58 = vpop.f32.mrf.mxu0  ;;  %15058 = vmatmul.mubr.msk.f32.gmra.mxu0 %vm478_vm1, %v12802_v3 }
 0x17a   : > { %22580 = vst [vmem:[#allocation27_spill] sm:$0xff] %v18190_v0  ;;  %v1715_v29 = vadd.f32 %v14723_v58, %v17839_v9  ;;  %15060 = vmatprep.mubr.msk.f32.mxu0 %vm478_vm1, %v12803_v46  ;;  %v12893_v9 = vld [vmem:[%s22483_s3 + $0xe8] sm:$0xff]  ;;  %v18217_v20 = vpop.f32.mrf.mxu1  ;;  %v12808_v58 = vld [vmem:[%s17015_s23 + $0xb2] sm:$0xff] }
 0x17b   : > { %v1627_v55 = vpop.f32.mrf.mxu0  ;;  %15115 = vmatprep.subr.mxu1 %v12893_v9 }
 0x17c   : > { %v18208_v37 = vadd.f32 %v1627_v55, %v17845_v16  ;;  %v18211_v30 = vadd.f32 %v18020_v31, %v1715_v29  ;;  %v12806_v16 = vld [vmem:[%s17015_s23 + $0x9a] sm:$0xff]  ;;  %15116 = vmatpush3.msra.mxu1 %v12893_v9  ;;  %v18223_v24 = vpop.f32.mrf.mxu1  ;;  %v12809_v55 = vld [vmem:[%s17015_s23 + $0xc2] sm:$0xff] }
 0x17d   : > { %v14726_v19 = vpop.f32.mrf.mxu0  ;;  %15061 = vmatmul.mubr.msk.f32.gmra.mxu0 %vm478_vm1, %v12804_v61  ;;  %v12892_v29 = vld [vmem:[%s22483_s3 + $0xe0] sm:$0xff] }
 0x17e   : > { %22581 = vst [vmem:[#allocation28_spill] sm:$0xff] %v18208_v37  ;;  %v1717_v45 = vadd.f32 %v14726_v19, %v17853_v34  ;;  %15063 = vmatprep.mubr.msk.f32.mxu0 %vm478_vm1, %v12805_v1  ;;  %v18232_v46 = vpop.f32.mrf.mxu1  ;;  %v22584_v34 = vld [vmem:[#allocation6_spill] sm:$0xff]  ;;  %15117 = vmatprep.subr.mxu1 %v12892_v29  ;;  %v22585_v1 = vld [vmem:[#allocation7_spill] sm:$0xff] }
 0x17f   : > { %v1637_v31 = vpop.f32.mrf.mxu0  ;;  %15118 = vmatpush3.msra.mxu1 %v12892_v29  ;;  %v22588_v29 = vld [vmem:[#allocation10_spill] sm:$0xff] }
 0x180   : > { %v18226_v47 = vadd.f32 %v1637_v31, %v22582_v36  ;;  %v18229_v3 = vadd.f32 %v18030_v38, %v1717_v45  ;;  %v18241_v38 = vpop.f32.mrf.mxu1  ;;  %v22587_v31 = vld [vmem:[#allocation9_spill] sm:$0xff] }
 0x181   : > { %v14729_v35 = vpop.f32.mrf.mxu0  ;;  %15064 = vmatmul.mubr.msk.f32.gmra.mxu0 %vm478_vm1, %v12806_v16  ;;  %v12810_v36 = vld [vmem:[%s17015_s23 + $0xca] sm:$0xff] }
 0x182   : > { %22583 = vst [vmem:[#allocation5_spill] sm:$0xff] %v18226_v47  ;;  %v1719_v59 = vadd.f32 %v14729_v35, %v22584_v34  ;;  %15066 = vmatprep.mubr.msk.f32.mxu0 %vm478_vm1, %v12807_v52  ;;  %v18250_v16 = vpop.f32.mrf.mxu1  ;;  %v12891_v35 = vld [vmem:[%s22483_s3 + $0xd8] sm:$0xff] }
 0x183   : > { %v1647_v61 = vpop.f32.mrf.mxu0  ;;  %15119 = vmatprep.subr.mxu1 %v12891_v35 }
 0x184   : > { %v18244_v9 = vadd.f32 %v1647_v61, %v22585_v1  ;;  %v18247_v19 = vadd.f32 %v18045_v28, %v1719_v59  ;;  %v12811_v28 = vld [vmem:[%s17015_s23 + $0xda] sm:$0xff]  ;;  %v18259_v59 = vpop.f32.mrf.mxu1  ;;  %15120 = vmatpush3.msra.mxu1 %v12891_v35 }
 0x185   : > { %v14732_v45 = vpop.f32.mrf.mxu0  ;;  %15067 = vmatmul.mubr.msk.f32.gmra.mxu0 %vm478_vm1, %v12808_v58 }
 0x186   : > { %22586 = vst [vmem:[#allocation6_spill] sm:$0xff] %v18244_v9  ;;  %v1721_v52 = vadd.f32 %v14732_v45, %v22587_v31  ;;  %15069 = vmatprep.mubr.msk.f32.mxu0 %vm478_vm1, %v12809_v55  ;;  %v18268_v1 = vpop.f32.mrf.mxu1  ;;  %v12812_v45 = vld [vmem:[%s17015_s23 + $0xe2] sm:$0xff] }
 0x187   : > { %v1657_v34 = vpop.f32.mrf.mxu0  ;;  %22590 = vst [vmem:[#allocation9_spill] sm:$0xff] %v18268_v1 }
 0x188   : > { %v18262_v58 = vadd.f32 %v1657_v34, %v22588_v29  ;;  %v18265_v61 = vadd.f32 %v18062_v60, %v1721_v52  ;;  %v18273_v22 = vpop.f32.mrf.mxu1  ;;  %v12890_v60 = vld [vmem:[%s22483_s3 + $0xd0] sm:$0xff] }
 0x189   : > { %v14735_v55 = vpop.f32.mrf.mxu0  ;;  %15070 = vmatmul.mubr.msk.f32.gmra.mxu0 %vm478_vm1, %v12810_v36  ;;  %15121 = vmatprep.subr.mxu1 %v12890_v60  ;;  %v12814_v36 = vld [vmem:[%s17015_s23 + $0xfa] sm:$0xff] }
 0x18a   : > { %22589 = vst [vmem:[#allocation7_spill] sm:$0xff] %v18262_v58  ;;  %15072 = vmatprep.mubr.msk.f32.mxu0 %vm478_vm1, %v12811_v28  ;;  %v18279_v35 = vpop.f32.mrf.mxu1  ;;  %15122 = vmatpush3.msra.mxu1 %v12890_v60  ;;  %v12815_v28 = vld [vmem:[%s17015_s23 + $0x10a] sm:$0xff] }
 0x18b   : > { %v1667_v31 = vpop.f32.mrf.mxu0  ;;  %22591 = vst [vmem:[#allocation10_spill] sm:$0xff] %v18279_v35  ;;  %v12889_v55 = vld [vmem:[%s22483_s3 + $0xc8] sm:$0xff] }
 0x18c   : > { %v18284_v29 = vpop.f32.mrf.mxu1  ;;  %15123 = vmatprep.subr.mxu1 %v12889_v55 }
 0x18d   : > { %v14738_v52 = vpop.f32.mrf.mxu0  ;;  %15073 = vmatmul.mubr.msk.f32.gmra.mxu0 %vm478_vm1, %v12812_v45  ;;  %15124 = vmatpush3.msra.mxu1 %v12889_v55  ;;  %v12819_v55 = vld [vmem:[%s17015_s23 + $0x13a] sm:$0xff] }
 0x18e   : > { %15075 = vmatprep.mubr.msk.f32.mxu0 %vm478_vm1, %v12813_v48  ;;  %v18290_v45 = vpop.f32.mrf.mxu1  ;;  %v12816_v48 = vld [vmem:[%s17015_s23 + $0x112] sm:$0xff]  ;;  %v12817_v52 = vld [vmem:[%s17015_s23 + $0x122] sm:$0xff] }
 0x18f   : > { %v1677_v34 = vpop.f32.mrf.mxu0  ;;  %22592 = vst [vmem:[#allocation29_spill] sm:$0xff] %v18290_v45  ;;  %v12822_v45 = vld [vmem:[%s17015_s23 + $0x15a] sm:$0xff] }
 0x190   : > { %v18295_v34 = vpop.f32.mrf.mxu1 }
 0x191   : > { %v14805_v31 = vpop.f32.mrf.mxu0  ;;  %15076 = vmatmul.mubr.msk.f32.gmra.mxu0 %vm478_vm1, %v12814_v36  ;;  %v12818_v36 = vld [vmem:[%s17015_s23 + $0x12a] sm:$0xff] }
 0x192   : > { %15078 = vmatprep.mubr.msk.f32.mxu0 %vm478_vm1, %v12815_v28  ;;  %v18298_v9 = vpop.f32.mrf.mxu1  ;;  %v12888_v28 = vld [vmem:[%s22483_s3 + $0xc0] sm:$0xff] }
 0x193   : > { %v2430_v60 = vpop.f32.mrf.mxu0  ;;  %22593 = vst [vmem:[#allocation30_spill] sm:$0xff] %v18298_v9  ;;  %15125 = vmatprep.subr.mxu1 %v12888_v28  ;;  %v12820_v9 = vld [vmem:[%s17015_s23 + $0x142] sm:$0xff] }
 0x194   : > { %v18306_v60 = vpop.f32.mrf.mxu1  ;;  %15126 = vmatpush3.msra.mxu1 %v12888_v28 }
 0x195   : > { %v14808_v58 = vpop.f32.mrf.mxu0  ;;  %15079 = vmatmul.mubr.msk.f32.gmra.mxu0 %vm478_vm1, %v12816_v48 }
 0x196   : > { %15081 = vmatprep.mubr.msk.f32.mxu0 %vm478_vm1, %v12817_v52  ;;  %v18309_v48 = vpop.f32.mrf.mxu1  ;;  %v2163_v52 = vadd.f32 %v22595_v39, %v18033_v14 }
 0x197   : > { %v2440_v31 = vpop.f32.mrf.mxu0  ;;  %22594 = vst [vmem:[#allocation31_spill] sm:$0xff] %v18309_v48 }
 0x198   : > { %v12887_v31 = vld [vmem:[%s22483_s3 + $0xb8] sm:$0xff]  ;;  %v18320_v37 = vpop.f32.mrf.mxu1 }
 0x199   : > { %v14811_v58 = vpop.f32.mrf.mxu0  ;;  %15082 = vmatmul.mubr.msk.f32.gmra.mxu0 %vm478_vm1, %v12818_v36  ;;  %15127 = vmatprep.subr.mxu1 %v12887_v31 }
 0x19a   : > { %v2634_v47 = vadd.f32 %v14811_v58, %v18036_v12  ;;  %15084 = vmatprep.mubr.msk.f32.mxu0 %vm478_vm1, %v12819_v55  ;;  %15128 = vmatpush3.msra.mxu1 %v12887_v31  ;;  %v18328_v39 = vpop.f32.mrf.mxu1  ;;  %v22597_v55 = vld [vmem:[#allocation11_spill] sm:$0xff] }
 0x19b   : > { %v2450_v28 = vpop.f32.mrf.mxu0  ;;  %22596 = vst [vmem:[#allocation8_spill] sm:$0xff] %v18328_v39  ;;  %v2165_v58 = vadd.f32 %v22597_v55, %v18049_v33  ;;  %v12886_v33 = vld [vmem:[%s22483_s3 + $0xb0] sm:$0xff]  ;;  %v12827_v39 = vld [vmem:[%s17015_s23 + $0x19a] sm:$0xff] }
 0x19c   : > { %v18322_v36 = vadd.f32 %v2450_v28, %v2163_v52  ;;  %v18325_v14 = vadd.f32 %v18123_v56, %v2634_v47  ;;  %v12823_v28 = vld [vmem:[%s17015_s23 + $0x16a] sm:$0xff]  ;;  %v18336_v56 = vpop.f32.mrf.mxu1  ;;  %15129 = vmatprep.subr.mxu1 %v12886_v33 }
 0x19d   : > { %v14814_v12 = vpop.f32.mrf.mxu0  ;;  %15085 = vmatmul.mubr.msk.f32.gmra.mxu0 %vm478_vm1, %v12820_v9  ;;  %15130 = vmatpush3.msra.mxu1 %v12886_v33 }
 0x19e   : > { %v2636_v48 = vadd.f32 %v14814_v12, %v18052_v32  ;;  %15087 = vmatprep.mubr.msk.f32.mxu0 %vm478_vm1, %v12821_v50  ;;  %v18347_v32 = vpop.f32.mrf.mxu1  ;;  %v22599_v50 = vld [vmem:[#allocation12_spill] sm:$0xff] }
 0x19f   : > { %v2460_v52 = vpop.f32.mrf.mxu0  ;;  %22598 = vst [vmem:[#allocation11_spill] sm:$0xff] %v18347_v32  ;;  %v2167_v12 = vadd.f32 %v22599_v50, %v18066_v44  ;;  %v22601_v50 = vld [vmem:[#allocation13_spill] sm:$0xff] }
 0x1a0   : > { %v18338_v47 = vadd.f32 %v2460_v52, %v2165_v58  ;;  %v18341_v9 = vadd.f32 %v18139_v13, %v2636_v48  ;;  %v12824_v58 = vld [vmem:[%s17015_s23 + $0x172] sm:$0xff]  ;;  %v12825_v52 = vld [vmem:[%s17015_s23 + $0x182] sm:$0xff] }
 0x1a1   : > { %v14817_v31 = vpop.f32.mrf.mxu0  ;;  %15088 = vmatmul.mubr.msk.f32.gmra.mxu0 %vm478_vm1, %v12822_v45  ;;  %v12911_v13 = vld [vmem:[%s22483_s3 + $0x178] sm:$0xff]  ;;  %v18358_v45 = vpop.f32.mrf.mxu1 }
 0x1a2   : > { %v2638_v55 = vadd.f32 %v14817_v31, %v18069_v23  ;;  %15090 = vmatprep.mubr.msk.f32.mxu0 %vm478_vm1, %v12823_v28  ;;  %15283 = vmatprep.subr.mxu0 %v12911_v13  ;;  %v12885_v23 = vld [vmem:[%s22483_s3 + $0xa8] sm:$0xff]  ;;  %v12910_v28 = vld [vmem:[%s22483_s3 + $0x170] sm:$0xff] }
 0x1a3   : > { %v2470_v48 = vpop.f32.mrf.mxu0  ;;  %15284 = vmatpush3.msra.mxu0 %v12911_v13  ;;  %v18372_v31 = vpop.f32.mrf.mxu1  ;;  %15131 = vmatprep.subr.mxu1 %v12885_v23  ;;  %v12909_v13 = vld [vmem:[%s22483_s3 + $0x168] sm:$0xff] }
 0x1a4   : > { %v18360_v32 = vadd.f32 %v2470_v48, %v2167_v12  ;;  %v18363_v44 = vadd.f32 %v18154_v43, %v2638_v55  ;;  %22600 = vst [vmem:[#allocation12_spill] sm:$0xff] %v18372_v31  ;;  %v2169_v12 = vadd.f32 %v22601_v50, %v18081_v17  ;;  %v12826_v55 = vld [vmem:[%s17015_s23 + $0x18a] sm:$0xff]  ;;  %15132 = vmatpush3.msra.mxu1 %v12885_v23  ;;  %v12828_v50 = vld [vmem:[%s17015_s23 + $0x1a2] sm:$0xff] }
 0x1a5   : > { %v14820_v33 = vpop.f32.mrf.mxu0  ;;  %15091 = vmatmul.mubr.msk.f32.gmra.mxu0 %vm478_vm1, %v12824_v58  ;;  %v14921_v58 = vpop.f32.mrf.mxu1  ;;  %15285 = vmatprep.subr.mxu0 %v12910_v28 }
 0x1a6   : > { %v2640_v43 = vadd.f32 %v14820_v33, %v18084_v54  ;;  %15093 = vmatprep.mubr.msk.f32.mxu0 %vm478_vm1, %v12825_v52  ;;  %15286 = vmatpush3.msra.mxu0 %v12910_v28  ;;  %v12908_v54 = vld [vmem:[%s22483_s3 + $0x160] sm:$0xff]  ;;  %v12907_v28 = vld [vmem:[%s22483_s3 + $0x158] sm:$0xff] }
 0x1a7   : > { %v2480_v48 = vpop.f32.mrf.mxu0  ;;  %v3080_v23 = vpop.f32.mrf.mxu1  ;;  %15287 = vmatprep.subr.mxu0 %v12909_v13  ;;  %v12883_v58 = vld [vmem:[%s22483_s3 + $0x98] sm:$0xff] }
 0x1a8   : > { %v18383_v31 = vadd.f32 %v2480_v48, %v2169_v12  ;;  %v18386_v17 = vadd.f32 %v18172_v41, %v2640_v43  ;;  %15288 = vmatpush3.msra.mxu0 %v12909_v13  ;;  %v12884_v41 = vld [vmem:[%s22483_s3 + $0xa0] sm:$0xff]  ;;  %v12829_v43 = vld [vmem:[%s17015_s23 + $0x1b2] sm:$0xff] }
 0x1a9   : > { %v14823_v52 = vpop.f32.mrf.mxu0  ;;  %15094 = vmatmul.mubr.msk.f32.gmra.mxu0 %vm478_vm1, %v12826_v55  ;;  %v14924_v55 = vpop.f32.mrf.mxu1  ;;  %15133 = vmatprep.subr.mxu1 %v12884_v41 }
 0x1aa   : > { %v2642_v33 = vadd.f32 %v14823_v52, %v18095_v2  ;;  %15096 = vmatprep.mubr.msk.f32.mxu0 %vm478_vm1, %v12827_v39  ;;  %15289 = vmatprep.subr.mxu0 %v12908_v54  ;;  %v12906_v39 = vld [vmem:[%s22483_s3 + $0x150] sm:$0xff] }
 0x1ab   : > { %v18401_v12 = vpop.f32.mrf.mxu0  ;;  %15134 = vmatpush3.msra.mxu1 %v12884_v41  ;;  %15290 = vmatpush3.msra.mxu0 %v12908_v54  ;;  %v3090_v48 = vpop.f32.mrf.mxu1  ;;  %v12905_v54 = vld [vmem:[%s22483_s3 + $0x148] sm:$0xff] }
 0x1ac   : > { %v18405_v2 = vadd.f32 %v18187_v25, %v2642_v33  ;;  %15291 = vmatprep.subr.mxu0 %v12907_v28  ;;  %v12830_v25 = vld [vmem:[%s17015_s23 + $0x1ba] sm:$0xff]  ;;  %v12831_v33 = vld [vmem:[%s17015_s23 + $0x1ca] sm:$0xff]  ;;  %15135 = vmatprep.subr.mxu1 %v12883_v58 }
 0x1ad   : > { %v14826_v13 = vpop.f32.mrf.mxu0  ;;  %15097 = vmatmul.mubr.msk.f32.gmra.mxu0 %vm478_vm1, %v12828_v50  ;;  %v14991_v50 = vpop.f32.mrf.mxu1  ;;  %15136 = vmatpush3.msra.mxu1 %v12883_v58 }
 0x1ae   : > { %v2644_v52 = vadd.f32 %v14826_v13, %v18106_v8  ;;  %15099 = vmatprep.mubr.msk.f32.mxu0 %vm478_vm1, %v12829_v43  ;;  %15292 = vmatpush3.msra.mxu0 %v12907_v28  ;;  %v12904_v8 = vld [vmem:[%s22483_s3 + $0x140] sm:$0xff]  ;;  %v12832_v13 = vld [vmem:[%s17015_s23 + $0x1d2] sm:$0xff] }
 0x1af   : > { %v18420_v23 = vpop.f32.mrf.mxu0  ;;  %15293 = vmatprep.subr.mxu0 %v12906_v39  ;;  %v3843_v43 = vpop.f32.mrf.mxu1 }
 0x1b0   : > { %v18424_v41 = vadd.f32 %v18205_v49, %v2644_v52  ;;  %15294 = vmatpush3.msra.mxu0 %v12906_v39  ;;  %v12882_v49 = vld [vmem:[%s22483_s3 + $0x90] sm:$0xff]  ;;  %v12903_v39 = vld [vmem:[%s22483_s3 + $0x138] sm:$0xff]  ;;  %v12751_v52 = vld [vmem:[%s17015_s23 + $0x1e1] sm:$0xff] }
 0x1b1   : > { %v14829_v28 = vpop.f32.mrf.mxu0  ;;  %15100 = vmatmul.mubr.msk.f32.gmra.mxu0 %vm478_vm1, %v12830_v25  ;;  %15295 = vmatprep.subr.mxu0 %v12905_v54  ;;  %v14994_v58 = vpop.f32.mrf.mxu1  ;;  %v12902_v25 = vld [vmem:[%s22483_s3 + $0x130] sm:$0xff] }
 0x1b2   : > { %v2646_v55 = vadd.f32 %v14829_v28, %v18116_v15  ;;  %15102 = vmatprep.mubr.msk.f32.mxu0 %vm478_vm1, %v12831_v33  ;;  %15296 = vmatpush3.msra.mxu0 %v12905_v54  ;;  %v18451_v54 = vld [vmem:[%s22483_s3 + $0x88] sm:$0xff] }
 0x1b3   : > { %v18439_v48 = vpop.f32.mrf.mxu0  ;;  %15297 = vmatprep.subr.mxu0 %v12904_v8  ;;  %15137 = vmatprep.subr.mxu1 %v12882_v49  ;;  %v3853_v50 = vpop.f32.mrf.mxu1  ;;  %v12752_v28 = vld [vmem:[%s17015_s23 + $0x1e9] sm:$0xff] }
 0x1b4   : > { %v18443_v15 = vadd.f32 %v18223_v24, %v2646_v55  ;;  %15298 = vmatpush3.msra.mxu0 %v12904_v8  ;;  %15138 = vmatpush3.msra.mxu1 %v12882_v49  ;;  %v18459_v8 = vld [vmem:[%s22483_s3 + $0x128] sm:$0xff] }
 0x1b5   : > { %v14832_v33 = vpop.f32.mrf.mxu0  ;;  %15103 = vmatmul.mubr.msk.f32.gmra.mxu0 %vm478_vm1, %v12832_v13  ;;  %15299 = vmatprep.subr.mxu0 %v12903_v39  ;;  %v16921_v13 = vmov 0.0   ;;  %v12833_v49 = vld [vmem:[%s17015_s23 + $0x1e2] sm:$0xff] }
 0x1b6   : > { %v2648_v24 = vadd.f32 %v14832_v33, %v18129_v21  ;;  %15300 = vmatpush3.msra.mxu0 %v12903_v39  ;;  %15043 = vmatprep.mubr.msk.f32.mxu1 %vm478_vm1, %v12751_v52  ;;  %v18472_v21 = vld [vmem:[%s22483_s3 + $0x120] sm:$0xff]  ;;  %4840 = vst [vmem:[#allocation2 + $0x1] sm:$0xff] %v16921_v13  ;;  %4720 = vst [vmem:[#allocation2] sm:$0x1] %v16921_v13  ;;  %v12834_v52 = vld [vmem:[%s17015_s23 + $0x1ea] sm:$0xff] }
 0x1b7   : > { %v18462_v43 = vpop.f32.mrf.mxu0  ;;  %15301 = vmatprep.subr.mxu0 %v12902_v25  ;;  %15139 = vmatprep.subr.mxu1 %v18451_v54  ;;  %4721 = vst [vmem:[#allocation2 + $0x18] sm:$0x1] %v16921_v13  ;;  %4722 = vst [vmem:[#allocation2 + $0x30] sm:$0x1] %v16921_v13  ;;  %v12753_v39 = vld [vmem:[%s17015_s23 + $0x1f9] sm:$0xff]  ;;  %v12754_v33 = vld [vmem:[%s17015_s23 + $0x201] sm:$0xff] }
 0x1b8   : > { %v18466_v55 = vadd.f32 %v18241_v38, %v2648_v24  ;;  %15302 = vmatpush3.msra.mxu0 %v12902_v25  ;;  %15044 = vmatmul.mubr.msk.f32.gmra.mxu1 %vm478_vm1, %v12752_v28  ;;  %4723 = vst [vmem:[#allocation2 + $0x48] sm:$0x1] %v16921_v13  ;;  %4724 = vst [vmem:[#allocation2 + $0x60] sm:$0x1] %v16921_v13  ;;  %v12899_v25 = vld [vmem:[%s22483_s3 + $0x118] sm:$0xff]  ;;  %v12898_v28 = vld [vmem:[%s22483_s3 + $0x110] sm:$0xff] }
 0x1b9   : > { %4725 = vst [vmem:[#allocation2 + $0x78] sm:$0x1] %v16921_v13  ;;  %4726 = vst [vmem:[#allocation2 + $0x90] sm:$0x1] %v16921_v13  ;;  %v14835_v38 = vpop.f32.mrf.mxu0  ;;  %15303 = vmatprep.subr.mxu0 %v18459_v8  ;;  %15140 = vmatpush3.msra.mxu1 %v18451_v54 }
 0x1ba   : > { %4727 = vst [vmem:[#allocation2 + $0xa8] sm:$0x1] %v16921_v13  ;;  %4728 = vst [vmem:[#allocation2 + $0xc0] sm:$0x1] %v16921_v13  ;;  %v2650_v58 = vadd.f32 %v14835_v38, %v18145_v18  ;;  %15304 = vmatpush3.msra.mxu0 %v18459_v8  ;;  %15105 = vmatprep.mubr.msk.f32.mxu0 %vm478_vm1, %v12833_v49  ;;  %v12880_v18 = vld [vmem:[%s22483_s3 + $0x80] sm:$0xff] }
 0x1bb   : > { %4729 = vst [vmem:[#allocation2 + $0xd8] sm:$0x1] %v16921_v13  ;;  %4730 = vst [vmem:[#allocation2 + $0xf0] sm:$0x1] %v16921_v13  ;;  %v18574_v50 = vpop.f32.mrf.mxu0  ;;  %15305 = vmatprep.subr.mxu0 %v18472_v21  ;;  %15106 = vmatmul.mubr.msk.f32.gmra.mxu0 %vm478_vm1, %v12834_v52  ;;  %v12835_v8 = vld [vmem:[%s17015_s23 + $0x1fa] sm:$0xff]  ;;  %v12836_v49 = vld [vmem:[%s17015_s23 + $0x202] sm:$0xff] }
 0x1bc   : > { %4731 = vst [vmem:[#allocation2 + $0x108] sm:$0x1] %v16921_v13  ;;  %4732 = vst [vmem:[#allocation2 + $0x120] sm:$0x1] %v16921_v13  ;;  %v18582_v54 = vadd.f32 %v18259_v59, %v2650_v58  ;;  %15306 = vmatpush3.msra.mxu0 %v18472_v21  ;;  %15046 = vmatprep.mubr.msk.f32.mxu1 %vm478_vm1, %v12753_v39  ;;  %v12897_v59 = vld [vmem:[%s22483_s3 + $0x108] sm:$0xff] }
 0x1bd   : > { %4733 = vst [vmem:[#allocation2 + $0x138] sm:$0x1] %v16921_v13  ;;  %4734 = vst [vmem:[#allocation2 + $0x150] sm:$0x1] %v16921_v13  ;;  %v14838_v24 = vpop.f32.mrf.mxu0  ;;  %15307 = vmatprep.subr.mxu0 %v12899_v25  ;;  %15047 = vmatmul.mubr.msk.f32.gmra.mxu1 %vm478_vm1, %v12754_v33 }
 0x1be   : > { %4735 = vst [vmem:[#allocation2 + $0x168] sm:$0x1] %v16921_v13  ;;  %4736 = vst [vmem:[#allocation2 + $0x180] sm:$0x1] %v16921_v13  ;;  %v2652_v38 = vadd.f32 %v14838_v24, %v18160_v6  ;;  %15308 = vmatpush3.msra.mxu0 %v12899_v25  ;;  %15141 = vmatprep.subr.mxu1 %v12880_v18  ;;  %v12896_v6 = vld [vmem:[%s22483_s3 + $0x100] sm:$0xff] }
 0x1bf   : > { %4737 = vst [vmem:[#allocation2 + $0x198] sm:$0x1] %v16921_v13  ;;  %4738 = vst [vmem:[#allocation2 + $0x1b0] sm:$0x1] %v16921_v13  ;;  %v18596_v21 = vpop.f32.mrf.mxu0  ;;  %15309 = vmatprep.subr.mxu0 %v12898_v28  ;;  %15108 = vmatprep.mubr.msk.f32.mxu0 %vm478_vm1, %v12835_v8 }
 0x1c0   : > { %4739 = vst [vmem:[#allocation2 + $0x1c8] sm:$0x1] %v16921_v13  ;;  %4740 = vst [vmem:[#allocation2 + $0x11] sm:$0x1] %v16921_v13  ;;  %v18600_v39 = vadd.f32 %v18273_v22, %v2652_v38  ;;  %15142 = vmatpush3.msra.mxu1 %v12880_v18  ;;  %15310 = vmatpush3.msra.mxu0 %v12898_v28 }
 0x1c1   : > { %4741 = vst [vmem:[#allocation2 + $0x29] sm:$0x1] %v16921_v13  ;;  %4742 = vst [vmem:[#allocation2 + $0x41] sm:$0x1] %v16921_v13  ;;  %v14841_v58 = vpop.f32.mrf.mxu0  ;;  %15109 = vmatmul.mubr.msk.f32.gmra.mxu0 %vm478_vm1, %v12836_v49  ;;  %15311 = vmatprep.subr.mxu0 %v12897_v59 }
 0x1c2   : > { %4743 = vst [vmem:[#allocation2 + $0x59] sm:$0x1] %v16921_v13  ;;  %4744 = vst [vmem:[#allocation2 + $0x71] sm:$0x1] %v16921_v13  ;;  %v2654_v25 = vadd.f32 %v14841_v58, %v18178_v5  ;;  %15143 = vmatprep.mubr.f32.mxu1 %v16921_v13  ;;  %15312 = vmatpush3.msra.mxu0 %v12897_v59 }
 0x1c3   : > { %4745 = vst [vmem:[#allocation2 + $0x89] sm:$0x1] %v16921_v13  ;;  %4746 = vst [vmem:[#allocation2 + $0xa1] sm:$0x1] %v16921_v13  ;;  %v18608_v24 = vpop.f32.mrf.mxu0  ;;  %15144 = vmatmul.mubr.f32.vlgmr.msra.gmra.mxu1 %v16921_v13  ;;  %15313 = vmatprep.subr.mxu0 %v12896_v6 }
 0x1c4   : > { %4747 = vst [vmem:[#allocation2 + $0xb9] sm:$0x1] %v16921_v13  ;;  %4748 = vst [vmem:[#allocation2 + $0xd1] sm:$0x1] %v16921_v13  ;;  %v18612_v22 = vadd.f32 %v18284_v29, %v2654_v25  ;;  %15314 = vmatpush3.msra.mxu0 %v12896_v6  ;;  %15146 = vmatprep.mubr.f32.mxu1 %v16921_v13  ;;  %v4931_v29 = vld [vmem:[%s22483_s3 + $0x78] sm:$0xff] }
 0x1c5   : > { %4749 = vst [vmem:[#allocation2 + $0xe9] sm:$0x1] %v16921_v13  ;;  %4750 = vst [vmem:[#allocation2 + $0x101] sm:$0x1] %v16921_v13  ;;  %v14844_v18 = vpop.f32.mrf.mxu0  ;;  %15197 = vmatprep.subr.mxu1 %v4931_v29 }
 0x1c6   : > { %4751 = vst [vmem:[#allocation2 + $0x119] sm:$0x1] %v16921_v13  ;;  %4752 = vst [vmem:[#allocation2 + $0x131] sm:$0x1] %v16921_v13  ;;  %v2656_v5 = vadd.f32 %v14844_v18, %v18193_v57  ;;  %15198 = vmatpush3.msra.mxu1 %v4931_v29 }
 0x1c7   : > { %4753 = vst [vmem:[#allocation2 + $0x149] sm:$0x1] %v16921_v13  ;;  %4754 = vst [vmem:[#allocation2 + $0x161] sm:$0x1] %v16921_v13  ;;  %v18616_v38 = vpop.f32.mrf.mxu0  ;;  %15147 = vmatmul.mubr.f32.gmra.mxu1 %v16921_v13 }
 0x1c8   : > { %4755 = vst [vmem:[#allocation2 + $0x179] sm:$0x1] %v16921_v13  ;;  %4756 = vst [vmem:[#allocation2 + $0x191] sm:$0x1] %v16921_v13  ;;  %v18620_v49 = vadd.f32 %v18295_v34, %v2656_v5  ;;  %v4930_v34 = vld [vmem:[%s22483_s3 + $0x70] sm:$0xff] }
 0x1c9   : > { %4757 = vst [vmem:[#allocation2 + $0x1a9] sm:$0x1] %v16921_v13  ;;  %4758 = vst [vmem:[#allocation2 + $0x1c1] sm:$0x1] %v16921_v13  ;;  %v14847_v59 = vpop.f32.mrf.mxu0  ;;  %15199 = vmatprep.subr.mxu1 %v4930_v34 }
 0x1ca   : > { %4759 = vst [vmem:[#allocation2 + $0x1d9] sm:$0x1] %v16921_v13  ;;  %4841 = vst [vmem:[#allocation2 + $0x9] sm:$0xff] %v16921_v13  ;;  %v2658_v6 = vadd.f32 %v14847_v59, %v18211_v30  ;;  %15200 = vmatpush3.msra.mxu1 %v4930_v34 }
 0x1cb   : > { %4842 = vst [vmem:[#allocation2 + $0x19] sm:$0xff] %v16921_v13  ;;  %4843 = vst [vmem:[#allocation2 + $0x21] sm:$0xff] %v16921_v13  ;;  %v18626_v57 = vpop.f32.mrf.mxu0 }
 0x1cc   : > { %4876 = vst [vmem:[#allocation2 + $0x1b1] sm:$0xff] %v16921_v13  ;;  %4877 = vst [vmem:[#allocation2 + $0x1b9] sm:$0xff] %v16921_v13  ;;  %v18629_v58 = vadd.f32 %v18306_v60, %v2658_v6  ;;  %v4929_v60 = vld [vmem:[%s22483_s3 + $0x68] sm:$0xff] }
 0x1cd   : > { %4878 = vst [vmem:[#allocation2 + $0x1c9] sm:$0xff] %v16921_v13  ;;  %4879 = vst [vmem:[#allocation2 + $0x1d1] sm:$0xff] %v16921_v13  ;;  %15201 = vmatprep.subr.mxu1 %v4929_v60 }
 0x1ce   : > { %8968 = vst [vmem:[#allocation3] sm:$0x1] %v16921_v13  ;;  %8969 = vst [vmem:[#allocation3 + $0x18] sm:$0x1] %v16921_v13  ;;  %15202 = vmatpush3.msra.mxu1 %v4929_v60 }
 0x1cf   : > { %8970 = vst [vmem:[#allocation3 + $0x30] sm:$0x1] %v16921_v13  ;;  %8971 = vst [vmem:[#allocation3 + $0x48] sm:$0x1] %v16921_v13 }
 0x1d0   : > { %8972 = vst [vmem:[#allocation3 + $0x60] sm:$0x1] %v16921_v13  ;;  %8973 = vst [vmem:[#allocation3 + $0x78] sm:$0x1] %v16921_v13 }
 0x1d1   : > { %8974 = vst [vmem:[#allocation3 + $0x90] sm:$0x1] %v16921_v13  ;;  %8975 = vst [vmem:[#allocation3 + $0xa8] sm:$0x1] %v16921_v13  ;;  %v5475_v52 = vld [vmem:[#allocation2 + $0x2] sm:$0xff]  ;;  %v5476_v33 = vld [vmem:[#allocation2 + $0xa] sm:$0xff] }
 0x1d2   : > { %8976 = vst [vmem:[#allocation3 + $0xc0] sm:$0x1] %v16921_v13  ;;  %8977 = vst [vmem:[#allocation3 + $0xd8] sm:$0x1] %v16921_v13  ;;  %15315 = vmatprep.mubr.f32.mxu0 %v5475_v52  ;;  %v5477_v28 = vld [vmem:[#allocation2 + $0x1a] sm:$0xff]  ;;  %v5478_v8 = vld [vmem:[#allocation2 + $0x22] sm:$0xff]  ;;  %v14850_v52 = vpop.f32.mrf.mxu0 }
 0x1d3   : > { %8978 = vst [vmem:[#allocation3 + $0xf0] sm:$0x1] %v16921_v13  ;;  %8979 = vst [vmem:[#allocation3 + $0x108] sm:$0x1] %v16921_v13  ;;  %15316 = vmatmul.mubr.f32.vlgmr.msra.gmra.mxu0 %v5476_v33 }
 0x1d4   : > { %8980 = vst [vmem:[#allocation3 + $0x120] sm:$0x1] %v16921_v13  ;;  %8981 = vst [vmem:[#allocation3 + $0x138] sm:$0x1] %v16921_v13  ;;  %15318 = vmatprep.mubr.f32.mxu0 %v5477_v28  ;;  %v18635_v25 = vpop.f32.mrf.mxu0 }
 0x1d5   : > { %8982 = vst [vmem:[#allocation3 + $0x150] sm:$0x1] %v16921_v13  ;;  %8983 = vst [vmem:[#allocation3 + $0x168] sm:$0x1] %v16921_v13 }
 0x1d6   : > { %8984 = vst [vmem:[#allocation3 + $0x180] sm:$0x1] %v16921_v13  ;;  %8985 = vst [vmem:[#allocation3 + $0x198] sm:$0x1] %v16921_v13  ;;  %v14853_v30 = vpop.f32.mrf.mxu0 }
 0x1d7   : > { %8986 = vst [vmem:[#allocation3 + $0x11] sm:$0x1] %v16921_v13  ;;  %8987 = vst [vmem:[#allocation3 + $0x29] sm:$0x1] %v16921_v13  ;;  %15319 = vmatmul.mubr.f32.gmra.mxu0 %v5478_v8  ;;  %v2662_v18 = vadd.f32 %v14853_v30, %v18247_v19  ;;  %v4925_v30 = vld [vmem:[%s22483_s3 + $0x48] sm:$0xff] }
 0x1d8   : > { %8988 = vst [vmem:[#allocation3 + $0x41] sm:$0x1] %v16921_v13  ;;  %8989 = vst [vmem:[#allocation3 + $0x59] sm:$0x1] %v16921_v13  ;;  %v18644_v28 = vpop.f32.mrf.mxu0 }
 0x1d9   : > { %8990 = vst [vmem:[#allocation3 + $0x71] sm:$0x1] %v16921_v13  ;;  %8991 = vst [vmem:[#allocation3 + $0x89] sm:$0x1] %v16921_v13 }
 0x1da   : > { %8992 = vst [vmem:[#allocation3 + $0xa1] sm:$0x1] %v16921_v13  ;;  %8993 = vst [vmem:[#allocation3 + $0xb9] sm:$0x1] %v16921_v13  ;;  %v14856_v5 = vpop.f32.mrf.mxu0 }
 0x1db   : > { %8994 = vst [vmem:[#allocation3 + $0xd1] sm:$0x1] %v16921_v13  ;;  %8995 = vst [vmem:[#allocation3 + $0xe9] sm:$0x1] %v16921_v13  ;;  %v2664_v8 = vadd.f32 %v14856_v5, %v18265_v61  ;;  %v4924_v5 = vld [vmem:[%s22483_s3 + $0x40] sm:$0xff] }
 0x1dc   : > { %8996 = vst [vmem:[#allocation3 + $0x101] sm:$0x1] %v16921_v13  ;;  %8997 = vst [vmem:[#allocation3 + $0x119] sm:$0x1] %v16921_v13  ;;  %v18653_v29 = vpop.f32.mrf.mxu0 }
 0x1dd   : > { %8998 = vst [vmem:[#allocation3 + $0x131] sm:$0x1] %v16921_v13  ;;  %8999 = vst [vmem:[#allocation3 + $0x149] sm:$0x1] %v16921_v13  ;;  %v18656_v19 = vadd.f32 %v18358_v45, %v2664_v8 }
 0x1de   : > { %9000 = vst [vmem:[#allocation3 + $0x161] sm:$0x1] %v16921_v13  ;;  %9001 = vst [vmem:[#allocation3 + $0x179] sm:$0x1] %v16921_v13  ;;  %v14859_v59 = vpop.f32.mrf.mxu0 }
 0x1df   : > { %9002 = vst [vmem:[#allocation3 + $0x191] sm:$0x1] %v16921_v13  ;;  %9003 = vst [vmem:[#allocation3 + $0x1a9] sm:$0x1] %v16921_v13  ;;  %v12943_v59 = vld [vmem:[%s22483_s3 + $0x278] sm:$0xff] }
 0x1e0   : > { %9076 = vst [vmem:[#allocation3 + $0x1] sm:$0xff] %v16921_v13  ;;  %9077 = vst [vmem:[#allocation3 + $0x9] sm:$0xff] %v16921_v13  ;;  %v2610_v6 = vpop.f32.mrf.mxu0  ;;  %15455 = vmatprep.subr.mxu0 %v12943_v59 }
 0x1e1   : > { %9110 = vst [vmem:[#allocation3 + $0x199] sm:$0xff] %v16921_v13  ;;  %9111 = vst [vmem:[#allocation3 + $0x1a1] sm:$0xff] %v16921_v13  ;;  %v2660_v13 = vadd.f32 %v14850_v52, %v18229_v3  ;;  %v18647_v3 = vadd.f32 %v18336_v56, %v2662_v18  ;;  %v4927_v56 = vld [vmem:[%s22483_s3 + $0x58] sm:$0xff]  ;;  %15456 = vmatpush3.msra.mxu0 %v12943_v59 }
 0x1e2   : > { %22602 = vst [vmem:[#allocation13_spill] sm:$0xff] %v18596_v21  ;;  %22603 = vst [vmem:[#allocation32_spill] sm:$0xff] %v18608_v24  ;;  %v14862_v61 = vpop.f32.mrf.mxu0  ;;  %v4923_v6 = vld [vmem:[%s22483_s3 + $0x38] sm:$0xff] }
 0x1e3   : > { %22604 = vst [vmem:[#allocation33_spill] sm:$0xff] %v18616_v38  ;;  %22605 = vst [vmem:[#allocation34_spill] sm:$0xff] %v18626_v57  ;;  %v18638_v33 = vadd.f32 %v18320_v37, %v2660_v13  ;;  %v4928_v37 = vld [vmem:[%s22483_s3 + $0x60] sm:$0xff]  ;;  %v4926_v13 = vld [vmem:[%s22483_s3 + $0x50] sm:$0xff] }
 0x1e4   : > { %22606 = vst [vmem:[#allocation35_spill] sm:$0xff] %v18635_v25  ;;  %22607 = vst [vmem:[#allocation36_spill] sm:$0xff] %v18644_v28  ;;  %15203 = vmatprep.subr.mxu1 %v4928_v37  ;;  %v2620_v52 = vpop.f32.mrf.mxu0  ;;  %v12942_v61 = vld [vmem:[%s22483_s3 + $0x270] sm:$0xff]  ;;  %v12931_v28 = vld [vmem:[%s22483_s3 + $0x218] sm:$0xff] }
 0x1e5   : > { %22608 = vst [vmem:[#allocation37_spill] sm:$0xff] %v18653_v29  ;;  %15204 = vmatpush3.msra.mxu1 %v4928_v37  ;;  %15457 = vmatprep.subr.mxu0 %v12942_v61  ;;  %v12928_v38 = vld [vmem:[%s22483_s3 + $0x200] sm:$0xff] }
 0x1e6   : > { %15205 = vmatprep.subr.mxu1 %v4927_v56  ;;  %v14929_v34 = vpop.f32.mrf.mxu0  ;;  %15458 = vmatpush3.msra.mxu0 %v12942_v61  ;;  %v12937_v61 = vld [vmem:[%s22483_s3 + $0x248] sm:$0xff] }
 0x1e7   : > { %15206 = vmatpush3.msra.mxu1 %v4927_v56 }
 0x1e8   : > { %15207 = vmatprep.subr.mxu1 %v4926_v13  ;;  %v3373_v45 = vpop.f32.mrf.mxu0 }
 0x1e9   : > { %15208 = vmatpush3.msra.mxu1 %v4926_v13  ;;  %v12941_v13 = vld [vmem:[%s22483_s3 + $0x268] sm:$0xff]  ;;  %v12940_v45 = vld [vmem:[%s22483_s3 + $0x260] sm:$0xff] }
 0x1ea   : > { %v14932_v18 = vpop.f32.mrf.mxu0  ;;  %15209 = vmatprep.subr.mxu1 %v4925_v30  ;;  %15459 = vmatprep.subr.mxu0 %v12941_v13 }
 0x1eb   : > { %15210 = vmatpush3.msra.mxu1 %v4925_v30  ;;  %15460 = vmatpush3.msra.mxu0 %v12941_v13 }
 0x1ec   : > { %v3383_v60 = vpop.f32.mrf.mxu0  ;;  %15211 = vmatprep.subr.mxu1 %v4924_v5  ;;  %15461 = vmatprep.subr.mxu0 %v12940_v45 }
 0x1ed   : > { %15212 = vmatpush3.msra.mxu1 %v4924_v5  ;;  %15462 = vmatpush3.msra.mxu0 %v12940_v45  ;;  %v12939_v60 = vld [vmem:[%s22483_s3 + $0x258] sm:$0xff]  ;;  %v12936_v45 = vld [vmem:[%s22483_s3 + $0x240] sm:$0xff] }
 0x1ee   : > { %v14935_v8 = vpop.f32.mrf.mxu0  ;;  %15213 = vmatprep.subr.mxu1 %v4923_v6  ;;  %15463 = vmatprep.subr.mxu0 %v12939_v60 }
 0x1ef   : > { %v18671_v37 = vadd.f32 %v14935_v8, %v18325_v14  ;;  %15214 = vmatpush3.msra.mxu1 %v4923_v6  ;;  %15464 = vmatpush3.msra.mxu0 %v12939_v60  ;;  %v4921_v6 = vld [vmem:[%s22483_s3 + $0x28] sm:$0xff]  ;;  %v4919_v60 = vld [vmem:[%s22483_s3 + $0x18] sm:$0xff] }
 0x1f0   : > { %v18676_v56 = vpop.f32.mrf.mxu0 }
 0x1f2   : > { %v14938_v52 = vpop.f32.mrf.mxu0 }
 0x1f3   : > { %v18685_v14 = vadd.f32 %v14938_v52, %v18341_v9  ;;  %v4922_v9 = vld [vmem:[%s22483_s3 + $0x30] sm:$0xff]  ;;  %v18718_v52 = vpop.f32.mrf.mxu1 }
 0x1f4   : > { %v18690_v34 = vpop.f32.mrf.mxu0  ;;  %15215 = vmatprep.subr.mxu1 %v4922_v9 }
 0x1f5   : > { %15216 = vmatpush3.msra.mxu1 %v4922_v9 }
 0x1f6   : > { %v14941_v30 = vpop.f32.mrf.mxu0  ;;  %15217 = vmatprep.subr.mxu1 %v4921_v6 }
 0x1f7   : > { %v18696_v18 = vadd.f32 %v14941_v30, %v18363_v44  ;;  %v12938_v44 = vld [vmem:[%s22483_s3 + $0x250] sm:$0xff]  ;;  %15218 = vmatpush3.msra.mxu1 %v4921_v6 }
 0x1f8   : > { %v18704_v5 = vpop.f32.mrf.mxu0  ;;  %15465 = vmatprep.subr.mxu0 %v12938_v44 }
 0x1f9   : > { %15466 = vmatpush3.msra.mxu0 %v12938_v44  ;;  %v12935_v44 = vld [vmem:[%s22483_s3 + $0x238] sm:$0xff] }
 0x1fa   : > { %v14944_v8 = vpop.f32.mrf.mxu0  ;;  %15467 = vmatprep.subr.mxu0 %v12937_v61 }
 0x1fb   : > { %v18710_v59 = vadd.f32 %v14944_v8, %v18386_v17  ;;  %v4920_v17 = vld [vmem:[%s22483_s3 + $0x20] sm:$0xff]  ;;  %15468 = vmatpush3.msra.mxu0 %v12937_v61  ;;  %v18737_v8 = vpop.f32.mrf.mxu1  ;;  %v12934_v61 = vld [vmem:[%s22483_s3 + $0x230] sm:$0xff] }
 0x1fc   : > { %v18720_v13 = vpop.f32.mrf.mxu0  ;;  %15219 = vmatprep.subr.mxu1 %v4920_v17  ;;  %15469 = vmatprep.subr.mxu0 %v12936_v45 }
 0x1fd   : > { %15220 = vmatpush3.msra.mxu1 %v4920_v17  ;;  %15470 = vmatpush3.msra.mxu0 %v12936_v45 }
 0x1fe   : > { %v14947_v30 = vpop.f32.mrf.mxu0  ;;  %15221 = vmatprep.subr.mxu1 %v4919_v60  ;;  %15471 = vmatprep.subr.mxu0 %v12935_v44 }
 0x1ff   : > { %v18729_v9 = vadd.f32 %v14947_v30, %v18405_v2  ;;  %15222 = vmatpush3.msra.mxu1 %v4919_v60  ;;  %15472 = vmatpush3.msra.mxu0 %v12935_v44  ;;  %v4918_v2 = vld [vmem:[%s22483_s3 + $0x10] sm:$0xff]  ;;  %v12933_v30 = vld [vmem:[%s22483_s3 + $0x228] sm:$0xff]  ;;  %v18756_v44 = vpop.f32.mrf.mxu1 }
 0x200   : > { %v18739_v6 = vpop.f32.mrf.mxu0  ;;  %15223 = vmatprep.subr.mxu1 %v4918_v2  ;;  %15473 = vmatprep.subr.mxu0 %v12934_v61  ;;  %v4917_v60 = vld [vmem:[%s22483_s3 + $0x8] sm:$0xff] }
 0x201   : > { %15224 = vmatpush3.msra.mxu1 %v4918_v2  ;;  %15474 = vmatpush3.msra.mxu0 %v12934_v61  ;;  %v4916_v2 = vld [vmem:[%s22483_s3] sm:$0xff]  ;;  %v18772_v25 = vpop.f32.mrf.mxu1 }
 0x202   : > { %v14950_v17 = vpop.f32.mrf.mxu0  ;;  %15475 = vmatprep.subr.mxu0 %v12933_v30  ;;  %15225 = vmatprep.subr.mxu1 %v4917_v60 }
 0x203   : > { %v18748_v45 = vadd.f32 %v14950_v17, %v18424_v41  ;;  %v12932_v41 = vld [vmem:[%s22483_s3 + $0x220] sm:$0xff]  ;;  %15476 = vmatpush3.msra.mxu0 %v12933_v30  ;;  %15226 = vmatpush3.msra.mxu1 %v4917_v60  ;;  %v12930_v60 = vld [vmem:[%s22483_s3 + $0x210] sm:$0xff] }
 0x204   : > { %v18758_v29 = vpop.f32.mrf.mxu0  ;;  %15477 = vmatprep.subr.mxu0 %v12932_v41  ;;  %15227 = vmatprep.subr.mxu1 %v4916_v2 }
 0x205   : > { %15478 = vmatpush3.msra.mxu0 %v12932_v41  ;;  %15228 = vmatpush3.msra.mxu1 %v4916_v2  ;;  %v12929_v41 = vld [vmem:[%s22483_s3 + $0x208] sm:$0xff]  ;;  %v18785_v2 = vpop.f32.mrf.mxu1 }
 0x206   : > { %v14953_v61 = vpop.f32.mrf.mxu0  ;;  %15479 = vmatprep.subr.mxu0 %v12931_v28 }
 0x207   : > { %v18767_v17 = vadd.f32 %v14953_v61, %v18443_v15  ;;  %15480 = vmatpush3.msra.mxu0 %v12931_v28  ;;  %v18795_v28 = vld [vmem:[%s22483_s3 + $0x1f8] sm:$0xff] }
 0x208   : > { %v18774_v30 = vpop.f32.mrf.mxu0  ;;  %15481 = vmatprep.subr.mxu0 %v12930_v60  ;;  %22610 = vst [vmem:[#allocation39_spill] sm:$0xff] %v18795_v28  ;;  %15369 = vmatprep.subr.mxu1 %v18795_v28 }
 0x209   : > { %15482 = vmatpush3.msra.mxu0 %v12930_v60  ;;  %v18801_v60 = vpop.f32.mrf.mxu1 }
 0x20a   : > { %v14956_v57 = vpop.f32.mrf.mxu0  ;;  %15483 = vmatprep.subr.mxu0 %v12929_v41 }
 0x20b   : > { %v18780_v15 = vadd.f32 %v14956_v57, %v18466_v55  ;;  %15484 = vmatpush3.msra.mxu0 %v12929_v41  ;;  %v18808_v4 = vpop.f32.mrf.mxu1 }
 0x20c   : > { %v18787_v61 = vpop.f32.mrf.mxu0  ;;  %15485 = vmatprep.subr.mxu0 %v12928_v38 }
 0x20d   : > { %22609 = vst [vmem:[#allocation38_spill] sm:$0xff] %v18780_v15  ;;  %15486 = vmatpush3.msra.mxu0 %v12928_v38  ;;  %v18815_v21 = vpop.f32.mrf.mxu1 }
 0x20e   : > { %v14959_v55 = vpop.f32.mrf.mxu0 }
 0x20f   : > { %v18799_v57 = vadd.f32 %v14959_v55, %v18582_v54 }
 0x210   : > { %v18803_v0 = vpop.f32.mrf.mxu0 }
 0x211   : > { %22611 = vst [vmem:[#allocation40_spill] sm:$0xff] %v18799_v57  ;;  %22612 = vst [vmem:[#allocation41_spill] sm:$0xff] %v18803_v0  ;;  %v18822_v57 = vpop.f32.mrf.mxu1 }
 0x212   : > { %v14962_v24 = vpop.f32.mrf.mxu0 }
 0x213   : > { %v18806_v35 = vadd.f32 %v14962_v24, %v18600_v39 }
 0x214   : > { %v18810_v15 = vpop.f32.mrf.mxu0 }
 0x215   : > { %22613 = vst [vmem:[#allocation42_spill] sm:$0xff] %v18806_v35  ;;  %22614 = vst [vmem:[#allocation43_spill] sm:$0xff] %v18810_v15  ;;  %v18829_v15 = vpop.f32.mrf.mxu1 }
 0x216   : > { %v14965_v41 = vpop.f32.mrf.mxu0 }
 0x217   : > { %v18813_v28 = vadd.f32 %v14965_v41, %v18612_v22 }
 0x218   : > { %v18817_v54 = vpop.f32.mrf.mxu0 }
 0x219   : > { %22615 = vst [vmem:[#allocation44_spill] sm:$0xff] %v18813_v28  ;;  %22616 = vst [vmem:[#allocation45_spill] sm:$0xff] %v18817_v54  ;;  %v18836_v54 = vpop.f32.mrf.mxu1 }
 0x21a   : > { %v14968_v38 = vpop.f32.mrf.mxu0 }
 0x21b   : > { %v18820_v55 = vadd.f32 %v14968_v38, %v18620_v49 }
 0x21c   : > { %v18824_v39 = vpop.f32.mrf.mxu0 }
 0x21d   : > { %22617 = vst [vmem:[#allocation46_spill] sm:$0xff] %v18820_v55  ;;  %22618 = vst [vmem:[#allocation47_spill] sm:$0xff] %v18824_v39  ;;  %v18843_v39 = vpop.f32.mrf.mxu1 }
 0x21e   : > { %v14971_v24 = vpop.f32.mrf.mxu0 }
 0x21f   : > { %v18827_v35 = vadd.f32 %v14971_v24, %v18629_v58 }
 0x220   : > { %v18831_v22 = vpop.f32.mrf.mxu0 }
 0x221   : > { %22619 = vst [vmem:[#allocation48_spill] sm:$0xff] %v18827_v35  ;;  %22620 = vst [vmem:[#allocation49_spill] sm:$0xff] %v18831_v22  ;;  %v18850_v22 = vpop.f32.mrf.mxu1 }
 0x222   : > { %v14974_v41 = vpop.f32.mrf.mxu0 }
 0x223   : > { %v18834_v28 = vadd.f32 %v14974_v41, %v18638_v33 }
 0x224   : > { %v18838_v49 = vpop.f32.mrf.mxu0 }
 0x225   : > { %22621 = vst [vmem:[#allocation50_spill] sm:$0xff] %v18834_v28  ;;  %22622 = vst [vmem:[#allocation51_spill] sm:$0xff] %v18838_v49  ;;  %v18854_v28 = vpop.f32.mrf.mxu1 }
 0x226   : > { %v14977_v38 = vpop.f32.mrf.mxu0 }
 0x227   : > { %v18841_v55 = vadd.f32 %v14977_v38, %v18647_v3  ;;  %v18856_v1 = vpop.f32.mrf.mxu1 }
 0x228   : > { %v18845_v58 = vpop.f32.mrf.mxu0 }
 0x229   : > { %22623 = vst [vmem:[#allocation52_spill] sm:$0xff] %v18841_v55  ;;  %22624 = vst [vmem:[#allocation53_spill] sm:$0xff] %v18845_v58  ;;  %v18858_v55 = vpop.f32.mrf.mxu1 }
 0x22a   : > { %v14980_v24 = vpop.f32.mrf.mxu0 }
 0x22b   : > { %v18848_v35 = vadd.f32 %v14980_v24, %v18656_v19  ;;  %v18863_v19 = vld [vmem:[%s22483_s3 + $0x378] sm:$0xff]  ;;  %v3103_v24 = vadd.f32 %v18133_v7, %v18322_v36 }
 0x22c   : > { %v18852_v33 = vpop.f32.mrf.mxu0  ;;  %22627 = vst [vmem:[#allocation56_spill] sm:$0xff] %v18863_v19  ;;  %15627 = vmatprep.subr.mxu0 %v18863_v19 }
 0x22d   : > { %22625 = vst [vmem:[#allocation54_spill] sm:$0xff] %v18848_v35  ;;  %22626 = vst [vmem:[#allocation55_spill] sm:$0xff] %v18852_v33  ;;  %v18878_v33 = vld [vmem:[%s22482_s2] ss:$0 sm:$0xff] }
 0x22e   : > { %v14983_v41 = vpop.f32.mrf.mxu0 }
 0x230   : > { %v3553_v49 = vpop.f32.mrf.mxu0 }
 0x231   : > { %v18869_v49 = vpop.f32.mrf.mxu1 }
 0x232   : > { %v14986_v0 = vpop.f32.mrf.mxu0 }
 0x233   : > { %v3576_v0 = vadd.f32 %v18676_v56, %v3103_v24  ;;  %v3107_v24 = vadd.f32 %v18163_v10, %v18360_v32 }
 0x234   : > { %v3563_v3 = vpop.f32.mrf.mxu0 }
 0x235   : > { %v4046_v7 = vadd.f32 %v18737_v8, %v3576_v0  ;;  %v3580_v8 = vadd.f32 %v18704_v5, %v3107_v24 }
 0x236   : > { %v15053_v38 = vpop.f32.mrf.mxu0 }
 0x237   : > { %v3105_v38 = vadd.f32 %v18148_v40, %v18338_v47  ;;  %v4049_v47 = vadd.f32 %v18756_v44, %v18685_v14  ;;  %v4050_v24 = vadd.f32 %v18801_v60, %v3580_v8 }
 0x238   : > { %v4313_v58 = vpop.f32.mrf.mxu0 }
 0x239   : > { %v4047_v58 = vadd.f32 %v18718_v52, %v18671_v37  ;;  %v3578_v36 = vadd.f32 %v18690_v34, %v3105_v38  ;;  %v3109_v38 = vadd.f32 %v18181_v42, %v18383_v31 }
 0x23a   : > { %v15056_v41 = vpop.f32.mrf.mxu0 }
 0x23b   : > { %v18884_v41 = vpop.f32.mrf.mxu1  ;;  %v3582_v42 = vadd.f32 %v18720_v13, %v3109_v38 }
 0x23c   : > { %v4323_v3 = vpop.f32.mrf.mxu0 }
 0x23d   : > { %v22628_v3 = vld [vmem:[#allocation14_spill] sm:$0xff]  ;;  %v18897_v44 = vpop.f32.mrf.mxu1 }
 0x23e   : > { %v15059_v35 = vpop.f32.mrf.mxu0  ;;  %v2171_v19 = vadd.f32 %v22628_v3, %v18092_v11  ;;  %v4051_v11 = vadd.f32 %v18785_v2, %v18696_v18  ;;  %v22630_v3 = vld [vmem:[#allocation16_spill] sm:$0xff] }
 0x23f   : > { %v4517_v56 = vadd.f32 %v15059_v35, %v4047_v58  ;;  %v4048_v35 = vadd.f32 %v18772_v25, %v3578_v36  ;;  %v22629_v36 = vld [vmem:[#allocation15_spill] sm:$0xff]  ;;  %v2175_v8 = vadd.f32 %v22630_v3, %v18113_v53 }
 0x240   : > { %v4333_v40 = vpop.f32.mrf.mxu0  ;;  %v2641_v14 = vadd.f32 %v18401_v12, %v2171_v19 }
 0x241   : > { %v4564_v37 = vadd.f32 %v18878_v33, %v4517_v56  ;;  %v4516_v52 = vadd.f32 %v4333_v40, %v4046_v7  ;;  %v2173_v56 = vadd.f32 %v22629_v36, %v18103_v51  ;;  %v4053_v51 = vadd.f32 %v18808_v4, %v18710_v59 }
 0x242   : > { %v15062_v0 = vpop.f32.mrf.mxu0  ;;  %v3111_v18 = vadd.f32 %v18199_v26, %v2641_v14 }
 0x243   : > { %v4604_v34 = vmax.f32 %v4564_v37, 0.0  ;;  %v4563_v10 = vadd.f32 %v18878_v33, %v4516_v52  ;;  %v4519_v32 = vadd.f32 %v15062_v0, %v4049_v47  ;;  %v2643_v2 = vadd.f32 %v18420_v23, %v2173_v56  ;;  %v18909_v47 = vpop.f32.mrf.mxu1 }
 0x244   : > { %v4343_v58 = vpop.f32.mrf.mxu0  ;;  %v3584_v26 = vadd.f32 %v18739_v6, %v3111_v18  ;;  %v4052_v23 = vadd.f32 %v18815_v21, %v3582_v42  ;;  %v4055_v21 = vadd.f32 %v18822_v57, %v18729_v9 }
 0x245   : > { %4845 = vst [vmem:[#allocation2 + $0x39] sm:$0xff] %v4604_v34  ;;  %v4603_v5 = vmax.f32 %v4563_v10, 0.0  ;;  %v4566_v7 = vadd.f32 %v18878_v33, %v4519_v32  ;;  %v4518_v25 = vadd.f32 %v4343_v58, %v4048_v35  ;;  %v2645_v10 = vadd.f32 %v18439_v48, %v2175_v8  ;;  %v18927_v32 = vpop.f32.mrf.mxu1  ;;  %v22631_v58 = vld [vmem:[#allocation17_spill] sm:$0xff] }
 0x246   : > { %v15065_v40 = vpop.f32.mrf.mxu0 }
 0x247   : > { %4844 = vst [vmem:[#allocation2 + $0x31] sm:$0xff] %v4603_v5  ;;  %v4606_v31 = vmax.f32 %v4566_v7, 0.0  ;;  %v4565_v12 = vadd.f32 %v18878_v33, %v4518_v25  ;;  %v4521_v19 = vadd.f32 %v15065_v40, %v4051_v11  ;;  %15149 = vmatprep.mubr.f32.mxu1 %v4603_v5  ;;  %v2177_v11 = vadd.f32 %v22631_v58, %v18126_v27 }
 0x248   : > { %v4353_v37 = vpop.f32.mrf.mxu0  ;;  %15150 = vmatmul.mubr.f32.gmra.mxu1 %v4604_v34  ;;  %v3113_v34 = vadd.f32 %v18217_v20, %v2643_v2  ;;  %v4054_v20 = vadd.f32 %v18829_v15, %v3584_v26  ;;  %v3115_v56 = vadd.f32 %v18232_v46, %v2645_v10  ;;  %v18946_v15 = vpop.f32.mrf.mxu1  ;;  %v22632_v46 = vld [vmem:[#allocation18_spill] sm:$0xff] }
 0x249   : > { %4847 = vst [vmem:[#allocation2 + $0x51] sm:$0xff] %v4606_v31  ;;  %v18913_v60 = vmax.f32 %v4565_v12, 0.0  ;;  %v4568_v13 = vadd.f32 %v18878_v33, %v4521_v19  ;;  %v4520_v52 = vadd.f32 %v4353_v37, %v4050_v24  ;;  %v2647_v27 = vadd.f32 %v18462_v43, %v2177_v11 }
 0x24a   : > { %v15068_v0 = vpop.f32.mrf.mxu0  ;;  %v3586_v7 = vadd.f32 %v18758_v29, %v3113_v34  ;;  %v4057_v29 = vadd.f32 %v18836_v54, %v18748_v45  ;;  %v2179_v12 = vadd.f32 %v22632_v46, %v18142_v62  ;;  %v3588_v43 = vadd.f32 %v18774_v30, %v3115_v56  ;;  %v18966_v30 = vpop.f32.mrf.mxu1  ;;  %v22640_v46 = vld [vmem:[#allocation10_spill] sm:$0xff] }
 0x24b   : > { %4846 = vst [vmem:[#allocation2 + $0x49] sm:$0xff] %v18913_v60  ;;  %v18921_v35 = vmax.f32 %v4568_v13, 0.0  ;;  %v4567_v4 = vadd.f32 %v18878_v33, %v4520_v52  ;;  %v4523_v59 = vadd.f32 %v15068_v0, %v4053_v51  ;;  %15152 = vmatprep.mubr.f32.mxu1 %v18913_v60  ;;  %v3117_v13 = vadd.f32 %v18250_v16, %v2647_v27  ;;  %v22633_v16 = vld [vmem:[#allocation19_spill] sm:$0xff] }
 0x24c   : > { %v4363_v53 = vpop.f32.mrf.mxu0  ;;  %15153 = vmatmul.mubr.f32.gmra.mxu1 %v4606_v31  ;;  %v5480_v36 = vld [vmem:[#allocation2 + $0x3a] sm:$0xff]  ;;  %v4056_v2 = vadd.f32 %v18843_v39, %v3586_v7  ;;  %v2649_v62 = vadd.f32 %v18574_v50, %v2179_v12  ;;  %v4059_v39 = vadd.f32 %v18850_v22, %v18767_v17  ;;  %v2181_v0 = vadd.f32 %v22633_v16, %v18157_v63  ;;  %v22635_v63 = vld [vmem:[#allocation13_spill] sm:$0xff]  ;;  %v22638_v7 = vld [vmem:[#allocation20_spill] sm:$0xff] }
 0x24d   : > { %4849 = vst [vmem:[#allocation2 + $0x69] sm:$0xff] %v18921_v35  ;;  %v18932_v6 = vmax.f32 %v4567_v4, 0.0  ;;  %v4570_v38 = vadd.f32 %v18878_v33, %v4523_v59  ;;  %v4522_v14 = vadd.f32 %v4363_v53, %v4052_v23  ;;  %v4058_v50 = vadd.f32 %v18854_v28, %v3588_v43  ;;  %v22634_v53 = vld [vmem:[#allocation9_spill] sm:$0xff]  ;;  %v18986_v28 = vpop.f32.mrf.mxu1  ;;  %v22641_v43 = vld [vmem:[#allocation32_spill] sm:$0xff] }
 0x24e   : > { %v15071_v48 = vpop.f32.mrf.mxu0  ;;  %v5479_v5 = vld [vmem:[#allocation2 + $0x32] sm:$0xff]  ;;  %v3590_v59 = vadd.f32 %v18787_v61, %v3117_v13 }
 0x24f   : > { %4848 = vst [vmem:[#allocation2 + $0x61] sm:$0xff] %v18932_v6  ;;  %v18940_v25 = vmax.f32 %v4570_v38, 0.0  ;;  %v4569_v9 = vadd.f32 %v18878_v33, %v4522_v14  ;;  %v4525_v57 = vadd.f32 %v15071_v48, %v4055_v21  ;;  %15321 = vmatprep.mubr.f32.mxu0 %v5479_v5  ;;  %15155 = vmatprep.mubr.f32.mxu1 %v18932_v6  ;;  %v22636_v61 = vld [vmem:[#allocation38_spill] sm:$0xff] }
 0x250   : > { %v4373_v24 = vpop.f32.mrf.mxu0  ;;  %15322 = vmatmul.mubr.f32.gmra.mxu0 %v5480_v36  ;;  %15156 = vmatmul.mubr.f32.gmra.mxu1 %v18921_v35  ;;  %v5482_v51 = vld [vmem:[#allocation2 + $0x52] sm:$0xff]  ;;  %v3119_v21 = vadd.f32 %v22634_v53, %v2649_v62  ;;  %v2651_v38 = vadd.f32 %v22635_v63, %v2181_v0  ;;  %v4061_v58 = vadd.f32 %v18856_v1, %v22636_v61  ;;  %v22643_v62 = vld [vmem:[#allocation27_spill] sm:$0xff] }
 0x251   : > { %4851 = vst [vmem:[#allocation2 + $0x81] sm:$0xff] %v18940_v25  ;;  %v18952_v40 = vmax.f32 %v4569_v9, 0.0  ;;  %v4572_v42 = vadd.f32 %v18878_v33, %v4525_v57  ;;  %v4524_v31 = vadd.f32 %v4373_v24, %v4054_v20  ;;  %v22637_v5 = vld [vmem:[#allocation26_spill] sm:$0xff]  ;;  %v22639_v57 = vld [vmem:[#allocation41_spill] sm:$0xff]  ;;  %v4060_v24 = vadd.f32 %v18858_v55, %v3590_v59  ;;  %v22642_v55 = vld [vmem:[#allocation40_spill] sm:$0xff] }
 0x252   : > { %v15074_v19 = vpop.f32.mrf.mxu0  ;;  %v5481_v18 = vld [vmem:[#allocation2 + $0x4a] sm:$0xff]  ;;  %v2183_v9 = vadd.f32 %v22638_v7, %v22637_v5  ;;  %v3592_v36 = vadd.f32 %v22639_v57, %v3119_v21  ;;  %v3121_v12 = vadd.f32 %v22640_v46, %v2651_v38  ;;  %v22645_v0 = vld [vmem:[#allocation43_spill] sm:$0xff]  ;;  %v22648_v63 = vld [vmem:[#allocation42_spill] sm:$0xff] }
 0x253   : > { %4850 = vst [vmem:[#allocation2 + $0x79] sm:$0xff] %v18952_v40  ;;  %v18960_v37 = vmax.f32 %v4572_v42, 0.0  ;;  %v4571_v45 = vadd.f32 %v18878_v33, %v4524_v31  ;;  %v4527_v54 = vadd.f32 %v15074_v19, %v4057_v29  ;;  %15324 = vmatprep.mubr.f32.mxu0 %v5481_v18  ;;  %15158 = vmatprep.mubr.f32.mxu1 %v18952_v40  ;;  %v19006_v18 = vpop.f32.mrf.mxu1  ;;  %v22651_v7 = vld [vmem:[#allocation45_spill] sm:$0xff]  ;;  %v22653_v46 = vld [vmem:[#allocation34_spill] sm:$0xff] }
 0x254   : > { %v4383_v52 = vpop.f32.mrf.mxu0  ;;  %15325 = vmatmul.mubr.f32.gmra.mxu0 %v5482_v51  ;;  %15159 = vmatmul.mubr.f32.gmra.mxu1 %v18940_v25  ;;  %v5484_v10 = vld [vmem:[#allocation2 + $0x6a] sm:$0xff]  ;;  %v2653_v19 = vadd.f32 %v22641_v43, %v2183_v9  ;;  %v4065_v38 = vadd.f32 %v18897_v44, %v22648_v63 }
 0x255   : > { %4853 = vst [vmem:[#allocation2 + $0x99] sm:$0xff] %v18960_v37  ;;  %v18972_v3 = vmax.f32 %v4571_v45, 0.0  ;;  %v4574_v8 = vadd.f32 %v18878_v33, %v4527_v54  ;;  %v4526_v26 = vadd.f32 %v4383_v52, %v4056_v2  ;;  %v4063_v45 = vadd.f32 %v18869_v49, %v22642_v55  ;;  %v22644_v52 = vld [vmem:[#allocation21_spill] sm:$0xff] }
 0x256   : > { %v15077_v23 = vpop.f32.mrf.mxu0  ;;  %v5483_v4 = vld [vmem:[#allocation2 + $0x62] sm:$0xff] }
 0x257   : > { %4852 = vst [vmem:[#allocation2 + $0x91] sm:$0xff] %v18972_v3  ;;  %v18980_v34 = vmax.f32 %v4574_v8, 0.0  ;;  %v4573_v17 = vadd.f32 %v18878_v33, %v4526_v26  ;;  %v4529_v22 = vadd.f32 %v15077_v23, %v4059_v39  ;;  %15327 = vmatprep.mubr.f32.mxu0 %v5483_v4  ;;  %15161 = vmatprep.mubr.f32.mxu1 %v18972_v3 }
 0x258   : > { %v4393_v14 = vpop.f32.mrf.mxu0  ;;  %15328 = vmatmul.mubr.f32.gmra.mxu0 %v5484_v10  ;;  %15162 = vmatmul.mubr.f32.gmra.mxu1 %v18960_v37  ;;  %v5486_v31 = vld [vmem:[#allocation2 + $0x82] sm:$0xff]  ;;  %v2185_v39 = vadd.f32 %v22644_v52, %v22643_v62  ;;  %v4062_v8 = vadd.f32 %v18884_v41, %v3592_v36  ;;  %v22647_v10 = vld [vmem:[#allocation33_spill] sm:$0xff]  ;;  %v19026_v41 = vpop.f32.mrf.mxu1 }
 0x259   : > { %4855 = vst [vmem:[#allocation2 + $0xb1] sm:$0xff] %v18980_v34  ;;  %v18992_v11 = vmax.f32 %v4573_v17, 0.0  ;;  %v4576_v20 = vadd.f32 %v18878_v33, %v4529_v22  ;;  %v4528_v48 = vadd.f32 %v4393_v14, %v4058_v50  ;;  %v3594_v50 = vadd.f32 %v22645_v0, %v3121_v12  ;;  %v22646_v17 = vld [vmem:[#allocation29_spill] sm:$0xff]  ;;  %v22656_v62 = vld [vmem:[#allocation23_spill] sm:$0xff] }
 0x25a   : > { %v15080_v56 = vpop.f32.mrf.mxu0  ;;  %v5485_v27 = vld [vmem:[#allocation2 + $0x7a] sm:$0xff]  ;;  %v3123_v22 = vadd.f32 %v22646_v17, %v2653_v19  ;;  %v2655_v53 = vadd.f32 %v22647_v10, %v2185_v39  ;;  %v19046_v43 = vpop.f32.mrf.mxu1 }
 0x25b   : > { %4854 = vst [vmem:[#allocation2 + $0xa9] sm:$0xff] %v18992_v11  ;;  %v19000_v29 = vmax.f32 %v4576_v20, 0.0  ;;  %v4575_v1 = vadd.f32 %v18878_v33, %v4528_v48  ;;  %v4531_v42 = vadd.f32 %v15080_v56, %v4061_v58  ;;  %15330 = vmatprep.mubr.f32.mxu0 %v5485_v27  ;;  %15164 = vmatprep.mubr.f32.mxu1 %v18992_v11  ;;  %v22649_v20 = vld [vmem:[#allocation28_spill] sm:$0xff]  ;;  %v22650_v48 = vld [vmem:[#allocation22_spill] sm:$0xff] }
 0x25c   : > { %v4403_v2 = vpop.f32.mrf.mxu0  ;;  %15331 = vmatmul.mubr.f32.gmra.mxu0 %v5486_v31  ;;  %15165 = vmatmul.mubr.f32.gmra.mxu1 %v18980_v34  ;;  %v5488_v59 = vld [vmem:[#allocation2 + $0x9a] sm:$0xff]  ;;  %v2187_v5 = vadd.f32 %v22650_v48, %v22649_v20  ;;  %v3596_v9 = vadd.f32 %v22651_v7, %v3123_v22  ;;  %v4064_v56 = vadd.f32 %v18909_v47, %v3594_v50  ;;  %v22654_v47 = vld [vmem:[#allocation44_spill] sm:$0xff]  ;;  %v22663_v7 = vld [vmem:[#allocation49_spill] sm:$0xff] }
 0x25d   : > { %4857 = vst [vmem:[#allocation2 + $0xc9] sm:$0xff] %v19000_v29  ;;  %v19012_v54 = vmax.f32 %v4575_v1, 0.0  ;;  %v4578_v51 = vadd.f32 %v18878_v33, %v4531_v42  ;;  %v4530_v13 = vadd.f32 %v4403_v2, %v4060_v24  ;;  %v22652_v42 = vld [vmem:[#allocation30_spill] sm:$0xff]  ;;  %v4067_v2 = vadd.f32 %v18927_v32, %v22654_v47  ;;  %v22659_v22 = vld [vmem:[#allocation35_spill] sm:$0xff]  ;;  %v22662_v48 = vld [vmem:[#allocation24_spill] sm:$0xff] }
 0x25e   : > { %v15083_v26 = vpop.f32.mrf.mxu0  ;;  %v5487_v16 = vld [vmem:[#allocation2 + $0x92] sm:$0xff]  ;;  %v3125_v31 = vadd.f32 %v22652_v42, %v2655_v53  ;;  %v2657_v12 = vadd.f32 %v22653_v46, %v2187_v5  ;;  %v4066_v39 = vadd.f32 %v18946_v15, %v3596_v9  ;;  %v3993_v15 = vpop.f32.mrf.mxu1  ;;  %v22664_v42 = vld [vmem:[#allocation8_spill] sm:$0xff] }
 0x25f   : > { %4856 = vst [vmem:[#allocation2 + $0xc1] sm:$0xff] %v19012_v54  ;;  %v19020_v23 = vmax.f32 %v4578_v51, 0.0  ;;  %v4577_v49 = vadd.f32 %v18878_v33, %v4530_v13  ;;  %v4533_v4 = vadd.f32 %v15083_v26, %v4063_v45  ;;  %15333 = vmatprep.mubr.f32.mxu0 %v5487_v16  ;;  %15167 = vmatprep.mubr.f32.mxu1 %v19012_v54  ;;  %v22655_v13 = vld [vmem:[#allocation5_spill] sm:$0xff]  ;;  %v22657_v16 = vld [vmem:[#allocation47_spill] sm:$0xff]  ;;  %v22661_v20 = vld [vmem:[#allocation6_spill] sm:$0xff] }
 0x260   : > { %v4413_v21 = vpop.f32.mrf.mxu0  ;;  %15334 = vmatmul.mubr.f32.gmra.mxu0 %v5488_v59  ;;  %15168 = vmatmul.mubr.f32.gmra.mxu1 %v19000_v29  ;;  %v5490_v1 = vld [vmem:[#allocation2 + $0xb2] sm:$0xff]  ;;  %v2189_v52 = vadd.f32 %v22656_v62, %v22655_v13  ;;  %v3598_v0 = vadd.f32 %v22657_v16, %v3125_v31  ;;  %v22658_v59 = vld [vmem:[#allocation31_spill] sm:$0xff]  ;;  %v2191_v5 = vadd.f32 %v22662_v48, %v22661_v20  ;;  %v22665_v46 = vld [vmem:[#allocation36_spill] sm:$0xff] }
 0x261   : > { %4859 = vst [vmem:[#allocation2 + $0xe1] sm:$0xff] %v19020_v23  ;;  %v19032_v14 = vmax.f32 %v4577_v49, 0.0  ;;  %v4580_v61 = vadd.f32 %v18878_v33, %v4533_v4  ;;  %v4532_v58 = vadd.f32 %v4413_v21, %v4062_v8  ;;  %v3127_v17 = vadd.f32 %v22658_v59, %v2657_v12  ;;  %v22660_v21 = vld [vmem:[#allocation46_spill] sm:$0xff]  ;;  %v22667_v62 = vld [vmem:[#allocation7_spill] sm:$0xff] }
 0x262   : > { %v15086_v57 = vpop.f32.mrf.mxu0  ;;  %v5489_v36 = vld [vmem:[#allocation2 + $0xaa] sm:$0xff]  ;;  %v2659_v10 = vadd.f32 %v22659_v22, %v2189_v52  ;;  %v4069_v63 = vadd.f32 %v18966_v30, %v22660_v21  ;;  %v2661_v12 = vadd.f32 %v22665_v46, %v2191_v5 }
 0x263   : > { %4858 = vst [vmem:[#allocation2 + $0xd9] sm:$0xff] %v19032_v14  ;;  %v19040_v27 = vmax.f32 %v4580_v61, 0.0  ;;  %v4579_v44 = vadd.f32 %v18878_v33, %v4532_v58  ;;  %v4535_v24 = vadd.f32 %v15086_v57, %v4065_v38  ;;  %15336 = vmatprep.mubr.f32.mxu0 %v5489_v36  ;;  %15170 = vmatprep.mubr.f32.mxu1 %v19032_v14  ;;  %v22668_v52 = vld [vmem:[#allocation25_spill] sm:$0xff] }
 0x264   : > { %v4423_v19 = vpop.f32.mrf.mxu0  ;;  %15337 = vmatmul.mubr.f32.gmra.mxu0 %v5490_v1  ;;  %15171 = vmatmul.mubr.f32.gmra.mxu1 %v19020_v23  ;;  %v5492_v4 = vld [vmem:[#allocation2 + $0xca] sm:$0xff]  ;;  %v3600_v9 = vadd.f32 %v22663_v7, %v3127_v17  ;;  %v3129_v31 = vadd.f32 %v22664_v42, %v2659_v10  ;;  %v22670_v17 = vld [vmem:[#allocation11_spill] sm:$0xff] }
 0x265   : > { %4861 = vst [vmem:[#allocation2 + $0xf9] sm:$0xff] %v19040_v27  ;;  %v19052_v55 = vmax.f32 %v4579_v44, 0.0  ;;  %v4582_v45 = vadd.f32 %v18878_v33, %v4535_v24  ;;  %v4534_v51 = vadd.f32 %v4423_v19, %v4064_v56  ;;  %v4068_v56 = vadd.f32 %v18986_v28, %v3598_v0  ;;  %v15039_v19 = vpop.f32.mrf.mxu1  ;;  %v22666_v28 = vld [vmem:[#allocation48_spill] sm:$0xff]  ;;  %v22669_v0 = vld [vmem:[#allocation51_spill] sm:$0xff]  ;;  %v22671_v10 = vld [vmem:[#allocation37_spill] sm:$0xff] }
 0x266   : > { %v15089_v8 = vpop.f32.mrf.mxu0  ;;  %v5491_v26 = vld [vmem:[#allocation2 + $0xc2] sm:$0xff]  ;;  %v3131_v22 = vadd.f32 %v22670_v17, %v2661_v12  ;;  %v22673_v5 = vld [vmem:[#allocation53_spill] sm:$0xff] }
 0x267   : > { %4860 = vst [vmem:[#allocation2 + $0xf1] sm:$0xff] %v19052_v55  ;;  %v19060_v50 = vmax.f32 %v4582_v45, 0.0  ;;  %v4581_v32 = vadd.f32 %v18878_v33, %v4534_v51  ;;  %v4537_v49 = vadd.f32 %v15089_v8, %v4067_v2  ;;  %15339 = vmatprep.mubr.f32.mxu0 %v5491_v26  ;;  %15173 = vmatprep.mubr.f32.mxu1 %v19052_v55  ;;  %v22675_v12 = vld [vmem:[#allocation52_spill] sm:$0xff] }
 0x268   : > { %v4433_v53 = vpop.f32.mrf.mxu0  ;;  %15340 = vmatmul.mubr.f32.gmra.mxu0 %v5492_v4  ;;  %15174 = vmatmul.mubr.f32.gmra.mxu1 %v19040_v27  ;;  %v5494_v1 = vld [vmem:[#allocation2 + $0xe2] sm:$0xff]  ;;  %v4071_v2 = vadd.f32 %v19006_v18, %v22666_v28  ;;  %v4070_v8 = vadd.f32 %v19026_v41, %v3600_v9  ;;  %v4003_v41 = vpop.f32.mrf.mxu1  ;;  %v3604_v7 = vadd.f32 %v22673_v5, %v3131_v22 }
 0x269   : > { %4863 = vst [vmem:[#allocation2 + $0x111] sm:$0xff] %v19060_v50  ;;  %v19070_v38 = vmax.f32 %v4581_v32, 0.0  ;;  %v4584_v61 = vadd.f32 %v18878_v33, %v4537_v49  ;;  %v4536_v58 = vadd.f32 %v4433_v53, %v4066_v39  ;;  %v2193_v39 = vadd.f32 %v22668_v52, %v22667_v62  ;;  %v22676_v52 = vld [vmem:[#allocation55_spill] sm:$0xff] }
 0x26a   : > { %v15092_v57 = vpop.f32.mrf.mxu0  ;;  %v5493_v36 = vld [vmem:[#allocation2 + $0xda] sm:$0xff]  ;;  %v3602_v32 = vadd.f32 %v22669_v0, %v3129_v31  ;;  %v15042_v31 = vpop.f32.mrf.mxu1 }
 0x26b   : > { %4862 = vst [vmem:[#allocation2 + $0x109] sm:$0xff] %v19070_v38  ;;  %v19078_v44 = vmax.f32 %v4584_v61, 0.0  ;;  %v4583_v30 = vadd.f32 %v18878_v33, %v4536_v58  ;;  %v4539_v24 = vadd.f32 %v15092_v57, %v4069_v63  ;;  %15342 = vmatprep.mubr.f32.mxu0 %v5493_v36  ;;  %15176 = vmatprep.mubr.f32.mxu1 %v19070_v38  ;;  %v22672_v63 = vld [vmem:[#allocation50_spill] sm:$0xff] }
 0x26c   : > { %v4443_v47 = vpop.f32.mrf.mxu0  ;;  %15343 = vmatmul.mubr.f32.gmra.mxu0 %v5494_v1  ;;  %15177 = vmatmul.mubr.f32.gmra.mxu1 %v19060_v50  ;;  %v5496_v59 = vld [vmem:[#allocation2 + $0xfa] sm:$0xff]  ;;  %v2663_v53 = vadd.f32 %v22671_v10, %v2193_v39  ;;  %v4073_v61 = vadd.f32 %v19046_v43, %v22672_v63  ;;  %v4072_v36 = vadd.f32 %v3993_v15, %v3602_v32  ;;  %v22674_v1 = vld [vmem:[#allocation12_spill] sm:$0xff]  ;;  %v4013_v0 = vpop.f32.mrf.mxu1 }
 0x26d   : > { %4865 = vst [vmem:[#allocation2 + $0x129] sm:$0xff] %v19078_v44  ;;  %v19088_v45 = vmax.f32 %v4583_v30, 0.0  ;;  %v4586_v51 = vadd.f32 %v18878_v33, %v4539_v24  ;;  %v4538_v13 = vadd.f32 %v4443_v47, %v4068_v56  ;;  %v4075_v15 = vadd.f32 %v15039_v19, %v22675_v12  ;;  %v4880_v12 = vld [vmem:[#allocation2] sm:$0xff] }
 0x26e   : > { %v15095_v26 = vpop.f32.mrf.mxu0  ;;  %v5495_v16 = vld [vmem:[#allocation2 + $0xf2] sm:$0xff]  ;;  %v3133_v42 = vadd.f32 %v22674_v1, %v2663_v53 }
 0x26f   : > { %4864 = vst [vmem:[#allocation2 + $0x121] sm:$0xff] %v19088_v45  ;;  %v19096_v49 = vmax.f32 %v4586_v51, 0.0  ;;  %v4585_v18 = vadd.f32 %v18878_v33, %v4538_v13  ;;  %v4541_v4 = vadd.f32 %v15095_v26, %v4071_v2  ;;  %15345 = vmatprep.mubr.f32.mxu0 %v5495_v16  ;;  %15179 = vmatprep.mubr.f32.mxu1 %v19088_v45 }
 0x270   : > { %v4453_v21 = vpop.f32.mrf.mxu0  ;;  %15346 = vmatmul.mubr.f32.gmra.mxu0 %v5496_v59  ;;  %15180 = vmatmul.mubr.f32.gmra.mxu1 %v19078_v44  ;;  %v5498_v43 = vld [vmem:[#allocation2 + $0x112] sm:$0xff]  ;;  %v4074_v51 = vadd.f32 %v4003_v41, %v3604_v7  ;;  %v3606_v39 = vadd.f32 %v22676_v52, %v3133_v42 }
 0x271   : > { %4867 = vst [vmem:[#allocation2 + $0x141] sm:$0xff] %v19096_v49  ;;  %v19106_v58 = vmax.f32 %v4585_v18, 0.0  ;;  %v4588_v20 = vadd.f32 %v18878_v33, %v4541_v4  ;;  %v4540_v48 = vadd.f32 %v4453_v21, %v4070_v8  ;;  %v22677_v18 = vld [vmem:[#allocation54_spill] sm:$0xff] }
 0x272   : > { %v15098_v9 = vpop.f32.mrf.mxu0  ;;  %v5497_v57 = vld [vmem:[#allocation2 + $0x10a] sm:$0xff]  ;;  %v4077_v4 = vadd.f32 %v15042_v31, %v22677_v18  ;;  %v4076_v41 = vadd.f32 %v4013_v0, %v3606_v39  ;;  %v19163_v0 = vld [vmem:[#allocation2 + $0x20] sm:$0xff] }
 0x273   : > { %4866 = vst [vmem:[#allocation2 + $0x139] sm:$0xff] %v19106_v58  ;;  %v19111_v56 = vmax.f32 %v4588_v20, 0.0  ;;  %v4587_v30 = vadd.f32 %v18878_v33, %v4540_v48  ;;  %v4543_v24 = vadd.f32 %v15098_v9, %v4073_v61  ;;  %15348 = vmatprep.mubr.f32.mxu0 %v5497_v57  ;;  %15182 = vmatprep.mubr.f32.mxu1 %v19106_v58 }
 0x274   : > { %v4463_v46 = vpop.f32.mrf.mxu0  ;;  %15349 = vmatmul.mubr.f32.gmra.mxu0 %v5498_v43  ;;  %15183 = vmatmul.mubr.f32.gmra.mxu1 %v19096_v49  ;;  %v5500_v19 = vld [vmem:[#allocation2 + $0x12a] sm:$0xff] }
 0x275   : > { %4869 = vst [vmem:[#allocation2 + $0x159] sm:$0xff] %v19111_v56  ;;  %v19119_v47 = vmax.f32 %v4587_v30, 0.0  ;;  %v4590_v28 = vadd.f32 %v18878_v33, %v4543_v24  ;;  %v4542_v2 = vadd.f32 %v4463_v46, %v4072_v36 }
 0x276   : > { %v15101_v13 = vpop.f32.mrf.mxu0  ;;  %v5499_v62 = vld [vmem:[#allocation2 + $0x122] sm:$0xff] }
 0x277   : > { %4868 = vst [vmem:[#allocation2 + $0x151] sm:$0xff] %v19119_v47  ;;  %v19124_v8 = vmax.f32 %v4590_v28, 0.0  ;;  %v4589_v26 = vadd.f32 %v18878_v33, %v4542_v2  ;;  %v4545_v16 = vadd.f32 %v15101_v13, %v4075_v15  ;;  %15351 = vmatprep.mubr.f32.mxu0 %v5499_v62  ;;  %15185 = vmatprep.mubr.f32.mxu1 %v19119_v47  ;;  %v19156_v62 = vld [vmem:[#allocation2 + $0x18] sm:$0xff] }
 0x278   : > { %v4473_v32 = vpop.f32.mrf.mxu0  ;;  %15352 = vmatmul.mubr.f32.gmra.mxu0 %v5500_v19  ;;  %15186 = vmatmul.mubr.f32.gmra.mxu1 %v19111_v56  ;;  %v5502_v20 = vld [vmem:[#allocation2 + $0x142] sm:$0xff]  ;;  %v15045_v57 = vpop.f32.mrf.mxu1 }
 0x279   : > { %4871 = vst [vmem:[#allocation2 + $0x171] sm:$0xff] %v19124_v8  ;;  %v19131_v59 = vmax.f32 %v4589_v26, 0.0  ;;  %v4592_v17 = vadd.f32 %v18878_v33, %v4545_v16  ;;  %v4544_v22 = vadd.f32 %v4473_v32, %v4074_v51  ;;  %v4881_v51 = vld [vmem:[#allocation2 + $0x8] sm:$0xff]  ;;  %v12926_v26 = vld [vmem:[%s22483_s3 + $0x1f0] sm:$0xff]  ;;  %v19195_v57 = vld [vmem:[#allocation2 + $0x60] sm:$0xff] }
 0x27a   : > { %v15104_v10 = vpop.f32.mrf.mxu0  ;;  %v5501_v53 = vld [vmem:[#allocation2 + $0x13a] sm:$0xff]  ;;  %v4023_v1 = vpop.f32.mrf.mxu1 }
 0x27b   : > { %4870 = vst [vmem:[#allocation2 + $0x169] sm:$0xff] %v19131_v59  ;;  %v19135_v21 = vmax.f32 %v4592_v17, 0.0  ;;  %v4591_v63 = vadd.f32 %v18878_v33, %v4544_v22  ;;  %v4547_v61 = vadd.f32 %v15104_v10, %v4077_v4  ;;  %15354 = vmatprep.mubr.f32.mxu0 %v5501_v53  ;;  %15188 = vmatprep.mubr.f32.mxu1 %v19131_v59  ;;  %v22678_v19 = vld [vmem:[#allocation39_spill] sm:$0xff]  ;;  %v19169_v17 = vld [vmem:[#allocation2 + $0x30] sm:$0xff]  ;;  %v19175_v10 = vld [vmem:[#allocation2 + $0x38] sm:$0xff] }
 0x27c   : > { %v4483_v48 = vpop.f32.mrf.mxu0  ;;  %15355 = vmatmul.mubr.f32.gmra.mxu0 %v5502_v20  ;;  %15189 = vmatmul.mubr.f32.gmra.mxu1 %v19124_v8  ;;  %v5504_v43 = vld [vmem:[#allocation2 + $0x15a] sm:$0xff]  ;;  %v12925_v4 = vld [vmem:[%s22483_s3 + $0x1e8] sm:$0xff]  ;;  %v12922_v1 = vld [vmem:[%s22483_s3 + $0x1d0] sm:$0xff] }
 0x27d   : > { %4873 = vst [vmem:[#allocation2 + $0x189] sm:$0xff] %v19135_v21  ;;  %v19141_v5 = vmax.f32 %v4591_v63, 0.0  ;;  %v4594_v7 = vadd.f32 %v18878_v33, %v4547_v61  ;;  %v4546_v9 = vadd.f32 %v4483_v48, %v4076_v41  ;;  %v15048_v15 = vpop.f32.mrf.mxu1  ;;  %v19171_v22 = vld [vmem:[#allocation2 + $0x1] sm:$0xff]  ;;  %v6146_v41 = vld [vmem:[#allocation2 + $0x31] sm:$0xff]  ;;  %v22679_v20 = vld [vmem:[#allocation56_spill] sm:$0xff] }
 0x27e   : > { %v5503_v36 = vld [vmem:[#allocation2 + $0x152] sm:$0xff]  ;;  %v15107_v42 = vpop.f32.mrf.mxu0  ;;  %v12924_v53 = vld [vmem:[%s22483_s3 + $0x1e0] sm:$0xff]  ;;  %v19182_v63 = vld [vmem:[#allocation2 + $0x48] sm:$0xff] }
 0x27f   : > { %4872 = vst [vmem:[#allocation2 + $0x181] sm:$0xff] %v19141_v5  ;;  %v19145_v30 = vmax.f32 %v4594_v7, 0.0  ;;  %v4593_v24 = vadd.f32 %v18878_v33, %v4546_v9  ;;  %15357 = vmatprep.mubr.f32.mxu0 %v5503_v36  ;;  %15191 = vmatprep.mubr.f32.mxu1 %v19141_v5  ;;  %v4033_v2 = vpop.f32.mrf.mxu1  ;;  %v12974_v61 = vld [vmem:[%s22483_s3 + $0x370] sm:$0xff]  ;;  %v6147_v48 = vld [vmem:[#allocation2 + $0x39] sm:$0xff]  ;;  %v12973_v36 = vld [vmem:[%s22483_s3 + $0x368] sm:$0xff] }
 0x280   : > { %15358 = vmatmul.mubr.f32.gmra.mxu0 %v5504_v43  ;;  %15192 = vmatmul.mubr.f32.gmra.mxu1 %v19135_v21  ;;  %v4493_v28 = vpop.f32.mrf.mxu0  ;;  %v5506_v33 = vld [vmem:[#allocation2 + $0x172] sm:$0xff]  ;;  %v19202_v43 = vld [vmem:[#allocation2 + $0x68] sm:$0xff] }
 0x281   : > { %4875 = vst [vmem:[#allocation2 + $0x1a1] sm:$0xff] %v19145_v30  ;;  %v19151_v31 = vmax.f32 %v4593_v24, 0.0  ;;  %v19189_v7 = vld [vmem:[#allocation2 + $0x50] sm:$0xff]  ;;  %v12923_v9 = vld [vmem:[%s22483_s3 + $0x1d8] sm:$0xff] }
 0x282   : > { %v5505_v46 = vld [vmem:[#allocation2 + $0x16a] sm:$0xff]  ;;  %v15110_v52 = vpop.f32.mrf.mxu0  ;;  %v19208_v42 = vld [vmem:[#allocation2 + $0x78] sm:$0xff] }
 0x283   : > { %4874 = vst [vmem:[#allocation2 + $0x199] sm:$0xff] %v19151_v31  ;;  %15360 = vmatprep.mubr.f32.mxu0 %v5505_v46  ;;  %15194 = vmatprep.mubr.f32.mxu1 %v19151_v31  ;;  %v6149_v24 = vld [vmem:[#allocation2 + $0x51] sm:$0xff]  ;;  %v19215_v46 = vld [vmem:[#allocation2 + $0x80] sm:$0xff] }
 0x284   : > { %15361 = vmatmul.mubr.f32.gmra.mxu0 %v5506_v33  ;;  %15195 = vmatmul.mubr.f32.gmra.mxu1 %v19145_v30  ;;  %v5508_v39 = vld [vmem:[#allocation2 + $0x18a] sm:$0xff]  ;;  %v4503_v16 = vpop.f32.mrf.mxu0  ;;  %v19229_v28 = vld [vmem:[#allocation2 + $0x98] sm:$0xff] }
 0x285   : > { %15229 = vmatprep.mubr.f32.mxu1 %v4880_v12  ;;  %v12921_v12 = vld [vmem:[%s22483_s3 + $0x1c8] sm:$0xff]  ;;  %v19222_v15 = vld [vmem:[#allocation2 + $0x90] sm:$0xff]  ;;  %v19264_v52 = vld [vmem:[#allocation2 + $0xd8] sm:$0xff] }
 0x286   : > { %v5507_v13 = vld [vmem:[#allocation2 + $0x182] sm:$0xff]  ;;  %v19243_v2 = vld [vmem:[#allocation2 + $0xb0] sm:$0xff]  ;;  %v19285_v16 = vld [vmem:[#allocation2 + $0xf8] sm:$0xff] }
 0x287   : > { %15363 = vmatprep.mubr.f32.mxu0 %v5507_v13  ;;  %v19236_v33 = vld [vmem:[#allocation2 + $0xa8] sm:$0xff] }
 0x288   : > { %15364 = vmatmul.mubr.f32.gmra.mxu0 %v5508_v39  ;;  %15230 = vmatmul.mubr.f32.vlgmr.msra.gmra.mxu1 %v4881_v51  ;;  %v5510_v18 = vld [vmem:[#allocation2 + $0x1a2] sm:$0xff] }
 0x289   : > { %15370 = vmatpush3.msra.mxu1 %v22678_v19  ;;  %15232 = vmatprep.mubr.f32.mxu1 %v19156_v62  ;;  %v19250_v51 = vld [vmem:[#allocation2 + $0xc0] sm:$0xff]  ;;  %v19257_v13 = vld [vmem:[#allocation2 + $0xc8] sm:$0xff] }
 0x28a   : > { %v5509_v32 = vld [vmem:[#allocation2 + $0x19a] sm:$0xff]  ;;  %15371 = vmatprep.subr.mxu1 %v12926_v26  ;;  %v19292_v19 = vld [vmem:[#allocation2 + $0x108] sm:$0xff] }
 0x28b   : > { %15366 = vmatprep.mubr.f32.mxu0 %v5509_v32  ;;  %15372 = vmatpush3.msra.mxu1 %v12926_v26  ;;  %v19271_v39 = vld [vmem:[#allocation2 + $0xe0] sm:$0xff]  ;;  %v19278_v26 = vld [vmem:[#allocation2 + $0xf0] sm:$0xff] }
 0x28c   : > { %15367 = vmatmul.mubr.f32.gmra.mxu0 %v5510_v18  ;;  %15233 = vmatmul.mubr.f32.gmra.mxu1 %v19163_v0  ;;  %v19299_v32 = vld [vmem:[#allocation2 + $0x110] sm:$0xff]  ;;  %v19306_v18 = vld [vmem:[#allocation2 + $0x120] sm:$0xff] }
 0x28d   : > { %15487 = vmatprep.mubr.f32.mxu0 %v19171_v22  ;;  %15235 = vmatprep.mubr.f32.mxu1 %v19169_v17 }
 0x28e   : > { %15373 = vmatprep.subr.mxu1 %v12925_v4 }
 0x28f   : > { %15374 = vmatpush3.msra.mxu1 %v12925_v4  ;;  %v19313_v4 = vld [vmem:[#allocation2 + $0x128] sm:$0xff] }
 0x290   : > { %15488 = vmatmul.mubr.f32.vlgmr.msra.gmra.mxu0 %v19171_v22  ;;  %15236 = vmatmul.mubr.f32.gmra.mxu1 %v19175_v10 }
 0x291   : > { %15490 = vmatprep.mubr.f32.mxu0 %v6146_v41  ;;  %15238 = vmatprep.mubr.f32.mxu1 %v19182_v63  ;;  %v19327_v41 = vld [vmem:[#allocation2 + $0x140] sm:$0xff] }
 0x292   : > { %15375 = vmatprep.subr.mxu1 %v12924_v53  ;;  %15628 = vmatpush3.msra.mxu0 %v22679_v20  ;;  %v19341_v20 = vld [vmem:[#allocation2 + $0x158] sm:$0xff] }
 0x293   : > { %15376 = vmatpush3.msra.mxu1 %v12924_v53  ;;  %15629 = vmatprep.subr.mxu0 %v12974_v61  ;;  %v19320_v53 = vld [vmem:[#allocation2 + $0x138] sm:$0xff] }
 0x294   : > { %15491 = vmatmul.mubr.f32.gmra.mxu0 %v6147_v48  ;;  %15239 = vmatmul.mubr.f32.gmra.mxu1 %v19189_v7  ;;  %v19348_v48 = vld [vmem:[#allocation2 + $0x168] sm:$0xff] }
 0x295   : > { %15493 = vmatprep.mubr.f32.mxu0 %v18913_v60  ;;  %15241 = vmatprep.mubr.f32.mxu1 %v19195_v57  ;;  %v12972_v60 = vld [vmem:[%s22483_s3 + $0x360] sm:$0xff] }
 0x296   : > { %15377 = vmatprep.subr.mxu1 %v12923_v9  ;;  %15630 = vmatpush3.msra.mxu0 %v12974_v61  ;;  %v19334_v61 = vld [vmem:[#allocation2 + $0x150] sm:$0xff] }
 0x297   : > { %15378 = vmatpush3.msra.mxu1 %v12923_v9  ;;  %15631 = vmatprep.subr.mxu0 %v12973_v36  ;;  %v19355_v9 = vld [vmem:[#allocation2 + $0x170] sm:$0xff] }
 0x298   : > { %15494 = vmatmul.mubr.f32.gmra.mxu0 %v6149_v24  ;;  %15242 = vmatmul.mubr.f32.gmra.mxu1 %v19202_v43  ;;  %v19369_v24 = vld [vmem:[#allocation2 + $0x188] sm:$0xff] }
 0x299   : > { %15496 = vmatprep.mubr.f32.mxu0 %v18932_v6  ;;  %15244 = vmatprep.mubr.f32.mxu1 %v19208_v42  ;;  %v12971_v6 = vld [vmem:[%s22483_s3 + $0x358] sm:$0xff] }
 0x29a   : > { %15379 = vmatprep.subr.mxu1 %v12922_v1  ;;  %15632 = vmatpush3.msra.mxu0 %v12973_v36  ;;  %v19362_v36 = vld [vmem:[#allocation2 + $0x180] sm:$0xff] }
 0x29b   : > { %15380 = vmatpush3.msra.mxu1 %v12922_v1  ;;  %15633 = vmatprep.subr.mxu0 %v12972_v60  ;;  %v12960_v1 = vld [vmem:[%s22483_s3 + $0x300] sm:$0xff] }
 0x29c   : > { %15497 = vmatmul.mubr.f32.gmra.mxu0 %v18921_v35  ;;  %15245 = vmatmul.mubr.f32.gmra.mxu1 %v19215_v46  ;;  %v12920_v35 = vld [vmem:[%s22483_s3 + $0x1c0] sm:$0xff] }
 0x29d   : > { %15499 = vmatprep.mubr.f32.mxu0 %v18952_v40  ;;  %15247 = vmatprep.mubr.f32.mxu1 %v19222_v15  ;;  %v12970_v40 = vld [vmem:[%s22483_s3 + $0x350] sm:$0xff] }
 0x29e   : > { %15381 = vmatprep.subr.mxu1 %v12921_v12  ;;  %15634 = vmatpush3.msra.mxu0 %v12972_v60  ;;  %v12950_v60 = vld [vmem:[%s22483_s3 + $0x2b0] sm:$0xff] }
 0x29f   : > { %15382 = vmatpush3.msra.mxu1 %v12921_v12  ;;  %15635 = vmatprep.subr.mxu0 %v12971_v6  ;;  %v12949_v12 = vld [vmem:[%s22483_s3 + $0x2a8] sm:$0xff] }
 0x2a0   : > { %15500 = vmatmul.mubr.f32.gmra.mxu0 %v18940_v25  ;;  %15248 = vmatmul.mubr.f32.gmra.mxu1 %v19229_v28  ;;  %v12919_v25 = vld [vmem:[%s22483_s3 + $0x1b8] sm:$0xff] }
 0x2a1   : > { %15502 = vmatprep.mubr.f32.mxu0 %v18972_v3  ;;  %15250 = vmatprep.mubr.f32.mxu1 %v19236_v33  ;;  %v12969_v3 = vld [vmem:[%s22483_s3 + $0x348] sm:$0xff] }
 0x2a2   : > { %15383 = vmatprep.subr.mxu1 %v12920_v35  ;;  %15636 = vmatpush3.msra.mxu0 %v12971_v6  ;;  %v12948_v6 = vld [vmem:[%s22483_s3 + $0x2a0] sm:$0xff] }
 0x2a3   : > { %15384 = vmatpush3.msra.mxu1 %v12920_v35  ;;  %15637 = vmatprep.subr.mxu0 %v12970_v40  ;;  %v19493_v35 = vpop.f32.mrf.mxu1 }
 0x2a4   : > { %15503 = vmatmul.mubr.f32.gmra.mxu0 %v18960_v37  ;;  %15251 = vmatmul.mubr.f32.gmra.mxu1 %v19243_v2  ;;  %v12918_v37 = vld [vmem:[%s22483_s3 + $0x1b0] sm:$0xff] }
 0x2a5   : > { %15505 = vmatprep.mubr.f32.mxu0 %v18992_v11  ;;  %15253 = vmatprep.mubr.f32.mxu1 %v19250_v51  ;;  %v12968_v11 = vld [vmem:[%s22483_s3 + $0x340] sm:$0xff] }
 0x2a6   : > { %15385 = vmatprep.subr.mxu1 %v12919_v25  ;;  %15638 = vmatpush3.msra.mxu0 %v12970_v40  ;;  %v12997_v40 = vld [vmem:[%s22483_s3 + $0x428] sm:$0xff] }
 0x2a7   : > { %15386 = vmatpush3.msra.mxu1 %v12919_v25  ;;  %15639 = vmatprep.subr.mxu0 %v12969_v3  ;;  %v12946_v25 = vld [vmem:[%s22483_s3 + $0x290] sm:$0xff] }
 0x2a8   : > { %15506 = vmatmul.mubr.f32.gmra.mxu0 %v18980_v34  ;;  %15254 = vmatmul.mubr.f32.gmra.mxu1 %v19257_v13  ;;  %v12917_v34 = vld [vmem:[%s22483_s3 + $0x1a8] sm:$0xff] }
 0x2a9   : > { %15508 = vmatprep.mubr.f32.mxu0 %v19012_v54  ;;  %15256 = vmatprep.mubr.f32.mxu1 %v19264_v52  ;;  %v12967_v54 = vld [vmem:[%s22483_s3 + $0x338] sm:$0xff] }
 0x2aa   : > { %15387 = vmatprep.subr.mxu1 %v12918_v37  ;;  %15640 = vmatpush3.msra.mxu0 %v12969_v3  ;;  %v12996_v3 = vld [vmem:[%s22483_s3 + $0x420] sm:$0xff] }
 0x2ab   : > { %15388 = vmatpush3.msra.mxu1 %v12918_v37  ;;  %15641 = vmatprep.subr.mxu0 %v12968_v11  ;;  %v12945_v37 = vld [vmem:[%s22483_s3 + $0x288] sm:$0xff] }
 0x2ac   : > { %15509 = vmatmul.mubr.f32.gmra.mxu0 %v19000_v29  ;;  %15257 = vmatmul.mubr.f32.gmra.mxu1 %v19271_v39  ;;  %v12916_v29 = vld [vmem:[%s22483_s3 + $0x1a0] sm:$0xff] }
 0x2ad   : > { %15511 = vmatprep.mubr.f32.mxu0 %v19032_v14  ;;  %15259 = vmatprep.mubr.f32.mxu1 %v19278_v26  ;;  %v12966_v14 = vld [vmem:[%s22483_s3 + $0x330] sm:$0xff] }
 0x2ae   : > { %15389 = vmatprep.subr.mxu1 %v12917_v34  ;;  %15642 = vmatpush3.msra.mxu0 %v12968_v11  ;;  %v12995_v11 = vld [vmem:[%s22483_s3 + $0x418] sm:$0xff] }
 0x2af   : > { %15390 = vmatpush3.msra.mxu1 %v12917_v34  ;;  %15643 = vmatprep.subr.mxu0 %v12967_v54  ;;  %v12944_v34 = vld [vmem:[%s22483_s3 + $0x280] sm:$0xff] }
 0x2b0   : > { %15512 = vmatmul.mubr.f32.gmra.mxu0 %v19020_v23  ;;  %15260 = vmatmul.mubr.f32.gmra.mxu1 %v19285_v16  ;;  %v12915_v23 = vld [vmem:[%s22483_s3 + $0x198] sm:$0xff] }
 0x2b1   : > { %15514 = vmatprep.mubr.f32.mxu0 %v19052_v55  ;;  %15262 = vmatprep.mubr.f32.mxu1 %v19292_v19  ;;  %v12965_v55 = vld [vmem:[%s22483_s3 + $0x328] sm:$0xff] }
 0x2b2   : > { %15391 = vmatprep.subr.mxu1 %v12916_v29  ;;  %15644 = vmatpush3.msra.mxu0 %v12967_v54 }
 0x2b3   : > { %15392 = vmatpush3.msra.mxu1 %v12916_v29  ;;  %15645 = vmatprep.subr.mxu0 %v12966_v14 }
 0x2b4   : > { %15515 = vmatmul.mubr.f32.gmra.mxu0 %v19040_v27  ;;  %15263 = vmatmul.mubr.f32.gmra.mxu1 %v19299_v32  ;;  %v12914_v27 = vld [vmem:[%s22483_s3 + $0x190] sm:$0xff] }
 0x2b5   : > { %15517 = vmatprep.mubr.f32.mxu0 %v19070_v38  ;;  %15265 = vmatprep.mubr.f32.mxu1 %v19306_v18  ;;  %v12964_v38 = vld [vmem:[%s22483_s3 + $0x320] sm:$0xff] }
 0x2b6   : > { %15393 = vmatprep.subr.mxu1 %v12915_v23  ;;  %15646 = vmatpush3.msra.mxu0 %v12966_v14 }
 0x2b7   : > { %15394 = vmatpush3.msra.mxu1 %v12915_v23  ;;  %15647 = vmatprep.subr.mxu0 %v12965_v55  ;;  %v12993_v23 = vld [vmem:[%s22483_s3 + $0x408] sm:$0xff] }
 0x2b8   : > { %15518 = vmatmul.mubr.f32.gmra.mxu0 %v19060_v50  ;;  %15266 = vmatmul.mubr.f32.gmra.mxu1 %v19313_v4  ;;  %v12913_v50 = vld [vmem:[%s22483_s3 + $0x188] sm:$0xff] }
 0x2b9   : > { %15520 = vmatprep.mubr.f32.mxu0 %v19088_v45  ;;  %15268 = vmatprep.mubr.f32.mxu1 %v19320_v53  ;;  %v12963_v45 = vld [vmem:[%s22483_s3 + $0x318] sm:$0xff] }
 0x2ba   : > { %15395 = vmatprep.subr.mxu1 %v12914_v27  ;;  %15648 = vmatpush3.msra.mxu0 %v12965_v55  ;;  %v6845_v55 = vld [vmem:[#allocation2 + $0x1b0] sm:$0xff] }
 0x2bb   : > { %15396 = vmatpush3.msra.mxu1 %v12914_v27  ;;  %15649 = vmatprep.subr.mxu0 %v12964_v38 }
 0x2bc   : > { %15521 = vmatmul.mubr.f32.gmra.mxu0 %v19078_v44  ;;  %15269 = vmatmul.mubr.f32.gmra.mxu1 %v19327_v41  ;;  %v12912_v44 = vld [vmem:[%s22483_s3 + $0x180] sm:$0xff] }
 0x2bd   : > { %15523 = vmatprep.mubr.f32.mxu0 %v19106_v58  ;;  %15271 = vmatprep.mubr.f32.mxu1 %v19334_v61  ;;  %v12962_v58 = vld [vmem:[%s22483_s3 + $0x310] sm:$0xff] }
 0x2be   : > { %15397 = vmatprep.subr.mxu1 %v12913_v50  ;;  %15650 = vmatpush3.msra.mxu0 %v12964_v38  ;;  %v6846_v38 = vld [vmem:[#allocation2 + $0x1b8] sm:$0xff] }
 0x2bf   : > { %15398 = vmatpush3.msra.mxu1 %v12913_v50  ;;  %15651 = vmatprep.subr.mxu0 %v12963_v45 }
 0x2c0   : > { %15524 = vmatmul.mubr.f32.gmra.mxu0 %v19096_v49  ;;  %15272 = vmatmul.mubr.f32.gmra.mxu1 %v19341_v20  ;;  %v12959_v49 = vld [vmem:[%s22483_s3 + $0x2f8] sm:$0xff] }
 0x2c1   : > { %15526 = vmatprep.mubr.f32.mxu0 %v19119_v47  ;;  %15274 = vmatprep.mubr.f32.mxu1 %v19348_v48  ;;  %v12961_v47 = vld [vmem:[%s22483_s3 + $0x308] sm:$0xff] }
 0x2c2   : > { %15652 = vmatpush3.msra.mxu0 %v12963_v45  ;;  %15399 = vmatprep.subr.mxu1 %v12912_v44 }
 0x2c3   : > { %15653 = vmatprep.subr.mxu0 %v12962_v58  ;;  %15400 = vmatpush3.msra.mxu1 %v12912_v44  ;;  %v6479_v44 = vld [vmem:[#allocation2 + $0x22] sm:$0xff] }
 0x2c4   : > { %15527 = vmatmul.mubr.f32.gmra.mxu0 %v19111_v56  ;;  %15275 = vmatmul.mubr.f32.gmra.mxu1 %v19355_v9  ;;  %v19373_v56 = vld [vmem:[#allocation2 + $0x198] sm:$0xff] }
 0x2c5   : > { %15529 = vmatprep.mubr.f32.mxu0 %v19131_v59  ;;  %15277 = vmatprep.mubr.f32.mxu1 %v19362_v36  ;;  %v19380_v59 = vld [vmem:[#allocation2 + $0x1a0] sm:$0xff] }
 0x2c6   : > { %15654 = vmatpush3.msra.mxu0 %v12962_v58  ;;  %15541 = vmatprep.subr.mxu1 %v12959_v49  ;;  %v6847_v58 = vld [vmem:[#allocation2 + $0x1c8] sm:$0xff] }
 0x2c7   : > { %15655 = vmatprep.subr.mxu0 %v12961_v47 }
 0x2c8   : > { %15530 = vmatmul.mubr.f32.gmra.mxu0 %v19124_v8  ;;  %15278 = vmatmul.mubr.f32.gmra.mxu1 %v19369_v24  ;;  %v13007_v8 = vld [vmem:[%s22483_s3 + $0x478] sm:$0xff] }
 0x2c9   : > { %15532 = vmatprep.mubr.f32.mxu0 %v19141_v5  ;;  %15280 = vmatprep.mubr.f32.mxu1 %v19373_v56  ;;  %v12958_v5 = vld [vmem:[%s22483_s3 + $0x2f0] sm:$0xff] }
 0x2ca   : > { %15656 = vmatpush3.msra.mxu0 %v12961_v47 }
 0x2cb   : > { %15657 = vmatprep.subr.mxu0 %v12960_v1 }
 0x2cc   : > { %15533 = vmatmul.mubr.f32.gmra.mxu0 %v19135_v21  ;;  %15281 = vmatmul.mubr.f32.gmra.mxu1 %v19380_v59  ;;  %v12957_v21 = vld [vmem:[%s22483_s3 + $0x2e8] sm:$0xff] }
 0x2cd   : > { %15535 = vmatprep.mubr.f32.mxu0 %v19151_v31  ;;  %15401 = vmatprep.mubr.f32.mxu1 %v19156_v62  ;;  %v13006_v31 = vld [vmem:[%s22483_s3 + $0x470] sm:$0xff]  ;;  %v12955_v62 = vld [vmem:[%s22483_s3 + $0x2d8] sm:$0xff] }
 0x2ce   : > { %15658 = vmatpush3.msra.mxu0 %v12960_v1 }
 0x2cf   : > { %15799 = vmatprep.subr.mxu0 %v13007_v8 }
 0x2d0   : > { %15536 = vmatmul.mubr.f32.gmra.mxu0 %v19145_v30  ;;  %15402 = vmatmul.mubr.f32.vlgmr.msra.gmra.mxu1 %v19163_v0  ;;  %v12956_v30 = vld [vmem:[%s22483_s3 + $0x2e0] sm:$0xff]  ;;  %v13005_v0 = vld [vmem:[%s22483_s3 + $0x468] sm:$0xff] }
 0x2d1   : > { %15538 = vmatprep.mubr.f32.mxu0 %v19171_v22  ;;  %15542 = vmatpush3.msra.mxu1 %v12959_v49  ;;  %v12990_v49 = vld [vmem:[%s22483_s3 + $0x3f0] sm:$0xff] }
 0x2d2   : > { %15404 = vmatprep.mubr.f32.mxu1 %v19169_v17  ;;  %15543 = vmatprep.subr.mxu1 %v12958_v5 }
 0x2d3   : > { %15544 = vmatpush3.msra.mxu1 %v12958_v5  ;;  %v12989_v5 = vld [vmem:[%s22483_s3 + $0x3e8] sm:$0xff] }
 0x2d4   : > { %15539 = vmatmul.mubr.f32.gmra.mxu0 %v19171_v22  ;;  %15405 = vmatmul.mubr.f32.gmra.mxu1 %v19175_v10  ;;  %v13004_v22 = vld [vmem:[%s22483_s3 + $0x460] sm:$0xff] }
 0x2d5   : > { %15659 = vmatprep.mubr.f32.mxu0 %v19169_v17  ;;  %15407 = vmatprep.mubr.f32.mxu1 %v19182_v63  ;;  %v12954_v17 = vld [vmem:[%s22483_s3 + $0x2d0] sm:$0xff] }
 0x2d6   : > { %15545 = vmatprep.subr.mxu1 %v12957_v21 }
 0x2d7   : > { %15546 = vmatpush3.msra.mxu1 %v12957_v21 }
 0x2d8   : > { %15660 = vmatmul.mubr.f32.vlgmr.msra.gmra.mxu0 %v19175_v10  ;;  %15408 = vmatmul.mubr.f32.gmra.mxu1 %v19189_v7  ;;  %v12953_v10 = vld [vmem:[%s22483_s3 + $0x2c8] sm:$0xff] }
 0x2d9   : > { %15662 = vmatprep.mubr.f32.mxu0 %v19182_v63  ;;  %15410 = vmatprep.mubr.f32.mxu1 %v19195_v57  ;;  %v13003_v63 = vld [vmem:[%s22483_s3 + $0x458] sm:$0xff] }
 0x2da   : > { %15547 = vmatprep.subr.mxu1 %v12956_v30  ;;  %15800 = vmatpush3.msra.mxu0 %v13007_v8  ;;  %v7482_v8 = vld [vmem:[#allocation2 + $0x3a] sm:$0xff] }
 0x2db   : > { %15548 = vmatpush3.msra.mxu1 %v12956_v30  ;;  %15801 = vmatprep.subr.mxu0 %v13006_v31  ;;  %v7483_v30 = vld [vmem:[#allocation2 + $0x4a] sm:$0xff] }
 0x2dc   : > { %15663 = vmatmul.mubr.f32.gmra.mxu0 %v19189_v7  ;;  %15411 = vmatmul.mubr.f32.gmra.mxu1 %v19202_v43  ;;  %v12952_v7 = vld [vmem:[%s22483_s3 + $0x2c0] sm:$0xff] }
 0x2dd   : > { %15665 = vmatprep.mubr.f32.mxu0 %v19195_v57  ;;  %15413 = vmatprep.mubr.f32.mxu1 %v19208_v42  ;;  %v13002_v57 = vld [vmem:[%s22483_s3 + $0x450] sm:$0xff] }
 0x2de   : > { %15549 = vmatprep.subr.mxu1 %v12955_v62  ;;  %15802 = vmatpush3.msra.mxu0 %v13006_v31 }
 0x2df   : > { %15550 = vmatpush3.msra.mxu1 %v12955_v62  ;;  %15803 = vmatprep.subr.mxu0 %v13005_v0 }
 0x2e0   : > { %15666 = vmatmul.mubr.f32.gmra.mxu0 %v19202_v43  ;;  %15414 = vmatmul.mubr.f32.gmra.mxu1 %v19215_v46  ;;  %v12951_v43 = vld [vmem:[%s22483_s3 + $0x2b8] sm:$0xff] }
 0x2e1   : > { %15668 = vmatprep.mubr.f32.mxu0 %v19208_v42  ;;  %15416 = vmatprep.mubr.f32.mxu1 %v19222_v15  ;;  %v13001_v42 = vld [vmem:[%s22483_s3 + $0x448] sm:$0xff] }
 0x2e2   : > { %15551 = vmatprep.subr.mxu1 %v12954_v17  ;;  %15804 = vmatpush3.msra.mxu0 %v13005_v0 }
 0x2e3   : > { %15552 = vmatpush3.msra.mxu1 %v12954_v17  ;;  %15805 = vmatprep.subr.mxu0 %v13004_v22  ;;  %v7484_v17 = vld [vmem:[#allocation2 + $0x52] sm:$0xff] }
 0x2e4   : > { %15669 = vmatmul.mubr.f32.gmra.mxu0 %v19215_v46  ;;  %15417 = vmatmul.mubr.f32.gmra.mxu1 %v19229_v28  ;;  %v13000_v46 = vld [vmem:[%s22483_s3 + $0x440] sm:$0xff] }
 0x2e5   : > { %15671 = vmatprep.mubr.f32.mxu0 %v19222_v15  ;;  %15419 = vmatprep.mubr.f32.mxu1 %v19236_v33  ;;  %v12999_v15 = vld [vmem:[%s22483_s3 + $0x438] sm:$0xff] }
 0x2e6   : > { %15553 = vmatprep.subr.mxu1 %v12953_v10  ;;  %15806 = vmatpush3.msra.mxu0 %v13004_v22  ;;  %v12988_v22 = vld [vmem:[%s22483_s3 + $0x3e0] sm:$0xff] }
 0x2e7   : > { %15554 = vmatpush3.msra.mxu1 %v12953_v10  ;;  %15807 = vmatprep.subr.mxu0 %v13003_v63 }
 0x2e8   : > { %15672 = vmatmul.mubr.f32.gmra.mxu0 %v19229_v28  ;;  %15420 = vmatmul.mubr.f32.gmra.mxu1 %v19243_v2  ;;  %v12998_v28 = vld [vmem:[%s22483_s3 + $0x430] sm:$0xff] }
 0x2e9   : > { %15674 = vmatprep.mubr.f32.mxu0 %v19236_v33  ;;  %15422 = vmatprep.mubr.f32.mxu1 %v19250_v51  ;;  %v12947_v33 = vld [vmem:[%s22483_s3 + $0x298] sm:$0xff] }
 0x2ea   : > { %15555 = vmatprep.subr.mxu1 %v12952_v7  ;;  %15808 = vmatpush3.msra.mxu0 %v13003_v63  ;;  %v7485_v63 = vld [vmem:[#allocation2 + $0x62] sm:$0xff] }
 0x2eb   : > { %15556 = vmatpush3.msra.mxu1 %v12952_v7  ;;  %15809 = vmatprep.subr.mxu0 %v13002_v57 }
 0x2ec   : > { %15675 = vmatmul.mubr.f32.gmra.mxu0 %v19243_v2  ;;  %15423 = vmatmul.mubr.f32.gmra.mxu1 %v19257_v13  ;;  %v19505_v2 = vpop.f32.mrf.mxu1 }
 0x2ed   : > { %15677 = vmatprep.mubr.f32.mxu0 %v19250_v51  ;;  %15425 = vmatprep.mubr.f32.mxu1 %v19264_v52  ;;  %22680 = vst [vmem:[#allocation14_spill] sm:$0xff] %v19505_v2  ;;  %v19511_v51 = vpop.f32.mrf.mxu0 }
 0x2ee   : > { %15557 = vmatprep.subr.mxu1 %v12951_v43  ;;  %15810 = vmatpush3.msra.mxu0 %v13002_v57 }
 0x2ef   : > { %15558 = vmatpush3.msra.mxu1 %v12951_v43  ;;  %15811 = vmatprep.subr.mxu0 %v13001_v42 }
 0x2f0   : > { %15678 = vmatmul.mubr.f32.gmra.mxu0 %v19257_v13  ;;  %15426 = vmatmul.mubr.f32.gmra.mxu1 %v19271_v39  ;;  %v19519_v13 = vpop.f32.mrf.mxu1 }
 0x2f1   : > { %15680 = vmatprep.mubr.f32.mxu0 %v19264_v52  ;;  %15428 = vmatprep.mubr.f32.mxu1 %v19278_v26  ;;  %v19525_v52 = vpop.f32.mrf.mxu0 }
 0x2f2   : > { %15559 = vmatprep.subr.mxu1 %v12950_v60  ;;  %15812 = vmatpush3.msra.mxu0 %v13001_v42  ;;  %22681 = vst [vmem:[#allocation15_spill] sm:$0xff] %v19525_v52  ;;  %v7486_v42 = vld [vmem:[#allocation2 + $0x6a] sm:$0xff] }
 0x2f3   : > { %15560 = vmatpush3.msra.mxu1 %v12950_v60  ;;  %15813 = vmatprep.subr.mxu0 %v13000_v46  ;;  %v12987_v60 = vld [vmem:[%s22483_s3 + $0x3d8] sm:$0xff] }
 0x2f4   : > { %15681 = vmatmul.mubr.f32.gmra.mxu0 %v19271_v39  ;;  %15429 = vmatmul.mubr.f32.gmra.mxu1 %v19285_v16  ;;  %v19533_v39 = vpop.f32.mrf.mxu1 }
 0x2f5   : > { %15683 = vmatprep.mubr.f32.mxu0 %v19278_v26  ;;  %15431 = vmatprep.mubr.f32.mxu1 %v19292_v19  ;;  %22682 = vst [vmem:[#allocation16_spill] sm:$0xff] %v19533_v39  ;;  %v19539_v26 = vpop.f32.mrf.mxu0 }
 0x2f6   : > { %15561 = vmatprep.subr.mxu1 %v12949_v12  ;;  %15814 = vmatpush3.msra.mxu0 %v13000_v46 }
 0x2f7   : > { %15562 = vmatpush3.msra.mxu1 %v12949_v12  ;;  %15815 = vmatprep.subr.mxu0 %v12999_v15  ;;  %v19555_v14 = vpop.f32.mrf.mxu0  ;;  %v7487_v12 = vld [vmem:[#allocation2 + $0x7a] sm:$0xff] }
 0x2f8   : > { %15684 = vmatmul.mubr.f32.gmra.mxu0 %v19285_v16  ;;  %15432 = vmatmul.mubr.f32.gmra.mxu1 %v19299_v32  ;;  %v12994_v16 = vld [vmem:[%s22483_s3 + $0x410] sm:$0xff]  ;;  %22684 = vst [vmem:[#allocation18_spill] sm:$0xff] %v19555_v14 }
 0x2f9   : > { %15686 = vmatprep.mubr.f32.mxu0 %v19292_v19  ;;  %15434 = vmatprep.mubr.f32.mxu1 %v19306_v18  ;;  %v12991_v19 = vld [vmem:[%s22483_s3 + $0x3f8] sm:$0xff] }
 0x2fa   : > { %15563 = vmatprep.subr.mxu1 %v12948_v6  ;;  %15816 = vmatpush3.msra.mxu0 %v12999_v15 }
 0x2fb   : > { %15564 = vmatpush3.msra.mxu1 %v12948_v6  ;;  %15817 = vmatprep.subr.mxu0 %v12998_v28 }
 0x2fc   : > { %15687 = vmatmul.mubr.f32.gmra.mxu0 %v19299_v32  ;;  %15435 = vmatmul.mubr.f32.gmra.mxu1 %v19313_v4 }
 0x2fd   : > { %15689 = vmatprep.mubr.f32.mxu0 %v19306_v18  ;;  %15437 = vmatprep.mubr.f32.mxu1 %v19320_v53 }
 0x2fe   : > { %15565 = vmatprep.subr.mxu1 %v12947_v33  ;;  %15818 = vmatpush3.msra.mxu0 %v12998_v28 }
 0x2ff   : > { %15566 = vmatpush3.msra.mxu1 %v12947_v33  ;;  %15819 = vmatprep.subr.mxu0 %v12997_v40  ;;  %v7488_v33 = vld [vmem:[#allocation2 + $0x82] sm:$0xff] }
 0x300   : > { %15690 = vmatmul.mubr.f32.gmra.mxu0 %v19313_v4  ;;  %15438 = vmatmul.mubr.f32.gmra.mxu1 %v19327_v41 }
 0x301   : > { %15692 = vmatprep.mubr.f32.mxu0 %v19320_v53  ;;  %15440 = vmatprep.mubr.f32.mxu1 %v19334_v61  ;;  %v12992_v53 = vld [vmem:[%s22483_s3 + $0x400] sm:$0xff] }
 0x302   : > { %15567 = vmatprep.subr.mxu1 %v12946_v25  ;;  %15820 = vmatpush3.msra.mxu0 %v12997_v40  ;;  %v12986_v40 = vld [vmem:[%s22483_s3 + $0x3d0] sm:$0xff] }
 0x303   : > { %15568 = vmatpush3.msra.mxu1 %v12946_v25  ;;  %15821 = vmatprep.subr.mxu0 %v12996_v3 }
 0x304   : > { %15693 = vmatmul.mubr.f32.gmra.mxu0 %v19327_v41  ;;  %15441 = vmatmul.mubr.f32.gmra.mxu1 %v19341_v20 }
 0x305   : > { %15695 = vmatprep.mubr.f32.mxu0 %v19334_v61  ;;  %15443 = vmatprep.mubr.f32.mxu1 %v19348_v48  ;;  %v6478_v61 = vld [vmem:[#allocation2 + $0x1a] sm:$0xff] }
 0x306   : > { %15569 = vmatprep.subr.mxu1 %v12945_v37  ;;  %15822 = vmatpush3.msra.mxu0 %v12996_v3  ;;  %v7489_v3 = vld [vmem:[#allocation2 + $0x92] sm:$0xff] }
 0x307   : > { %15570 = vmatpush3.msra.mxu1 %v12945_v37  ;;  %15823 = vmatprep.subr.mxu0 %v12995_v11 }
 0x308   : > { %15696 = vmatmul.mubr.f32.gmra.mxu0 %v19341_v20  ;;  %v19541_v54 = vpop.f32.mrf.mxu1  ;;  %15444 = vmatmul.mubr.f32.gmra.mxu1 %v19355_v9 }
 0x309   : > { %15698 = vmatprep.mubr.f32.mxu0 %v19348_v48  ;;  %15446 = vmatprep.mubr.f32.mxu1 %v19362_v36 }
 0x30a   : > { %v19549_v29 = vpop.f32.mrf.mxu1  ;;  %15824 = vmatpush3.msra.mxu0 %v12995_v11  ;;  %15571 = vmatprep.subr.mxu1 %v12944_v34 }
 0x30b   : > { %22683 = vst [vmem:[#allocation17_spill] sm:$0xff] %v19549_v29  ;;  %15825 = vmatprep.subr.mxu0 %v12994_v16  ;;  %15572 = vmatpush3.msra.mxu1 %v12944_v34  ;;  %v7151_v29 = vld [vmem:[#allocation2 + $0x61] sm:$0xff] }
 0x30c   : > { %15699 = vmatmul.mubr.f32.gmra.mxu0 %v19355_v9  ;;  %v19557_v32 = vpop.f32.mrf.mxu1  ;;  %15447 = vmatmul.mubr.f32.gmra.mxu1 %v19369_v24 }
 0x30d   : > { %15701 = vmatprep.mubr.f32.mxu0 %v19362_v36  ;;  %15449 = vmatprep.mubr.f32.mxu1 %v19373_v56 }
 0x30e   : > { %v19565_v18 = vpop.f32.mrf.mxu1  ;;  %15826 = vmatpush3.msra.mxu0 %v12994_v16  ;;  %15713 = vmatprep.subr.mxu1 %v12991_v19  ;;  %v7490_v16 = vld [vmem:[#allocation2 + $0x9a] sm:$0xff] }
 0x30f   : > { %22685 = vst [vmem:[#allocation19_spill] sm:$0xff] %v19565_v18  ;;  %15827 = vmatprep.subr.mxu0 %v12993_v23 }
 0x310   : > { %v19567_v4 = vpop.f32.mrf.mxu0  ;;  %15702 = vmatmul.mubr.f32.gmra.mxu0 %v19369_v24  ;;  %v19570_v27 = vpop.f32.mrf.mxu1  ;;  %15450 = vmatmul.mubr.f32.gmra.mxu1 %v19380_v59  ;;  %v6848_v24 = vld [vmem:[#allocation2 + $0x1d0] sm:$0xff] }
 0x311   : > { %15704 = vmatprep.mubr.f32.mxu0 %v19373_v56  ;;  %15452 = vmatprep.mubr.f32.mxu1 %v6845_v55  ;;  %v7481_v56 = vld [vmem:[#allocation2 + $0x32] sm:$0xff] }
 0x312   : > { %v19577_v41 = vpop.f32.mrf.mxu0  ;;  %v19579_v50 = vpop.f32.mrf.mxu1  ;;  %15828 = vmatpush3.msra.mxu0 %v12993_v23 }
 0x313   : > { %22686 = vst [vmem:[#allocation9_spill] sm:$0xff] %v19577_v41  ;;  %22687 = vst [vmem:[#allocation13_spill] sm:$0xff] %v19579_v50  ;;  %15829 = vmatprep.subr.mxu0 %v12992_v53 }
 0x314   : > { %v19581_v45 = vpop.f32.mrf.mxu0  ;;  %15705 = vmatmul.mubr.f32.gmra.mxu0 %v19380_v59  ;;  %v19584_v20 = vpop.f32.mrf.mxu1  ;;  %15453 = vmatmul.mubr.f32.gmra.mxu1 %v6846_v38 }
 0x315   : > { %15707 = vmatprep.mubr.f32.mxu0 %v6845_v55  ;;  %15573 = vmatprep.mubr.f32.mxu1 %v6478_v61  ;;  %v7491_v55 = vld [vmem:[#allocation2 + $0xaa] sm:$0xff] }
 0x316   : > { %v19586_v48 = vpop.f32.mrf.mxu0  ;;  %v19588_v9 = vpop.f32.mrf.mxu1  ;;  %15830 = vmatpush3.msra.mxu0 %v12992_v53 }
 0x317   : > { %22688 = vst [vmem:[#allocation38_spill] sm:$0xff] %v19586_v48  ;;  %22689 = vst [vmem:[#allocation26_spill] sm:$0xff] %v19588_v9  ;;  %v7512_v9 = vld [vmem:[#allocation2 + $0x1a2] sm:$0xff] }
 0x318   : > { %v19593_v36 = vpop.f32.mrf.mxu0  ;;  %15708 = vmatmul.mubr.f32.gmra.mxu0 %v6846_v38  ;;  %v19595_v47 = vpop.f32.mrf.mxu1  ;;  %15574 = vmatmul.mubr.f32.vlgmr.msra.gmra.mxu1 %v6479_v44  ;;  %v7492_v44 = vld [vmem:[#allocation2 + $0xb2] sm:$0xff] }
 0x319   : > { %15710 = vmatprep.mubr.f32.mxu0 %v6847_v58  ;;  %15714 = vmatpush3.msra.mxu1 %v12991_v19  ;;  %v12985_v19 = vld [vmem:[%s22483_s3 + $0x3c8] sm:$0xff]  ;;  %v12984_v58 = vld [vmem:[%s22483_s3 + $0x3c0] sm:$0xff] }
 0x31a   : > { %v19597_v1 = vpop.f32.mrf.mxu0  ;;  %15576 = vmatprep.mubr.f32.mxu1 %v7481_v56  ;;  %v19599_v59 = vpop.f32.mrf.mxu1  ;;  %15715 = vmatprep.subr.mxu1 %v12990_v49 }
 0x31b   : > { %22690 = vst [vmem:[#allocation20_spill] sm:$0xff] %v19597_v1  ;;  %22691 = vst [vmem:[#allocation41_spill] sm:$0xff] %v19599_v59  ;;  %15716 = vmatpush3.msra.mxu1 %v12990_v49  ;;  %v6512_v1 = vld [vmem:[#allocation2 + $0x1b2] sm:$0xff] }
 0x31c   : > { %v19604_v21 = vpop.f32.mrf.mxu0  ;;  %15711 = vmatmul.mubr.f32.gmra.mxu0 %v6848_v24  ;;  %v19606_v31 = vpop.f32.mrf.mxu1  ;;  %15577 = vmatmul.mubr.f32.gmra.mxu1 %v7482_v8  ;;  %v7493_v24 = vld [vmem:[#allocation2 + $0xc2] sm:$0xff] }
 0x31d   : > { %15831 = vmatprep.mubr.f32.mxu0 %v7481_v56  ;;  %15579 = vmatprep.mubr.f32.mxu1 %v7483_v30 }
 0x31e   : > { %v19608_v62 = vpop.f32.mrf.mxu0  ;;  %v19610_v0 = vpop.f32.mrf.mxu1  ;;  %15717 = vmatprep.subr.mxu1 %v12989_v5 }
 0x31f   : > { %22692 = vst [vmem:[#allocation10_spill] sm:$0xff] %v19608_v62  ;;  %22693 = vst [vmem:[#allocation32_spill] sm:$0xff] %v19610_v0  ;;  %15718 = vmatpush3.msra.mxu1 %v12989_v5  ;;  %v7510_v0 = vld [vmem:[#allocation2 + $0x18a] sm:$0xff]  ;;  %v7511_v62 = vld [vmem:[#allocation2 + $0x19a] sm:$0xff] }
 0x320   : > { %v19615_v10 = vpop.f32.mrf.mxu0  ;;  %15832 = vmatmul.mubr.f32.vlgmr.msra.gmra.mxu0 %v7482_v8  ;;  %v19617_v7 = vpop.f32.mrf.mxu1  ;;  %15580 = vmatmul.mubr.f32.gmra.mxu1 %v7484_v17 }
 0x321   : > { %15834 = vmatprep.mubr.f32.mxu0 %v7483_v30  ;;  %15582 = vmatprep.mubr.f32.mxu1 %v7485_v63  ;;  %v7494_v30 = vld [vmem:[#allocation2 + $0xca] sm:$0xff] }
 0x322   : > { %v19619_v57 = vpop.f32.mrf.mxu0  ;;  %v19621_v43 = vpop.f32.mrf.mxu1  ;;  %15719 = vmatprep.subr.mxu1 %v12988_v22 }
 0x323   : > { %22694 = vst [vmem:[#allocation40_spill] sm:$0xff] %v19619_v57  ;;  %22695 = vst [vmem:[#allocation27_spill] sm:$0xff] %v19621_v43  ;;  %15720 = vmatpush3.msra.mxu1 %v12988_v22 }
 0x324   : > { %v19626_v46 = vpop.f32.mrf.mxu0  ;;  %15835 = vmatmul.mubr.f32.gmra.mxu0 %v7484_v17  ;;  %v19628_v15 = vpop.f32.mrf.mxu1  ;;  %15583 = vmatmul.mubr.f32.gmra.mxu1 %v7486_v42  ;;  %v12983_v17 = vld [vmem:[%s22483_s3 + $0x3b8] sm:$0xff] }
 0x325   : > { %15837 = vmatprep.mubr.f32.mxu0 %v7485_v63  ;;  %15585 = vmatprep.mubr.f32.mxu1 %v7487_v12  ;;  %v7495_v63 = vld [vmem:[#allocation2 + $0xda] sm:$0xff] }
 0x326   : > { %v19630_v6 = vpop.f32.mrf.mxu0  ;;  %v19632_v28 = vpop.f32.mrf.mxu1  ;;  %15721 = vmatprep.subr.mxu1 %v12987_v60 }
 0x327   : > { %22696 = vst [vmem:[#allocation21_spill] sm:$0xff] %v19630_v6  ;;  %22697 = vst [vmem:[#allocation43_spill] sm:$0xff] %v19632_v28  ;;  %15722 = vmatpush3.msra.mxu1 %v12987_v60  ;;  %v7508_v6 = vld [vmem:[#allocation2 + $0x172] sm:$0xff] }
 0x328   : > { %v19637_v25 = vpop.f32.mrf.mxu0  ;;  %15838 = vmatmul.mubr.f32.gmra.mxu0 %v7486_v42  ;;  %v19639_v37 = vpop.f32.mrf.mxu1  ;;  %15586 = vmatmul.mubr.f32.gmra.mxu1 %v7488_v33 }
 0x329   : > { %15840 = vmatprep.mubr.f32.mxu0 %v7487_v12  ;;  %15588 = vmatprep.mubr.f32.mxu1 %v7489_v3 }
 0x32a   : > { %v19641_v11 = vpop.f32.mrf.mxu0  ;;  %v19643_v34 = vpop.f32.mrf.mxu1  ;;  %15723 = vmatprep.subr.mxu1 %v12986_v40 }
 0x32b   : > { %22698 = vst [vmem:[#allocation29_spill] sm:$0xff] %v19641_v11  ;;  %22699 = vst [vmem:[#allocation33_spill] sm:$0xff] %v19643_v34  ;;  %15724 = vmatpush3.msra.mxu1 %v12986_v40  ;;  %v12982_v40 = vld [vmem:[%s22483_s3 + $0x3b0] sm:$0xff] }
 0x32c   : > { %v19648_v23 = vpop.f32.mrf.mxu0  ;;  %15841 = vmatmul.mubr.f32.gmra.mxu0 %v7488_v33  ;;  %v19650_v53 = vpop.f32.mrf.mxu1  ;;  %15589 = vmatmul.mubr.f32.gmra.mxu1 %v7490_v16  ;;  %v7496_v33 = vld [vmem:[#allocation2 + $0xe2] sm:$0xff] }
 0x32d   : > { %15843 = vmatprep.mubr.f32.mxu0 %v7489_v3  ;;  %15591 = vmatprep.mubr.f32.mxu1 %v7491_v55 }
 0x32e   : > { %v19652_v38 = vpop.f32.mrf.mxu0  ;;  %v19654_v61 = vpop.f32.mrf.mxu1  ;;  %15725 = vmatprep.subr.mxu1 %v12985_v19 }
 0x32f   : > { %22700 = vst [vmem:[#allocation42_spill] sm:$0xff] %v19652_v38  ;;  %22701 = vst [vmem:[#allocation28_spill] sm:$0xff] %v19654_v61  ;;  %15726 = vmatpush3.msra.mxu1 %v12985_v19 }
 0x330   : > { %v19659_v49 = vpop.f32.mrf.mxu0  ;;  %15844 = vmatmul.mubr.f32.gmra.mxu0 %v7490_v16  ;;  %v19661_v56 = vpop.f32.mrf.mxu1  ;;  %15592 = vmatmul.mubr.f32.gmra.mxu1 %v7492_v44  ;;  %v7497_v16 = vld [vmem:[#allocation2 + $0xf2] sm:$0xff] }
 0x331   : > { %15846 = vmatprep.mubr.f32.mxu0 %v7491_v55  ;;  %15594 = vmatprep.mubr.f32.mxu1 %v7493_v24 }
 0x332   : > { %v19663_v8 = vpop.f32.mrf.mxu0  ;;  %v19665_v5 = vpop.f32.mrf.mxu1  ;;  %15727 = vmatprep.subr.mxu1 %v12984_v58 }
 0x333   : > { %22702 = vst [vmem:[#allocation22_spill] sm:$0xff] %v19663_v8  ;;  %22703 = vst [vmem:[#allocation45_spill] sm:$0xff] %v19665_v5  ;;  %15728 = vmatpush3.msra.mxu1 %v12984_v58  ;;  %v7498_v58 = vld [vmem:[#allocation2 + $0xfa] sm:$0xff] }
 0x334   : > { %v19670_v22 = vpop.f32.mrf.mxu0  ;;  %15847 = vmatmul.mubr.f32.gmra.mxu0 %v7492_v44  ;;  %v19672_v42 = vpop.f32.mrf.mxu1  ;;  %15595 = vmatmul.mubr.f32.gmra.mxu1 %v7494_v30 }
 0x335   : > { %15849 = vmatprep.mubr.f32.mxu0 %v7493_v24  ;;  %15597 = vmatprep.mubr.f32.mxu1 %v7495_v63  ;;  %v12981_v24 = vld [vmem:[%s22483_s3 + $0x3a8] sm:$0xff] }
 0x336   : > { %v19674_v60 = vpop.f32.mrf.mxu0  ;;  %v19676_v12 = vpop.f32.mrf.mxu1  ;;  %15729 = vmatprep.subr.mxu1 %v12983_v17 }
 0x337   : > { %22704 = vst [vmem:[#allocation30_spill] sm:$0xff] %v19674_v60  ;;  %22705 = vst [vmem:[#allocation34_spill] sm:$0xff] %v19676_v12  ;;  %15730 = vmatpush3.msra.mxu1 %v12983_v17 }
 0x338   : > { %v19681_v3 = vpop.f32.mrf.mxu0  ;;  %15850 = vmatmul.mubr.f32.gmra.mxu0 %v7494_v30  ;;  %v19683_v19 = vpop.f32.mrf.mxu1  ;;  %15598 = vmatmul.mubr.f32.gmra.mxu1 %v7496_v33  ;;  %v7499_v30 = vld [vmem:[#allocation2 + $0x10a] sm:$0xff] }
 0x339   : > { %15852 = vmatprep.mubr.f32.mxu0 %v7495_v63  ;;  %15600 = vmatprep.mubr.f32.mxu1 %v7497_v16 }
 0x33a   : > { %v19685_v55 = vpop.f32.mrf.mxu0  ;;  %v19687_v44 = vpop.f32.mrf.mxu1  ;;  %15731 = vmatprep.subr.mxu1 %v12982_v40 }
 0x33b   : > { %22706 = vst [vmem:[#allocation44_spill] sm:$0xff] %v19685_v55  ;;  %22707 = vst [vmem:[#allocation5_spill] sm:$0xff] %v19687_v44  ;;  %15732 = vmatpush3.msra.mxu1 %v12982_v40  ;;  %v7500_v44 = vld [vmem:[#allocation2 + $0x112] sm:$0xff]  ;;  %v12980_v40 = vld [vmem:[%s22483_s3 + $0x3a0] sm:$0xff] }
 0x33c   : > { %v19692_v17 = vpop.f32.mrf.mxu0  ;;  %15853 = vmatmul.mubr.f32.gmra.mxu0 %v7496_v33  ;;  %v19694_v12 = vpop.f32.mrf.mxu1  ;;  %15601 = vmatmul.mubr.f32.gmra.mxu1 %v7498_v58  ;;  %v7501_v33 = vld [vmem:[#allocation2 + $0x122] sm:$0xff] }
 0x33d   : > { %15855 = vmatprep.mubr.f32.mxu0 %v7497_v16  ;;  %15603 = vmatprep.mubr.f32.mxu1 %v7499_v30 }
 0x33e   : > { %v19696_v63 = vpop.f32.mrf.mxu0  ;;  %v19698_v55 = vpop.f32.mrf.mxu1  ;;  %15733 = vmatprep.subr.mxu1 %v12981_v24 }
 0x33f   : > { %22708 = vst [vmem:[#allocation23_spill] sm:$0xff] %v19696_v63  ;;  %22709 = vst [vmem:[#allocation47_spill] sm:$0xff] %v19698_v55  ;;  %15734 = vmatpush3.msra.mxu1 %v12981_v24  ;;  %v7502_v55 = vld [vmem:[#allocation2 + $0x12a] sm:$0xff]  ;;  %v12979_v24 = vld [vmem:[%s22483_s3 + $0x398] sm:$0xff] }
 0x340   : > { %v19703_v60 = vpop.f32.mrf.mxu0  ;;  %15856 = vmatmul.mubr.f32.gmra.mxu0 %v7498_v58  ;;  %v19705_v5 = vpop.f32.mrf.mxu1  ;;  %15604 = vmatmul.mubr.f32.gmra.mxu1 %v7500_v44  ;;  %v7503_v58 = vld [vmem:[#allocation2 + $0x13a] sm:$0xff] }
 0x341   : > { %15858 = vmatprep.mubr.f32.mxu0 %v7499_v30  ;;  %15606 = vmatprep.mubr.f32.mxu1 %v7501_v33 }
 0x342   : > { %v19707_v16 = vpop.f32.mrf.mxu0  ;;  %v19709_v63 = vpop.f32.mrf.mxu1  ;;  %15735 = vmatprep.subr.mxu1 %v12980_v40 }
 0x343   : > { %22710 = vst [vmem:[#allocation31_spill] sm:$0xff] %v19707_v16  ;;  %22711 = vst [vmem:[#allocation35_spill] sm:$0xff] %v19709_v63  ;;  %15736 = vmatpush3.msra.mxu1 %v12980_v40  ;;  %v7504_v63 = vld [vmem:[#allocation2 + $0x142] sm:$0xff]  ;;  %v12978_v40 = vld [vmem:[%s22483_s3 + $0x390] sm:$0xff] }
 0x344   : > { %v19714_v8 = vpop.f32.mrf.mxu0  ;;  %15859 = vmatmul.mubr.f32.gmra.mxu0 %v7500_v44  ;;  %v19716_v61 = vpop.f32.mrf.mxu1  ;;  %15607 = vmatmul.mubr.f32.gmra.mxu1 %v7502_v55  ;;  %v7505_v44 = vld [vmem:[#allocation2 + $0x152] sm:$0xff] }
 0x345   : > { %15861 = vmatprep.mubr.f32.mxu0 %v7501_v33  ;;  %15609 = vmatprep.mubr.f32.mxu1 %v7503_v58 }
 0x346   : > { %v19718_v30 = vpop.f32.mrf.mxu0  ;;  %v19720_v16 = vpop.f32.mrf.mxu1  ;;  %15737 = vmatprep.subr.mxu1 %v12979_v24 }
 0x347   : > { %22712 = vst [vmem:[#allocation46_spill] sm:$0xff] %v19718_v30  ;;  %22713 = vst [vmem:[#allocation6_spill] sm:$0xff] %v19720_v16  ;;  %15738 = vmatpush3.msra.mxu1 %v12979_v24  ;;  %v7506_v16 = vld [vmem:[#allocation2 + $0x15a] sm:$0xff]  ;;  %v12977_v24 = vld [vmem:[%s22483_s3 + $0x388] sm:$0xff] }
 0x348   : > { %v19725_v38 = vpop.f32.mrf.mxu0  ;;  %15862 = vmatmul.mubr.f32.gmra.mxu0 %v7502_v55  ;;  %v19727_v34 = vpop.f32.mrf.mxu1  ;;  %15610 = vmatmul.mubr.f32.gmra.mxu1 %v7504_v63  ;;  %v7507_v55 = vld [vmem:[#allocation2 + $0x16a] sm:$0xff] }
 0x349   : > { %15864 = vmatprep.mubr.f32.mxu0 %v7503_v58  ;;  %15612 = vmatprep.mubr.f32.mxu1 %v7505_v44 }
 0x34a   : > { %v19729_v33 = vpop.f32.mrf.mxu0  ;;  %v19731_v30 = vpop.f32.mrf.mxu1  ;;  %15739 = vmatprep.subr.mxu1 %v12978_v40 }
 0x34b   : > { %22714 = vst [vmem:[#allocation24_spill] sm:$0xff] %v19729_v33  ;;  %22715 = vst [vmem:[#allocation49_spill] sm:$0xff] %v19731_v30  ;;  %15740 = vmatpush3.msra.mxu1 %v12978_v40  ;;  %v12976_v40 = vld [vmem:[%s22483_s3 + $0x380] sm:$0xff]  ;;  %v7157_v30 = vld [vmem:[#allocation2 + $0xa9] sm:$0xff] }
 0x34c   : > { %v19736_v11 = vpop.f32.mrf.mxu0  ;;  %15865 = vmatmul.mubr.f32.gmra.mxu0 %v7504_v63  ;;  %v19738_v28 = vpop.f32.mrf.mxu1  ;;  %15613 = vmatmul.mubr.f32.gmra.mxu1 %v7506_v16  ;;  %v7509_v63 = vld [vmem:[#allocation2 + $0x182] sm:$0xff] }
 0x34d   : > { %15867 = vmatprep.mubr.f32.mxu0 %v7505_v44  ;;  %15615 = vmatprep.mubr.f32.mxu1 %v7507_v55 }
 0x34e   : > { %v19740_v58 = vpop.f32.mrf.mxu0  ;;  %v19742_v33 = vpop.f32.mrf.mxu1  ;;  %15741 = vmatprep.subr.mxu1 %v12977_v24 }
 0x34f   : > { %22716 = vst [vmem:[#allocation8_spill] sm:$0xff] %v19740_v58  ;;  %22717 = vst [vmem:[#allocation36_spill] sm:$0xff] %v19742_v33  ;;  %15742 = vmatpush3.msra.mxu1 %v12977_v24 }
 0x350   : > { %v19747_v43 = vpop.f32.mrf.mxu0  ;;  %15868 = vmatmul.mubr.f32.gmra.mxu0 %v7506_v16  ;;  %v19749_v57 = vpop.f32.mrf.mxu1  ;;  %15616 = vmatmul.mubr.f32.gmra.mxu1 %v7508_v6 }
 0x351   : > { %22718 = vst [vmem:[#allocation48_spill] sm:$0xff] %v19747_v43  ;;  %15870 = vmatprep.mubr.f32.mxu0 %v7507_v55  ;;  %15618 = vmatprep.mubr.f32.mxu1 %v7509_v63 }
 0x352   : > { %v19751_v44 = vpop.f32.mrf.mxu0  ;;  %v19753_v58 = vpop.f32.mrf.mxu1  ;;  %15743 = vmatprep.subr.mxu1 %v12976_v40 }
 0x353   : > { %22719 = vst [vmem:[#allocation7_spill] sm:$0xff] %v19751_v44  ;;  %22720 = vst [vmem:[#allocation25_spill] sm:$0xff] %v19753_v58  ;;  %15744 = vmatpush3.msra.mxu1 %v12976_v40  ;;  %v7148_v44 = vld [vmem:[#allocation2 + $0x39] sm:$0xff] }
 0x354   : > { %v19755_v24 = vpop.f32.mrf.mxu0  ;;  %15871 = vmatmul.mubr.f32.gmra.mxu0 %v7508_v6  ;;  %v19757_v59 = vpop.f32.mrf.mxu1  ;;  %15619 = vmatmul.mubr.f32.gmra.mxu1 %v7510_v0  ;;  %v6513_v6 = vld [vmem:[#allocation2 + $0x1ba] sm:$0xff] }
 0x355   : > { %22721 = vst [vmem:[#allocation51_spill] sm:$0xff] %v19755_v24  ;;  %15873 = vmatprep.mubr.f32.mxu0 %v7509_v63  ;;  %15621 = vmatprep.mubr.f32.mxu1 %v7511_v62 }
 0x356   : > { %v19759_v16 = vpop.f32.mrf.mxu0  ;;  %v19761_v55 = vpop.f32.mrf.mxu1 }
 0x357   : > { %22722 = vst [vmem:[#allocation11_spill] sm:$0xff] %v19759_v16  ;;  %22723 = vst [vmem:[#allocation37_spill] sm:$0xff] %v19761_v55  ;;  %v7147_v55 = vld [vmem:[#allocation2 + $0x31] sm:$0xff] }
 0x358   : > { %v19763_v48 = vpop.f32.mrf.mxu0  ;;  %15874 = vmatmul.mubr.f32.gmra.mxu0 %v7510_v0  ;;  %v19765_v50 = vpop.f32.mrf.mxu1  ;;  %15622 = vmatmul.mubr.f32.gmra.mxu1 %v7512_v9 }
 0x359   : > { %22724 = vst [vmem:[#allocation50_spill] sm:$0xff] %v19763_v48  ;;  %15876 = vmatprep.mubr.f32.mxu0 %v7511_v62  ;;  %15624 = vmatprep.mubr.f32.mxu1 %v6512_v1  ;;  %v7515_v62 = vld [vmem:[#allocation2 + $0x1ca] sm:$0xff] }
 0x35a   : > { %v19767_v40 = vpop.f32.mrf.mxu0  ;;  %v19769_v41 = vpop.f32.mrf.mxu1  ;;  %v7168_v48 = vld [vmem:[#allocation2 + $0x129] sm:$0xff] }
 0x35b   : > { %22725 = vst [vmem:[#allocation53_spill] sm:$0xff] %v19767_v40  ;;  %22726 = vst [vmem:[#allocation12_spill] sm:$0xff] %v19769_v41  ;;  %v7149_v41 = vld [vmem:[#allocation2 + $0x49] sm:$0xff] }
 0x35c   : > { %v19771_v63 = vpop.f32.mrf.mxu0  ;;  %15877 = vmatmul.mubr.f32.gmra.mxu0 %v7512_v9  ;;  %v19773_v16 = vpop.f32.mrf.mxu1  ;;  %15625 = vmatmul.mubr.f32.gmra.mxu1 %v6513_v6  ;;  %v7516_v9 = vld [vmem:[#allocation2 + $0x1d2] sm:$0xff] }
 0x35d   : > { %22727 = vst [vmem:[#allocation52_spill] sm:$0xff] %v19771_v63  ;;  %15745 = vmatprep.mubr.f32.mxu1 %v7147_v55  ;;  %15879 = vmatprep.mubr.f32.mxu0 %v6512_v1  ;;  %v7150_v1 = vld [vmem:[#allocation2 + $0x51] sm:$0xff] }
 0x35e   : > { %v19775_v0 = vpop.f32.mrf.mxu0  ;;  %v19777_v18 = vpop.f32.mrf.mxu1  ;;  %v7166_v63 = vld [vmem:[#allocation2 + $0x111] sm:$0xff] }
 0x35f   : > { %22728 = vst [vmem:[#allocation55_spill] sm:$0xff] %v19775_v0  ;;  %22729 = vst [vmem:[#allocation54_spill] sm:$0xff] %v19777_v18 }
 0x360   : > { %v19779_v14 = vpop.f32.mrf.mxu0  ;;  %v19781_v40 = vpop.f32.mrf.mxu1  ;;  %15746 = vmatmul.mubr.f32.vlgmr.msra.gmra.mxu1 %v7148_v44  ;;  %15880 = vmatmul.mubr.f32.gmra.mxu0 %v6513_v6  ;;  %v7152_v6 = vld [vmem:[#allocation2 + $0x69] sm:$0xff] }
 0x361   : > { %22730 = vst [vmem:[#allocation39_spill] sm:$0xff] %v19779_v14  ;;  %15748 = vmatprep.mubr.f32.mxu1 %v7149_v41  ;;  %15882 = vmatprep.mubr.f32.mxu0 %v7515_v62  ;;  %v7164_v14 = vld [vmem:[#allocation2 + $0xf9] sm:$0xff] }
 0x362   : > { %v19783_v58 = vpop.f32.mrf.mxu0  ;;  %v19785_v55 = vpop.f32.mrf.mxu1 }
 0x363   : > { %22731 = vst [vmem:[#allocation56_spill] sm:$0xff] %v19783_v58  ;;  %22732 = vst [vmem:[#allocation57_spill] sm:$0xff] %v19785_v55  ;;  %v7153_v55 = vld [vmem:[#allocation2 + $0x79] sm:$0xff] }
 0x364   : > { %v19787_v0 = vpop.f32.mrf.mxu0  ;;  %v19789_v18 = vpop.f32.mrf.mxu1  ;;  %15749 = vmatmul.mubr.f32.gmra.mxu1 %v7150_v1  ;;  %15883 = vmatmul.mubr.f32.gmra.mxu0 %v7516_v9  ;;  %v7154_v1 = vld [vmem:[#allocation2 + $0x81] sm:$0xff] }
 0x365   : > { %22733 = vst [vmem:[#allocation58_spill] sm:$0xff] %v19787_v0  ;;  %15751 = vmatprep.mubr.f32.mxu1 %v7151_v29  ;;  %v7162_v0 = vld [vmem:[#allocation2 + $0xe1] sm:$0xff] }
 0x366   : > { %v19791_v44 = vpop.f32.mrf.mxu0  ;;  %v19793_v41 = vpop.f32.mrf.mxu1 }
 0x367   : > { %22734 = vst [vmem:[#allocation59_spill] sm:$0xff] %v19791_v44  ;;  %22735 = vst [vmem:[#allocation60_spill] sm:$0xff] %v19793_v41  ;;  %v7155_v44 = vld [vmem:[#allocation2 + $0x91] sm:$0xff] }
 0x368   : > { %v19795_v62 = vpop.f32.mrf.mxu0  ;;  %v19797_v58 = vpop.f32.mrf.mxu1  ;;  %15752 = vmatmul.mubr.f32.gmra.mxu1 %v7152_v6  ;;  %v7894_v6 = vld [vmem:[%s377_s22] sm:$0x7] }
 0x369   : > { %22736 = vst [vmem:[#allocation61_spill] sm:$0xff] %v19795_v62  ;;  %15754 = vmatprep.mubr.f32.mxu1 %v7153_v55  ;;  %15885 = vmatprep.subr.mxu1 %v7894_v6 }
 0x36a   : > { %v19799_v52 = vpop.f32.mrf.mxu0  ;;  %v19801_v33 = vpop.f32.mrf.mxu1  ;;  %15886 = vmatpush3.xpose.msra.mxu1 %v7894_v6 }
 0x36b   : > { %22737 = vst [vmem:[#allocation62_spill] sm:$0xff] %v19799_v52  ;;  %22738 = vst [vmem:[#allocation63_spill] sm:$0xff] %v19801_v33  ;;  %v7156_v33 = vld [vmem:[#allocation2 + $0x99] sm:$0xff] }
 0x36c   : > { %v19809_v29 = vpop.f32.mrf.mxu0  ;;  %v19811_v9 = vpop.f32.mrf.mxu1  ;;  %15755 = vmatmul.mubr.f32.gmra.mxu1 %v7154_v1 }
 0x36d   : > { %22739 = vst [vmem:[#allocation64_spill] sm:$0xff] %v19809_v29  ;;  %15757 = vmatprep.mubr.f32.mxu1 %v7155_v44  ;;  %v7158_v29 = vld [vmem:[#allocation2 + $0xb1] sm:$0xff] }
 0x36e   : > { %v19813_v55 = vpop.f32.mrf.mxu0  ;;  %v19815_v52 = vpop.f32.mrf.mxu1 }
 0x36f   : > { %22740 = vst [vmem:[#allocation65_spill] sm:$0xff] %v19813_v55  ;;  %22741 = vst [vmem:[#allocation66_spill] sm:$0xff] %v19815_v52  ;;  %v7159_v55 = vld [vmem:[#allocation2 + $0xc1] sm:$0xff] }
 0x370   : > { %v19817_v41 = vpop.f32.mrf.mxu0  ;;  %v19819_v39 = vpop.f32.mrf.mxu1  ;;  %15758 = vmatmul.mubr.f32.gmra.mxu1 %v7156_v33 }
 0x371   : > { %22742 = vst [vmem:[#allocation67_spill] sm:$0xff] %v19817_v41  ;;  %15760 = vmatprep.mubr.f32.mxu1 %v7157_v30  ;;  %v7160_v41 = vld [vmem:[#allocation2 + $0xc9] sm:$0xff] }
 0x372   : > { %v19821_v2 = vpop.f32.mrf.mxu0  ;;  %v19823_v1 = vpop.f32.mrf.mxu1 }
 0x373   : > { %22743 = vst [vmem:[#allocation68_spill] sm:$0xff] %v19821_v2  ;;  %22744 = vst [vmem:[#allocation69_spill] sm:$0xff] %v19823_v1  ;;  %v7161_v2 = vld [vmem:[#allocation2 + $0xd9] sm:$0xff] }
 0x374   : > { %v19825_v44 = vpop.f32.mrf.mxu0  ;;  %v19827_v62 = vpop.f32.mrf.mxu1  ;;  %15761 = vmatmul.mubr.f32.gmra.mxu1 %v7158_v29 }
 0x375   : > { %22745 = vst [vmem:[#allocation70_spill] sm:$0xff] %v19825_v44  ;;  %15763 = vmatprep.mubr.f32.mxu1 %v7159_v55 }
 0x376   : > { %v19829_v6 = vpop.f32.mrf.mxu0  ;;  %v19831_v52 = vpop.f32.mrf.mxu1 }
 0x377   : > { %22746 = vst [vmem:[#allocation71_spill] sm:$0xff] %v19829_v6  ;;  %22747 = vst [vmem:[#allocation72_spill] sm:$0xff] %v19831_v52  ;;  %v7163_v6 = vld [vmem:[#allocation2 + $0xf1] sm:$0xff] }
 0x378   : > { %v19833_v33 = vpop.f32.mrf.mxu0  ;;  %v19835_v30 = vpop.f32.mrf.mxu1  ;;  %15764 = vmatmul.mubr.f32.gmra.mxu1 %v7160_v41 }
 0x379   : > { %22748 = vst [vmem:[#allocation73_spill] sm:$0xff] %v19833_v33  ;;  %15766 = vmatprep.mubr.f32.mxu1 %v7161_v2 }
 0x37a   : > { %v19837_v1 = vpop.f32.mrf.mxu0  ;;  %v19839_v44 = vpop.f32.mrf.mxu1 }
 0x37b   : > { %22749 = vst [vmem:[#allocation74_spill] sm:$0xff] %v19837_v1  ;;  %22750 = vst [vmem:[#allocation75_spill] sm:$0xff] %v19839_v44  ;;  %v7165_v1 = vld [vmem:[#allocation2 + $0x109] sm:$0xff] }
 0x37c   : > { %v19841_v29 = vpop.f32.mrf.mxu0  ;;  %v19843_v55 = vpop.f32.mrf.mxu1  ;;  %15767 = vmatmul.mubr.f32.gmra.mxu1 %v7162_v0 }
 0x37d   : > { %22751 = vst [vmem:[#allocation76_spill] sm:$0xff] %v19841_v29  ;;  %15769 = vmatprep.mubr.f32.mxu1 %v7163_v6 }
 0x37e   : > { %v19845_v52 = vpop.f32.mrf.mxu0  ;;  %v19847_v33 = vpop.f32.mrf.mxu1 }
 0x37f   : > { %22752 = vst [vmem:[#allocation77_spill] sm:$0xff] %v19845_v52  ;;  %22753 = vst [vmem:[#allocation78_spill] sm:$0xff] %v19847_v33  ;;  %v7167_v52 = vld [vmem:[#allocation2 + $0x121] sm:$0xff] }
 0x380   : > { %v19849_v41 = vpop.f32.mrf.mxu0  ;;  %v19851_v2 = vpop.f32.mrf.mxu1  ;;  %15770 = vmatmul.mubr.f32.gmra.mxu1 %v7164_v14 }
 0x381   : > { %22754 = vst [vmem:[#allocation79_spill] sm:$0xff] %v19849_v41  ;;  %15772 = vmatprep.mubr.f32.mxu1 %v7165_v1 }
 0x382   : > { %v19853_v44 = vpop.f32.mrf.mxu0  ;;  %v19855_v29 = vpop.f32.mrf.mxu1 }
 0x383   : > { %22755 = vst [vmem:[#allocation80_spill] sm:$0xff] %v19853_v44  ;;  %22756 = vst [vmem:[#allocation81_spill] sm:$0xff] %v19855_v29  ;;  %v7169_v44 = vld [vmem:[#allocation2 + $0x139] sm:$0xff] }
 0x384   : > { %v19857_v0 = vpop.f32.mrf.mxu0  ;;  %v19859_v6 = vpop.f32.mrf.mxu1  ;;  %15773 = vmatmul.mubr.f32.gmra.mxu1 %v7166_v63  ;;  %v5302_v63 = vadd.f32 %v19727_v34, %v19493_v35  ;;  %v7173_v34 = vld [vmem:[#allocation2 + $0x169] sm:$0xff] }
 0x385   : > { %22757 = vst [vmem:[#allocation82_spill] sm:$0xff] %v19857_v0  ;;  %15775 = vmatprep.mubr.f32.mxu1 %v7167_v52  ;;  %v7170_v52 = vld [vmem:[#allocation2 + $0x141] sm:$0xff] }
 0x386   : > { %v19861_v33 = vpop.f32.mrf.mxu0  ;;  %v19863_v41 = vpop.f32.mrf.mxu1 }
 0x387   : > { %22758 = vst [vmem:[#allocation83_spill] sm:$0xff] %v19861_v33  ;;  %22759 = vst [vmem:[#allocation84_spill] sm:$0xff] %v19863_v41  ;;  %v7171_v41 = vld [vmem:[#allocation2 + $0x151] sm:$0xff] }
 0x388   : > { %v19865_v14 = vpop.f32.mrf.mxu0  ;;  %v19867_v1 = vpop.f32.mrf.mxu1  ;;  %15776 = vmatmul.mubr.f32.gmra.mxu1 %v7168_v48 }
 0x389   : > { %22760 = vst [vmem:[#allocation85_spill] sm:$0xff] %v19865_v14  ;;  %15778 = vmatprep.mubr.f32.mxu1 %v7169_v44  ;;  %v5312_v44 = vadd.f32 %v19738_v28, %v19519_v13  ;;  %v7174_v28 = vld [vmem:[#allocation2 + $0x171] sm:$0xff] }
 0x38a   : > { %v19869_v29 = vpop.f32.mrf.mxu0  ;;  %v19871_v0 = vpop.f32.mrf.mxu1 }
 0x38b   : > { %22761 = vst [vmem:[#allocation86_spill] sm:$0xff] %v19869_v29  ;;  %22762 = vst [vmem:[#allocation87_spill] sm:$0xff] %v19871_v0  ;;  %v5774_v29 = vadd.f32 %v19511_v51, %v5302_v63  ;;  %v7172_v0 = vld [vmem:[#allocation2 + $0x159] sm:$0xff]  ;;  %v5776_v13 = vadd.f32 %v19539_v26, %v5312_v44 }
 0x38c   : > { %v19875_v24 = vpop.f32.mrf.mxu0  ;;  %v19877_v33 = vpop.f32.mrf.mxu1  ;;  %15779 = vmatmul.mubr.f32.gmra.mxu1 %v7170_v52 }
 0x38d   : > { %22763 = vst [vmem:[#allocation88_spill] sm:$0xff] %v19875_v24  ;;  %15781 = vmatprep.mubr.f32.mxu1 %v7171_v41 }
 0x38e   : > { %v19879_v14 = vpop.f32.mrf.mxu0  ;;  %v19881_v48 = vpop.f32.mrf.mxu1 }
 0x38f   : > { %22764 = vst [vmem:[#allocation89_spill] sm:$0xff] %v19879_v14  ;;  %22765 = vst [vmem:[#allocation90_spill] sm:$0xff] %v19881_v48  ;;  %v5322_v14 = vadd.f32 %v19749_v57, %v19541_v54  ;;  %v7175_v48 = vld [vmem:[#allocation2 + $0x181] sm:$0xff]  ;;  %v7176_v57 = vld [vmem:[#allocation2 + $0x189] sm:$0xff] }
 0x390   : > { %v19886_v43 = vpop.f32.mrf.mxu0  ;;  %v15403_v35 = vpop.f32.mrf.mxu1  ;;  %15782 = vmatmul.mubr.f32.gmra.mxu1 %v7172_v0 }
 0x391   : > { %v19888_v24 = vadd.f32 %v15403_v35, %v5774_v29  ;;  %15784 = vmatprep.mubr.f32.mxu1 %v7173_v34  ;;  %v5332_v34 = vadd.f32 %v19757_v59, %v19557_v32  ;;  %v5778_v54 = vadd.f32 %v19567_v4, %v5322_v14  ;;  %v7178_v59 = vld [vmem:[#allocation2 + $0x1a1] sm:$0xff] }
 0x392   : > { %v19890_v52 = vpop.f32.mrf.mxu0  ;;  %v19892_v41 = vpop.f32.mrf.mxu1 }
 0x393   : > { %22766 = vst [vmem:[#allocation91_spill] sm:$0xff] %v19890_v52  ;;  %v7177_v52 = vld [vmem:[#allocation2 + $0x199] sm:$0xff]  ;;  %v5780_v32 = vadd.f32 %v19581_v45, %v5332_v34 }
 0x394   : > { %v19897_v51 = vpop.f32.mrf.mxu0  ;;  %v15406_v63 = vpop.f32.mrf.mxu1  ;;  %15785 = vmatmul.mubr.f32.gmra.mxu1 %v7174_v28 }
 0x395   : > { %v19899_v0 = vadd.f32 %v15406_v63, %v5776_v13  ;;  %15787 = vmatprep.mubr.f32.mxu1 %v7175_v48  ;;  %v5342_v63 = vadd.f32 %v19765_v50, %v19570_v27 }
 0x396   : > { %v19901_v29 = vpop.f32.mrf.mxu0  ;;  %v19903_v35 = vpop.f32.mrf.mxu1 }
 0x397   : > { %22767 = vst [vmem:[#allocation92_spill] sm:$0xff] %v19901_v29  ;;  %v5782_v27 = vadd.f32 %v19593_v36, %v5342_v63 }
 0x398   : > { %v19908_v26 = vpop.f32.mrf.mxu0  ;;  %v15409_v44 = vpop.f32.mrf.mxu1  ;;  %15788 = vmatmul.mubr.f32.gmra.mxu1 %v7176_v57  ;;  %v16893_v57 = vld [vmem:[#allocation2 + $0x1] sm:$0xff] }
 0x399   : > { %v19910_v28 = vadd.f32 %v15409_v44, %v5778_v54  ;;  %15790 = vmatprep.mubr.f32.mxu1 %v7177_v52  ;;  %v5352_v44 = vadd.f32 %v19773_v16, %v19584_v20 }
 0x39a   : > { %v19912_v13 = vpop.f32.mrf.mxu0  ;;  %v19914_v48 = vpop.f32.mrf.mxu1 }
 0x39c   : > { %v19919_v4 = vpop.f32.mrf.mxu0  ;;  %v15412_v14 = vpop.f32.mrf.mxu1  ;;  %15791 = vmatmul.mubr.f32.gmra.mxu1 %v7178_v59 }
 0x39d   : > { %22768 = vst [vmem:[#allocation93_spill] sm:$0xff] %v19919_v4  ;;  %v19921_v29 = vadd.f32 %v15412_v14, %v5780_v32  ;;  %15793 = vmatprep.mubr.f32.mxu1 %v16893_v57  ;;  %v5362_v14 = vadd.f32 %v19781_v40, %v19595_v47 }
 0x39e   : > { %v19923_v54 = vpop.f32.mrf.mxu0  ;;  %v19925_v52 = vpop.f32.mrf.mxu1 }
 0x39f   : > { %22769 = vst [vmem:[#allocation94_spill] sm:$0xff] %v19923_v54  ;;  %v5784_v54 = vadd.f32 %v19604_v21, %v5352_v44 }
 0x3a0   : > { %v19930_v50 = vpop.f32.mrf.mxu0  ;;  %v15415_v45 = vpop.f32.mrf.mxu1  ;;  %15794 = vmatmul.mubr.f32.gmra.mxu1 %v16893_v57 }
 0x3a1   : > { %v19932_v34 = vadd.f32 %v15415_v45, %v5782_v27  ;;  %15796 = vmatprep.mubr.f32.mxu1 %v16893_v57  ;;  %v5372_v27 = vadd.f32 %v19789_v18, %v19606_v31  ;;  %v5786_v45 = vadd.f32 %v19615_v10, %v5362_v14  ;;  %v5392_v14 = vadd.f32 %v19811_v9, %v19628_v15 }
 0x3a2   : > { %v19934_v32 = vpop.f32.mrf.mxu0  ;;  %v19936_v59 = vpop.f32.mrf.mxu1 }
 0x3a3   : > { %22770 = vst [vmem:[#allocation95_spill] sm:$0xff] %v19934_v32 }
 0x3a4   : > { %v19941_v4 = vpop.f32.mrf.mxu0  ;;  %v15418_v20 = vpop.f32.mrf.mxu1  ;;  %15797 = vmatmul.mubr.f32.gmra.mxu1 %v16893_v57  ;;  %v5382_v57 = vadd.f32 %v19797_v58, %v19617_v7 }
 0x3a5   : > { %v19943_v36 = vadd.f32 %v15418_v20, %v5784_v54  ;;  %v5788_v54 = vadd.f32 %v19626_v46, %v5372_v27  ;;  %v5792_v27 = vadd.f32 %v19648_v23, %v5392_v14 }
 0x3a6   : > { %v19945_v16 = vpop.f32.mrf.mxu0  ;;  %v19947_v63 = vpop.f32.mrf.mxu1 }
 0x3a7   : > { %22771 = vst [vmem:[#allocation96_spill] sm:$0xff] %v19945_v16 }
 0x3a8   : > { %v19952_v32 = vpop.f32.mrf.mxu0  ;;  %v15421_v47 = vpop.f32.mrf.mxu1 }
 0x3a9   : > { %v19954_v40 = vadd.f32 %v15421_v47, %v5786_v45  ;;  %v5790_v45 = vadd.f32 %v19637_v25, %v5382_v57 }
 0x3aa   : > { %v19956_v21 = vpop.f32.mrf.mxu0  ;;  %v19958_v44 = vpop.f32.mrf.mxu1 }
 0x3ab   : > { %22772 = vst [vmem:[#allocation97_spill] sm:$0xff] %v19956_v21 }
 0x3ac   : > { %v19963_v20 = vpop.f32.mrf.mxu0  ;;  %v15424_v16 = vpop.f32.mrf.mxu1 }
 0x3ad   : > { %v19965_v18 = vadd.f32 %v15424_v16, %v5788_v54  ;;  %v5402_v16 = vadd.f32 %v19819_v39, %v19639_v37 }
 0x3ae   : > { %v19967_v31 = vpop.f32.mrf.mxu0  ;;  %v19969_v10 = vpop.f32.mrf.mxu1 }
 0x3af   : > { %22773 = vst [vmem:[#allocation98_spill] sm:$0xff] %v19967_v31  ;;  %v5794_v57 = vadd.f32 %v19659_v49, %v5402_v16 }
 0x3b0   : > { %v19974_v47 = vpop.f32.mrf.mxu0  ;;  %v15427_v21 = vpop.f32.mrf.mxu1 }
 0x3b1   : > { %v19976_v7 = vadd.f32 %v15427_v21, %v5790_v45  ;;  %v5412_v21 = vadd.f32 %v19827_v62, %v19650_v53 }
 0x3b2   : > { %v19978_v46 = vpop.f32.mrf.mxu0  ;;  %v19980_v58 = vpop.f32.mrf.mxu1 }
 0x3b3   : > { %22774 = vst [vmem:[#allocation99_spill] sm:$0xff] %v19978_v46  ;;  %v5796_v14 = vadd.f32 %v19670_v22, %v5412_v21 }
 0x3b4   : > { %v19985_v54 = vpop.f32.mrf.mxu0  ;;  %v15430_v31 = vpop.f32.mrf.mxu1 }
 0x3b5   : > { %22775 = vst [vmem:[#allocation100_spill] sm:$0xff] %v19985_v54  ;;  %v19987_v15 = vadd.f32 %v15430_v31, %v5792_v27  ;;  %v5422_v31 = vadd.f32 %v19835_v30, %v19661_v56 }
 0x3b6   : > { %v19989_v25 = vpop.f32.mrf.mxu0  ;;  %v19991_v9 = vpop.f32.mrf.mxu1 }
 0x3b7   : > { %22776 = vst [vmem:[#allocation101_spill] sm:$0xff] %v19989_v25  ;;  %22777 = vst [vmem:[#allocation102_spill] sm:$0xff] %v19991_v9  ;;  %v5798_v16 = vadd.f32 %v19681_v3, %v5422_v31 }
 0x3b8   : > { %v19996_v45 = vpop.f32.mrf.mxu0  ;;  %v15433_v46 = vpop.f32.mrf.mxu1 }
 0x3b9   : > { %22778 = vst [vmem:[#allocation103_spill] sm:$0xff] %v19996_v45  ;;  %v19998_v39 = vadd.f32 %v15433_v46, %v5794_v57  ;;  %v5432_v46 = vadd.f32 %v19843_v55, %v19672_v42 }
 0x3ba   : > { %v20000_v37 = vpop.f32.mrf.mxu0  ;;  %v20002_v23 = vpop.f32.mrf.mxu1 }
 0x3bb   : > { %22779 = vst [vmem:[#allocation104_spill] sm:$0xff] %v20000_v37  ;;  %22780 = vst [vmem:[#allocation105_spill] sm:$0xff] %v20002_v23  ;;  %v5800_v21 = vadd.f32 %v19692_v17, %v5432_v46  ;;  %v22819_v23 = vld [vmem:[#allocation70_spill] sm:$0xff] }
 0x3bc   : > { %v20007_v27 = vpop.f32.mrf.mxu0  ;;  %v15436_v25 = vpop.f32.mrf.mxu1 }
 0x3bd   : > { %22781 = vst [vmem:[#allocation106_spill] sm:$0xff] %v20007_v27  ;;  %v20009_v53 = vadd.f32 %v15436_v25, %v5796_v14  ;;  %v5442_v25 = vadd.f32 %v19851_v2, %v19683_v19 }
 0x3be   : > { %v20011_v49 = vpop.f32.mrf.mxu0  ;;  %v20013_v62 = vpop.f32.mrf.mxu1 }
 0x3bf   : > { %22782 = vst [vmem:[#allocation107_spill] sm:$0xff] %v20011_v49  ;;  %22783 = vst [vmem:[#allocation108_spill] sm:$0xff] %v20013_v62  ;;  %v5802_v31 = vadd.f32 %v19703_v60, %v5442_v25  ;;  %v22816_v62 = vld [vmem:[#allocation67_spill] sm:$0xff] }
 0x3c0   : > { %v20018_v57 = vpop.f32.mrf.mxu0  ;;  %v15439_v37 = vpop.f32.mrf.mxu1 }
 0x3c1   : > { %22784 = vst [vmem:[#allocation109_spill] sm:$0xff] %v20018_v57  ;;  %v20020_v56 = vadd.f32 %v15439_v37, %v5798_v16  ;;  %v5452_v37 = vadd.f32 %v19859_v6, %v19694_v12 }
 0x3c2   : > { %v20022_v22 = vpop.f32.mrf.mxu0  ;;  %v20024_v30 = vpop.f32.mrf.mxu1 }
 0x3c3   : > { %22785 = vst [vmem:[#allocation110_spill] sm:$0xff] %v20022_v22  ;;  %22786 = vst [vmem:[#allocation111_spill] sm:$0xff] %v20024_v30  ;;  %v5804_v46 = vadd.f32 %v19714_v8, %v5452_v37  ;;  %v22813_v30 = vld [vmem:[#allocation64_spill] sm:$0xff] }
 0x3c4   : > { %v20029_v14 = vpop.f32.mrf.mxu0  ;;  %v15442_v49 = vpop.f32.mrf.mxu1 }
 0x3c5   : > { %22787 = vst [vmem:[#allocation112_spill] sm:$0xff] %v20029_v14  ;;  %v20031_v42 = vadd.f32 %v15442_v49, %v5800_v21  ;;  %v5462_v49 = vadd.f32 %v19867_v1, %v19705_v5 }
 0x3c6   : > { %v20033_v3 = vpop.f32.mrf.mxu0  ;;  %v20035_v55 = vpop.f32.mrf.mxu1 }
 0x3c7   : > { %22788 = vst [vmem:[#allocation113_spill] sm:$0xff] %v20033_v3  ;;  %22789 = vst [vmem:[#allocation114_spill] sm:$0xff] %v20035_v55  ;;  %v5806_v25 = vadd.f32 %v19725_v38, %v5462_v49  ;;  %v22802_v38 = vld [vmem:[#allocation48_spill] sm:$0xff]  ;;  %v22812_v55 = vld [vmem:[#allocation61_spill] sm:$0xff] }
 0x3c8   : > { %v20040_v16 = vpop.f32.mrf.mxu0  ;;  %v15445_v22 = vpop.f32.mrf.mxu1 }
 0x3c9   : > { %22790 = vst [vmem:[#allocation115_spill] sm:$0xff] %v20040_v16  ;;  %v20042_v19 = vadd.f32 %v15445_v22, %v5802_v31  ;;  %v5472_v22 = vadd.f32 %v19877_v33, %v19716_v61  ;;  %v6443_v33 = vadd.f32 %v22802_v38, %v19888_v24  ;;  %v22808_v38 = vld [vmem:[#allocation50_spill] sm:$0xff] }
 0x3ca   : > { %v20044_v17 = vpop.f32.mrf.mxu0  ;;  %v20046_v2 = vpop.f32.mrf.mxu1 }
 0x3cb   : > { %22791 = vst [vmem:[#allocation116_spill] sm:$0xff] %v20044_v17  ;;  %22792 = vst [vmem:[#allocation117_spill] sm:$0xff] %v20046_v2  ;;  %v22811_v2 = vld [vmem:[#allocation58_spill] sm:$0xff] }
 0x3cc   : > { %v20051_v21 = vpop.f32.mrf.mxu0  ;;  %v15448_v3 = vpop.f32.mrf.mxu1 }
 0x3cd   : > { %22793 = vst [vmem:[#allocation118_spill] sm:$0xff] %v20051_v21  ;;  %v20053_v12 = vadd.f32 %v15448_v3, %v5804_v46  ;;  %v5808_v3 = vadd.f32 %v19736_v11, %v5472_v22  ;;  %v22805_v22 = vld [vmem:[#allocation51_spill] sm:$0xff] }
 0x3ce   : > { %v20055_v60 = vpop.f32.mrf.mxu0  ;;  %v20057_v6 = vpop.f32.mrf.mxu1 }
 0x3cf   : > { %22794 = vst [vmem:[#allocation119_spill] sm:$0xff] %v20055_v60  ;;  %22795 = vst [vmem:[#allocation120_spill] sm:$0xff] %v20057_v6 }
 0x3d0   : > { %v20062_v31 = vpop.f32.mrf.mxu0  ;;  %v15451_v17 = vpop.f32.mrf.mxu1 }
 0x3d1   : > { %22796 = vst [vmem:[#allocation121_spill] sm:$0xff] %v20062_v31  ;;  %v20064_v5 = vadd.f32 %v15451_v17, %v5806_v25 }
 0x3d2   : > { %v20066_v8 = vpop.f32.mrf.mxu0  ;;  %v20068_v1 = vpop.f32.mrf.mxu1 }
 0x3d3   : > { %22797 = vst [vmem:[#allocation122_spill] sm:$0xff] %v20066_v8  ;;  %22798 = vst [vmem:[#allocation123_spill] sm:$0xff] %v20068_v1 }
 0x3d4   : > { %v20071_v37 = vpop.f32.mrf.mxu0  ;;  %v15454_v46 = vpop.f32.mrf.mxu1 }
 0x3d5   : > { %22799 = vst [vmem:[#allocation124_spill] sm:$0xff] %v20071_v37  ;;  %v20073_v60 = vadd.f32 %v15454_v46, %v5808_v3  ;;  %v6445_v3 = vadd.f32 %v22805_v22, %v19899_v0  ;;  %v22809_v22 = vld [vmem:[#allocation52_spill] sm:$0xff] }
 0x3d6   : > { %v20075_v21 = vpop.f32.mrf.mxu0  ;;  %v20077_v61 = vpop.f32.mrf.mxu1 }
 0x3d7   : > { %22800 = vst [vmem:[#allocation125_spill] sm:$0xff] %v20075_v21  ;;  %22801 = vst [vmem:[#allocation126_spill] sm:$0xff] %v20077_v61 }
 0x3d8   : > { %v20081_v17 = vpop.f32.mrf.mxu0  ;;  %v15575_v49 = vpop.f32.mrf.mxu1 }
 0x3d9   : > { %22803 = vst [vmem:[#allocation48_spill] sm:$0xff] %v20081_v17  ;;  %v20083_v25 = vadd.f32 %v15575_v49, %v6443_v33  ;;  %v6447_v33 = vadd.f32 %v22808_v38, %v19910_v28  ;;  %v22810_v28 = vld [vmem:[#allocation39_spill] sm:$0xff] }
 0x3da   : > { %v20085_v8 = vpop.f32.mrf.mxu0  ;;  %v20087_v11 = vpop.f32.mrf.mxu1  ;;  %v6451_v38 = vadd.f32 %v22810_v28, %v19932_v34  ;;  %v6455_v34 = vadd.f32 %v22812_v55, %v19954_v40  ;;  %v6459_v40 = vadd.f32 %v22816_v62, %v19976_v7 }
 0x3db   : > { %22804 = vst [vmem:[#allocation127_spill] sm:$0xff] %v20085_v8 }
 0x3dc   : > { %v20091_v46 = vpop.f32.mrf.mxu0  ;;  %v15578_v21 = vpop.f32.mrf.mxu1 }
 0x3dd   : > { %22806 = vst [vmem:[#allocation51_spill] sm:$0xff] %v20091_v46  ;;  %v20093_v37 = vadd.f32 %v15578_v21, %v6445_v3  ;;  %v6449_v21 = vadd.f32 %v22809_v22, %v19921_v29  ;;  %v6453_v29 = vadd.f32 %v22811_v2, %v19943_v36  ;;  %v6457_v36 = vadd.f32 %v22813_v30, %v19965_v18 }
 0x3de   : > { %v20095_v61 = vpop.f32.mrf.mxu0  ;;  %v20097_v24 = vpop.f32.mrf.mxu1  ;;  %v6461_v18 = vadd.f32 %v22819_v23, %v19987_v15 }
 0x3df   : > { %22807 = vst [vmem:[#allocation128_spill] sm:$0xff] %v20095_v61 }
 0x3e0   : > { %v20101_v49 = vpop.f32.mrf.mxu0  ;;  %v15581_v8 = vpop.f32.mrf.mxu1 }
 0x3e1   : > { %v20103_v17 = vadd.f32 %v15581_v8, %v6447_v33 }
 0x3e2   : > { %v20105_v31 = vpop.f32.mrf.mxu0  ;;  %v20107_v0 = vpop.f32.mrf.mxu1 }
 0x3e4   : > { %v20111_v3 = vpop.f32.mrf.mxu0  ;;  %v15584_v61 = vpop.f32.mrf.mxu1 }
 0x3e5   : > { %v20113_v46 = vadd.f32 %v15584_v61, %v6449_v21 }
 0x3e6   : > { %v20115_v1 = vpop.f32.mrf.mxu1  ;;  %v20119_v6 = vpop.f32.mrf.mxu0 }
 0x3e8   : > { %v15587_v8 = vpop.f32.mrf.mxu1  ;;  %v20127_v22 = vpop.f32.mrf.mxu0 }
 0x3e9   : > { %v20121_v33 = vadd.f32 %v15587_v8, %v6451_v38 }
 0x3ea   : > { %v20123_v16 = vpop.f32.mrf.mxu1  ;;  %v20135_v28 = vpop.f32.mrf.mxu0 }
 0x3ec   : > { %v15590_v14 = vpop.f32.mrf.mxu1  ;;  %v20143_v2 = vpop.f32.mrf.mxu0 }
 0x3ed   : > { %v20129_v61 = vadd.f32 %v15590_v14, %v6453_v29 }
 0x3ee   : > { %v20131_v21 = vpop.f32.mrf.mxu1  ;;  %v20151_v55 = vpop.f32.mrf.mxu0 }
 0x3f0   : > { %v15593_v57 = vpop.f32.mrf.mxu1  ;;  %v20159_v30 = vpop.f32.mrf.mxu0 }
 0x3f1   : > { %v20137_v38 = vadd.f32 %v15593_v57, %v6455_v34 }
 0x3f2   : > { %v20139_v8 = vpop.f32.mrf.mxu1  ;;  %v20167_v62 = vpop.f32.mrf.mxu0 }
 0x3f4   : > { %v15596_v27 = vpop.f32.mrf.mxu1  ;;  %v20175_v23 = vpop.f32.mrf.mxu0 }
 0x3f5   : > { %v20145_v14 = vadd.f32 %v15596_v27, %v6457_v36 }
 0x3f6   : > { %v20147_v29 = vpop.f32.mrf.mxu1 }
 0x3f7   : > { %22814 = vst [vmem:[#allocation50_spill] sm:$0xff] %v20145_v14  ;;  %22815 = vst [vmem:[#allocation52_spill] sm:$0xff] %v20147_v29  ;;  %v22822_v14 = vld [vmem:[#allocation73_spill] sm:$0xff] }
 0x3f8   : > { %v15599_v45 = vpop.f32.mrf.mxu1  ;;  %v6463_v7 = vadd.f32 %v22822_v14, %v19998_v39  ;;  %v20183_v14 = vpop.f32.mrf.mxu0 }
 0x3f9   : > { %v20153_v57 = vadd.f32 %v15599_v45, %v6459_v40 }
 0x3fa   : > { %v20155_v34 = vpop.f32.mrf.mxu1 }
 0x3fb   : > { %22817 = vst [vmem:[#allocation39_spill] sm:$0xff] %v20153_v57  ;;  %22818 = vst [vmem:[#allocation58_spill] sm:$0xff] %v20155_v34  ;;  %v22825_v57 = vld [vmem:[#allocation76_spill] sm:$0xff] }
 0x3fc   : > { %v15602_v54 = vpop.f32.mrf.mxu1  ;;  %v6465_v15 = vadd.f32 %v22825_v57, %v20009_v53  ;;  %v20191_v57 = vpop.f32.mrf.mxu0 }
 0x3fd   : > { %v20161_v27 = vadd.f32 %v15602_v54, %v6461_v18 }
 0x3fe   : > { %v20163_v36 = vpop.f32.mrf.mxu1 }
 0x3ff   : > { %22820 = vst [vmem:[#allocation61_spill] sm:$0xff] %v20161_v27  ;;  %22821 = vst [vmem:[#allocation64_spill] sm:$0xff] %v20163_v36  ;;  %v22828_v27 = vld [vmem:[#allocation79_spill] sm:$0xff] }
 0x400   : > { %v15605_v9 = vpop.f32.mrf.mxu1  ;;  %v6467_v39 = vadd.f32 %v22828_v27, %v20020_v56  ;;  %22829 = vst [vmem:[#allocation79_spill] sm:$0xff] %v20183_v14  ;;  %v20199_v27 = vpop.f32.mrf.mxu0 }
 0x401   : > { %v20169_v45 = vadd.f32 %v15605_v9, %v6463_v7 }
 0x402   : > { %v20171_v40 = vpop.f32.mrf.mxu1 }
 0x403   : > { %22823 = vst [vmem:[#allocation67_spill] sm:$0xff] %v20169_v45  ;;  %22824 = vst [vmem:[#allocation70_spill] sm:$0xff] %v20171_v40  ;;  %v22832_v45 = vld [vmem:[#allocation82_spill] sm:$0xff] }
 0x404   : > { %v15608_v34 = vpop.f32.mrf.mxu1  ;;  %v6469_v53 = vadd.f32 %v22832_v45, %v20031_v42  ;;  %22833 = vst [vmem:[#allocation82_spill] sm:$0xff] %v20191_v57  ;;  %v22842_v42 = vld [vmem:[#allocation88_spill] sm:$0xff] }
 0x405   : > { %v20177_v54 = vadd.f32 %v15608_v34, %v6465_v15  ;;  %v6473_v45 = vadd.f32 %v22842_v42, %v20053_v12 }
 0x406   : > { %v20179_v18 = vpop.f32.mrf.mxu1 }
 0x407   : > { %22826 = vst [vmem:[#allocation73_spill] sm:$0xff] %v20177_v54  ;;  %22827 = vst [vmem:[#allocation76_spill] sm:$0xff] %v20179_v18  ;;  %v22836_v54 = vld [vmem:[#allocation85_spill] sm:$0xff] }
 0x408   : > { %v15611_v36 = vpop.f32.mrf.mxu1  ;;  %v6471_v56 = vadd.f32 %v22836_v54, %v20042_v19  ;;  %22837 = vst [vmem:[#allocation85_spill] sm:$0xff] %v20199_v27  ;;  %v22846_v19 = vld [vmem:[#allocation15_spill] sm:$0xff] }
 0x409   : > { %v20185_v9 = vadd.f32 %v15611_v36, %v6467_v39  ;;  %v22838_v36 = vld [vmem:[#allocation14_spill] sm:$0xff]  ;;  %v22839_v39 = vld [vmem:[#allocation49_spill] sm:$0xff] }
 0x40a   : > { %v20187_v7 = vpop.f32.mrf.mxu1 }
 0x40b   : > { %22830 = vst [vmem:[#allocation129_spill] sm:$0xff] %v20185_v9  ;;  %22831 = vst [vmem:[#allocation130_spill] sm:$0xff] %v20187_v7  ;;  %v5297_v9 = vadd.f32 %v22839_v39, %v22838_v36  ;;  %v22848_v36 = vld [vmem:[#allocation17_spill] sm:$0xff] }
 0x40c   : > { %v15614_v40 = vpop.f32.mrf.mxu1  ;;  %v22849_v39 = vld [vmem:[#allocation25_spill] sm:$0xff] }
 0x40d   : > { %v20193_v34 = vadd.f32 %v15614_v40, %v6469_v53  ;;  %v20209_v40 = vpop.f32.mrf.mxu0  ;;  %v5773_v54 = vadd.f32 %v22846_v19, %v5297_v9  ;;  %v5317_v12 = vadd.f32 %v22849_v39, %v22848_v36 }
 0x40e   : > { %v20195_v15 = vpop.f32.mrf.mxu1  ;;  %22843 = vst [vmem:[#allocation88_spill] sm:$0xff] %v20209_v40 }
 0x40f   : > { %22834 = vst [vmem:[#allocation131_spill] sm:$0xff] %v20193_v34  ;;  %22835 = vst [vmem:[#allocation132_spill] sm:$0xff] %v20195_v15  ;;  %v22844_v34 = vld [vmem:[#allocation16_spill] sm:$0xff]  ;;  %v20223_v42 = vpop.f32.mrf.mxu0 }
 0x410   : > { %v15617_v18 = vpop.f32.mrf.mxu1  ;;  %v22845_v15 = vld [vmem:[#allocation36_spill] sm:$0xff] }
 0x411   : > { %v20203_v7 = vadd.f32 %v15617_v18, %v6471_v56  ;;  %v5307_v57 = vadd.f32 %v22845_v15, %v22844_v34  ;;  %v6108_v18 = vadd.f32 %v19892_v41, %v5773_v54  ;;  %v6475_v56 = vadd.f32 %v19886_v43, %v20064_v5  ;;  %v22852_v43 = vld [vmem:[#allocation19_spill] sm:$0xff]  ;;  %v22853_v5 = vld [vmem:[#allocation37_spill] sm:$0xff]  ;;  %v20237_v39 = vpop.f32.mrf.mxu0 }
 0x412   : > { %v20205_v14 = vpop.f32.mrf.mxu1  ;;  %v6477_v41 = vadd.f32 %v19897_v51, %v20073_v60  ;;  %v5327_v19 = vadd.f32 %v22853_v5, %v22852_v43  ;;  %v22854_v54 = vld [vmem:[#allocation9_spill] sm:$0xff]  ;;  %v7112_v51 = vadd.f32 %v19908_v26, %v20083_v25  ;;  %v20261_v25 = vld [vmem:[%s22484_s4] ss:$0 sm:$0xff] }
 0x413   : > { %22840 = vst [vmem:[#allocation14_spill] sm:$0xff] %v20203_v7  ;;  %22841 = vst [vmem:[#allocation49_spill] sm:$0xff] %v20205_v14  ;;  %v22850_v14 = vld [vmem:[#allocation18_spill] sm:$0xff]  ;;  %v5777_v36 = vadd.f32 %v22854_v54, %v5317_v12  ;;  %v22856_v60 = vld [vmem:[#allocation13_spill] sm:$0xff]  ;;  %v20251_v5 = vpop.f32.mrf.mxu0 }
 0x414   : > { %v15620_v53 = vpop.f32.mrf.mxu1  ;;  %v5775_v40 = vadd.f32 %v22850_v14, %v5307_v57  ;;  %v22858_v12 = vld [vmem:[#allocation38_spill] sm:$0xff] }
 0x415   : > { %v20214_v27 = vadd.f32 %v15620_v53, %v6473_v45  ;;  %v22851_v45 = vld [vmem:[#allocation7_spill] sm:$0xff]  ;;  %v6112_v57 = vadd.f32 %v19914_v48, %v5777_v36  ;;  %v5779_v43 = vadd.f32 %v22858_v12, %v5327_v19 }
 0x416   : > { %v20216_v29 = vpop.f32.mrf.mxu1  ;;  %v6110_v15 = vadd.f32 %v19903_v35, %v5775_v40  ;;  %v6442_v53 = vadd.f32 %v22851_v45, %v6108_v18  ;;  %v22855_v40 = vld [vmem:[#allocation11_spill] sm:$0xff] }
 0x417   : > { %22847 = vst [vmem:[#allocation16_spill] sm:$0xff] %v20214_v27 }
 0x418   : > { %v15623_v7 = vpop.f32.mrf.mxu1  ;;  %v6776_v14 = vadd.f32 %v20087_v11, %v6442_v53  ;;  %v6444_v18 = vadd.f32 %v22855_v40, %v6110_v15  ;;  %v6114_v53 = vadd.f32 %v19925_v52, %v5779_v43  ;;  %v22860_v40 = vld [vmem:[#allocation93_spill] sm:$0xff]  ;;  %v22864_v43 = vld [vmem:[#allocation94_spill] sm:$0xff] }
 0x419   : > { %v20226_v34 = vadd.f32 %v15623_v7, %v6475_v56  ;;  %v22857_v56 = vld [vmem:[#allocation12_spill] sm:$0xff] }
 0x41a   : > { %v20228_v9 = vpop.f32.mrf.mxu1  ;;  %v5337_v45 = vadd.f32 %v22857_v56, %v22856_v60  ;;  %v6778_v11 = vadd.f32 %v20097_v24, %v6444_v18  ;;  %v7111_v48 = vadd.f32 %v19912_v13, %v6776_v14  ;;  %v7114_v60 = vadd.f32 %v22860_v40, %v20093_v37  ;;  %v22861_v24 = vld [vmem:[#allocation26_spill] sm:$0xff]  ;;  %v22863_v13 = vld [vmem:[#allocation20_spill] sm:$0xff] }
 0x41b   : > { %v22862_v18 = vld [vmem:[#allocation54_spill] sm:$0xff] }
 0x41c   : > { %v15626_v27 = vpop.f32.mrf.mxu1  ;;  %v5781_v14 = vadd.f32 %v22863_v13, %v5337_v45 }
 0x41d   : > { %v20240_v7 = vadd.f32 %v15626_v27, %v6477_v41  ;;  %v22859_v41 = vld [vmem:[#allocation53_spill] sm:$0xff] }
 0x41e   : > { %v20243_v35 = vpop.f32.mrf.mxu1  ;;  %v6446_v15 = vadd.f32 %v22859_v41, %v6112_v57  ;;  %v20269_v57 = vpop.f32.mrf.mxu0 }
 0x420   : > { %v15747_v54 = vpop.f32.mrf.mxu1  ;;  %v6780_v52 = vadd.f32 %v20107_v0, %v6446_v15  ;;  %v7116_v0 = vadd.f32 %v19930_v50, %v20103_v17  ;;  %v22870_v17 = vld [vmem:[#allocation56_spill] sm:$0xff] }
 0x421   : > { %v7446_v27 = vadd.f32 %v15747_v54, %v7112_v51  ;;  %v5347_v51 = vadd.f32 %v22862_v18, %v22861_v24  ;;  %v7113_v54 = vadd.f32 %v22864_v43, %v6778_v11  ;;  %v22866_v24 = vld [vmem:[#allocation41_spill] sm:$0xff]  ;;  %v20283_v18 = vpop.f32.mrf.mxu0 }
 0x422   : > { %v7266_v36 = vpop.f32.mrf.mxu1 }
 0x423   : > { %v7780_v26 = vadd.f32 %v20101_v49, %v7446_v27  ;;  %v7445_v19 = vadd.f32 %v7266_v36, %v7111_v48  ;;  %v6116_v27 = vadd.f32 %v19936_v59, %v5781_v14  ;;  %v22865_v48 = vld [vmem:[#allocation55_spill] sm:$0xff] }
 0x424   : > { %v15750_v56 = vpop.f32.mrf.mxu1  ;;  %v6448_v41 = vadd.f32 %v22865_v48, %v6114_v53  ;;  %v22869_v53 = vld [vmem:[#allocation95_spill] sm:$0xff] }
 0x425   : > { %v7779_v49 = vadd.f32 %v20105_v31, %v7445_v19  ;;  %v7448_v12 = vadd.f32 %v15750_v56, %v7114_v60  ;;  %v7823_v37 = vadd.f32 %v20261_v25, %v7780_v26  ;;  %v22867_v31 = vld [vmem:[#allocation57_spill] sm:$0xff]  ;;  %v22868_v60 = vld [vmem:[#allocation10_spill] sm:$0xff]  ;;  %v7115_v13 = vadd.f32 %v22869_v53, %v6780_v52 }
 0x426   : > { %v7276_v36 = vpop.f32.mrf.mxu1  ;;  %v5357_v19 = vadd.f32 %v22867_v31, %v22866_v24  ;;  %v5783_v11 = vadd.f32 %v22868_v60, %v5347_v51  ;;  %v6782_v26 = vadd.f32 %v20115_v1, %v6448_v41  ;;  %v7118_v52 = vadd.f32 %v19941_v4, %v20113_v46  ;;  %v22872_v41 = vld [vmem:[#allocation60_spill] sm:$0xff]  ;;  %v22875_v46 = vld [vmem:[#allocation59_spill] sm:$0xff] }
 0x427   : > { %v7782_v40 = vadd.f32 %v20111_v3, %v7448_v12  ;;  %v7447_v45 = vadd.f32 %v7276_v36, %v7113_v54  ;;  %v7822_v15 = vadd.f32 %v20261_v25, %v7779_v49  ;;  %v6450_v49 = vadd.f32 %v22870_v17, %v6116_v27 }
 0x428   : > { %v15753_v59 = vpop.f32.mrf.mxu1  ;;  %v6118_v50 = vadd.f32 %v19947_v63, %v5783_v11  ;;  %v7859_v12 = vmax.f32 %v7823_v37, 0.0  ;;  %v20299_v37 = vpop.f32.mrf.mxu0 }
 0x429   : > { %v7781_v3 = vadd.f32 %v20119_v6, %v7447_v45  ;;  %v7450_v14 = vadd.f32 %v15753_v59, %v7116_v0  ;;  %v7858_v56 = vmax.f32 %v7822_v15, 0.0  ;;  %v7825_v43 = vadd.f32 %v20261_v25, %v7782_v40  ;;  %v22871_v6 = vld [vmem:[#allocation32_spill] sm:$0xff] }
 0x42a   : > { %v7286_v54 = vpop.f32.mrf.mxu1  ;;  %v5367_v36 = vadd.f32 %v22872_v41, %v22871_v6  ;;  %v22873_v45 = vld [vmem:[#allocation40_spill] sm:$0xff]  ;;  %v6784_v27 = vadd.f32 %v20123_v16, %v6450_v49  ;;  %v6452_v60 = vadd.f32 %v22875_v46, %v6118_v50  ;;  %v20313_v17 = vpop.f32.mrf.mxu0  ;;  %v22879_v49 = vld [vmem:[#allocation97_spill] sm:$0xff] }
 0x42b   : > { %v7784_v51 = vadd.f32 %v20127_v22, %v7450_v14  ;;  %v7449_v48 = vadd.f32 %v7286_v54, %v7115_v13  ;;  %15887 = vmatprep.mubr.f32.mxu1 %v7858_v56  ;;  %v7824_v1 = vadd.f32 %v20261_v25, %v7781_v3  ;;  %v5785_v63 = vadd.f32 %v22873_v45, %v5357_v19  ;;  %v22874_v15 = vld [vmem:[#allocation96_spill] sm:$0xff]  ;;  %v22876_v3 = vld [vmem:[#allocation27_spill] sm:$0xff]  ;;  %v22878_v56 = vld [vmem:[#allocation21_spill] sm:$0xff] }
 0x42c   : > { %v15756_v40 = vpop.f32.mrf.mxu1  ;;  %15888 = vmatmul.mubr.f32.vlgmr.msra.gmra.mxu1 %v7859_v12  ;;  %v7117_v24 = vadd.f32 %v22874_v15, %v6782_v26  ;;  %v7861_v11 = vmax.f32 %v7825_v43, 0.0  ;;  %v7120_v13 = vadd.f32 %v19952_v32, %v20121_v33  ;;  %v22877_v26 = vld [vmem:[#allocation63_spill] sm:$0xff]  ;;  %v7119_v12 = vadd.f32 %v22879_v49, %v6784_v27  ;;  %v22880_v33 = vld [vmem:[#allocation62_spill] sm:$0xff]  ;;  %v22890_v49 = vld [vmem:[#allocation52_spill] sm:$0xff] }
 0x42d   : > { %v7783_v22 = vadd.f32 %v20135_v28, %v7449_v48  ;;  %v7452_v0 = vadd.f32 %v15756_v40, %v7118_v52  ;;  %v7860_v31 = vmax.f32 %v7824_v1, 0.0  ;;  %v6120_v4 = vadd.f32 %v19958_v44, %v5785_v63  ;;  %v22882_v63 = vld [vmem:[#allocation66_spill] sm:$0xff]  ;;  %v22883_v40 = vld [vmem:[#allocation29_spill] sm:$0xff] }
 0x42e   : > { %v7827_v59 = vadd.f32 %v20261_v25, %v7784_v51  ;;  %v7296_v19 = vpop.f32.mrf.mxu1  ;;  %v5377_v14 = vadd.f32 %v22877_v26, %v22876_v3  ;;  %v5787_v44 = vadd.f32 %v22878_v56, %v5367_v36  ;;  %v7122_v45 = vadd.f32 %v19963_v20, %v20129_v61  ;;  %v22885_v61 = vld [vmem:[#allocation65_spill] sm:$0xff]  ;;  %v22888_v26 = vld [vmem:[#allocation42_spill] sm:$0xff] }
 0x42f   : > { %v7786_v16 = vadd.f32 %v20143_v2, %v7452_v0  ;;  %v7451_v53 = vadd.f32 %v7296_v19, %v7117_v24  ;;  %15890 = vmatprep.mubr.f32.mxu1 %v7860_v31  ;;  %v7826_v28 = vadd.f32 %v20261_v25, %v7783_v22  ;;  %v6786_v2 = vadd.f32 %v20131_v21, %v6452_v60  ;;  %v20329_v0 = vpop.f32.mrf.mxu0  ;;  %v22884_v31 = vld [vmem:[#allocation98_spill] sm:$0xff] }
 0x430   : > { %v15759_v50 = vpop.f32.mrf.mxu1  ;;  %15891 = vmatmul.mubr.f32.gmra.mxu1 %v7861_v11  ;;  %v6122_v32 = vadd.f32 %v19969_v10, %v5787_v44  ;;  %v6454_v48 = vadd.f32 %v22880_v33, %v6120_v4  ;;  %v7863_v52 = vmax.f32 %v7827_v59, 0.0  ;;  %v5789_v10 = vadd.f32 %v22883_v40, %v5377_v14  ;;  %v22889_v44 = vld [vmem:[#allocation99_spill] sm:$0xff] }
 0x431   : > { %v7785_v43 = vadd.f32 %v20151_v55, %v7451_v53  ;;  %v7454_v54 = vadd.f32 %v15759_v50, %v7120_v13  ;;  %v7862_v51 = vmax.f32 %v7826_v28, 0.0  ;;  %v7829_v1 = vadd.f32 %v20261_v25, %v7786_v16  ;;  %v22881_v55 = vld [vmem:[#allocation43_spill] sm:$0xff]  ;;  %v22886_v13 = vld [vmem:[#allocation33_spill] sm:$0xff]  ;;  %v20343_v14 = vpop.f32.mrf.mxu0 }
 0x432   : > { %v7306_v6 = vpop.f32.mrf.mxu1  ;;  %v5387_v27 = vadd.f32 %v22882_v63, %v22881_v55  ;;  %v6788_v22 = vadd.f32 %v20139_v8, %v6454_v48  ;;  %v7121_v4 = vadd.f32 %v22884_v31, %v6786_v2  ;;  %v6124_v20 = vadd.f32 %v19980_v58, %v5789_v10  ;;  %v22887_v28 = vld [vmem:[#allocation69_spill] sm:$0xff]  ;;  %v22897_v63 = vld [vmem:[#allocation28_spill] sm:$0xff]  ;;  %v22899_v10 = vld [vmem:[#allocation22_spill] sm:$0xff] }
 0x433   : > { %v7788_v41 = vadd.f32 %v20159_v30, %v7454_v54  ;;  %v7453_v36 = vadd.f32 %v7306_v6, %v7119_v12  ;;  %15893 = vmatprep.mubr.f32.mxu1 %v7862_v51  ;;  %v7828_v21 = vadd.f32 %v20261_v25, %v7785_v43  ;;  %v6456_v60 = vadd.f32 %v22885_v61, %v6122_v32  ;;  %v22891_v12 = vld [vmem:[#allocation79_spill] sm:$0xff]  ;;  %v22893_v51 = vld [vmem:[#allocation68_spill] sm:$0xff]  ;;  %v22902_v61 = vld [vmem:[#allocation101_spill] sm:$0xff] }
 0x434   : > { %v15762_v15 = vpop.f32.mrf.mxu1  ;;  %15894 = vmatmul.mubr.f32.gmra.mxu1 %v7863_v52  ;;  %v7865_v11 = vmax.f32 %v7829_v1, 0.0  ;;  %v7124_v53 = vadd.f32 %v19974_v47, %v20137_v38  ;;  %v5397_v3 = vadd.f32 %v22887_v28, %v22886_v13  ;;  %v5791_v58 = vadd.f32 %v22888_v26, %v5387_v27  ;;  %v22892_v47 = vld [vmem:[#allocation102_spill] sm:$0xff]  ;;  %v22898_v27 = vld [vmem:[#allocation72_spill] sm:$0xff] }
 0x435   : > { %v7787_v30 = vadd.f32 %v20167_v62, %v7453_v36  ;;  %v7456_v24 = vadd.f32 %v15762_v15, %v7122_v45  ;;  %v7864_v46 = vmax.f32 %v7828_v21, 0.0  ;;  %v7831_v59 = vadd.f32 %v20261_v25, %v7788_v41  ;;  %v22894_v1 = vld [vmem:[#allocation82_spill] sm:$0xff]  ;;  %v22896_v45 = vld [vmem:[#allocation100_spill] sm:$0xff] }
 0x436   : > { %v7316_v19 = vpop.f32.mrf.mxu1  ;;  %v7123_v50 = vadd.f32 %v22889_v44, %v6788_v22  ;;  %v6126_v38 = vadd.f32 %v22892_v47, %v5791_v58  ;;  %v6458_v32 = vadd.f32 %v22893_v51, %v6124_v20  ;;  %v22895_v36 = vld [vmem:[#allocation50_spill] sm:$0xff]  ;;  %v5407_v40 = vadd.f32 %v22898_v27, %v22897_v63  ;;  %v22905_v28 = vld [vmem:[#allocation88_spill] sm:$0xff]  ;;  %v22906_v58 = vld [vmem:[#allocation39_spill] sm:$0xff] }
 0x437   : > { %v7790_v8 = vadd.f32 %v20175_v23, %v7456_v24  ;;  %v7455_v16 = vadd.f32 %v7316_v19, %v7121_v4  ;;  %15896 = vmatprep.mubr.f32.mxu1 %v7864_v46  ;;  %v7830_v62 = vadd.f32 %v20261_v25, %v7787_v30  ;;  %v6790_v23 = vadd.f32 %v22890_v49, %v6456_v60  ;;  %v22900_v15 = vld [vmem:[#allocation58_spill] sm:$0xff]  ;;  %v20359_v24 = vpop.f32.mrf.mxu0  ;;  %v22901_v4 = vld [vmem:[#allocation85_spill] sm:$0xff] }
 0x438   : > { %v15765_v56 = vpop.f32.mrf.mxu1  ;;  %15897 = vmatmul.mubr.f32.gmra.mxu1 %v7865_v11  ;;  %v7867_v33 = vmax.f32 %v7831_v59, 0.0  ;;  %v7126_v21 = vadd.f32 %v22896_v45, %v22895_v36  ;;  %v5793_v22 = vadd.f32 %v22899_v10, %v5397_v3  ;;  %v6792_v30 = vadd.f32 %v22900_v15, %v6458_v32  ;;  %v22903_v59 = vld [vmem:[#allocation105_spill] sm:$0xff]  ;;  %v22912_v32 = vld [vmem:[#allocation64_spill] sm:$0xff]  ;;  %v22914_v36 = vld [vmem:[#allocation74_spill] sm:$0xff] }
 0x439   : > { %v7789_v2 = vadd.f32 %v22891_v12, %v7455_v16  ;;  %v7458_v43 = vadd.f32 %v15765_v56, %v7124_v53  ;;  %v7866_v54 = vmax.f32 %v7830_v62, 0.0  ;;  %v7833_v48 = vadd.f32 %v20261_v25, %v7790_v8  ;;  %v22904_v8 = vld [vmem:[#allocation71_spill] sm:$0xff]  ;;  %v22908_v49 = vld [vmem:[#allocation45_spill] sm:$0xff] }
 0x43a   : > { %v7326_v52 = vpop.f32.mrf.mxu1  ;;  %v7125_v60 = vadd.f32 %v22902_v61, %v6790_v23  ;;  %v6128_v19 = vadd.f32 %v22903_v59, %v5793_v22  ;;  %v6460_v16 = vadd.f32 %v22904_v8, %v6126_v38  ;;  %v22907_v56 = vld [vmem:[#allocation103_spill] sm:$0xff]  ;;  %v22911_v38 = vld [vmem:[#allocation104_spill] sm:$0xff]  ;;  %v22915_v10 = vld [vmem:[#allocation61_spill] sm:$0xff] }
 0x43b   : > { %v7792_v6 = vadd.f32 %v22894_v1, %v7458_v43  ;;  %v7457_v41 = vadd.f32 %v7326_v52, %v7123_v50  ;;  %15899 = vmatprep.mubr.f32.mxu1 %v7866_v54  ;;  %v7832_v55 = vadd.f32 %v20261_v25, %v7789_v2  ;;  %v7869_v53 = vmax.f32 %v7833_v48, 0.0  ;;  %v22909_v23 = vld [vmem:[#allocation75_spill] sm:$0xff]  ;;  %v22910_v2 = vld [vmem:[#allocation30_spill] sm:$0xff]  ;;  %v20373_v54 = vpop.f32.mrf.mxu0 }
 0x43c   : > { %v15768_v31 = vpop.f32.mrf.mxu1  ;;  %15900 = vmatmul.mubr.f32.gmra.mxu1 %v7867_v33  ;;  %v7128_v44 = vadd.f32 %v22907_v56, %v22906_v58  ;;  %v5417_v12 = vadd.f32 %v22909_v23, %v22908_v49  ;;  %v5795_v43 = vadd.f32 %v22910_v2, %v5407_v40  ;;  %v7127_v51 = vadd.f32 %v22911_v38, %v6792_v30  ;;  %v22916_v22 = vld [vmem:[#allocation106_spill] sm:$0xff]  ;;  %v22921_v8 = vld [vmem:[#allocation107_spill] sm:$0xff]  ;;  %v22925_v23 = vld [vmem:[#allocation109_spill] sm:$0xff] }
 0x43d   : > { %v7791_v46 = vadd.f32 %v22901_v4, %v7457_v41  ;;  %v7460_v20 = vadd.f32 %v15768_v31, %v7126_v21  ;;  %v7868_v11 = vmax.f32 %v7832_v55, 0.0  ;;  %v7835_v62 = vadd.f32 %v20261_v25, %v7792_v6  ;;  %v22913_v6 = vld [vmem:[#allocation108_spill] sm:$0xff]  ;;  %v22918_v31 = vld [vmem:[#allocation78_spill] sm:$0xff]  ;;  %v22924_v49 = vld [vmem:[#allocation67_spill] sm:$0xff] }
 0x43e   : > { %v7336_v13 = vpop.f32.mrf.mxu1  ;;  %v6794_v33 = vadd.f32 %v22912_v32, %v6460_v16  ;;  %v6130_v41 = vadd.f32 %v22913_v6, %v5795_v43  ;;  %v6462_v45 = vadd.f32 %v22914_v36, %v6128_v19  ;;  %v7130_v15 = vadd.f32 %v22916_v22, %v22915_v10  ;;  %v22920_v61 = vld [vmem:[#allocation70_spill] sm:$0xff]  ;;  %v22926_v2 = vld [vmem:[#allocation5_spill] sm:$0xff]  ;;  %v22928_v38 = vld [vmem:[#allocation23_spill] sm:$0xff] }
 0x43f   : > { %v7794_v3 = vadd.f32 %v22905_v28, %v7460_v20  ;;  %v7459_v26 = vadd.f32 %v7336_v13, %v7125_v60  ;;  %15902 = vmatprep.mubr.f32.mxu1 %v7868_v11  ;;  %v7834_v50 = vadd.f32 %v20261_v25, %v7791_v46  ;;  %v7871_v21 = vmax.f32 %v7835_v62, 0.0  ;;  %v22919_v46 = vld [vmem:[#allocation44_spill] sm:$0xff]  ;;  %v20389_v11 = vpop.f32.mrf.mxu0  ;;  %v22922_v62 = vld [vmem:[#allocation111_spill] sm:$0xff]  ;;  %v22923_v28 = vld [vmem:[#allocation77_spill] sm:$0xff] }
 0x440   : > { %v15771_v47 = vpop.f32.mrf.mxu1  ;;  %15903 = vmatmul.mubr.f32.gmra.mxu1 %v7869_v53  ;;  %v5797_v20 = vadd.f32 %v22919_v46, %v5417_v12  ;;  %v6796_v60 = vadd.f32 %v22920_v61, %v6462_v45  ;;  %v7129_v16 = vadd.f32 %v22921_v8, %v6794_v33  ;;  %v7132_v12 = vadd.f32 %v22925_v23, %v22924_v49  ;;  %v22927_v43 = vld [vmem:[#allocation81_spill] sm:$0xff]  ;;  %v22931_v45 = vld [vmem:[#allocation114_spill] sm:$0xff]  ;;  %v22936_v46 = vld [vmem:[#allocation84_spill] sm:$0xff] }
 0x441   : > { %v7793_v48 = vadd.f32 %v20223_v42, %v7459_v26  ;;  %v7462_v52 = vadd.f32 %v15771_v47, %v7128_v44  ;;  %v7870_v1 = vmax.f32 %v7834_v50, 0.0  ;;  %v7837_v55 = vadd.f32 %v20261_v25, %v7794_v3  ;;  %v22917_v42 = vld [vmem:[#allocation34_spill] sm:$0xff]  ;;  %v20403_v32 = vpop.f32.mrf.mxu0  ;;  %v22937_v61 = vld [vmem:[#allocation31_spill] sm:$0xff] }
 0x442   : > { %v7346_v63 = vpop.f32.mrf.mxu1  ;;  %v5427_v4 = vadd.f32 %v22918_v31, %v22917_v42  ;;  %v6132_v13 = vadd.f32 %v22922_v62, %v5797_v20  ;;  %v6464_v3 = vadd.f32 %v22923_v28, %v6130_v41  ;;  %v5437_v47 = vadd.f32 %v22927_v43, %v22926_v2  ;;  %v22934_v42 = vld [vmem:[#allocation112_spill] sm:$0xff]  ;;  %v22940_v28 = vld [vmem:[#allocation117_spill] sm:$0xff]  ;;  %v22944_v43 = vld [vmem:[#allocation35_spill] sm:$0xff] }
 0x443   : > { %v7796_v27 = vadd.f32 %v20237_v39, %v7462_v52  ;;  %v7461_v40 = vadd.f32 %v7346_v63, %v7127_v51  ;;  %15905 = vmatprep.mubr.f32.mxu1 %v7870_v1  ;;  %v7836_v30 = vadd.f32 %v20261_v25, %v7793_v48  ;;  %v7873_v26 = vmax.f32 %v7837_v55, 0.0  ;;  %v22929_v48 = vld [vmem:[#allocation110_spill] sm:$0xff]  ;;  %v22930_v1 = vld [vmem:[#allocation76_spill] sm:$0xff] }
 0x444   : > { %v15774_v59 = vpop.f32.mrf.mxu1  ;;  %15906 = vmatmul.mubr.f32.gmra.mxu1 %v7871_v21  ;;  %v5799_v51 = vadd.f32 %v22928_v38, %v5427_v4  ;;  %v7131_v52 = vadd.f32 %v22929_v48, %v6796_v60  ;;  %v22932_v55 = vld [vmem:[#allocation80_spill] sm:$0xff]  ;;  %v5801_v60 = vadd.f32 %v22937_v61, %v5437_v47  ;;  %v22945_v47 = vld [vmem:[#allocation87_spill] sm:$0xff] }
 0x445   : > { %v7795_v39 = vadd.f32 %v20251_v5, %v7461_v40  ;;  %v7464_v19 = vadd.f32 %v15774_v59, %v7130_v15  ;;  %v7872_v53 = vmax.f32 %v7836_v30, 0.0  ;;  %v7839_v58 = vadd.f32 %v20261_v25, %v7796_v27  ;;  %v22933_v30 = vld [vmem:[#allocation73_spill] sm:$0xff]  ;;  %v22938_v59 = vld [vmem:[#allocation130_spill] sm:$0xff]  ;;  %v22955_v61 = vld [vmem:[#allocation24_spill] sm:$0xff] }
 0x446   : > { %v7356_v56 = vpop.f32.mrf.mxu1  ;;  %v6134_v21 = vadd.f32 %v22931_v45, %v5799_v51  ;;  %v6466_v63 = vadd.f32 %v22932_v55, %v6132_v13  ;;  %v7134_v31 = vadd.f32 %v22934_v42, %v22933_v30  ;;  %v5457_v38 = vadd.f32 %v22945_v47, %v22944_v43  ;;  %v22946_v51 = vld [vmem:[#allocation46_spill] sm:$0xff]  ;;  %v22951_v42 = vld [vmem:[#allocation131_spill] sm:$0xff] }
 0x447   : > { %v7798_v44 = vadd.f32 %v20269_v57, %v7464_v19  ;;  %v7463_v50 = vadd.f32 %v7356_v56, %v7129_v16  ;;  %15908 = vmatprep.mubr.f32.mxu1 %v7872_v53  ;;  %v7838_v5 = vadd.f32 %v20261_v25, %v7795_v39  ;;  %v6798_v57 = vadd.f32 %v22930_v1, %v6464_v3  ;;  %v20419_v19 = vpop.f32.mrf.mxu0  ;;  %v22939_v53 = vld [vmem:[#allocation113_spill] sm:$0xff]  ;;  %v22947_v1 = vld [vmem:[#allocation116_spill] sm:$0xff] }
 0x448   : > { %v15777_v33 = vpop.f32.mrf.mxu1  ;;  %15909 = vmatmul.mubr.f32.gmra.mxu1 %v7873_v26  ;;  %v7875_v27 = vmax.f32 %v7839_v58, 0.0  ;;  %v6800_v39 = vadd.f32 %v22938_v59, %v6466_v63  ;;  %v6136_v3 = vadd.f32 %v22940_v28, %v5801_v60  ;;  %v22941_v26 = vld [vmem:[#allocation83_spill] sm:$0xff]  ;;  %v22950_v63 = vld [vmem:[#allocation86_spill] sm:$0xff]  ;;  %v5805_v60 = vadd.f32 %v22955_v61, %v5457_v38  ;;  %v22956_v59 = vld [vmem:[#allocation49_spill] sm:$0xff] }
 0x449   : > { %v7797_v6 = vadd.f32 %v20283_v18, %v7463_v50  ;;  %v7466_v41 = vadd.f32 %v15777_v33, %v7132_v12  ;;  %v7874_v36 = vmax.f32 %v7838_v5, 0.0  ;;  %v7841_v40 = vadd.f32 %v20261_v25, %v7798_v44  ;;  %v22935_v18 = vld [vmem:[#allocation47_spill] sm:$0xff]  ;;  %v22942_v12 = vld [vmem:[#allocation129_spill] sm:$0xff]  ;;  %v7740_v48 = vpop.f32.mrf.mxu0 }
 0x44a   : > { %v7366_v10 = vpop.f32.mrf.mxu1  ;;  %v5447_v20 = vadd.f32 %v22936_v46, %v22935_v18  ;;  %v7133_v62 = vadd.f32 %v22939_v53, %v6798_v57  ;;  %v6468_v58 = vadd.f32 %v22941_v26, %v6134_v21  ;;  %v22943_v5 = vld [vmem:[#allocation115_spill] sm:$0xff]  ;;  %v7135_v57 = vadd.f32 %v22947_v1, %v6800_v39  ;;  %v22949_v21 = vld [vmem:[#allocation120_spill] sm:$0xff]  ;;  %v22954_v46 = vld [vmem:[#allocation90_spill] sm:$0xff] }
 0x44b   : > { %v7800_v22 = vadd.f32 %v20299_v37, %v7466_v41  ;;  %v7465_v15 = vadd.f32 %v7366_v10, %v7131_v52  ;;  %15911 = vmatprep.mubr.f32.mxu1 %v7874_v36  ;;  %v7840_v4 = vadd.f32 %v20261_v25, %v7797_v6  ;;  %v7877_v56 = vmax.f32 %v7841_v40, 0.0  ;;  %v22948_v6 = vld [vmem:[#allocation132_spill] sm:$0xff]  ;;  %v22957_v53 = vld [vmem:[#allocation119_spill] sm:$0xff]  ;;  %v22959_v26 = vld [vmem:[#allocation89_spill] sm:$0xff] }
 0x44c   : > { %v15780_v8 = vpop.f32.mrf.mxu1  ;;  %15912 = vmatmul.mubr.f32.gmra.mxu1 %v7875_v27  ;;  %v7136_v2 = vadd.f32 %v22943_v5, %v22942_v12  ;;  %v5803_v33 = vadd.f32 %v22946_v51, %v5447_v20  ;;  %v6802_v41 = vadd.f32 %v22948_v6, %v6468_v58  ;;  %v6470_v27 = vadd.f32 %v22950_v63, %v6136_v3  ;;  %v22958_v28 = vld [vmem:[#allocation123_spill] sm:$0xff]  ;;  %v22960_v12 = vld [vmem:[#allocation14_spill] sm:$0xff]  ;;  %v22961_v5 = vld [vmem:[#allocation121_spill] sm:$0xff] }
 0x44d   : > { %v7799_v37 = vadd.f32 %v20313_v17, %v7465_v15  ;;  %v7468_v16 = vadd.f32 %v15780_v8, %v7134_v31  ;;  %v7876_v13 = vmax.f32 %v7840_v4, 0.0  ;;  %v7843_v44 = vadd.f32 %v20261_v25, %v7800_v22  ;;  %v22952_v31 = vld [vmem:[#allocation118_spill] sm:$0xff]  ;;  %v15878_v8 = vpop.f32.mrf.mxu0 }
 0x44e   : > { %v7376_v50 = vpop.f32.mrf.mxu1  ;;  %v6138_v55 = vadd.f32 %v22949_v21, %v5803_v33  ;;  %v7138_v4 = vadd.f32 %v22952_v31, %v22951_v42  ;;  %v6804_v39 = vadd.f32 %v22956_v59, %v6470_v27  ;;  %v6140_v3 = vadd.f32 %v22958_v28, %v5805_v60  ;;  %v22963_v51 = vld [vmem:[#allocation122_spill] sm:$0xff] }
 0x44f   : > { %v7802_v49 = vadd.f32 %v20329_v0, %v7468_v16  ;;  %v7467_v23 = vadd.f32 %v7376_v50, %v7133_v62  ;;  %15914 = vmatprep.mubr.f32.mxu1 %v7876_v13  ;;  %v7842_v17 = vadd.f32 %v20261_v25, %v7799_v37  ;;  %v7879_v40 = vmax.f32 %v7843_v44, 0.0  ;;  %v7750_v47 = vpop.f32.mrf.mxu0  ;;  %v22964_v6 = vld [vmem:[#allocation126_spill] sm:$0xff] }
 0x450   : > { %v15783_v52 = vpop.f32.mrf.mxu1  ;;  %15915 = vmatmul.mubr.f32.gmra.mxu1 %v7877_v56  ;;  %v7137_v62 = vadd.f32 %v22957_v53, %v6802_v41  ;;  %v6472_v58 = vadd.f32 %v22959_v26, %v6138_v55  ;;  %v7139_v33 = vadd.f32 %v22963_v51, %v6804_v39  ;;  %v22971_v53 = vld [vmem:[#allocation127_spill] sm:$0xff] }
 0x451   : > { %v7801_v0 = vadd.f32 %v20343_v14, %v7467_v23  ;;  %v7470_v36 = vadd.f32 %v15783_v52, %v7136_v2  ;;  %v7878_v45 = vmax.f32 %v7842_v17, 0.0  ;;  %v7845_v10 = vadd.f32 %v20261_v25, %v7802_v49  ;;  %v22953_v14 = vld [vmem:[#allocation6_spill] sm:$0xff]  ;;  %v22962_v17 = vld [vmem:[#allocation8_spill] sm:$0xff]  ;;  %v15881_v63 = vpop.f32.mrf.mxu0 }
 0x452   : > { %v7386_v22 = vpop.f32.mrf.mxu1  ;;  %v5467_v20 = vadd.f32 %v22954_v46, %v22953_v14  ;;  %v7140_v2 = vadd.f32 %v22961_v5, %v22960_v12  ;;  %v6806_v52 = vadd.f32 %v20216_v29, %v6472_v58  ;;  %v22969_v46 = vld [vmem:[#allocation92_spill] sm:$0xff] }
 0x453   : > { %v7804_v15 = vadd.f32 %v20359_v24, %v7470_v36  ;;  %v7469_v30 = vadd.f32 %v7386_v22, %v7135_v57  ;;  %15917 = vmatprep.mubr.f32.mxu1 %v7878_v45  ;;  %v7844_v18 = vadd.f32 %v20261_v25, %v7801_v0  ;;  %v7881_v56 = vmax.f32 %v7845_v10, 0.0  ;;  %v22965_v0 = vld [vmem:[#allocation91_spill] sm:$0xff]  ;;  %v22966_v10 = vld [vmem:[#allocation16_spill] sm:$0xff]  ;;  %v7760_v59 = vpop.f32.mrf.mxu0 }
 0x454   : > { %v15786_v37 = vpop.f32.mrf.mxu1  ;;  %15918 = vmatmul.mubr.f32.gmra.mxu1 %v7879_v40  ;;  %v5807_v43 = vadd.f32 %v22962_v17, %v5467_v20  ;;  %v6474_v36 = vadd.f32 %v22965_v0, %v6140_v3  ;;  %v22967_v22 = vld [vmem:[#allocation124_spill] sm:$0xff] }
 0x455   : > { %v7803_v16 = vadd.f32 %v20373_v54, %v7469_v30  ;;  %v7472_v24 = vadd.f32 %v15786_v37, %v7138_v4  ;;  %v7880_v13 = vmax.f32 %v7844_v18, 0.0  ;;  %v7847_v44 = vadd.f32 %v20261_v25, %v7804_v15  ;;  %v22968_v4 = vld [vmem:[#allocation125_spill] sm:$0xff] }
 0x456   : > { %v7396_v50 = vpop.f32.mrf.mxu1  ;;  %v6142_v41 = vadd.f32 %v22964_v6, %v5807_v43  ;;  %v7142_v29 = vadd.f32 %v22967_v22, %v22966_v10  ;;  %v6808_v15 = vadd.f32 %v20228_v9, %v6474_v36  ;;  %v7141_v18 = vadd.f32 %v22968_v4, %v6806_v52 }
 0x457   : > { %v7806_v49 = vadd.f32 %v20389_v11, %v7472_v24  ;;  %v7471_v23 = vadd.f32 %v7396_v50, %v7137_v62  ;;  %15920 = vmatprep.mubr.f32.mxu1 %v7880_v13  ;;  %v7846_v54 = vadd.f32 %v20261_v25, %v7803_v16  ;;  %v7883_v45 = vmax.f32 %v7847_v44, 0.0  ;;  %v22970_v16 = vld [vmem:[#allocation48_spill] sm:$0xff]  ;;  %v15884_v44 = vpop.f32.mrf.mxu0 }
 0x458   : > { %v15789_v38 = vpop.f32.mrf.mxu1  ;;  %15921 = vmatmul.mubr.f32.gmra.mxu1 %v7881_v56  ;;  %v6476_v20 = vadd.f32 %v22969_v46, %v6142_v41  ;;  %v7144_v9 = vadd.f32 %v22970_v16, %v20226_v34  ;;  %v7143_v62 = vadd.f32 %v22971_v53, %v6808_v15  ;;  %v22972_v34 = vld [vmem:[#allocation51_spill] sm:$0xff] }
 0x459   : > { %v7805_v1 = vadd.f32 %v20403_v32, %v7471_v23  ;;  %v7474_v57 = vadd.f32 %v15789_v38, %v7140_v2  ;;  %v7882_v11 = vmax.f32 %v7846_v54, 0.0  ;;  %v7849_v21 = vadd.f32 %v20261_v25, %v7806_v49  ;;  %v22973_v54 = vld [vmem:[#allocation128_spill] sm:$0xff] }
 0x45a   : > { %v7406_v55 = vpop.f32.mrf.mxu1  ;;  %v6810_v13 = vadd.f32 %v20243_v35, %v6476_v20  ;;  %v7146_v23 = vadd.f32 %v22972_v34, %v20240_v7 }
 0x45b   : > { %v7808_v27 = vadd.f32 %v20419_v19, %v7474_v57  ;;  %v7473_v40 = vadd.f32 %v7406_v55, %v7139_v33  ;;  %15923 = vmatprep.mubr.f32.mxu1 %v7882_v11  ;;  %v7848_v32 = vadd.f32 %v20261_v25, %v7805_v1  ;;  %v7885_v61 = vmax.f32 %v7849_v21, 0.0  ;;  %v7770_v33 = vpop.f32.mrf.mxu0  ;;  %v16894_v21 = vld [vmem:[#allocation2 + $0x1] sm:$0xff] }
 0x45c   : > { %v15792_v30 = vpop.f32.mrf.mxu1  ;;  %15924 = vmatmul.mubr.f32.gmra.mxu1 %v7883_v45  ;;  %v7145_v17 = vadd.f32 %v22973_v54, %v6810_v13 }
 0x45d   : > { %v7807_v42 = vadd.f32 %v7740_v48, %v7473_v40  ;;  %v7476_v31 = vadd.f32 %v15792_v30, %v7142_v29  ;;  %v7884_v14 = vmax.f32 %v7848_v32, 0.0  ;;  %v7851_v19 = vadd.f32 %v20261_v25, %v7808_v27 }
 0x45e   : > { %v7416_v60 = vpop.f32.mrf.mxu1 }
 0x45f   : > { %v7810_v39 = vadd.f32 %v15878_v8, %v7476_v31  ;;  %v7475_v37 = vadd.f32 %v7416_v60, %v7141_v18  ;;  %15926 = vmatprep.mubr.f32.mxu1 %v7884_v14  ;;  %v7850_v24 = vadd.f32 %v20261_v25, %v7807_v42  ;;  %v7887_v58 = vmax.f32 %v7851_v19, 0.0 }
 0x460   : > { %v15795_v48 = vpop.f32.mrf.mxu1  ;;  %15927 = vmatmul.mubr.f32.gmra.mxu1 %v7885_v61 }
 0x461   : > { %v7809_v28 = vadd.f32 %v7750_v47, %v7475_v37  ;;  %v7478_v3 = vadd.f32 %v15795_v48, %v7144_v9  ;;  %v7886_v26 = vmax.f32 %v7850_v24, 0.0  ;;  %v7853_v56 = vadd.f32 %v20261_v25, %v7810_v39 }
 0x462   : > { %v7426_v8 = vpop.f32.mrf.mxu1 }
 0x463   : > { %v7477_v50 = vadd.f32 %v7426_v8, %v7143_v62  ;;  %v7812_v49 = vadd.f32 %v15881_v63, %v7478_v3  ;;  %15929 = vmatprep.mubr.f32.mxu1 %v7886_v26  ;;  %v7852_v12 = vadd.f32 %v20261_v25, %v7809_v28  ;;  %v7889_v47 = vmax.f32 %v7853_v56, 0.0 }
 0x464   : > { %v15798_v5 = vpop.f32.mrf.mxu1  ;;  %15930 = vmatmul.mubr.f32.gmra.mxu1 %v7887_v58 }
 0x465   : > { %v7480_v2 = vadd.f32 %v15798_v5, %v7146_v23  ;;  %v7811_v35 = vadd.f32 %v7760_v59, %v7477_v50  ;;  %v7888_v43 = vmax.f32 %v7852_v12, 0.0  ;;  %v7855_v38 = vadd.f32 %v20261_v25, %v7812_v49 }
 0x466   : > { %v7436_v51 = vpop.f32.mrf.mxu1 }
 0x467   : > { %v7854_v52 = vadd.f32 %v20261_v25, %v7811_v35  ;;  %v7479_v1 = vadd.f32 %v7436_v51, %v7145_v17  ;;  %v7814_v57 = vadd.f32 %v15884_v44, %v7480_v2  ;;  %15932 = vmatprep.mubr.f32.mxu1 %v7888_v43  ;;  %v7891_v6 = vmax.f32 %v7855_v38, 0.0 }
 0x468   : > { %15933 = vmatmul.mubr.f32.gmra.mxu1 %v7889_v47 }
 0x469   : > { %v7813_v7 = vadd.f32 %v7770_v33, %v7479_v1  ;;  %v7890_v11 = vmax.f32 %v7854_v52, 0.0  ;;  %v7857_v41 = vadd.f32 %v20261_v25, %v7814_v57 }
 0x46b   : > { %v7856_v0 = vadd.f32 %v20261_v25, %v7813_v7  ;;  %15935 = vmatprep.mubr.f32.mxu1 %v7890_v11  ;;  %v7893_v45 = vmax.f32 %v7857_v41, 0.0 }
 0x46c   : > { %15936 = vmatmul.mubr.f32.gmra.mxu1 %v7891_v6 }
 0x46d   : > { %v7892_v36 = vmax.f32 %v7856_v0, 0.0 }
 0x46f   : > { %15938 = vmatprep.mubr.f32.mxu1 %v7892_v36 }
 0x470   : > { %15939 = vmatmul.mubr.f32.gmra.mxu1 %v7893_v45 }
 0x471   : > { %16029 = vmatprep.mubr.f32.mxu1 %v16894_v21 }
 0x4ec   : > { %v20485_v55 = vpop.f32.mrf.mxu1 }
 0x4ed   : > { %v8144_v10 = vsel %vm8140_vm2, %v20485_v55, -inf }
 0x4ee   : > { %v20487_v63 = vpop.f32.mrf.mxu1 }
 0x4ef   : > { %v8141_v27 = vsel %vm8140_vm2, %v20487_v63, -inf }
 0x4f0   : > { %8142 = vmax.xlane.f32.xlu0 %v8141_v27  ;;  %v20491_v40 = vpop.f32.mrf.mxu1  ;;  %v8537_v27 = vld [vmem:[%s381_s28] sm:$0x7]  ;;  %s13209_s28 = sshll.u32 %s23051_s11, 8 }
 0x4f1   : > { %v8150_v15 = vsel %vm8140_vm2, %v20491_v40, -inf  ;;  %15941 = vmatprep.subr.msk.mxu0 %vm8646_vm3, %v8537_v27  ;;  %s22374_s10 = scalar_lea.vmem %s22489_s9, %s13209_s28 }
 0x4f2   : > { %v20493_v25 = vpop.f32.mrf.mxu1  ;;  %15942 = vmatpush3.msk.msra.mxu0 %vm8646_vm3, %v8537_v27 }
 0x4f3   : > { %v8147_v22 = vsel %vm8140_vm2, %v20493_v25, -inf }
 0x4f4   : > { %8145 = vmax.xlane.f32.xlu0 %v8144_v10  ;;  %8148 = vmax.xlane.f32.xlu1 %v8147_v22  ;;  %v20499_v29 = vpop.f32.mrf.mxu1 }
 0x4f5   : > { %v8156_v4 = vsel %vm8140_vm2, %v20499_v29, -inf }
 0x4f6   : > { %v20501_v32 = vpop.f32.mrf.mxu1 }
 0x4f7   : > { %v8153_v30 = vsel %vm8140_vm2, %v20501_v32, -inf }
 0x4f8   : > { %8151 = vmax.xlane.f32.xlu1 %v8150_v15  ;;  %8154 = vmax.xlane.f32.xlu0 %v8153_v30  ;;  %v20507_v42 = vpop.f32.mrf.mxu1 }
 0x4f9   : > { %v8162_v20 = vsel %vm8140_vm2, %v20507_v42, -inf }
 0x4fa   : > { %v20509_v31 = vpop.f32.mrf.mxu1 }
 0x4fb   : > { %v8159_v18 = vsel %vm8140_vm2, %v20509_v31, -inf }
 0x4fc   : > { %8157 = vmax.xlane.f32.xlu1 %v8156_v4  ;;  %8160 = vmax.xlane.f32.xlu0 %v8159_v18  ;;  %v20515_v14 = vpop.f32.mrf.mxu1 }
 0x4fd   : > { %v8168_v59 = vsel %vm8140_vm2, %v20515_v14, -inf }
 0x4fe   : > { %v20517_v46 = vpop.f32.mrf.mxu1 }
 0x4ff   : > { %v8165_v61 = vsel %vm8140_vm2, %v20517_v46, -inf }
 0x500   : > { %8163 = vmax.xlane.f32.xlu1 %v8162_v20  ;;  %8166 = vmax.xlane.f32.xlu0 %v8165_v61  ;;  %v20523_v19 = vpop.f32.mrf.mxu1 }
 0x501   : > { %v8174_v9 = vsel %vm8140_vm2, %v20523_v19, -inf }
 0x502   : > { %v20525_v60 = vpop.f32.mrf.mxu1 }
 0x503   : > { %v8171_v39 = vsel %vm8140_vm2, %v20525_v60, -inf }
 0x504   : > { %8169 = vmax.xlane.f32.xlu1 %v8168_v59  ;;  %8172 = vmax.xlane.f32.xlu0 %v8171_v39  ;;  %v20531_v37 = vpop.f32.mrf.mxu1 }
 0x505   : > { %v8180_v62 = vsel %vm8140_vm2, %v20531_v37, -inf }
 0x506   : > { %v20533_v16 = vpop.f32.mrf.mxu1 }
 0x507   : > { %v8177_v24 = vsel %vm8140_vm2, %v20533_v16, -inf }
 0x508   : > { %8175 = vmax.xlane.f32.xlu1 %v8174_v9  ;;  %8178 = vmax.xlane.f32.xlu0 %v8177_v24  ;;  %v20539_v48 = vpop.f32.mrf.mxu1 }
 0x509   : > { %v8186_v26 = vsel %vm8140_vm2, %v20539_v48, -inf }
 0x50a   : > { %v20541_v53 = vpop.f32.mrf.mxu1 }
 0x50b   : > { %v8183_v13 = vsel %vm8140_vm2, %v20541_v53, -inf }
 0x50c   : > { %8181 = vmax.xlane.f32.xlu1 %v8180_v62  ;;  %8184 = vmax.xlane.f32.xlu0 %v8183_v13  ;;  %v20547_v28 = vpop.f32.mrf.mxu1 }
 0x50d   : > { %v8192_v44 = vsel %vm8140_vm2, %v20547_v28, -inf }
 0x50e   : > { %v20549_v3 = vpop.f32.mrf.mxu1 }
 0x50f   : > { %v8189_v58 = vsel %vm8140_vm2, %v20549_v3, -inf }
 0x510   : > { %8187 = vmax.xlane.f32.xlu1 %v8186_v26  ;;  %8190 = vmax.xlane.f32.xlu0 %v8189_v58  ;;  %v20555_v56 = vpop.f32.mrf.mxu1 }
 0x511   : > { %v8198_v23 = vsel %vm8140_vm2, %v20555_v56, -inf }
 0x512   : > { %v20557_v8 = vpop.f32.mrf.mxu1 }
 0x513   : > { %v8195_v50 = vsel %vm8140_vm2, %v20557_v8, -inf }
 0x514   : > { %8193 = vmax.xlane.f32.xlu1 %v8192_v44  ;;  %8196 = vmax.xlane.f32.xlu0 %v8195_v50  ;;  %v20563_v49 = vpop.f32.mrf.mxu1 }
 0x515   : > { %v8204_v35 = vsel %vm8140_vm2, %v20563_v49, -inf }
 0x516   : > { %v20565_v34 = vpop.f32.mrf.mxu1 }
 0x517   : > { %v8201_v12 = vsel %vm8140_vm2, %v20565_v34, -inf }
 0x518   : > { %8199 = vmax.xlane.f32.xlu1 %v8198_v23  ;;  %8202 = vmax.xlane.f32.xlu0 %v8201_v12  ;;  %v20571_v5 = vpop.f32.mrf.mxu1 }
 0x519   : > { %v8210_v47 = vsel %vm8140_vm2, %v20571_v5, -inf }
 0x51a   : > { %v20573_v2 = vpop.f32.mrf.mxu1 }
 0x51b   : > { %v8207_v54 = vsel %vm8140_vm2, %v20573_v2, -inf }
 0x51c   : > { %8205 = vmax.xlane.f32.xlu1 %v8204_v35  ;;  %8208 = vmax.xlane.f32.xlu0 %v8207_v54  ;;  %v20579_v17 = vpop.f32.mrf.mxu1 }
 0x51d   : > { %v8216_v52 = vsel %vm8140_vm2, %v20579_v17, -inf }
 0x51e   : > { %v20581_v43 = vpop.f32.mrf.mxu1 }
 0x51f   : > { %v8213_v38 = vsel %vm8140_vm2, %v20581_v43, -inf }
 0x520   : > { %8211 = vmax.xlane.f32.xlu1 %v8210_v47  ;;  %8214 = vmax.xlane.f32.xlu0 %v8213_v38  ;;  %v20587_v51 = vpop.f32.mrf.mxu1 }
 0x521   : > { %v8222_v11 = vsel %vm8140_vm2, %v20587_v51, -inf }
 0x522   : > { %v20589_v33 = vpop.f32.mrf.mxu1 }
 0x523   : > { %v8219_v1 = vsel %vm8140_vm2, %v20589_v33, -inf }
 0x524   : > { %8217 = vmax.xlane.f32.xlu1 %v8216_v52  ;;  %8220 = vmax.xlane.f32.xlu0 %v8219_v1  ;;  %v20595_v57 = vpop.f32.mrf.mxu1 }
 0x525   : > { %v8228_v36 = vsel %vm8140_vm2, %v20595_v57, -inf }
 0x526   : > { %v20597_v7 = vpop.f32.mrf.mxu1 }
 0x527   : > { %v8225_v6 = vsel %vm8140_vm2, %v20597_v7, -inf }
 0x528   : > { %8223 = vmax.xlane.f32.xlu1 %v8222_v11  ;;  %8226 = vmax.xlane.f32.xlu0 %v8225_v6  ;;  %v20603_v41 = vpop.f32.mrf.mxu1 }
 0x529   : > { %v8234_v21 = vsel %vm8140_vm2, %v20603_v41, -inf }
 0x52a   : > { %v20605_v0 = vpop.f32.mrf.mxu1 }
 0x52b   : > { %v8231_v45 = vsel %vm8140_vm2, %v20605_v0, -inf }
 0x52c   : > { %8229 = vmax.xlane.f32.xlu1 %v8228_v36  ;;  %8232 = vmax.xlane.f32.xlu0 %v8231_v45 }
 0x530   : > { %8235 = vmax.xlane.f32.xlu1 %v8234_v21 }
 0x579   : > { %v8143_v10 = vpop.xlane.xlu0 %8142 }
 0x57a   : > { %v8249_v22 = vsub.f32 %v20487_v63, %v8143_v10 }
 0x57c   : > { %v8285_v15 = vmul.f32 1.442695, %v8249_v22 }
 0x57d   : > { %v8146_v30 = vpop.xlane.xlu0 %8145  ;;  %v8149_v4 = vpop.xlane.xlu1 %8148 }
 0x57e   : > { %16748 = vpow2.f32 %v8285_v15  ;;  %v8250_v18 = vsub.f32 %v20485_v55, %v8146_v30  ;;  %v8251_v20 = vsub.f32 %v20493_v25, %v8149_v4 }
 0x580   : > { %v8287_v61 = vmul.f32 1.442695, %v8250_v18  ;;  %v8289_v59 = vmul.f32 1.442695, %v8251_v20 }
 0x581   : > { %v8152_v39 = vpop.xlane.xlu1 %8151  ;;  %v8155_v9 = vpop.xlane.xlu0 %8154 }
 0x582   : > { %16750 = vpow2.f32 %v8287_v61  ;;  %v8252_v24 = vsub.f32 %v20491_v40, %v8152_v39  ;;  %v8253_v62 = vsub.f32 %v20501_v32, %v8155_v9 }
 0x583   : > { %16752 = vpow2.f32 %v8289_v59 }
 0x584   : > { %v8291_v13 = vmul.f32 1.442695, %v8252_v24  ;;  %v8293_v63 = vmul.f32 1.442695, %v8253_v62 }
 0x585   : > { %v8158_v26 = vpop.xlane.xlu1 %8157  ;;  %v8161_v58 = vpop.xlane.xlu0 %8160 }
 0x586   : > { %16754 = vpow2.f32 %v8291_v13  ;;  %v8254_v44 = vsub.f32 %v20499_v29, %v8158_v26  ;;  %v8255_v55 = vsub.f32 %v20509_v31, %v8161_v58 }
 0x587   : > { %16756 = vpow2.f32 %v8293_v63 }
 0x588   : > { %v8295_v25 = vmul.f32 1.442695, %v8254_v44  ;;  %v8297_v50 = vmul.f32 1.442695, %v8255_v55 }
 0x589   : > { %v8164_v23 = vpop.xlane.xlu1 %8163  ;;  %v8167_v12 = vpop.xlane.xlu0 %8166 }
 0x58a   : > { %16758 = vpow2.f32 %v8295_v25  ;;  %v8256_v40 = vsub.f32 %v20507_v42, %v8164_v23  ;;  %v8257_v32 = vsub.f32 %v20517_v46, %v8167_v12 }
 0x58b   : > { %v20627_v35 = vpop.eup %16748  ;;  %16760 = vpow2.f32 %v8297_v50 }
 0x58c   : > { %v8299_v54 = vmul.f32 1.442695, %v8256_v40  ;;  %v8301_v47 = vmul.f32 1.442695, %v8257_v32  ;;  %v8357_v29 = vsel %vm8140_vm2, %v20627_v35, 0.0 }
 0x58d   : > { %v8170_v38 = vpop.xlane.xlu1 %8169  ;;  %v8173_v31 = vpop.xlane.xlu0 %8172  ;;  %8358 = vadd.xlane.f32.xlu0 %v8357_v29 }
 0x58e   : > { %16762 = vpow2.f32 %v8299_v54  ;;  %v8258_v52 = vsub.f32 %v20515_v14, %v8170_v38  ;;  %v8259_v1 = vsub.f32 %v20525_v60, %v8173_v31 }
 0x58f   : > { %v20633_v11 = vpop.eup %16750  ;;  %16764 = vpow2.f32 %v8301_v47 }
 0x590   : > { %v20635_v42 = vpop.eup %16752  ;;  %v8303_v46 = vmul.f32 1.442695, %v8258_v52  ;;  %v8305_v6 = vmul.f32 1.442695, %v8259_v1  ;;  %v8360_v36 = vsel %vm8140_vm2, %v20633_v11, 0.0 }
 0x591   : > { %v8176_v45 = vpop.xlane.xlu1 %8175  ;;  %v8179_v21 = vpop.xlane.xlu0 %8178  ;;  %8361 = vadd.xlane.f32.xlu1 %v8360_v36  ;;  %v8363_v27 = vsel %vm8140_vm2, %v20635_v42, 0.0 }
 0x592   : > { %16766 = vpow2.f32 %v8303_v46  ;;  %v8260_v14 = vsub.f32 %v20523_v19, %v8176_v45  ;;  %v8261_v60 = vsub.f32 %v20533_v16, %v8179_v21  ;;  %8364 = vadd.xlane.f32.xlu0 %v8363_v27 }
 0x593   : > { %v20643_v10 = vpop.eup %16754  ;;  %16768 = vpow2.f32 %v8305_v6 }
 0x594   : > { %v20645_v22 = vpop.eup %16756  ;;  %v8307_v15 = vmul.f32 1.442695, %v8260_v14  ;;  %v8309_v30 = vmul.f32 1.442695, %v8261_v60  ;;  %v8366_v4 = vsel %vm8140_vm2, %v20643_v10, 0.0 }
 0x595   : > { %v8182_v18 = vpop.xlane.xlu1 %8181  ;;  %v8185_v20 = vpop.xlane.xlu0 %8184  ;;  %8367 = vadd.xlane.f32.xlu1 %v8366_v4  ;;  %v8369_v61 = vsel %vm8140_vm2, %v20645_v22, 0.0 }
 0x596   : > { %16770 = vpow2.f32 %v8307_v15  ;;  %v8262_v19 = vsub.f32 %v20531_v37, %v8182_v18  ;;  %v8263_v16 = vsub.f32 %v20541_v53, %v8185_v20  ;;  %8370 = vadd.xlane.f32.xlu0 %v8369_v61 }
 0x597   : > { %v20653_v59 = vpop.eup %16758  ;;  %16772 = vpow2.f32 %v8309_v30 }
 0x598   : > { %v20655_v39 = vpop.eup %16760  ;;  %v8311_v9 = vmul.f32 1.442695, %v8262_v19  ;;  %v8313_v24 = vmul.f32 1.442695, %v8263_v16  ;;  %v8372_v62 = vsel %vm8140_vm2, %v20653_v59, 0.0 }
 0x599   : > { %v8188_v13 = vpop.xlane.xlu1 %8187  ;;  %v8191_v63 = vpop.xlane.xlu0 %8190  ;;  %8373 = vadd.xlane.f32.xlu1 %v8372_v62  ;;  %v8375_v26 = vsel %vm8140_vm2, %v20655_v39, 0.0 }
 0x59a   : > { %16774 = vpow2.f32 %v8311_v9  ;;  %v8264_v37 = vsub.f32 %v20539_v48, %v8188_v13  ;;  %v8265_v53 = vsub.f32 %v20549_v3, %v8191_v63  ;;  %8376 = vadd.xlane.f32.xlu0 %v8375_v26 }
 0x59b   : > { %v20663_v58 = vpop.eup %16762  ;;  %16776 = vpow2.f32 %v8313_v24 }
 0x59c   : > { %v20665_v44 = vpop.eup %16764  ;;  %v8315_v55 = vmul.f32 1.442695, %v8264_v37  ;;  %v8317_v25 = vmul.f32 1.442695, %v8265_v53  ;;  %v8378_v50 = vsel %vm8140_vm2, %v20663_v58, 0.0 }
 0x59d   : > { %v8194_v23 = vpop.xlane.xlu1 %8193  ;;  %v8197_v12 = vpop.xlane.xlu0 %8196  ;;  %8379 = vadd.xlane.f32.xlu1 %v8378_v50  ;;  %v8381_v40 = vsel %vm8140_vm2, %v20665_v44, 0.0 }
 0x59e   : > { %16778 = vpow2.f32 %v8315_v55  ;;  %v8266_v48 = vsub.f32 %v20547_v28, %v8194_v23  ;;  %v8267_v3 = vsub.f32 %v20557_v8, %v8197_v12  ;;  %8382 = vadd.xlane.f32.xlu0 %v8381_v40 }
 0x59f   : > { %v20673_v32 = vpop.eup %16766  ;;  %16780 = vpow2.f32 %v8317_v25 }
 0x5a0   : > { %v20675_v54 = vpop.eup %16768  ;;  %v8319_v47 = vmul.f32 1.442695, %v8266_v48  ;;  %v8321_v29 = vmul.f32 1.442695, %v8267_v3  ;;  %v8384_v38 = vsel %vm8140_vm2, %v20673_v32, 0.0 }
 0x5a1   : > { %v8200_v31 = vpop.xlane.xlu1 %8199  ;;  %v8203_v52 = vpop.xlane.xlu0 %8202  ;;  %8385 = vadd.xlane.f32.xlu1 %v8384_v38  ;;  %v8387_v1 = vsel %vm8140_vm2, %v20675_v54, 0.0 }
 0x5a2   : > { %16782 = vpow2.f32 %v8319_v47  ;;  %v8268_v28 = vsub.f32 %v20555_v56, %v8200_v31  ;;  %v8269_v8 = vsub.f32 %v20565_v34, %v8203_v52  ;;  %8388 = vadd.xlane.f32.xlu0 %v8387_v1 }
 0x5a3   : > { %v20683_v46 = vpop.eup %16770  ;;  %16784 = vpow2.f32 %v8321_v29 }
 0x5a4   : > { %v20685_v6 = vpop.eup %16772  ;;  %v8323_v36 = vmul.f32 1.442695, %v8268_v28  ;;  %v8325_v45 = vmul.f32 1.442695, %v8269_v8  ;;  %v8390_v21 = vsel %vm8140_vm2, %v20683_v46, 0.0 }
 0x5a5   : > { %v8206_v27 = vpop.xlane.xlu1 %8205  ;;  %v8209_v14 = vpop.xlane.xlu0 %8208  ;;  %8391 = vadd.xlane.f32.xlu1 %v8390_v21  ;;  %v8393_v60 = vsel %vm8140_vm2, %v20685_v6, 0.0 }
 0x5a6   : > { %16786 = vpow2.f32 %v8323_v36  ;;  %v8270_v56 = vsub.f32 %v20563_v49, %v8206_v27  ;;  %v8271_v34 = vsub.f32 %v20573_v2, %v8209_v14  ;;  %8394 = vadd.xlane.f32.xlu0 %v8393_v60 }
 0x5a7   : > { %v20693_v15 = vpop.eup %16774  ;;  %16788 = vpow2.f32 %v8325_v45 }
 0x5a8   : > { %v20695_v30 = vpop.eup %16776  ;;  %v8327_v4 = vmul.f32 1.442695, %v8270_v56  ;;  %v8329_v18 = vmul.f32 1.442695, %v8271_v34  ;;  %v8396_v20 = vsel %vm8140_vm2, %v20693_v15, 0.0 }
 0x5a9   : > { %v8212_v61 = vpop.xlane.xlu1 %8211  ;;  %v8215_v19 = vpop.xlane.xlu0 %8214  ;;  %8397 = vadd.xlane.f32.xlu1 %v8396_v20  ;;  %v8399_v16 = vsel %vm8140_vm2, %v20695_v30, 0.0 }
 0x5aa   : > { %16790 = vpow2.f32 %v8327_v4  ;;  %v8272_v49 = vsub.f32 %v20571_v5, %v8212_v61  ;;  %v8273_v2 = vsub.f32 %v20581_v43, %v8215_v19  ;;  %8400 = vadd.xlane.f32.xlu0 %v8399_v16 }
 0x5ab   : > { %v20703_v9 = vpop.eup %16778  ;;  %16792 = vpow2.f32 %v8329_v18 }
 0x5ac   : > { %v20705_v24 = vpop.eup %16780  ;;  %v8331_v62 = vmul.f32 1.442695, %v8272_v49  ;;  %v8333_v13 = vmul.f32 1.442695, %v8273_v2  ;;  %v8402_v63 = vsel %vm8140_vm2, %v20703_v9, 0.0  ;;  %v20758_v49 = vpop.f32.mrf.mxu1 }
 0x5ad   : > { %v8218_v26 = vpop.xlane.xlu1 %8217  ;;  %v8221_v37 = vpop.xlane.xlu0 %8220  ;;  %8403 = vadd.xlane.f32.xlu1 %v8402_v63  ;;  %v8405_v53 = vsel %vm8140_vm2, %v20705_v24, 0.0 }
 0x5ae   : > { %16794 = vpow2.f32 %v8331_v62  ;;  %v8274_v5 = vsub.f32 %v20579_v17, %v8218_v26  ;;  %v8275_v43 = vsub.f32 %v20589_v33, %v8221_v37  ;;  %8406 = vadd.xlane.f32.xlu0 %v8405_v53  ;;  %v20768_v26 = vpop.f32.mrf.mxu1 }
 0x5af   : > { %v20713_v55 = vpop.eup %16782  ;;  %16796 = vpow2.f32 %v8333_v13 }
 0x5b0   : > { %v20715_v25 = vpop.eup %16784  ;;  %v8335_v50 = vmul.f32 1.442695, %v8274_v5  ;;  %v8337_v23 = vmul.f32 1.442695, %v8275_v43  ;;  %v8408_v12 = vsel %vm8140_vm2, %v20713_v55, 0.0 }
 0x5b1   : > { %v8224_v40 = vpop.xlane.xlu1 %8223  ;;  %v8227_v48 = vpop.xlane.xlu0 %8226  ;;  %8409 = vadd.xlane.f32.xlu1 %v8408_v12  ;;  %v8411_v3 = vsel %vm8140_vm2, %v20715_v25, 0.0 }
 0x5b2   : > { %16798 = vpow2.f32 %v8335_v50  ;;  %v8276_v17 = vsub.f32 %v20587_v51, %v8224_v40  ;;  %v8277_v33 = vsub.f32 %v20597_v7, %v8227_v48  ;;  %8412 = vadd.xlane.f32.xlu0 %v8411_v3  ;;  %v20778_v50 = vpop.f32.mrf.mxu1  ;;  %v8237_v40 = vsel %vm8140_vm2, %v20768_v26, -inf }
 0x5b3   : > { %v20723_v47 = vpop.eup %16786  ;;  %16800 = vpow2.f32 %v8337_v23  ;;  %v8240_v3 = vsel %vm8140_vm2, %v20758_v49, -inf }
 0x5b4   : > { %v20725_v29 = vpop.eup %16788  ;;  %v8339_v38 = vmul.f32 1.442695, %v8276_v17  ;;  %v8341_v31 = vmul.f32 1.442695, %v8277_v33  ;;  %v8414_v52 = vsel %vm8140_vm2, %v20723_v47, 0.0  ;;  %v20786_v48 = vpop.f32.mrf.mxu1  ;;  %v8246_v33 = vsel %vm8140_vm2, %v20778_v50, -inf }
 0x5b5   : > { %v8230_v1 = vpop.xlane.xlu1 %8229  ;;  %8415 = vadd.xlane.f32.xlu1 %v8414_v52  ;;  %v8417_v28 = vsel %vm8140_vm2, %v20725_v29, 0.0  ;;  %v8233_v8 = vpop.xlane.xlu0 %8232  ;;  %v8243_v17 = vsel %vm8140_vm2, %v20786_v48, -inf  ;;  %v13059_v52 = vld [vmem:[%s22487_s7 + $0xe8] sm:$0xff] }
 0x5b6   : > { %16802 = vpow2.f32 %v8339_v38  ;;  %v8278_v51 = vsub.f32 %v20595_v57, %v8230_v1  ;;  %8418 = vadd.xlane.f32.xlu0 %v8417_v28  ;;  %v8279_v7 = vsub.f32 %v20605_v0, %v8233_v8  ;;  %v13061_v38 = vld [vmem:[%s22487_s7 + $0xf8] sm:$0xff]  ;;  %v13058_v1 = vld [vmem:[%s22487_s7 + $0xe0] sm:$0xff]  ;;  %v13056_v8 = vld [vmem:[%s22487_s7 + $0xd0] sm:$0xff] }
 0x5b7   : > { %v20733_v36 = vpop.eup %16790  ;;  %16804 = vpow2.f32 %v8341_v31  ;;  %v13060_v31 = vld [vmem:[%s22487_s7 + $0xf0] sm:$0xff]  ;;  %15997 = vmatprep.subr.mxu1 %v13061_v38  ;;  %v13057_v28 = vld [vmem:[%s22487_s7 + $0xd8] sm:$0xff] }
 0x5b8   : > { %v20735_v45 = vpop.eup %16792  ;;  %v8343_v21 = vmul.f32 1.442695, %v8278_v51  ;;  %v8345_v27 = vmul.f32 1.442695, %v8279_v7  ;;  %v8420_v14 = vsel %vm8140_vm2, %v20733_v36, 0.0  ;;  %15998 = vmatpush3.msra.mxu1 %v13061_v38  ;;  %v13055_v51 = vld [vmem:[%s22487_s7 + $0xc8] sm:$0xff] }
 0x5b9   : > { %8421 = vadd.xlane.f32.xlu1 %v8420_v14  ;;  %v8236_v60 = vpop.xlane.xlu1 %8235  ;;  %v8423_v56 = vsel %vm8140_vm2, %v20735_v45, 0.0  ;;  %15999 = vmatprep.subr.mxu1 %v13060_v31  ;;  %v13054_v7 = vld [vmem:[%s22487_s7 + $0xc0] sm:$0xff] }
 0x5ba   : > { %16806 = vpow2.f32 %v8343_v21  ;;  %v8280_v57 = vsub.f32 %v20603_v41, %v8236_v60  ;;  %8424 = vadd.xlane.f32.xlu0 %v8423_v56  ;;  %16000 = vmatpush3.msra.mxu1 %v13060_v31  ;;  %v13053_v21 = vld [vmem:[%s22487_s7 + $0xb8] sm:$0xff] }
 0x5bb   : > { %v20742_v0 = vpop.eup %16794  ;;  %16808 = vpow2.f32 %v8345_v27  ;;  %16001 = vmatprep.subr.mxu1 %v13059_v52  ;;  %v13052_v27 = vld [vmem:[%s22487_s7 + $0xb0] sm:$0xff] }
 0x5bc   : > { %v20744_v34 = vpop.eup %16796  ;;  %v8347_v4 = vmul.f32 1.442695, %v8280_v57  ;;  %v8426_v18 = vsel %vm8140_vm2, %v20742_v0, 0.0  ;;  %16002 = vmatpush3.msra.mxu1 %v13059_v52 }
 0x5bd   : > { %8427 = vadd.xlane.f32.xlu1 %v8426_v18  ;;  %v8429_v20 = vsel %vm8140_vm2, %v20744_v34, 0.0  ;;  %16003 = vmatprep.subr.mxu1 %v13058_v1 }
 0x5be   : > { %16810 = vpow2.f32 %v8347_v4  ;;  %8430 = vadd.xlane.f32.xlu0 %v8429_v20  ;;  %16004 = vmatpush3.msra.mxu1 %v13058_v1 }
 0x5bf   : > { %v20750_v61 = vpop.eup %16798  ;;  %16005 = vmatprep.subr.mxu1 %v13057_v28 }
 0x5c0   : > { %v20752_v19 = vpop.eup %16800  ;;  %v8432_v41 = vsel %vm8140_vm2, %v20750_v61, 0.0  ;;  %16006 = vmatpush3.msra.mxu1 %v13057_v28 }
 0x5c1   : > { %8433 = vadd.xlane.f32.xlu1 %v8432_v41  ;;  %v8435_v16 = vsel %vm8140_vm2, %v20752_v19, 0.0  ;;  %16007 = vmatprep.subr.mxu1 %v13056_v8 }
 0x5c2   : > { %8436 = vadd.xlane.f32.xlu0 %v8435_v16  ;;  %16008 = vmatpush3.msra.mxu1 %v13056_v8 }
 0x5c3   : > { %v20760_v2 = vpop.eup %16802  ;;  %16009 = vmatprep.subr.mxu1 %v13055_v51 }
 0x5c4   : > { %v20762_v62 = vpop.eup %16804  ;;  %v8438_v13 = vsel %vm8140_vm2, %v20760_v2, 0.0  ;;  %16010 = vmatpush3.msra.mxu1 %v13055_v51 }
 0x5c5   : > { %8439 = vadd.xlane.f32.xlu1 %v8438_v13  ;;  %v8441_v63 = vsel %vm8140_vm2, %v20762_v62, 0.0  ;;  %16011 = vmatprep.subr.mxu1 %v13054_v7 }
 0x5c6   : > { %8442 = vadd.xlane.f32.xlu0 %v8441_v63  ;;  %16012 = vmatpush3.msra.mxu1 %v13054_v7 }
 0x5c7   : > { %v20770_v37 = vpop.eup %16806  ;;  %16013 = vmatprep.subr.mxu1 %v13053_v21 }
 0x5c8   : > { %v20772_v53 = vpop.eup %16808  ;;  %v8444_v5 = vsel %vm8140_vm2, %v20770_v37, 0.0  ;;  %16014 = vmatpush3.msra.mxu1 %v13053_v21 }
 0x5c9   : > { %8445 = vadd.xlane.f32.xlu1 %v8444_v5  ;;  %v8447_v43 = vsel %vm8140_vm2, %v20772_v53, 0.0  ;;  %16015 = vmatprep.subr.mxu1 %v13052_v27 }
 0x5ca   : > { %8448 = vadd.xlane.f32.xlu0 %v8447_v43  ;;  %16016 = vmatpush3.msra.mxu1 %v13052_v27 }
 0x5cb   : > { %v20780_v23 = vpop.eup %16810 }
 0x5cc   : > { %v8450_v12 = vsel %vm8140_vm2, %v20780_v23, 0.0 }
 0x5cd   : > { %8451 = vadd.xlane.f32.xlu1 %v8450_v12 }
 0x5ce   : > { %8238 = vmax.xlane.f32.xlu0 %v8237_v40 }
 0x5d1   : > { %8241 = vmax.xlane.f32.xlu1 %v8240_v3 }
 0x5d2   : > { %8244 = vmax.xlane.f32.xlu0 %v8243_v17 }
 0x5d5   : > { %8247 = vmax.xlane.f32.xlu1 %v8246_v33 }
 0x616   : > { %v8359_v14 = vpop.xlane.xlu0 %8358 }
 0x617   : > { %16812 = vrcp.f32 %v8359_v14 }
 0x61a   : > { %v8362_v60 = vpop.xlane.xlu1 %8361 }
 0x61b   : > { %16814 = vrcp.f32 %v8362_v60  ;;  %v8365_v56 = vpop.xlane.xlu0 %8364 }
 0x61c   : > { %16816 = vrcp.f32 %v8365_v56 }
 0x61e   : > { %v8368_v57 = vpop.xlane.xlu1 %8367 }
 0x61f   : > { %16818 = vrcp.f32 %v8368_v57  ;;  %v8371_v4 = vpop.xlane.xlu0 %8370 }
 0x620   : > { %16820 = vrcp.f32 %v8371_v4 }
 0x622   : > { %v8374_v18 = vpop.xlane.xlu1 %8373 }
 0x623   : > { %16822 = vrcp.f32 %v8374_v18  ;;  %v8377_v20 = vpop.xlane.xlu0 %8376 }
 0x624   : > { %v16813_v41 = vpop.eup %16812  ;;  %16824 = vrcp.f32 %v8377_v20 }
 0x625   : > { %v8466_v16 = vmul.f32 %v16813_v41, %v20627_v35 }
 0x626   : > { %v8380_v13 = vpop.xlane.xlu1 %8379 }
 0x627   : > { %16826 = vrcp.f32 %v8380_v13  ;;  %v8383_v63 = vpop.xlane.xlu0 %8382  ;;  %15943 = vmatprep.mubr.msk.f32.mxu0 %vm8140_vm2, %v8466_v16 }
 0x628   : > { %v16815_v5 = vpop.eup %16814  ;;  %16828 = vrcp.f32 %v8383_v63 }
 0x629   : > { %v16817_v43 = vpop.eup %16816  ;;  %v8468_v12 = vmul.f32 %v16815_v5, %v20633_v11 }
 0x62a   : > { %v8386_v40 = vpop.xlane.xlu1 %8385  ;;  %v8470_v3 = vmul.f32 %v16817_v43, %v20635_v42 }
 0x62b   : > { %16830 = vrcp.f32 %v8386_v40  ;;  %v8389_v17 = vpop.xlane.xlu0 %8388  ;;  %15944 = vmatmul.mubr.msk.f32.vlgmr.msra.gmra.mxu0 %vm8140_vm2, %v8468_v12 }
 0x62c   : > { %v16819_v33 = vpop.eup %16818  ;;  %16832 = vrcp.f32 %v8389_v17  ;;  %15946 = vmatprep.mubr.msk.f32.mxu0 %vm8140_vm2, %v8470_v3 }
 0x62d   : > { %v16821_v35 = vpop.eup %16820  ;;  %v8472_v38 = vmul.f32 %v16819_v33, %v20643_v10 }
 0x62e   : > { %v8392_v31 = vpop.xlane.xlu1 %8391  ;;  %v8474_v52 = vmul.f32 %v16821_v35, %v20645_v22 }
 0x62f   : > { %16834 = vrcp.f32 %v8392_v31  ;;  %v8395_v1 = vpop.xlane.xlu0 %8394  ;;  %15947 = vmatmul.mubr.msk.f32.gmra.mxu0 %vm8140_vm2, %v8472_v38 }
 0x630   : > { %v16823_v11 = vpop.eup %16822  ;;  %16836 = vrcp.f32 %v8395_v1  ;;  %15949 = vmatprep.mubr.msk.f32.mxu0 %vm8140_vm2, %v8474_v52 }
 0x631   : > { %v16825_v42 = vpop.eup %16824  ;;  %v8476_v28 = vmul.f32 %v16823_v11, %v20653_v59 }
 0x632   : > { %v8398_v8 = vpop.xlane.xlu1 %8397  ;;  %v8478_v51 = vmul.f32 %v16825_v42, %v20655_v39 }
 0x633   : > { %16838 = vrcp.f32 %v8398_v8  ;;  %v8401_v7 = vpop.xlane.xlu0 %8400  ;;  %15950 = vmatmul.mubr.msk.f32.gmra.mxu0 %vm8140_vm2, %v8476_v28 }
 0x634   : > { %v16827_v10 = vpop.eup %16826  ;;  %16840 = vrcp.f32 %v8401_v7  ;;  %15952 = vmatprep.mubr.msk.f32.mxu0 %vm8140_vm2, %v8478_v51 }
 0x635   : > { %v16829_v22 = vpop.eup %16828  ;;  %v8480_v21 = vmul.f32 %v16827_v10, %v20663_v58 }
 0x636   : > { %v8404_v27 = vpop.xlane.xlu1 %8403  ;;  %v8482_v14 = vmul.f32 %v16829_v22, %v20665_v44 }
 0x637   : > { %16842 = vrcp.f32 %v8404_v27  ;;  %v8407_v60 = vpop.xlane.xlu0 %8406  ;;  %15953 = vmatmul.mubr.msk.f32.gmra.mxu0 %vm8140_vm2, %v8480_v21 }
 0x638   : > { %v16831_v59 = vpop.eup %16830  ;;  %16844 = vrcp.f32 %v8407_v60  ;;  %15955 = vmatprep.mubr.msk.f32.mxu0 %vm8140_vm2, %v8482_v14 }
 0x639   : > { %v16833_v39 = vpop.eup %16832  ;;  %v8484_v56 = vmul.f32 %v16831_v59, %v20673_v32 }
 0x63a   : > { %v8410_v57 = vpop.xlane.xlu1 %8409  ;;  %v8486_v4 = vmul.f32 %v16833_v39, %v20675_v54 }
 0x63b   : > { %16846 = vrcp.f32 %v8410_v57  ;;  %v8413_v18 = vpop.xlane.xlu0 %8412  ;;  %15956 = vmatmul.mubr.msk.f32.gmra.mxu0 %vm8140_vm2, %v8484_v56 }
 0x63c   : > { %v16835_v58 = vpop.eup %16834  ;;  %16848 = vrcp.f32 %v8413_v18  ;;  %15958 = vmatprep.mubr.msk.f32.mxu0 %vm8140_vm2, %v8486_v4 }
 0x63d   : > { %v16837_v44 = vpop.eup %16836  ;;  %v8488_v20 = vmul.f32 %v16835_v58, %v20683_v46 }
 0x63e   : > { %v8416_v41 = vpop.xlane.xlu1 %8415  ;;  %v8490_v16 = vmul.f32 %v16837_v44, %v20685_v6 }
 0x63f   : > { %16850 = vrcp.f32 %v8416_v41  ;;  %v8419_v13 = vpop.xlane.xlu0 %8418  ;;  %15959 = vmatmul.mubr.msk.f32.gmra.mxu0 %vm8140_vm2, %v8488_v20 }
 0x640   : > { %v16839_v32 = vpop.eup %16838  ;;  %16852 = vrcp.f32 %v8419_v13  ;;  %15961 = vmatprep.mubr.msk.f32.mxu0 %vm8140_vm2, %v8490_v16 }
 0x641   : > { %v16841_v54 = vpop.eup %16840  ;;  %v8492_v63 = vmul.f32 %v16839_v32, %v20693_v15 }
 0x642   : > { %v8422_v5 = vpop.xlane.xlu1 %8421  ;;  %v8494_v43 = vmul.f32 %v16841_v54, %v20695_v30  ;;  %v13051_v54 = vld [vmem:[%s22487_s7 + $0xa8] sm:$0xff] }
 0x643   : > { %16854 = vrcp.f32 %v8422_v5  ;;  %v8425_v12 = vpop.xlane.xlu0 %8424  ;;  %15962 = vmatmul.mubr.msk.f32.gmra.mxu0 %vm8140_vm2, %v8492_v63  ;;  %16017 = vmatprep.subr.mxu1 %v13051_v54 }
 0x644   : > { %v16843_v46 = vpop.eup %16842  ;;  %16856 = vrcp.f32 %v8425_v12  ;;  %15964 = vmatprep.mubr.msk.f32.mxu0 %vm8140_vm2, %v8494_v43  ;;  %16018 = vmatpush3.msra.mxu1 %v13051_v54  ;;  %v13049_v43 = vld [vmem:[%s22487_s7 + $0x98] sm:$0xff] }
 0x645   : > { %v16845_v6 = vpop.eup %16844  ;;  %v8496_v40 = vmul.f32 %v16843_v46, %v20703_v9  ;;  %v13048_v46 = vld [vmem:[%s22487_s7 + $0x90] sm:$0xff] }
 0x646   : > { %v8428_v3 = vpop.xlane.xlu1 %8427  ;;  %v8498_v17 = vmul.f32 %v16845_v6, %v20705_v24 }
 0x647   : > { %16858 = vrcp.f32 %v8428_v3  ;;  %v8431_v33 = vpop.xlane.xlu0 %8430  ;;  %15965 = vmatmul.mubr.msk.f32.gmra.mxu0 %vm8140_vm2, %v8496_v40  ;;  %v9159_v40 = vld [vmem:[%s22487_s7 + $0x78] sm:$0xff] }
 0x648   : > { %v16847_v15 = vpop.eup %16846  ;;  %16860 = vrcp.f32 %v8431_v33  ;;  %15967 = vmatprep.mubr.msk.f32.mxu0 %vm8140_vm2, %v8498_v17  ;;  %16077 = vmatprep.subr.mxu0 %v9159_v40  ;;  %v13047_v17 = vld [vmem:[%s22487_s7 + $0x88] sm:$0xff]  ;;  %v9158_v33 = vld [vmem:[%s22487_s7 + $0x70] sm:$0xff] }
 0x649   : > { %v16849_v30 = vpop.eup %16848  ;;  %v8500_v35 = vmul.f32 %v16847_v15, %v20713_v55  ;;  %16078 = vmatpush3.msra.mxu0 %v9159_v40  ;;  %v13046_v15 = vld [vmem:[%s22487_s7 + $0x80] sm:$0xff] }
 0x64a   : > { %v8434_v38 = vpop.xlane.xlu1 %8433  ;;  %v8502_v31 = vmul.f32 %v16849_v30, %v20715_v25  ;;  %16079 = vmatprep.subr.mxu0 %v9158_v33  ;;  %v9157_v30 = vld [vmem:[%s22487_s7 + $0x68] sm:$0xff] }
 0x64b   : > { %16862 = vrcp.f32 %v8434_v38  ;;  %v8437_v52 = vpop.xlane.xlu0 %8436  ;;  %15968 = vmatmul.mubr.msk.f32.gmra.mxu0 %vm8140_vm2, %v8500_v35  ;;  %v9156_v35 = vld [vmem:[%s22487_s7 + $0x60] sm:$0xff] }
 0x64c   : > { %v16851_v9 = vpop.eup %16850  ;;  %16864 = vrcp.f32 %v8437_v52  ;;  %15970 = vmatprep.mubr.msk.f32.mxu0 %vm8140_vm2, %v8502_v31  ;;  %16080 = vmatpush3.msra.mxu0 %v9158_v33  ;;  %v16895_v38 = vld [vmem:[#allocation2 + $0x1] sm:$0xff]  ;;  %v9155_v31 = vld [vmem:[%s22487_s7 + $0x58] sm:$0xff]  ;;  %v9154_v52 = vld [vmem:[%s22487_s7 + $0x50] sm:$0xff] }
 0x64d   : > { %v16853_v24 = vpop.eup %16852  ;;  %v8504_v1 = vmul.f32 %v16851_v9, %v20723_v47  ;;  %16081 = vmatprep.subr.mxu0 %v9157_v30  ;;  %v9153_v9 = vld [vmem:[%s22487_s7 + $0x48] sm:$0xff] }
 0x64e   : > { %v8440_v11 = vpop.xlane.xlu1 %8439  ;;  %v8506_v42 = vmul.f32 %v16853_v24, %v20725_v29  ;;  %16082 = vmatpush3.msra.mxu0 %v9157_v30  ;;  %v9152_v24 = vld [vmem:[%s22487_s7 + $0x40] sm:$0xff] }
 0x64f   : > { %16866 = vrcp.f32 %v8440_v11  ;;  %v8443_v28 = vpop.xlane.xlu0 %8442  ;;  %15971 = vmatmul.mubr.msk.f32.gmra.mxu0 %vm8140_vm2, %v8504_v1  ;;  %16083 = vmatprep.subr.mxu0 %v9156_v35  ;;  %v9151_v1 = vld [vmem:[%s22487_s7 + $0x38] sm:$0xff]  ;;  %v9150_v11 = vld [vmem:[%s22487_s7 + $0x30] sm:$0xff] }
 0x650   : > { %v16855_v55 = vpop.eup %16854  ;;  %16868 = vrcp.f32 %v8443_v28  ;;  %15973 = vmatprep.mubr.msk.f32.mxu0 %vm8140_vm2, %v8506_v42  ;;  %16084 = vmatpush3.msra.mxu0 %v9156_v35  ;;  %v9149_v42 = vld [vmem:[%s22487_s7 + $0x28] sm:$0xff]  ;;  %v9148_v28 = vld [vmem:[%s22487_s7 + $0x20] sm:$0xff] }
 0x651   : > { %v16857_v25 = vpop.eup %16856  ;;  %v8508_v8 = vmul.f32 %v16855_v55, %v20733_v36  ;;  %16085 = vmatprep.subr.mxu0 %v9155_v31  ;;  %v9147_v55 = vld [vmem:[%s22487_s7 + $0x18] sm:$0xff]  ;;  %v9113_v35 = vld [vmem:[#allocation3 + $0x8] sm:$0xff] }
 0x652   : > { %v8446_v51 = vpop.xlane.xlu1 %8445  ;;  %v8510_v7 = vmul.f32 %v16857_v25, %v20735_v45  ;;  %16086 = vmatpush3.msra.mxu0 %v9155_v31  ;;  %v9146_v25 = vld [vmem:[%s22487_s7 + $0x10] sm:$0xff] }
 0x653   : > { %16870 = vrcp.f32 %v8446_v51  ;;  %v8449_v10 = vpop.xlane.xlu0 %8448  ;;  %15974 = vmatmul.mubr.msk.f32.gmra.mxu0 %vm8140_vm2, %v8508_v8  ;;  %16087 = vmatprep.subr.mxu0 %v9154_v52  ;;  %v9145_v8 = vld [vmem:[%s22487_s7 + $0x8] sm:$0xff]  ;;  %v9144_v51 = vld [vmem:[%s22487_s7] sm:$0xff] }
 0x654   : > { %v16859_v47 = vpop.eup %16858  ;;  %16872 = vrcp.f32 %v8449_v10  ;;  %15976 = vmatprep.mubr.msk.f32.mxu0 %vm8140_vm2, %v8510_v7  ;;  %16088 = vmatpush3.msra.mxu0 %v9154_v52  ;;  %v13077_v7 = vld [vmem:[%s22487_s7 + $0x178] sm:$0xff]  ;;  %v13076_v10 = vld [vmem:[%s22487_s7 + $0x170] sm:$0xff] }
 0x655   : > { %v16861_v29 = vpop.eup %16860  ;;  %v8512_v22 = vmul.f32 %v16859_v47, %v20742_v0  ;;  %16089 = vmatprep.subr.mxu0 %v9153_v9  ;;  %v13075_v47 = vld [vmem:[%s22487_s7 + $0x168] sm:$0xff] }
 0x656   : > { %v8452_v21 = vpop.xlane.xlu1 %8451  ;;  %v8514_v27 = vmul.f32 %v16861_v29, %v20744_v34  ;;  %16090 = vmatpush3.msra.mxu0 %v9153_v9  ;;  %v13074_v29 = vld [vmem:[%s22487_s7 + $0x160] sm:$0xff]  ;;  %v13091_v9 = vld [vmem:[%s22487_s7 + $0x1e8] sm:$0xff] }
 0x657   : > { %16874 = vrcp.f32 %v8452_v21  ;;  %v8239_v14 = vpop.xlane.xlu0 %8238  ;;  %15977 = vmatmul.mubr.msk.f32.gmra.mxu0 %vm8140_vm2, %v8512_v22  ;;  %16091 = vmatprep.subr.mxu0 %v9152_v24  ;;  %v13073_v22 = vld [vmem:[%s22487_s7 + $0x158] sm:$0xff]  ;;  %v13072_v21 = vld [vmem:[%s22487_s7 + $0x150] sm:$0xff] }
 0x658   : > { %v16863_v36 = vpop.eup %16862  ;;  %v8281_v45 = vsub.f32 %v20768_v26, %v8239_v14  ;;  %15979 = vmatprep.mubr.msk.f32.mxu0 %vm8140_vm2, %v8514_v27  ;;  %16092 = vmatpush3.msra.mxu0 %v9152_v24  ;;  %v13071_v27 = vld [vmem:[%s22487_s7 + $0x148] sm:$0xff]  ;;  %v13070_v14 = vld [vmem:[%s22487_s7 + $0x140] sm:$0xff] }
 0x659   : > { %v16865_v60 = vpop.eup %16864  ;;  %v8516_v59 = vmul.f32 %v16863_v36, %v20750_v61  ;;  %16093 = vmatprep.subr.mxu0 %v9151_v1  ;;  %v13069_v36 = vld [vmem:[%s22487_s7 + $0x138] sm:$0xff] }
 0x65a   : > { %v8349_v39 = vmul.f32 1.442695, %v8281_v45  ;;  %v8242_v56 = vpop.xlane.xlu1 %8241  ;;  %v8518_v57 = vmul.f32 %v16865_v60, %v20752_v19  ;;  %16094 = vmatpush3.msra.mxu0 %v9151_v1  ;;  %v13068_v45 = vld [vmem:[%s22487_s7 + $0x130] sm:$0xff]  ;;  %v13067_v60 = vld [vmem:[%s22487_s7 + $0x128] sm:$0xff] }
 0x65b   : > { %v8282_v0 = vsub.f32 %v20758_v49, %v8242_v56  ;;  %v8245_v4 = vpop.xlane.xlu0 %8244  ;;  %15980 = vmatmul.mubr.msk.f32.gmra.mxu0 %vm8140_vm2, %v8516_v59  ;;  %16095 = vmatprep.subr.mxu0 %v9150_v11  ;;  %v13066_v59 = vld [vmem:[%s22487_s7 + $0x120] sm:$0xff]  ;;  %v13064_v56 = vld [vmem:[%s22487_s7 + $0x110] sm:$0xff] }
 0x65c   : > { %v16867_v34 = vpop.eup %16866  ;;  %16876 = vpow2.f32 %v8349_v39  ;;  %v8283_v18 = vsub.f32 %v20786_v48, %v8245_v4  ;;  %15982 = vmatprep.mubr.msk.f32.mxu0 %vm8140_vm2, %v8518_v57  ;;  %16096 = vmatpush3.msra.mxu0 %v9150_v11  ;;  %v13065_v39 = vld [vmem:[%s22487_s7 + $0x118] sm:$0xff]  ;;  %v13062_v4 = vld [vmem:[%s22487_s7 + $0x100] sm:$0xff] }
 0x65d   : > { %v16869_v26 = vpop.eup %16868  ;;  %v8351_v58 = vmul.f32 1.442695, %v8282_v0  ;;  %v8520_v44 = vmul.f32 %v16867_v34, %v20760_v2  ;;  %16097 = vmatprep.subr.mxu0 %v9149_v42  ;;  %v21019_v57 = vld [vmem:[%s22487_s7 + $0x1f8] sm:$0xff]  ;;  %v13063_v0 = vld [vmem:[%s22487_s7 + $0x108] sm:$0xff]  ;;  %v13090_v11 = vld [vmem:[%s22487_s7 + $0x1e0] sm:$0xff] }
 0x65e   : > { %v8353_v61 = vmul.f32 1.442695, %v8283_v18  ;;  %v8248_v20 = vpop.xlane.xlu1 %8247  ;;  %v8522_v41 = vmul.f32 %v16869_v26, %v20762_v62  ;;  %16098 = vmatpush3.msra.mxu0 %v9149_v42  ;;  %v21031_v34 = vld [vmem:[%s22487_s7 + $0x278] sm:$0xff] }
 0x65f   : > { %16878 = vpow2.f32 %v8351_v58  ;;  %v8284_v19 = vsub.f32 %v20778_v50, %v8248_v20  ;;  %15983 = vmatmul.mubr.msk.f32.gmra.mxu0 %vm8140_vm2, %v8520_v44  ;;  %16099 = vmatprep.subr.mxu0 %v9148_v28 }
 0x660   : > { %v16871_v49 = vpop.eup %16870  ;;  %16880 = vpow2.f32 %v8353_v61  ;;  %15985 = vmatprep.mubr.msk.f32.mxu0 %vm8140_vm2, %v8522_v41  ;;  %16100 = vmatpush3.msra.mxu0 %v9148_v28 }
 0x661   : > { %v16873_v48 = vpop.eup %16872  ;;  %v8355_v16 = vmul.f32 1.442695, %v8284_v19  ;;  %v8524_v13 = vmul.f32 %v16871_v49, %v20770_v37  ;;  %16101 = vmatprep.subr.mxu0 %v9147_v55 }
 0x662   : > { %v8526_v32 = vmul.f32 %v16873_v48, %v20772_v53  ;;  %v13050_v53 = vld [vmem:[%s22487_s7 + $0xa0] sm:$0xff]  ;;  %16102 = vmatpush3.msra.mxu0 %v9147_v55  ;;  %v13089_v55 = vld [vmem:[%s22487_s7 + $0x1d8] sm:$0xff] }
 0x663   : > { %16882 = vpow2.f32 %v8355_v16  ;;  %15986 = vmatmul.mubr.msk.f32.gmra.mxu0 %vm8140_vm2, %v8524_v13  ;;  %16019 = vmatprep.subr.mxu1 %v13050_v53 }
 0x664   : > { %v16875_v2 = vpop.eup %16874  ;;  %15988 = vmatprep.mubr.msk.f32.mxu0 %vm8140_vm2, %v8526_v32  ;;  %16020 = vmatpush3.msra.mxu1 %v13050_v53 }
 0x665   : > { %v8528_v62 = vmul.f32 %v16875_v2, %v20780_v23  ;;  %16021 = vmatprep.subr.mxu1 %v13049_v43  ;;  %16103 = vmatprep.subr.mxu0 %v9146_v25 }
 0x666   : > { %16022 = vmatpush3.msra.mxu1 %v13049_v43  ;;  %16104 = vmatpush3.msra.mxu0 %v9146_v25 }
 0x667   : > { %15989 = vmatmul.mubr.msk.f32.gmra.mxu0 %vm8140_vm2, %v8528_v62  ;;  %16023 = vmatprep.subr.mxu1 %v13048_v46 }
 0x668   : > { %16024 = vmatpush3.msra.mxu1 %v13048_v46  ;;  %16105 = vmatprep.subr.mxu0 %v9145_v8 }
 0x669   : > { %v20892_v50 = vpop.eup %16876  ;;  %16025 = vmatprep.subr.mxu1 %v13047_v17  ;;  %16106 = vmatpush3.msra.mxu0 %v9145_v8 }
 0x66a   : > { %v8453_v37 = vsel %vm8140_vm2, %v20892_v50, 0.0  ;;  %16026 = vmatpush3.msra.mxu1 %v13047_v17  ;;  %16107 = vmatprep.subr.mxu0 %v9144_v51 }
 0x66b   : > { %8454 = vadd.xlane.f32.xlu0 %v8453_v37  ;;  %16027 = vmatprep.subr.mxu1 %v13046_v15 }
 0x66c   : > { %v20902_v63 = vpop.eup %16878  ;;  %16028 = vmatpush3.msra.mxu1 %v13046_v15  ;;  %16108 = vmatpush3.msra.mxu0 %v9144_v51  ;;  %v9112_v15 = vld [vmem:[#allocation3] sm:$0xff]  ;;  %v13088_v51 = vld [vmem:[%s22487_s7 + $0x1d0] sm:$0xff] }
 0x66d   : > { %v20904_v23 = vpop.eup %16880  ;;  %v8456_v5 = vsel %vm8140_vm2, %v20902_v63, 0.0  ;;  %16030 = vmatmul.mubr.f32.vlgmr.msra.gmra.mxu1 %v16895_v38  ;;  %16157 = vmatprep.subr.mxu1 %v13077_v7  ;;  %v13092_v38 = vld [vmem:[%s22487_s7 + $0x1f0] sm:$0xff] }
 0x66e   : > { %8457 = vadd.xlane.f32.xlu1 %v8456_v5  ;;  %v8459_v12 = vsel %vm8140_vm2, %v20904_v23, 0.0  ;;  %16158 = vmatpush3.msra.mxu1 %v13077_v7 }
 0x66f   : > { %8460 = vadd.xlane.f32.xlu0 %v8459_v12  ;;  %16159 = vmatprep.subr.mxu1 %v13076_v10 }
 0x670   : > { %v20916_v6 = vpop.eup %16882  ;;  %16160 = vmatpush3.msra.mxu1 %v13076_v10  ;;  %16237 = vmatprep.subr.mxu0 %v21019_v57 }
 0x671   : > { %v8462_v3 = vsel %vm8140_vm2, %v20916_v6, 0.0  ;;  %16161 = vmatprep.subr.mxu1 %v13075_v47 }
 0x672   : > { %8463 = vadd.xlane.f32.xlu1 %v8462_v3  ;;  %16162 = vmatpush3.msra.mxu1 %v13075_v47  ;;  %v13087_v47 = vld [vmem:[%s22487_s7 + $0x1c8] sm:$0xff] }
 0x673   : > { %16163 = vmatprep.subr.mxu1 %v13074_v29 }
 0x674   : > { %16164 = vmatpush3.msra.mxu1 %v13074_v29 }
 0x675   : > { %16165 = vmatprep.subr.mxu1 %v13073_v22 }
 0x676   : > { %16166 = vmatpush3.msra.mxu1 %v13073_v22 }
 0x677   : > { %16167 = vmatprep.subr.mxu1 %v13072_v21 }
 0x678   : > { %16168 = vmatpush3.msra.mxu1 %v13072_v21  ;;  %v13086_v21 = vld [vmem:[%s22487_s7 + $0x1c0] sm:$0xff] }
 0x679   : > { %16169 = vmatprep.subr.mxu1 %v13071_v27 }
 0x67a   : > { %16170 = vmatpush3.msra.mxu1 %v13071_v27 }
 0x67b   : > { %16171 = vmatprep.subr.mxu1 %v13070_v14 }
 0x67c   : > { %16172 = vmatpush3.msra.mxu1 %v13070_v14 }
 0x67d   : > { %16173 = vmatprep.subr.mxu1 %v13069_v36 }
 0x67e   : > { %16174 = vmatpush3.msra.mxu1 %v13069_v36  ;;  %v13085_v36 = vld [vmem:[%s22487_s7 + $0x1b8] sm:$0xff] }
 0x67f   : > { %16175 = vmatprep.subr.mxu1 %v13068_v45 }
 0x680   : > { %16176 = vmatpush3.msra.mxu1 %v13068_v45 }
 0x681   : > { %16177 = vmatprep.subr.mxu1 %v13067_v60 }
 0x682   : > { %16178 = vmatpush3.msra.mxu1 %v13067_v60 }
 0x683   : > { %16179 = vmatprep.subr.mxu1 %v13066_v59 }
 0x684   : > { %16180 = vmatpush3.msra.mxu1 %v13066_v59  ;;  %v13084_v59 = vld [vmem:[%s22487_s7 + $0x1b0] sm:$0xff] }
 0x685   : > { %16181 = vmatprep.subr.mxu1 %v13065_v39 }
 0x686   : > { %16182 = vmatpush3.msra.mxu1 %v13065_v39 }
 0x687   : > { %16183 = vmatprep.subr.mxu1 %v13064_v56 }
 0x688   : > { %16184 = vmatpush3.msra.mxu1 %v13064_v56 }
 0x689   : > { %16185 = vmatprep.subr.mxu1 %v13063_v0 }
 0x68a   : > { %16186 = vmatpush3.msra.mxu1 %v13063_v0 }
 0x68b   : > { %16187 = vmatprep.subr.mxu1 %v13062_v4 }
 0x68c   : > { %16188 = vmatpush3.msra.mxu1 %v13062_v4 }
 0x68d   : > { %16317 = vmatprep.subr.mxu1 %v21031_v34 }
 0x6eb   : > { %v15945_v18 = vpop.f32.mrf.mxu0 }
 0x6ec   : > { %v13082_v18 = vld [vmem:[%s22487_s7 + $0x1a0] sm:$0xff] }
 0x6ed   : > { %v8716_v26 = vpop.f32.mrf.mxu0 }
 0x6ef   : > { %v15948_v58 = vpop.f32.mrf.mxu0 }
 0x6f0   : > { %9079 = vst [vmem:[#allocation3 + $0x21] sm:$0xff] %v15948_v58 }
 0x6f1   : > { %v21034_v44 = vpop.f32.mrf.mxu0 }
 0x6f2   : > { %9078 = vst [vmem:[#allocation3 + $0x19] sm:$0xff] %v21034_v44  ;;  %16032 = vmatprep.mubr.f32.mxu1 %v21034_v44 }
 0x6f3   : > { %v21038_v61 = vpop.f32.mrf.mxu0  ;;  %16033 = vmatmul.mubr.f32.gmra.mxu1 %v15948_v58 }
 0x6f4   : > { %9081 = vst [vmem:[#allocation3 + $0x39] sm:$0xff] %v21038_v61  ;;  %v8455_v20 = vpop.xlane.xlu0 %8454 }
 0x6f5   : > { %16884 = vrcp.f32 %v8455_v20  ;;  %v21041_v41 = vpop.f32.mrf.mxu0  ;;  %v13081_v20 = vld [vmem:[%s22487_s7 + $0x198] sm:$0xff] }
 0x6f6   : > { %9080 = vst [vmem:[#allocation3 + $0x31] sm:$0xff] %v21041_v41  ;;  %16035 = vmatprep.mubr.f32.mxu1 %v21041_v41 }
 0x6f7   : > { %v21045_v19 = vpop.f32.mrf.mxu0  ;;  %v8458_v49 = vpop.xlane.xlu1 %8457  ;;  %16036 = vmatmul.mubr.f32.gmra.mxu1 %v21038_v61 }
 0x6f8   : > { %9083 = vst [vmem:[#allocation3 + $0x51] sm:$0xff] %v21045_v19  ;;  %16886 = vrcp.f32 %v8458_v49  ;;  %v8461_v48 = vpop.xlane.xlu0 %8460 }
 0x6f9   : > { %16888 = vrcp.f32 %v8461_v48  ;;  %v21049_v16 = vpop.f32.mrf.mxu0  ;;  %v21108_v31 = vld [vmem:[#allocation3 + $0x18] sm:$0xff]  ;;  %v21121_v1 = vld [vmem:[#allocation3 + $0x20] sm:$0xff] }
 0x6fa   : > { %9082 = vst [vmem:[#allocation3 + $0x49] sm:$0xff] %v21049_v16  ;;  %16038 = vmatprep.mubr.f32.mxu1 %v21049_v16 }
 0x6fb   : > { %v21053_v13 = vpop.f32.mrf.mxu0  ;;  %v8464_v32 = vpop.xlane.xlu1 %8463  ;;  %16039 = vmatmul.mubr.f32.gmra.mxu1 %v21045_v19 }
 0x6fc   : > { %9085 = vst [vmem:[#allocation3 + $0x69] sm:$0xff] %v21053_v13  ;;  %16890 = vrcp.f32 %v8464_v32  ;;  %v13080_v32 = vld [vmem:[%s22487_s7 + $0x190] sm:$0xff] }
 0x6fd   : > { %v21057_v2 = vpop.f32.mrf.mxu0  ;;  %v21129_v42 = vld [vmem:[#allocation3 + $0x30] sm:$0xff]  ;;  %v21141_v8 = vld [vmem:[#allocation3 + $0x38] sm:$0xff] }
 0x6fe   : > { %9084 = vst [vmem:[#allocation3 + $0x61] sm:$0xff] %v21057_v2  ;;  %16041 = vmatprep.mubr.f32.mxu1 %v21057_v2 }
 0x6ff   : > { %v21061_v62 = vpop.f32.mrf.mxu0  ;;  %16042 = vmatmul.mubr.f32.gmra.mxu1 %v21053_v13 }
 0x700   : > { %9087 = vst [vmem:[#allocation3 + $0x81] sm:$0xff] %v21061_v62 }
 0x701   : > { %v21065_v54 = vpop.f32.mrf.mxu0  ;;  %v21149_v7 = vld [vmem:[#allocation3 + $0x48] sm:$0xff]  ;;  %v21161_v22 = vld [vmem:[#allocation3 + $0x50] sm:$0xff] }
 0x702   : > { %v16885_v37 = vpop.eup %16884  ;;  %9086 = vst [vmem:[#allocation3 + $0x79] sm:$0xff] %v21065_v54  ;;  %16044 = vmatprep.mubr.f32.mxu1 %v21065_v54 }
 0x703   : > { %v21069_v53 = vpop.f32.mrf.mxu0  ;;  %v8530_v5 = vmul.f32 %v16885_v37, %v20892_v50  ;;  %16045 = vmatmul.mubr.f32.gmra.mxu1 %v21061_v62 }
 0x704   : > { %9089 = vst [vmem:[#allocation3 + $0x99] sm:$0xff] %v21069_v53 }
 0x705   : > { %v16887_v43 = vpop.eup %16886  ;;  %15991 = vmatprep.mubr.msk.f32.mxu0 %vm8140_vm2, %v8530_v5  ;;  %v21075_v12 = vpop.f32.mrf.mxu0  ;;  %v21169_v27 = vld [vmem:[#allocation3 + $0x60] sm:$0xff]  ;;  %v21181_v60 = vld [vmem:[#allocation3 + $0x68] sm:$0xff] }
 0x706   : > { %v16889_v46 = vpop.eup %16888  ;;  %9088 = vst [vmem:[#allocation3 + $0x91] sm:$0xff] %v21075_v12  ;;  %v8532_v40 = vmul.f32 %v16887_v43, %v20902_v63  ;;  %16047 = vmatprep.mubr.f32.mxu1 %v21075_v12  ;;  %v9659_v43 = vld [vmem:[#allocation3 + $0x2] sm:$0xff] }
 0x707   : > { %v21080_v3 = vpop.f32.mrf.mxu0  ;;  %v8534_v50 = vmul.f32 %v16889_v46, %v20904_v23  ;;  %16048 = vmatmul.mubr.f32.gmra.mxu1 %v21069_v53  ;;  %v13079_v46 = vld [vmem:[%s22487_s7 + $0x188] sm:$0xff] }
 0x708   : > { %9091 = vst [vmem:[#allocation3 + $0xb1] sm:$0xff] %v21080_v3  ;;  %15992 = vmatmul.mubr.msk.f32.gmra.mxu0 %vm8140_vm2, %v8532_v40 }
 0x709   : > { %v16891_v17 = vpop.eup %16890  ;;  %v21086_v33 = vpop.f32.mrf.mxu0  ;;  %15994 = vmatprep.mubr.msk.f32.mxu0 %vm8140_vm2, %v8534_v50  ;;  %v21189_v39 = vld [vmem:[#allocation3 + $0x78] sm:$0xff]  ;;  %v21201_v4 = vld [vmem:[#allocation3 + $0x80] sm:$0xff] }
 0x70a   : > { %9090 = vst [vmem:[#allocation3 + $0xa9] sm:$0xff] %v21086_v33  ;;  %v8536_v63 = vmul.f32 %v16891_v17, %v20916_v6  ;;  %16050 = vmatprep.mubr.f32.mxu1 %v21086_v33  ;;  %v9660_v17 = vld [vmem:[#allocation3 + $0xa] sm:$0xff] }
 0x70b   : > { %v21092_v30 = vpop.f32.mrf.mxu0  ;;  %16051 = vmatmul.mubr.f32.gmra.mxu1 %v21080_v3 }
 0x70c   : > { %9093 = vst [vmem:[#allocation3 + $0xc9] sm:$0xff] %v21092_v30  ;;  %15995 = vmatmul.mubr.msk.f32.gmra.mxu0 %vm8140_vm2, %v8536_v63  ;;  %v13078_v63 = vld [vmem:[%s22487_s7 + $0x180] sm:$0xff] }
 0x70d   : > { %v21097_v23 = vpop.f32.mrf.mxu0  ;;  %16109 = vmatprep.mubr.f32.mxu0 %v9112_v15  ;;  %v21209_v26 = vld [vmem:[#allocation3 + $0x90] sm:$0xff]  ;;  %v21221_v48 = vld [vmem:[#allocation3 + $0x98] sm:$0xff] }
 0x70e   : > { %9092 = vst [vmem:[#allocation3 + $0xc1] sm:$0xff] %v21097_v23  ;;  %16053 = vmatprep.mubr.f32.mxu1 %v21097_v23 }
 0x70f   : > { %v21101_v6 = vpop.f32.mrf.mxu0  ;;  %16054 = vmatmul.mubr.f32.gmra.mxu1 %v21092_v30 }
 0x710   : > { %9095 = vst [vmem:[#allocation3 + $0xe1] sm:$0xff] %v21101_v6  ;;  %16110 = vmatmul.mubr.f32.vlgmr.msra.gmra.mxu0 %v9113_v35  ;;  %v21251_v35 = vld [vmem:[#allocation3 + $0x1a] sm:$0xff] }
 0x711   : > { %v21110_v52 = vpop.f32.mrf.mxu0  ;;  %16112 = vmatprep.mubr.f32.mxu0 %v21108_v31  ;;  %16238 = vmatpush3.msra.mxu0 %v21019_v57  ;;  %v13083_v57 = vld [vmem:[%s22487_s7 + $0x1a8] sm:$0xff]  ;;  %v21239_v40 = vld [vmem:[#allocation3 + $0xb0] sm:$0xff]  ;;  %22976 = vst [vmem:[#allocation17_spill] sm:$0xff] %v21251_v35 }
 0x712   : > { %9094 = vst [vmem:[#allocation3 + $0xd9] sm:$0xff] %v21110_v52  ;;  %16056 = vmatprep.mubr.f32.mxu1 %v21110_v52  ;;  %16239 = vmatprep.subr.mxu0 %v13092_v38  ;;  %v21229_v37 = vld [vmem:[#allocation3 + $0xa8] sm:$0xff] }
 0x713   : > { %v21119_v24 = vpop.f32.mrf.mxu0  ;;  %16057 = vmatmul.mubr.f32.gmra.mxu1 %v21101_v6  ;;  %16240 = vmatpush3.msra.mxu0 %v13092_v38  ;;  %v21256_v38 = vld [vmem:[%s22487_s7 + $0x2f8] sm:$0xff] }
 0x714   : > { %9097 = vst [vmem:[#allocation3 + $0xf9] sm:$0xff] %v21119_v24  ;;  %16113 = vmatmul.mubr.f32.gmra.mxu0 %v21121_v1  ;;  %16241 = vmatprep.subr.mxu0 %v13091_v9 }
 0x715   : > { %v21131_v28 = vpop.f32.mrf.mxu0  ;;  %16115 = vmatprep.mubr.f32.mxu0 %v21129_v42  ;;  %16242 = vmatpush3.msra.mxu0 %v13091_v9  ;;  %v21243_v50 = vld [vmem:[#allocation3 + $0xc0] sm:$0xff]  ;;  %v21249_v15 = vld [vmem:[#allocation3 + $0xc8] sm:$0xff] }
 0x716   : > { %9096 = vst [vmem:[#allocation3 + $0xf1] sm:$0xff] %v21131_v28  ;;  %16059 = vmatprep.mubr.f32.mxu1 %v21131_v28  ;;  %16243 = vmatprep.subr.mxu0 %v13090_v11 }
 0x717   : > { %v21139_v25 = vpop.f32.mrf.mxu0  ;;  %16060 = vmatmul.mubr.f32.gmra.mxu1 %v21119_v24  ;;  %16244 = vmatpush3.msra.mxu0 %v13090_v11  ;;  %v13108_v11 = vld [vmem:[%s22487_s7 + $0x270] sm:$0xff] }
 0x718   : > { %9099 = vst [vmem:[#allocation3 + $0x111] sm:$0xff] %v21139_v25  ;;  %16116 = vmatmul.mubr.f32.gmra.mxu0 %v21141_v8  ;;  %16245 = vmatprep.subr.mxu0 %v13089_v55 }
 0x719   : > { %v21151_v10 = vpop.f32.mrf.mxu0  ;;  %16118 = vmatprep.mubr.f32.mxu0 %v21149_v7  ;;  %16246 = vmatpush3.msra.mxu0 %v13089_v55  ;;  %v21259_v9 = vld [vmem:[#allocation3 + $0xd8] sm:$0xff]  ;;  %v21266_v55 = vld [vmem:[#allocation3 + $0x22] sm:$0xff] }
 0x71a   : > { %9098 = vst [vmem:[#allocation3 + $0x109] sm:$0xff] %v21151_v10  ;;  %16062 = vmatprep.mubr.f32.mxu1 %v21151_v10  ;;  %16247 = vmatprep.subr.mxu0 %v13088_v51  ;;  %22977 = vst [vmem:[#allocation25_spill] sm:$0xff] %v21266_v55 }
 0x71b   : > { %v21159_v29 = vpop.f32.mrf.mxu0  ;;  %16063 = vmatmul.mubr.f32.gmra.mxu1 %v21139_v25  ;;  %16248 = vmatpush3.msra.mxu0 %v13088_v51  ;;  %v21270_v51 = vld [vmem:[#allocation3 + $0xe0] sm:$0xff] }
 0x71c   : > { %9101 = vst [vmem:[#allocation3 + $0x129] sm:$0xff] %v21159_v29  ;;  %16119 = vmatmul.mubr.f32.gmra.mxu0 %v21161_v22  ;;  %16249 = vmatprep.subr.mxu0 %v13087_v47 }
 0x71d   : > { %v21171_v14 = vpop.f32.mrf.mxu0  ;;  %16121 = vmatprep.mubr.f32.mxu0 %v21169_v27  ;;  %16250 = vmatpush3.msra.mxu0 %v13087_v47  ;;  %v21273_v47 = vld [vmem:[#allocation3 + $0x32] sm:$0xff] }
 0x71e   : > { %9100 = vst [vmem:[#allocation3 + $0x121] sm:$0xff] %v21171_v14  ;;  %16065 = vmatprep.mubr.f32.mxu1 %v21171_v14  ;;  %16251 = vmatprep.subr.mxu0 %v13086_v21  ;;  %22978 = vst [vmem:[#allocation18_spill] sm:$0xff] %v21273_v47 }
 0x71f   : > { %v21179_v45 = vpop.f32.mrf.mxu0  ;;  %16066 = vmatmul.mubr.f32.gmra.mxu1 %v21159_v29  ;;  %16252 = vmatpush3.msra.mxu0 %v13086_v21  ;;  %v13107_v21 = vld [vmem:[%s22487_s7 + $0x268] sm:$0xff] }
 0x720   : > { %9103 = vst [vmem:[#allocation3 + $0x141] sm:$0xff] %v21179_v45  ;;  %16122 = vmatmul.mubr.f32.gmra.mxu0 %v21181_v60  ;;  %16253 = vmatprep.subr.mxu0 %v13085_v36 }
 0x721   : > { %v21191_v56 = vpop.f32.mrf.mxu0  ;;  %16124 = vmatprep.mubr.f32.mxu0 %v21189_v39  ;;  %16254 = vmatpush3.msra.mxu0 %v13085_v36  ;;  %v21279_v36 = vld [vmem:[#allocation3 + $0xf0] sm:$0xff] }
 0x722   : > { %9102 = vst [vmem:[#allocation3 + $0x139] sm:$0xff] %v21191_v56  ;;  %16068 = vmatprep.mubr.f32.mxu1 %v21191_v56  ;;  %16255 = vmatprep.subr.mxu0 %v13084_v59 }
 0x723   : > { %v21199_v0 = vpop.f32.mrf.mxu0  ;;  %16069 = vmatmul.mubr.f32.gmra.mxu1 %v21179_v45  ;;  %16256 = vmatpush3.msra.mxu0 %v13084_v59  ;;  %v21285_v59 = vld [vmem:[#allocation3 + $0xf8] sm:$0xff] }
 0x724   : > { %9105 = vst [vmem:[#allocation3 + $0x159] sm:$0xff] %v21199_v0  ;;  %16125 = vmatmul.mubr.f32.gmra.mxu0 %v21201_v4  ;;  %16257 = vmatprep.subr.mxu0 %v13083_v57 }
 0x725   : > { %v21211_v58 = vpop.f32.mrf.mxu0  ;;  %16127 = vmatprep.mubr.f32.mxu0 %v21209_v26  ;;  %16258 = vmatpush3.msra.mxu0 %v13083_v57  ;;  %v21288_v57 = vld [vmem:[#allocation3 + $0x4a] sm:$0xff] }
 0x726   : > { %9104 = vst [vmem:[#allocation3 + $0x151] sm:$0xff] %v21211_v58  ;;  %16071 = vmatprep.mubr.f32.mxu1 %v21211_v58  ;;  %16259 = vmatprep.subr.mxu0 %v13082_v18  ;;  %22980 = vst [vmem:[#allocation19_spill] sm:$0xff] %v21288_v57 }
 0x727   : > { %v21219_v49 = vpop.f32.mrf.mxu0  ;;  %16072 = vmatmul.mubr.f32.gmra.mxu1 %v21199_v0  ;;  %16260 = vmatpush3.msra.mxu0 %v13082_v18  ;;  %v13106_v18 = vld [vmem:[%s22487_s7 + $0x260] sm:$0xff] }
 0x728   : > { %22974 = vst [vmem:[#allocation36_spill] sm:$0xff] %v21219_v49  ;;  %9107 = vst [vmem:[#allocation3 + $0x171] sm:$0xff] %v21219_v49  ;;  %16128 = vmatmul.mubr.f32.gmra.mxu0 %v21221_v48  ;;  %16261 = vmatprep.subr.mxu0 %v13081_v20 }
 0x729   : > { %v21231_v5 = vpop.f32.mrf.mxu0  ;;  %16130 = vmatprep.mubr.f32.mxu0 %v21229_v37  ;;  %16262 = vmatpush3.msra.mxu0 %v13081_v20  ;;  %v21294_v20 = vld [vmem:[#allocation3 + $0x108] sm:$0xff] }
 0x72a   : > { %22975 = vst [vmem:[#allocation15_spill] sm:$0xff] %v21231_v5  ;;  %9106 = vst [vmem:[#allocation3 + $0x169] sm:$0xff] %v21231_v5  ;;  %16074 = vmatprep.mubr.f32.mxu1 %v21231_v5  ;;  %16263 = vmatprep.subr.mxu0 %v13080_v32  ;;  %v13101_v5 = vld [vmem:[%s22487_s7 + $0x238] sm:$0xff] }
 0x72b   : > { %16075 = vmatmul.mubr.f32.gmra.mxu1 %v21219_v49  ;;  %16264 = vmatpush3.msra.mxu0 %v13080_v32  ;;  %v21298_v32 = vld [vmem:[#allocation3 + $0x52] sm:$0xff] }
 0x72c   : > { %16131 = vmatmul.mubr.f32.gmra.mxu0 %v21239_v40  ;;  %16189 = vmatprep.mubr.f32.mxu1 %v9659_v43  ;;  %22981 = vst [vmem:[#allocation37_spill] sm:$0xff] %v21298_v32  ;;  %v21300_v43 = vld [vmem:[#allocation3 + $0x110] sm:$0xff] }
 0x72d   : > { %16133 = vmatprep.mubr.f32.mxu0 %v21243_v50  ;;  %16265 = vmatprep.subr.mxu0 %v13079_v46 }
 0x72e   : > { %16266 = vmatpush3.msra.mxu0 %v13079_v46  ;;  %v21303_v46 = vld [vmem:[#allocation3 + $0x62] sm:$0xff] }
 0x72f   : > { %16190 = vmatmul.mubr.f32.vlgmr.msra.gmra.mxu1 %v9660_v17  ;;  %16267 = vmatprep.subr.mxu0 %v13078_v63  ;;  %22982 = vst [vmem:[#allocation9_spill] sm:$0xff] %v21303_v46  ;;  %v13105_v17 = vld [vmem:[%s22487_s7 + $0x258] sm:$0xff] }
 0x730   : > { %16134 = vmatmul.mubr.f32.gmra.mxu0 %v21249_v15  ;;  %16192 = vmatprep.mubr.f32.mxu1 %v21251_v35  ;;  %v13102_v35 = vld [vmem:[%s22487_s7 + $0x240] sm:$0xff] }
 0x731   : > { %16136 = vmatprep.mubr.f32.mxu0 %v21259_v9  ;;  %16268 = vmatpush3.msra.mxu0 %v13078_v63  ;;  %v21309_v63 = vld [vmem:[#allocation3 + $0x120] sm:$0xff]  ;;  %v21354_v49 = vld [vmem:[#allocation3 + $0x168] sm:$0xff] }
 0x732   : > { %16318 = vmatpush3.msra.mxu1 %v21031_v34  ;;  %16397 = vmatprep.subr.mxu0 %v21256_v38  ;;  %v21283_v34 = vld [vmem:[#allocation3 + $0x3a] sm:$0xff] }
 0x733   : > { %16193 = vmatmul.mubr.f32.gmra.mxu1 %v21266_v55  ;;  %16319 = vmatprep.subr.mxu1 %v13108_v11  ;;  %22979 = vst [vmem:[#allocation7_spill] sm:$0xff] %v21283_v34  ;;  %v21339_v55 = vld [vmem:[#allocation3 + $0x150] sm:$0xff] }
 0x734   : > { %16137 = vmatmul.mubr.f32.gmra.mxu0 %v21270_v51  ;;  %16195 = vmatprep.mubr.f32.mxu1 %v21273_v47  ;;  %v13103_v47 = vld [vmem:[%s22487_s7 + $0x248] sm:$0xff] }
 0x735   : > { %16139 = vmatprep.mubr.f32.mxu0 %v21279_v36  ;;  %16320 = vmatpush3.msra.mxu1 %v13108_v11  ;;  %v21313_v11 = vld [vmem:[#allocation3 + $0x6a] sm:$0xff] }
 0x736   : > { %16321 = vmatprep.subr.mxu1 %v13107_v21  ;;  %22983 = vst [vmem:[#allocation11_spill] sm:$0xff] %v21313_v11 }
 0x737   : > { %16196 = vmatmul.mubr.f32.gmra.mxu1 %v21283_v34  ;;  %v21324_v34 = vld [vmem:[#allocation3 + $0x138] sm:$0xff] }
 0x738   : > { %16140 = vmatmul.mubr.f32.gmra.mxu0 %v21285_v59  ;;  %16198 = vmatprep.mubr.f32.mxu1 %v21288_v57  ;;  %v13104_v57 = vld [vmem:[%s22487_s7 + $0x250] sm:$0xff] }
 0x739   : > { %16142 = vmatprep.mubr.f32.mxu0 %v21294_v20  ;;  %16322 = vmatpush3.msra.mxu1 %v13107_v21  ;;  %v21315_v21 = vld [vmem:[#allocation3 + $0x128] sm:$0xff] }
 0x73a   : > { %16323 = vmatprep.subr.mxu1 %v13106_v18 }
 0x73b   : > { %16199 = vmatmul.mubr.f32.gmra.mxu1 %v21298_v32  ;;  %v21318_v32 = vld [vmem:[#allocation3 + $0x7a] sm:$0xff] }
 0x73c   : > { %16143 = vmatmul.mubr.f32.gmra.mxu0 %v21300_v43  ;;  %16201 = vmatprep.mubr.f32.mxu1 %v21303_v46  ;;  %22984 = vst [vmem:[#allocation13_spill] sm:$0xff] %v21318_v32  ;;  %v21330_v46 = vld [vmem:[#allocation3 + $0x140] sm:$0xff] }
 0x73d   : > { %16145 = vmatprep.mubr.f32.mxu0 %v21309_v63  ;;  %16324 = vmatpush3.msra.mxu1 %v13106_v18  ;;  %v21328_v18 = vld [vmem:[#allocation3 + $0x82] sm:$0xff] }
 0x73e   : > { %16325 = vmatprep.subr.mxu1 %v13105_v17  ;;  %22985 = vst [vmem:[#allocation12_spill] sm:$0xff] %v21328_v18 }
 0x73f   : > { %16202 = vmatmul.mubr.f32.gmra.mxu1 %v21313_v11  ;;  %v21333_v11 = vld [vmem:[#allocation3 + $0x92] sm:$0xff] }
 0x740   : > { %16146 = vmatmul.mubr.f32.gmra.mxu0 %v21315_v21  ;;  %16204 = vmatprep.mubr.f32.mxu1 %v21318_v32  ;;  %22986 = vst [vmem:[#allocation38_spill] sm:$0xff] %v21333_v11  ;;  %v21345_v32 = vld [vmem:[#allocation3 + $0x158] sm:$0xff] }
 0x741   : > { %16148 = vmatprep.mubr.f32.mxu0 %v21324_v34  ;;  %16326 = vmatpush3.msra.mxu1 %v13105_v17  ;;  %v21343_v17 = vld [vmem:[#allocation3 + $0x9a] sm:$0xff] }
 0x742   : > { %16327 = vmatprep.subr.mxu1 %v13104_v57  ;;  %22987 = vst [vmem:[#allocation53_spill] sm:$0xff] %v21343_v17 }
 0x743   : > { %16205 = vmatmul.mubr.f32.gmra.mxu1 %v21328_v18  ;;  %v21348_v18 = vld [vmem:[#allocation3 + $0xaa] sm:$0xff] }
 0x744   : > { %16149 = vmatmul.mubr.f32.gmra.mxu0 %v21330_v46  ;;  %16207 = vmatprep.mubr.f32.mxu1 %v21333_v11  ;;  %22988 = vst [vmem:[#allocation93_spill] sm:$0xff] %v21348_v18  ;;  %v21360_v11 = vld [vmem:[#allocation3 + $0x170] sm:$0xff] }
 0x745   : > { %16151 = vmatprep.mubr.f32.mxu0 %v21339_v55  ;;  %16328 = vmatpush3.msra.mxu1 %v13104_v57  ;;  %v21358_v57 = vld [vmem:[#allocation3 + $0xb2] sm:$0xff] }
 0x746   : > { %16329 = vmatprep.subr.mxu1 %v13103_v47  ;;  %22989 = vst [vmem:[#allocation26_spill] sm:$0xff] %v21358_v57 }
 0x747   : > { %16208 = vmatmul.mubr.f32.gmra.mxu1 %v21343_v17  ;;  %v21363_v17 = vld [vmem:[#allocation3 + $0xc2] sm:$0xff] }
 0x748   : > { %16152 = vmatmul.mubr.f32.gmra.mxu0 %v21345_v32  ;;  %16210 = vmatprep.mubr.f32.mxu1 %v21348_v18  ;;  %v21374_v18 = vld [vmem:[#allocation3 + $0xda] sm:$0xff] }
 0x749   : > { %16154 = vmatprep.mubr.f32.mxu0 %v21354_v49  ;;  %16330 = vmatpush3.msra.mxu1 %v13103_v47  ;;  %v21371_v47 = vld [vmem:[#allocation3 + $0xca] sm:$0xff] }
 0x74a   : > { %16331 = vmatprep.subr.mxu1 %v13102_v35  ;;  %22990 = vst [vmem:[#allocation54_spill] sm:$0xff] %v21371_v47 }
 0x74b   : > { %16211 = vmatmul.mubr.f32.gmra.mxu1 %v21358_v57  ;;  %v13100_v57 = vld [vmem:[%s22487_s7 + $0x230] sm:$0xff] }
 0x74c   : > { %16155 = vmatmul.mubr.f32.gmra.mxu0 %v21360_v11  ;;  %16213 = vmatprep.mubr.f32.mxu1 %v21363_v17 }
 0x74d   : > { %16269 = vmatprep.mubr.f32.mxu0 %v21108_v31  ;;  %16332 = vmatpush3.msra.mxu1 %v13102_v35  ;;  %v13124_v31 = vld [vmem:[%s22487_s7 + $0x2f0] sm:$0xff]  ;;  %v21385_v35 = vld [vmem:[#allocation3 + $0xe2] sm:$0xff] }
 0x74e   : > { %16333 = vmatprep.subr.mxu1 %v13101_v5 }
 0x74f   : > { %16214 = vmatmul.mubr.f32.gmra.mxu1 %v21371_v47  ;;  %v21389_v47 = vld [vmem:[#allocation3 + $0xf2] sm:$0xff] }
 0x750   : > { %16270 = vmatmul.mubr.f32.vlgmr.msra.gmra.mxu0 %v21121_v1  ;;  %16216 = vmatprep.mubr.f32.mxu1 %v21374_v18  ;;  %v13099_v1 = vld [vmem:[%s22487_s7 + $0x228] sm:$0xff] }
 0x751   : > { %16272 = vmatprep.mubr.f32.mxu0 %v21129_v42  ;;  %16334 = vmatpush3.msra.mxu1 %v13101_v5  ;;  %v13123_v42 = vld [vmem:[%s22487_s7 + $0x2e8] sm:$0xff]  ;;  %v21400_v5 = vld [vmem:[#allocation3 + $0xfa] sm:$0xff] }
 0x752   : > { %16335 = vmatprep.subr.mxu1 %v13100_v57  ;;  %16398 = vmatpush3.msra.mxu0 %v21256_v38  ;;  %v21403_v38 = vld [vmem:[#allocation3 + $0x10a] sm:$0xff] }
 0x753   : > { %16217 = vmatmul.mubr.f32.gmra.mxu1 %v21385_v35  ;;  %16399 = vmatprep.subr.mxu0 %v13124_v31 }
 0x754   : > { %16273 = vmatmul.mubr.f32.gmra.mxu0 %v21141_v8  ;;  %16219 = vmatprep.mubr.f32.mxu1 %v21389_v47  ;;  %v13098_v8 = vld [vmem:[%s22487_s7 + $0x220] sm:$0xff] }
 0x755   : > { %16275 = vmatprep.mubr.f32.mxu0 %v21149_v7  ;;  %16336 = vmatpush3.msra.mxu1 %v13100_v57  ;;  %v13122_v7 = vld [vmem:[%s22487_s7 + $0x2e0] sm:$0xff]  ;;  %v21414_v57 = vld [vmem:[#allocation3 + $0x112] sm:$0xff] }
 0x756   : > { %16337 = vmatprep.subr.mxu1 %v13099_v1  ;;  %16400 = vmatpush3.msra.mxu0 %v13124_v31  ;;  %v21417_v31 = vld [vmem:[#allocation3 + $0x122] sm:$0xff] }
 0x757   : > { %16220 = vmatmul.mubr.f32.gmra.mxu1 %v21400_v5  ;;  %16401 = vmatprep.subr.mxu0 %v13123_v42 }
 0x758   : > { %16276 = vmatmul.mubr.f32.gmra.mxu0 %v21161_v22  ;;  %16222 = vmatprep.mubr.f32.mxu1 %v21403_v38  ;;  %v13097_v22 = vld [vmem:[%s22487_s7 + $0x218] sm:$0xff] }
 0x759   : > { %16278 = vmatprep.mubr.f32.mxu0 %v21169_v27  ;;  %16338 = vmatpush3.msra.mxu1 %v13099_v1  ;;  %v13121_v27 = vld [vmem:[%s22487_s7 + $0x2d8] sm:$0xff]  ;;  %v21428_v1 = vld [vmem:[#allocation3 + $0x12a] sm:$0xff] }
 0x75a   : > { %16339 = vmatprep.subr.mxu1 %v13098_v8  ;;  %16402 = vmatpush3.msra.mxu0 %v13123_v42  ;;  %v21431_v42 = vld [vmem:[#allocation3 + $0x13a] sm:$0xff] }
 0x75b   : > { %16223 = vmatmul.mubr.f32.gmra.mxu1 %v21414_v57  ;;  %16403 = vmatprep.subr.mxu0 %v13122_v7 }
 0x75c   : > { %16279 = vmatmul.mubr.f32.gmra.mxu0 %v21181_v60  ;;  %16225 = vmatprep.mubr.f32.mxu1 %v21417_v31  ;;  %v13096_v60 = vld [vmem:[%s22487_s7 + $0x210] sm:$0xff] }
 0x75d   : > { %16281 = vmatprep.mubr.f32.mxu0 %v21189_v39  ;;  %16340 = vmatpush3.msra.mxu1 %v13098_v8  ;;  %v13120_v39 = vld [vmem:[%s22487_s7 + $0x2d0] sm:$0xff]  ;;  %v21442_v8 = vld [vmem:[#allocation3 + $0x142] sm:$0xff] }
 0x75e   : > { %16341 = vmatprep.subr.mxu1 %v13097_v22  ;;  %16404 = vmatpush3.msra.mxu0 %v13122_v7  ;;  %22991 = vst [vmem:[#allocation20_spill] sm:$0xff] %v21442_v8  ;;  %v9687_v7 = vld [vmem:[#allocation3 + $0x152] sm:$0xff] }
 0x75f   : > { %16226 = vmatmul.mubr.f32.gmra.mxu1 %v21428_v1  ;;  %16405 = vmatprep.subr.mxu0 %v13121_v27 }
 0x760   : > { %16282 = vmatmul.mubr.f32.gmra.mxu0 %v21201_v4  ;;  %16228 = vmatprep.mubr.f32.mxu1 %v21431_v42  ;;  %v13095_v4 = vld [vmem:[%s22487_s7 + $0x208] sm:$0xff] }
 0x761   : > { %16284 = vmatprep.mubr.f32.mxu0 %v21209_v26  ;;  %16342 = vmatpush3.msra.mxu1 %v13097_v22  ;;  %v13119_v26 = vld [vmem:[%s22487_s7 + $0x2c8] sm:$0xff]  ;;  %v9688_v22 = vld [vmem:[#allocation3 + $0x15a] sm:$0xff] }
 0x762   : > { %16343 = vmatprep.subr.mxu1 %v13096_v60  ;;  %16406 = vmatpush3.msra.mxu0 %v13121_v27  ;;  %v9689_v27 = vld [vmem:[#allocation3 + $0x16a] sm:$0xff] }
 0x763   : > { %16229 = vmatmul.mubr.f32.gmra.mxu1 %v21442_v8  ;;  %16407 = vmatprep.subr.mxu0 %v13120_v39  ;;  %v13094_v8 = vld [vmem:[%s22487_s7 + $0x200] sm:$0xff] }
 0x764   : > { %16285 = vmatmul.mubr.f32.gmra.mxu0 %v21221_v48  ;;  %16231 = vmatprep.mubr.f32.mxu1 %v9687_v7  ;;  %v13118_v48 = vld [vmem:[%s22487_s7 + $0x2c0] sm:$0xff]  ;;  %v10885_v7 = vld [vmem:[#allocation3 + $0x30] sm:$0xff] }
 0x765   : > { %16287 = vmatprep.mubr.f32.mxu0 %v21229_v37  ;;  %16344 = vmatpush3.msra.mxu1 %v13096_v60  ;;  %v9690_v37 = vld [vmem:[#allocation3 + $0x172] sm:$0xff] }
 0x766   : > { %16345 = vmatprep.subr.mxu1 %v13095_v4  ;;  %16408 = vmatpush3.msra.mxu0 %v13120_v39  ;;  %v13141_v60 = vld [vmem:[%s22487_s7 + $0x378] sm:$0xff]  ;;  %v13140_v39 = vld [vmem:[%s22487_s7 + $0x370] sm:$0xff] }
 0x767   : > { %16232 = vmatmul.mubr.f32.gmra.mxu1 %v9688_v22  ;;  %16409 = vmatprep.subr.mxu0 %v13119_v26 }
 0x768   : > { %16288 = vmatmul.mubr.f32.gmra.mxu0 %v21239_v40  ;;  %16234 = vmatprep.mubr.f32.mxu1 %v9689_v27  ;;  %v13117_v40 = vld [vmem:[%s22487_s7 + $0x2b8] sm:$0xff] }
 0x769   : > { %16290 = vmatprep.mubr.f32.mxu0 %v21243_v50  ;;  %16346 = vmatpush3.msra.mxu1 %v13095_v4  ;;  %v10273_v50 = vld [vmem:[#allocation3 + $0x21] sm:$0xff]  ;;  %v10886_v27 = vld [vmem:[#allocation3 + $0x38] sm:$0xff] }
 0x76a   : > { %16347 = vmatprep.subr.mxu1 %v13094_v8  ;;  %16410 = vmatpush3.msra.mxu0 %v13119_v26 }
 0x76b   : > { %16235 = vmatmul.mubr.f32.gmra.mxu1 %v9690_v37  ;;  %16411 = vmatprep.subr.mxu0 %v13118_v48 }
 0x76c   : > { %16291 = vmatmul.mubr.f32.gmra.mxu0 %v21249_v15  ;;  %16349 = vmatprep.mubr.f32.mxu1 %v21034_v44  ;;  %v13116_v44 = vld [vmem:[%s22487_s7 + $0x2b0] sm:$0xff]  ;;  %v13139_v15 = vld [vmem:[%s22487_s7 + $0x368] sm:$0xff] }
 0x76d   : > { %16293 = vmatprep.mubr.f32.mxu0 %v21259_v9  ;;  %16348 = vmatpush3.msra.mxu1 %v13094_v8  ;;  %v13131_v9 = vld [vmem:[%s22487_s7 + $0x328] sm:$0xff] }
 0x76e   : > { %16477 = vmatprep.subr.mxu1 %v13141_v60  ;;  %16412 = vmatpush3.msra.mxu0 %v13118_v48  ;;  %v13172_v48 = vld [vmem:[%s22487_s7 + $0x470] sm:$0xff] }
 0x76f   : > { %16350 = vmatmul.mubr.f32.vlgmr.msra.gmra.mxu1 %v10273_v50  ;;  %16413 = vmatprep.subr.mxu0 %v13117_v40 }
 0x770   : > { %16294 = vmatmul.mubr.f32.gmra.mxu0 %v21270_v51  ;;  %16352 = vmatprep.mubr.f32.mxu1 %v21041_v41  ;;  %v13115_v41 = vld [vmem:[%s22487_s7 + $0x2a8] sm:$0xff] }
 0x771   : > { %16296 = vmatprep.mubr.f32.mxu0 %v21279_v36  ;;  %16478 = vmatpush3.msra.mxu1 %v13141_v60  ;;  %v10887_v60 = vld [vmem:[#allocation3 + $0x48] sm:$0xff] }
 0x772   : > { %16479 = vmatprep.subr.mxu1 %v13140_v39  ;;  %16414 = vmatpush3.msra.mxu0 %v13117_v40 }
 0x773   : > { %16353 = vmatmul.mubr.f32.gmra.mxu1 %v21038_v61  ;;  %16415 = vmatprep.subr.mxu0 %v13116_v44  ;;  %v13138_v61 = vld [vmem:[%s22487_s7 + $0x360] sm:$0xff] }
 0x774   : > { %16297 = vmatmul.mubr.f32.gmra.mxu0 %v21285_v59  ;;  %16355 = vmatprep.mubr.f32.mxu1 %v21049_v16  ;;  %v13114_v16 = vld [vmem:[%s22487_s7 + $0x2a0] sm:$0xff] }
 0x775   : > { %16299 = vmatprep.mubr.f32.mxu0 %v21294_v20  ;;  %16480 = vmatpush3.msra.mxu1 %v13140_v39 }
 0x776   : > { %16481 = vmatprep.subr.mxu1 %v13139_v15  ;;  %16416 = vmatpush3.msra.mxu0 %v13116_v44 }
 0x777   : > { %16356 = vmatmul.mubr.f32.gmra.mxu1 %v21045_v19  ;;  %16417 = vmatprep.subr.mxu0 %v13115_v41  ;;  %v13137_v19 = vld [vmem:[%s22487_s7 + $0x358] sm:$0xff] }
 0x778   : > { %16300 = vmatmul.mubr.f32.gmra.mxu0 %v21300_v43  ;;  %16358 = vmatprep.mubr.f32.mxu1 %v21057_v2  ;;  %v13113_v2 = vld [vmem:[%s22487_s7 + $0x298] sm:$0xff] }
 0x779   : > { %16302 = vmatprep.mubr.f32.mxu0 %v21309_v63  ;;  %16482 = vmatpush3.msra.mxu1 %v13139_v15 }
 0x77a   : > { %16483 = vmatprep.subr.mxu1 %v13138_v61  ;;  %16418 = vmatpush3.msra.mxu0 %v13115_v41  ;;  %v10888_v41 = vld [vmem:[#allocation3 + $0x50] sm:$0xff] }
 0x77b   : > { %16359 = vmatmul.mubr.f32.gmra.mxu1 %v21053_v13  ;;  %16419 = vmatprep.subr.mxu0 %v13114_v16  ;;  %v13136_v13 = vld [vmem:[%s22487_s7 + $0x350] sm:$0xff] }
 0x77c   : > { %16303 = vmatmul.mubr.f32.gmra.mxu0 %v21315_v21  ;;  %16361 = vmatprep.mubr.f32.mxu1 %v21065_v54  ;;  %v13112_v54 = vld [vmem:[%s22487_s7 + $0x290] sm:$0xff] }
 0x77d   : > { %16305 = vmatprep.mubr.f32.mxu0 %v21324_v34  ;;  %16484 = vmatpush3.msra.mxu1 %v13138_v61  ;;  %v13171_v61 = vld [vmem:[%s22487_s7 + $0x468] sm:$0xff] }
 0x77e   : > { %16485 = vmatprep.subr.mxu1 %v13137_v19  ;;  %16420 = vmatpush3.msra.mxu0 %v13114_v16 }
 0x77f   : > { %16362 = vmatmul.mubr.f32.gmra.mxu1 %v21061_v62  ;;  %16421 = vmatprep.subr.mxu0 %v13113_v2  ;;  %v13135_v62 = vld [vmem:[%s22487_s7 + $0x348] sm:$0xff] }
 0x780   : > { %16306 = vmatmul.mubr.f32.gmra.mxu0 %v21330_v46  ;;  %16364 = vmatprep.mubr.f32.mxu1 %v21075_v12  ;;  %v13111_v12 = vld [vmem:[%s22487_s7 + $0x288] sm:$0xff] }
 0x781   : > { %16308 = vmatprep.mubr.f32.mxu0 %v21339_v55  ;;  %16486 = vmatpush3.msra.mxu1 %v13137_v19  ;;  %v21586_v55 = vpop.f32.mrf.mxu1  ;;  %v10889_v19 = vld [vmem:[#allocation3 + $0x60] sm:$0xff] }
 0x782   : > { %16487 = vmatprep.subr.mxu1 %v13136_v13  ;;  %16422 = vmatpush3.msra.mxu0 %v13113_v2 }
 0x783   : > { %16365 = vmatmul.mubr.f32.gmra.mxu1 %v21069_v53  ;;  %16423 = vmatprep.subr.mxu0 %v13112_v54  ;;  %v13134_v53 = vld [vmem:[%s22487_s7 + $0x340] sm:$0xff]  ;;  %v21588_v51 = vpop.f32.mrf.mxu1 }
 0x784   : > { %16309 = vmatmul.mubr.f32.gmra.mxu0 %v21345_v32  ;;  %16367 = vmatprep.mubr.f32.mxu1 %v21086_v33  ;;  %v13110_v33 = vld [vmem:[%s22487_s7 + $0x280] sm:$0xff] }
 0x785   : > { %16311 = vmatprep.mubr.f32.mxu0 %v21354_v49  ;;  %16488 = vmatpush3.msra.mxu1 %v13136_v13  ;;  %v21544_v49 = vld [vmem:[%s22487_s7 + $0x3f8] sm:$0xff] }
 0x786   : > { %16489 = vmatprep.subr.mxu1 %v13135_v62  ;;  %16424 = vmatpush3.msra.mxu0 %v13112_v54  ;;  %v22994_v13 = vld [vmem:[#allocation17_spill] sm:$0xff] }
 0x787   : > { %16368 = vmatmul.mubr.f32.gmra.mxu1 %v21080_v3  ;;  %16425 = vmatprep.subr.mxu0 %v13111_v12  ;;  %v13133_v3 = vld [vmem:[%s22487_s7 + $0x338] sm:$0xff] }
 0x788   : > { %16312 = vmatmul.mubr.f32.gmra.mxu0 %v21360_v11  ;;  %16370 = vmatprep.mubr.f32.mxu1 %v21097_v23  ;;  %v13132_v23 = vld [vmem:[%s22487_s7 + $0x330] sm:$0xff] }
 0x789   : > { %16490 = vmatpush3.msra.mxu1 %v13135_v62  ;;  %16426 = vmatpush3.msra.mxu0 %v13111_v12  ;;  %v13156_v12 = vld [vmem:[%s22487_s7 + $0x3f0] sm:$0xff] }
 0x78a   : > { %16491 = vmatprep.subr.mxu1 %v13134_v53  ;;  %16427 = vmatprep.subr.mxu0 %v13110_v33 }
 0x78b   : > { %16371 = vmatmul.mubr.f32.gmra.mxu1 %v21092_v30  ;;  %16428 = vmatpush3.msra.mxu0 %v13110_v33  ;;  %v13130_v30 = vld [vmem:[%s22487_s7 + $0x320] sm:$0xff]  ;;  %v10890_v33 = vld [vmem:[#allocation3 + $0x68] sm:$0xff] }
 0x78c   : > { %16373 = vmatprep.mubr.f32.mxu1 %v21110_v52  ;;  %16492 = vmatpush3.msra.mxu1 %v13134_v53  ;;  %v13129_v52 = vld [vmem:[%s22487_s7 + $0x318] sm:$0xff] }
 0x78d   : > { %16493 = vmatprep.subr.mxu1 %v13133_v3  ;;  %16557 = vmatprep.subr.mxu0 %v21544_v49 }
 0x78e   : > { %16494 = vmatpush3.msra.mxu1 %v13133_v3 }
 0x78f   : > { %16374 = vmatmul.mubr.f32.gmra.mxu1 %v21101_v6  ;;  %16495 = vmatprep.subr.mxu1 %v13132_v23  ;;  %v13128_v6 = vld [vmem:[%s22487_s7 + $0x310] sm:$0xff] }
 0x790   : > { %16376 = vmatprep.mubr.f32.mxu1 %v21131_v28  ;;  %16496 = vmatpush3.msra.mxu1 %v13132_v23  ;;  %v13127_v28 = vld [vmem:[%s22487_s7 + $0x308] sm:$0xff]  ;;  %v22995_v23 = vld [vmem:[#allocation25_spill] sm:$0xff] }
 0x791   : > { %16497 = vmatprep.subr.mxu1 %v13131_v9 }
 0x792   : > { %16498 = vmatpush3.msra.mxu1 %v13131_v9  ;;  %v13170_v9 = vld [vmem:[%s22487_s7 + $0x460] sm:$0xff] }
 0x793   : > { %16377 = vmatmul.mubr.f32.gmra.mxu1 %v21119_v24  ;;  %16499 = vmatprep.subr.mxu1 %v13130_v30  ;;  %v13126_v24 = vld [vmem:[%s22487_s7 + $0x300] sm:$0xff] }
 0x794   : > { %16379 = vmatprep.mubr.f32.mxu1 %v21151_v10  ;;  %16500 = vmatpush3.msra.mxu1 %v13130_v30  ;;  %v13173_v10 = vld [vmem:[%s22487_s7 + $0x478] sm:$0xff] }
 0x795   : > { %16501 = vmatprep.subr.mxu1 %v13129_v52 }
 0x796   : > { %16502 = vmatpush3.msra.mxu1 %v13129_v52  ;;  %v22996_v52 = vld [vmem:[#allocation18_spill] sm:$0xff] }
 0x797   : > { %16380 = vmatmul.mubr.f32.gmra.mxu1 %v21139_v25  ;;  %16503 = vmatprep.subr.mxu1 %v13128_v6  ;;  %v22992_v25 = vld [vmem:[#allocation15_spill] sm:$0xff] }
 0x798   : > { %16382 = vmatprep.mubr.f32.mxu1 %v21171_v14  ;;  %16504 = vmatpush3.msra.mxu1 %v13128_v6  ;;  %v22993_v14 = vld [vmem:[#allocation36_spill] sm:$0xff] }
 0x799   : > { %16505 = vmatprep.subr.mxu1 %v13127_v28  ;;  %v13155_v6 = vld [vmem:[%s22487_s7 + $0x3e8] sm:$0xff] }
 0x79a   : > { %16506 = vmatpush3.msra.mxu1 %v13127_v28 }
 0x79b   : > { %16383 = vmatmul.mubr.f32.gmra.mxu1 %v21159_v29  ;;  %16507 = vmatprep.subr.mxu1 %v13126_v24 }
 0x79c   : > { %16385 = vmatprep.mubr.f32.mxu1 %v21191_v56  ;;  %16508 = vmatpush3.msra.mxu1 %v13126_v24  ;;  %v10891_v24 = vld [vmem:[#allocation3 + $0x78] sm:$0xff] }
 0x79d   : > { %16637 = vmatprep.subr.mxu1 %v13173_v10 }
 0x79f   : > { %16386 = vmatmul.mubr.f32.gmra.mxu1 %v21179_v45 }
 0x7a0   : > { %16388 = vmatprep.mubr.f32.mxu1 %v21211_v58 }
 0x7a3   : > { %16389 = vmatmul.mubr.f32.gmra.mxu1 %v21199_v0 }
 0x7a4   : > { %16391 = vmatprep.mubr.f32.mxu1 %v22992_v25 }
 0x7a7   : > { %16392 = vmatmul.mubr.f32.gmra.mxu1 %v22993_v14 }
 0x7b3   : > { %v16034_v29 = vpop.f32.mrf.mxu1 }
 0x7b5   : > { %v21590_v36 = vpop.f32.mrf.mxu1 }
 0x7b7   : > { %v16037_v56 = vpop.f32.mrf.mxu1 }
 0x7b9   : > { %v21592_v34 = vpop.f32.mrf.mxu1 }
 0x7bb   : > { %v21594_v59 = vpop.f32.mrf.mxu1 }
 0x7bd   : > { %v21596_v45 = vpop.f32.mrf.mxu1 }
 0x7bf   : > { %v21598_v58 = vpop.f32.mrf.mxu1 }
 0x7c1   : > { %v21600_v0 = vpop.f32.mrf.mxu1 }
 0x7c3   : > { %v21602_v20 = vpop.f32.mrf.mxu1 }
 0x7c5   : > { %v21604_v32 = vpop.f32.mrf.mxu1 }
 0x7c7   : > { %v21606_v43 = vpop.f32.mrf.mxu1 }
 0x7c8   : > { %v15993_v46 = vpop.f32.mrf.mxu0 }
 0x7c9   : > { %9109 = vst [vmem:[#allocation3 + $0x189] sm:$0xff] %v15993_v46  ;;  %v21608_v63 = vpop.f32.mrf.mxu1 }
 0x7ca   : > { %v8876_v11 = vpop.f32.mrf.mxu0 }
 0x7cb   : > { %9108 = vst [vmem:[#allocation3 + $0x181] sm:$0xff] %v8876_v11  ;;  %v21610_v21 = vpop.f32.mrf.mxu1  ;;  %16394 = vmatprep.mubr.f32.mxu1 %v8876_v11  ;;  %v10892_v11 = vld [vmem:[#allocation3 + $0x80] sm:$0xff] }
 0x7cc   : > { %v15996_v8 = vpop.f32.mrf.mxu0  ;;  %16395 = vmatmul.mubr.f32.gmra.mxu1 %v15993_v46  ;;  %v22998_v46 = vld [vmem:[#allocation19_spill] sm:$0xff] }
 0x7cd   : > { %v21612_v4 = vpop.f32.mrf.mxu1  ;;  %16509 = vmatprep.mubr.f32.mxu1 %v10885_v7 }
 0x7ce   : > { %v8886_v26 = vpop.f32.mrf.mxu0 }
 0x7cf   : > { %v21614_v22 = vpop.f32.mrf.mxu1  ;;  %v10893_v26 = vld [vmem:[#allocation3 + $0x90] sm:$0xff] }
 0x7d0   : > { %v21619_v37 = vpop.f32.mrf.mxu0  ;;  %16510 = vmatmul.mubr.f32.vlgmr.msra.gmra.mxu1 %v10886_v27  ;;  %v13153_v27 = vld [vmem:[%s22487_s7 + $0x3d8] sm:$0xff] }
 0x7d1   : > { %v21621_v40 = vpop.f32.mrf.mxu1  ;;  %16512 = vmatprep.mubr.f32.mxu1 %v10887_v60  ;;  %16638 = vmatpush3.msra.mxu1 %v13173_v10  ;;  %v22999_v60 = vld [vmem:[#allocation37_spill] sm:$0xff] }
 0x7d2   : > { %v21623_v50 = vpop.f32.mrf.mxu0  ;;  %v21625_v39 = vld [vmem:[#allocation3 + $0x180] sm:$0xff]  ;;  %v21627_v44 = vld [vmem:[#allocation3 + $0x188] sm:$0xff]  ;;  %16639 = vmatprep.subr.mxu1 %v13172_v48 }
 0x7d3   : > { %16314 = vmatprep.mubr.f32.mxu0 %v21625_v39  ;;  %v21630_v15 = vpop.f32.mrf.mxu1  ;;  %16640 = vmatpush3.msra.mxu1 %v13172_v48 }
 0x7d4   : > { %v16114_v16 = vpop.f32.mrf.mxu0  ;;  %16315 = vmatmul.mubr.f32.gmra.mxu0 %v21627_v44  ;;  %16513 = vmatmul.mubr.f32.gmra.mxu1 %v10888_v41  ;;  %v13169_v41 = vld [vmem:[%s22487_s7 + $0x458] sm:$0xff] }
 0x7d5   : > { %v21636_v2 = vadd.f32 %v16114_v16, %v16034_v29  ;;  %16429 = vmatprep.mubr.f32.mxu0 %v22994_v13  ;;  %v21639_v54 = vpop.f32.mrf.mxu1  ;;  %16515 = vmatprep.mubr.f32.mxu1 %v10889_v19  ;;  %v22997_v29 = vld [vmem:[#allocation7_spill] sm:$0xff]  ;;  %v23000_v16 = vld [vmem:[#allocation9_spill] sm:$0xff] }
 0x7d6   : > { %v21641_v62 = vpop.f32.mrf.mxu0  ;;  %16641 = vmatprep.subr.mxu1 %v13171_v61  ;;  %v10894_v19 = vld [vmem:[#allocation3 + $0x98] sm:$0xff] }
 0x7d7   : > { %v21646_v53 = vpop.f32.mrf.mxu1  ;;  %16642 = vmatpush3.msra.mxu1 %v13171_v61 }
 0x7d8   : > { %v16117_v3 = vpop.f32.mrf.mxu0  ;;  %16430 = vmatmul.mubr.f32.vlgmr.msra.gmra.mxu0 %v22995_v23  ;;  %16516 = vmatmul.mubr.f32.gmra.mxu1 %v10890_v33  ;;  %v10895_v33 = vld [vmem:[#allocation3 + $0xa8] sm:$0xff] }
 0x7d9   : > { %v21652_v30 = vadd.f32 %v16117_v3, %v16037_v56  ;;  %16558 = vmatpush3.msra.mxu0 %v21544_v49  ;;  %16432 = vmatprep.mubr.f32.mxu0 %v22996_v52  ;;  %v21659_v28 = vpop.f32.mrf.mxu1  ;;  %v13154_v49 = vld [vmem:[%s22487_s7 + $0x3e0] sm:$0xff]  ;;  %v13152_v3 = vld [vmem:[%s22487_s7 + $0x3d0] sm:$0xff] }
 0x7da   : > { %v21661_v10 = vpop.f32.mrf.mxu0  ;;  %16559 = vmatprep.subr.mxu0 %v13156_v12  ;;  %16518 = vmatprep.mubr.f32.mxu1 %v10891_v24  ;;  %v13168_v52 = vld [vmem:[%s22487_s7 + $0x450] sm:$0xff] }
 0x7db   : > { %16560 = vmatpush3.msra.mxu0 %v13156_v12  ;;  %v21663_v25 = vpop.f32.mrf.mxu1  ;;  %16643 = vmatprep.subr.mxu1 %v13170_v9  ;;  %v23002_v24 = vld [vmem:[#allocation13_spill] sm:$0xff] }
 0x7dc   : > { %v16120_v14 = vpop.f32.mrf.mxu0  ;;  %16433 = vmatmul.mubr.f32.gmra.mxu0 %v22997_v29  ;;  %16561 = vmatprep.subr.mxu0 %v13155_v6 }
 0x7dd   : > { %v21670_v56 = vadd.f32 %v16120_v14, %v21594_v59  ;;  %16435 = vmatprep.mubr.f32.mxu0 %v22998_v46  ;;  %16562 = vmatpush3.msra.mxu0 %v13155_v6  ;;  %v21673_v8 = vpop.f32.mrf.mxu1  ;;  %v10897_v46 = vld [vmem:[#allocation3 + $0xc0] sm:$0xff] }
 0x7de   : > { %v21675_v7 = vpop.f32.mrf.mxu0  ;;  %16563 = vmatprep.subr.mxu0 %v13154_v49  ;;  %16519 = vmatmul.mubr.f32.gmra.mxu1 %v10892_v11  ;;  %v13151_v11 = vld [vmem:[%s22487_s7 + $0x3c8] sm:$0xff] }
 0x7df   : > { %16564 = vmatpush3.msra.mxu0 %v13154_v49  ;;  %16521 = vmatprep.mubr.f32.mxu1 %v10893_v26  ;;  %v21680_v48 = vpop.f32.mrf.mxu1  ;;  %v10896_v49 = vld [vmem:[#allocation3 + $0xb0] sm:$0xff] }
 0x7e0   : > { %v16123_v59 = vpop.f32.mrf.mxu0  ;;  %16436 = vmatmul.mubr.f32.gmra.mxu0 %v22999_v60  ;;  %16644 = vmatpush3.msra.mxu1 %v13170_v9  ;;  %v23001_v9 = vld [vmem:[#allocation11_spill] sm:$0xff] }
 0x7e1   : > { %v21687_v61 = vadd.f32 %v16123_v59, %v21598_v58  ;;  %16438 = vmatprep.mubr.f32.mxu0 %v23000_v16  ;;  %16565 = vmatprep.subr.mxu0 %v13153_v27  ;;  %v21690_v13 = vpop.f32.mrf.mxu1  ;;  %v13167_v59 = vld [vmem:[%s22487_s7 + $0x448] sm:$0xff] }
 0x7e2   : > { %v21692_v12 = vpop.f32.mrf.mxu0  ;;  %16522 = vmatmul.mubr.f32.gmra.mxu1 %v10894_v19  ;;  %16566 = vmatpush3.msra.mxu0 %v13153_v27  ;;  %v23003_v27 = vld [vmem:[#allocation12_spill] sm:$0xff] }
 0x7e3   : > { %16524 = vmatprep.mubr.f32.mxu1 %v10895_v33  ;;  %16645 = vmatprep.subr.mxu1 %v13169_v41  ;;  %v21697_v23 = vpop.f32.mrf.mxu1  ;;  %v10898_v16 = vld [vmem:[#allocation3 + $0xc8] sm:$0xff] }
 0x7e4   : > { %v16126_v58 = vpop.f32.mrf.mxu0  ;;  %16439 = vmatmul.mubr.f32.gmra.mxu0 %v23001_v9  ;;  %16646 = vmatpush3.msra.mxu1 %v13169_v41  ;;  %v23004_v41 = vld [vmem:[#allocation38_spill] sm:$0xff] }
 0x7e5   : > { %v21704_v6 = vadd.f32 %v16126_v58, %v21602_v20  ;;  %16441 = vmatprep.mubr.f32.mxu0 %v23002_v24  ;;  %16567 = vmatprep.subr.mxu0 %v13152_v3  ;;  %v21707_v14 = vpop.f32.mrf.mxu1  ;;  %v13150_v58 = vld [vmem:[%s22487_s7 + $0x3c0] sm:$0xff] }
 0x7e6   : > { %v21709_v29 = vpop.f32.mrf.mxu0  ;;  %16525 = vmatmul.mubr.f32.gmra.mxu1 %v10896_v49  ;;  %16568 = vmatpush3.msra.mxu0 %v13152_v3  ;;  %v10899_v3 = vld [vmem:[#allocation3 + $0xd8] sm:$0xff]  ;;  %v13166_v24 = vld [vmem:[%s22487_s7 + $0x440] sm:$0xff] }
 0x7e7   : > { %16527 = vmatprep.mubr.f32.mxu1 %v10897_v46  ;;  %16647 = vmatprep.subr.mxu1 %v13168_v52  ;;  %v21714_v26 = vpop.f32.mrf.mxu1  ;;  %v23006_v46 = vld [vmem:[#allocation93_spill] sm:$0xff] }
 0x7e8   : > { %v16129_v20 = vpop.f32.mrf.mxu0  ;;  %16442 = vmatmul.mubr.f32.gmra.mxu0 %v23003_v27  ;;  %16648 = vmatpush3.msra.mxu1 %v13168_v52  ;;  %v23005_v52 = vld [vmem:[#allocation53_spill] sm:$0xff]  ;;  %v9506_v27 = vadd.f32 %v21619_v37, %v21586_v55 }
 0x7e9   : > { %v21721_v60 = vadd.f32 %v16129_v20, %v21606_v43  ;;  %16444 = vmatprep.mubr.f32.mxu0 %v23004_v41  ;;  %16569 = vmatprep.subr.mxu0 %v13151_v11  ;;  %v21724_v19 = vpop.f32.mrf.mxu1  ;;  %v13165_v37 = vld [vmem:[%s22487_s7 + $0x438] sm:$0xff] }
 0x7ea   : > { %v21726_v33 = vpop.f32.mrf.mxu0  ;;  %16528 = vmatmul.mubr.f32.gmra.mxu1 %v10898_v16  ;;  %16570 = vmatpush3.msra.mxu0 %v13151_v11  ;;  %v10900_v11 = vld [vmem:[#allocation3 + $0xe0] sm:$0xff]  ;;  %v13149_v16 = vld [vmem:[%s22487_s7 + $0x3b8] sm:$0xff] }
 0x7eb   : > { %16530 = vmatprep.mubr.f32.mxu1 %v10899_v3  ;;  %16649 = vmatprep.subr.mxu1 %v13167_v59  ;;  %v21731_v9 = vpop.f32.mrf.mxu1  ;;  %v9501_v3 = vadd.f32 %v21623_v50, %v21588_v51  ;;  %v10903_v50 = vld [vmem:[#allocation3 + $0x108] sm:$0xff] }
 0x7ec   : > { %v16132_v43 = vpop.f32.mrf.mxu0  ;;  %16445 = vmatmul.mubr.f32.gmra.mxu0 %v23005_v52  ;;  %16650 = vmatpush3.msra.mxu1 %v13167_v59  ;;  %v10901_v59 = vld [vmem:[#allocation3 + $0xf0] sm:$0xff]  ;;  %v23007_v52 = vld [vmem:[#allocation26_spill] sm:$0xff] }
 0x7ed   : > { %v21738_v49 = vadd.f32 %v16132_v43, %v21610_v21  ;;  %16447 = vmatprep.mubr.f32.mxu0 %v23006_v46  ;;  %16571 = vmatprep.subr.mxu0 %v13150_v58  ;;  %v21741_v20 = vpop.f32.mrf.mxu1  ;;  %v10902_v46 = vld [vmem:[#allocation3 + $0xf8] sm:$0xff] }
 0x7ee   : > { %v21745_v41 = vpop.f32.mrf.mxu0  ;;  %16531 = vmatmul.mubr.f32.gmra.mxu1 %v10900_v11  ;;  %16572 = vmatpush3.msra.mxu0 %v13150_v58 }
 0x7ef   : > { %16533 = vmatprep.mubr.f32.mxu1 %v10901_v59  ;;  %16651 = vmatprep.subr.mxu1 %v13166_v24  ;;  %v16191_v21 = vpop.f32.mrf.mxu1 }
 0x7f0   : > { %v16135_v43 = vpop.f32.mrf.mxu0  ;;  %16448 = vmatmul.mubr.f32.gmra.mxu0 %v23007_v52  ;;  %16652 = vmatpush3.msra.mxu1 %v13166_v24  ;;  %v21753_v55 = vadd.f32 %v16191_v21, %v9506_v27  ;;  %v13148_v24 = vld [vmem:[%s22487_s7 + $0x3b0] sm:$0xff] }
 0x7f1   : > { %v21759_v58 = vadd.f32 %v16135_v43, %v21614_v22  ;;  %16450 = vmatprep.mubr.f32.mxu0 %v21363_v17  ;;  %16573 = vmatprep.subr.mxu0 %v13149_v16  ;;  %v9774_v11 = vpop.f32.mrf.mxu1  ;;  %v9511_v17 = vadd.f32 %v21641_v62, %v21590_v36  ;;  %v23008_v43 = vld [vmem:[#allocation54_spill] sm:$0xff]  ;;  %v10904_v52 = vld [vmem:[#allocation3 + $0x110] sm:$0xff] }
 0x7f2   : > { %v9580_v59 = vpop.f32.mrf.mxu0  ;;  %16534 = vmatmul.mubr.f32.gmra.mxu1 %v10902_v46  ;;  %16574 = vmatpush3.msra.mxu0 %v13149_v16  ;;  %v21762_v51 = vadd.f32 %v9774_v11, %v9501_v3  ;;  %v13164_v3 = vld [vmem:[%s22487_s7 + $0x430] sm:$0xff] }
 0x7f3   : > { %v21768_v27 = vadd.f32 %v9580_v59, %v21621_v40  ;;  %16536 = vmatprep.mubr.f32.mxu1 %v10903_v50  ;;  %16653 = vmatprep.subr.mxu1 %v13165_v37  ;;  %v16194_v22 = vpop.f32.mrf.mxu1 }
 0x7f4   : > { %v16138_v21 = vpop.f32.mrf.mxu0  ;;  %16451 = vmatmul.mubr.f32.gmra.mxu0 %v23008_v43  ;;  %16654 = vmatpush3.msra.mxu1 %v13165_v37  ;;  %v21774_v16 = vadd.f32 %v16194_v22, %v21636_v2  ;;  %v10905_v37 = vld [vmem:[#allocation3 + $0x120] sm:$0xff]  ;;  %v13147_v2 = vld [vmem:[%s22487_s7 + $0x3a8] sm:$0xff] }
 0x7f5   : > { %v21780_v40 = vadd.f32 %v16138_v21, %v21630_v15  ;;  %16453 = vmatprep.mubr.f32.mxu0 %v21374_v18  ;;  %16575 = vmatprep.subr.mxu0 %v13148_v24  ;;  %v9784_v46 = vpop.f32.mrf.mxu1  ;;  %v9521_v18 = vadd.f32 %v21661_v10, %v21592_v34  ;;  %v10906_v22 = vld [vmem:[#allocation3 + $0x128] sm:$0xff]  ;;  %v10907_v10 = vld [vmem:[#allocation3 + $0x138] sm:$0xff] }
 0x7f6   : > { %v9590_v36 = vpop.f32.mrf.mxu0  ;;  %16537 = vmatmul.mubr.f32.gmra.mxu1 %v10904_v52  ;;  %16576 = vmatpush3.msra.mxu0 %v13148_v24  ;;  %v21783_v62 = vadd.f32 %v9784_v46, %v9511_v17  ;;  %v13163_v24 = vld [vmem:[%s22487_s7 + $0x428] sm:$0xff]  ;;  %v13162_v52 = vld [vmem:[%s22487_s7 + $0x420] sm:$0xff] }
 0x7f7   : > { %v21789_v11 = vadd.f32 %v9590_v36, %v21639_v54  ;;  %16539 = vmatprep.mubr.f32.mxu1 %v10905_v37  ;;  %16655 = vmatprep.subr.mxu1 %v13164_v3  ;;  %v16197_v15 = vpop.f32.mrf.mxu1  ;;  %v10908_v46 = vld [vmem:[#allocation3 + $0x140] sm:$0xff] }
 0x7f8   : > { %v16141_v59 = vpop.f32.mrf.mxu0  ;;  %16454 = vmatmul.mubr.f32.gmra.mxu0 %v21385_v35  ;;  %16656 = vmatpush3.msra.mxu1 %v13164_v3  ;;  %v21795_v50 = vadd.f32 %v16197_v15, %v21652_v30  ;;  %v13146_v30 = vld [vmem:[%s22487_s7 + $0x3a0] sm:$0xff] }
 0x7f9   : > { %v21801_v54 = vadd.f32 %v16141_v59, %v21646_v53  ;;  %16456 = vmatprep.mubr.f32.mxu0 %v21389_v47  ;;  %16577 = vmatprep.subr.mxu0 %v13147_v2  ;;  %v9794_v17 = vpop.f32.mrf.mxu1  ;;  %v9531_v47 = vadd.f32 %v21675_v7, %v21596_v45  ;;  %v10909_v7 = vld [vmem:[#allocation3 + $0x150] sm:$0xff]  ;;  %v10910_v59 = vld [vmem:[#allocation3 + $0x158] sm:$0xff] }
 0x7fa   : > { %v9600_v34 = vpop.f32.mrf.mxu0  ;;  %16540 = vmatmul.mubr.f32.gmra.mxu1 %v10906_v22  ;;  %16578 = vmatpush3.msra.mxu0 %v13147_v2  ;;  %v21804_v35 = vadd.f32 %v9794_v17, %v9521_v18  ;;  %v13161_v18 = vld [vmem:[%s22487_s7 + $0x418] sm:$0xff] }
 0x7fb   : > { %v21810_v21 = vadd.f32 %v9600_v34, %v21659_v28  ;;  %16542 = vmatprep.mubr.f32.mxu1 %v10907_v10  ;;  %16657 = vmatprep.subr.mxu1 %v13163_v24  ;;  %v16200_v53 = vpop.f32.mrf.mxu1  ;;  %v13160_v10 = vld [vmem:[%s22487_s7 + $0x410] sm:$0xff] }
 0x7fc   : > { %v16144_v43 = vpop.f32.mrf.mxu0  ;;  %16457 = vmatmul.mubr.f32.gmra.mxu0 %v21400_v5  ;;  %16658 = vmatpush3.msra.mxu1 %v13163_v24  ;;  %v21816_v3 = vadd.f32 %v16200_v53, %v21670_v56  ;;  %v13145_v56 = vld [vmem:[%s22487_s7 + $0x398] sm:$0xff] }
 0x7fd   : > { %v21822_v28 = vadd.f32 %v16144_v43, %v21663_v25  ;;  %16459 = vmatprep.mubr.f32.mxu0 %v21403_v38  ;;  %16579 = vmatprep.subr.mxu0 %v13146_v30  ;;  %v9804_v36 = vpop.f32.mrf.mxu1  ;;  %v9541_v38 = vadd.f32 %v21692_v12, %v21600_v0  ;;  %v10911_v12 = vld [vmem:[#allocation3 + $0x168] sm:$0xff] }
 0x7fe   : > { %v9610_v45 = vpop.f32.mrf.mxu0  ;;  %16543 = vmatmul.mubr.f32.gmra.mxu1 %v10908_v46  ;;  %16580 = vmatpush3.msra.mxu0 %v13146_v30  ;;  %v21825_v5 = vadd.f32 %v9804_v36, %v9531_v47  ;;  %v10912_v30 = vld [vmem:[#allocation3 + $0x170] sm:$0xff]  ;;  %v10915_v36 = vld [vmem:[#allocation3 + $0x198] sm:$0xff] }
 0x7ff   : > { %v21831_v37 = vadd.f32 %v9610_v45, %v21673_v8  ;;  %16545 = vmatprep.mubr.f32.mxu1 %v10909_v7  ;;  %16659 = vmatprep.subr.mxu1 %v13162_v52  ;;  %v16203_v25 = vpop.f32.mrf.mxu1  ;;  %v23009_v43 = vld [vmem:[#allocation20_spill] sm:$0xff] }
 0x800   : > { %v16147_v2 = vpop.f32.mrf.mxu0  ;;  %16460 = vmatmul.mubr.f32.gmra.mxu0 %v21414_v57  ;;  %16660 = vmatpush3.msra.mxu1 %v13162_v52  ;;  %v21837_v15 = vadd.f32 %v16203_v25, %v21687_v61  ;;  %v13144_v61 = vld [vmem:[%s22487_s7 + $0x390] sm:$0xff]  ;;  %v10916_v25 = vld [vmem:[#allocation3 + $0x1a0] sm:$0xff] }
 0x801   : > { %v21843_v8 = vadd.f32 %v16147_v2, %v21680_v48  ;;  %16462 = vmatprep.mubr.f32.mxu0 %v21417_v31  ;;  %16581 = vmatprep.subr.mxu0 %v13145_v56  ;;  %v9814_v24 = vpop.f32.mrf.mxu1  ;;  %v9551_v31 = vadd.f32 %v21709_v29, %v21604_v32  ;;  %v21879_v52 = vld [vmem:[#allocation3 + $0x152] sm:$0xff]  ;;  %v21905_v2 = vld [vmem:[#allocation3 + $0x16a] sm:$0xff] }
 0x802   : > { %v9620_v0 = vpop.f32.mrf.mxu0  ;;  %16546 = vmatmul.mubr.f32.gmra.mxu1 %v10910_v59  ;;  %16582 = vmatpush3.msra.mxu0 %v13145_v56  ;;  %v21846_v57 = vadd.f32 %v9814_v24, %v9541_v38  ;;  %v21900_v56 = vld [vmem:[#allocation3 + $0x15a] sm:$0xff]  ;;  %v9571_v38 = vadd.f32 %v21745_v41, %v21612_v4 }
 0x803   : > { %v21852_v22 = vadd.f32 %v9620_v0, %v21690_v13  ;;  %16548 = vmatprep.mubr.f32.mxu1 %v10911_v12  ;;  %16661 = vmatprep.subr.mxu1 %v13161_v18  ;;  %v16206_v48 = vpop.f32.mrf.mxu1  ;;  %v11497_v0 = vld [vmem:[#allocation3 + $0x32] sm:$0xff] }
 0x804   : > { %v16150_v17 = vpop.f32.mrf.mxu0  ;;  %16463 = vmatmul.mubr.f32.gmra.mxu0 %v21428_v1  ;;  %16662 = vmatpush3.msra.mxu1 %v13161_v18  ;;  %v21858_v34 = vadd.f32 %v16206_v48, %v21704_v6  ;;  %v13143_v6 = vld [vmem:[%s22487_s7 + $0x388] sm:$0xff]  ;;  %v21922_v12 = vld [vmem:[#allocation3 + $0x172] sm:$0xff] }
 0x805   : > { %v21864_v13 = vadd.f32 %v16150_v17, %v21697_v23  ;;  %16465 = vmatprep.mubr.f32.mxu0 %v21431_v42  ;;  %16583 = vmatprep.subr.mxu0 %v13144_v61  ;;  %v9824_v53 = vpop.f32.mrf.mxu1  ;;  %v9561_v42 = vadd.f32 %v21726_v33, %v21608_v63  ;;  %v21925_v48 = vld [vmem:[#allocation3 + $0x182] sm:$0xff] }
 0x806   : > { %v9630_v32 = vpop.f32.mrf.mxu0  ;;  %16549 = vmatmul.mubr.f32.gmra.mxu1 %v10912_v30  ;;  %16584 = vmatpush3.msra.mxu0 %v13144_v61  ;;  %v21867_v1 = vadd.f32 %v9824_v53, %v9551_v31 }
 0x807   : > { %v21873_v29 = vadd.f32 %v9630_v32, %v21707_v14  ;;  %16551 = vmatprep.mubr.f32.mxu1 %v21625_v39  ;;  %16663 = vmatprep.subr.mxu1 %v13160_v10  ;;  %v16209_v23 = vpop.f32.mrf.mxu1  ;;  %v13159_v14 = vld [vmem:[%s22487_s7 + $0x408] sm:$0xff] }
 0x808   : > { %v16153_v47 = vpop.f32.mrf.mxu0  ;;  %16466 = vmatmul.mubr.f32.gmra.mxu0 %v23009_v43  ;;  %16664 = vmatpush3.msra.mxu1 %v13160_v10  ;;  %v21882_v46 = vadd.f32 %v16209_v23, %v21721_v60  ;;  %v13142_v60 = vld [vmem:[%s22487_s7 + $0x380] sm:$0xff]  ;;  %v11499_v32 = vld [vmem:[#allocation3 + $0x4a] sm:$0xff] }
 0x809   : > { %v21888_v39 = vadd.f32 %v16153_v47, %v21714_v26  ;;  %16468 = vmatprep.mubr.f32.mxu0 %v21879_v52  ;;  %16585 = vmatprep.subr.mxu0 %v13143_v6  ;;  %v9834_v63 = vpop.f32.mrf.mxu1  ;;  %v21940_v23 = vld [vmem:[#allocation3 + $0x18a] sm:$0xff] }
 0x80a   : > { %v9640_v33 = vpop.f32.mrf.mxu0  ;;  %16552 = vmatmul.mubr.f32.gmra.mxu1 %v21627_v44  ;;  %16586 = vmatpush3.msra.mxu0 %v13143_v6  ;;  %v21892_v45 = vadd.f32 %v9834_v63, %v9561_v42  ;;  %v11501_v63 = vld [vmem:[#allocation3 + $0x62] sm:$0xff] }
 0x80b   : > { %v21898_v7 = vadd.f32 %v9640_v33, %v21724_v19  ;;  %16665 = vmatprep.subr.mxu1 %v13159_v14  ;;  %v16212_v26 = vpop.f32.mrf.mxu1  ;;  %16554 = vmatprep.mubr.f32.mxu1 %v10915_v36  ;;  %v13158_v19 = vld [vmem:[%s22487_s7 + $0x400] sm:$0xff] }
 0x80c   : > { %v16156_v44 = vpop.f32.mrf.mxu0  ;;  %16469 = vmatmul.mubr.f32.gmra.mxu0 %v21900_v56  ;;  %16666 = vmatpush3.msra.mxu1 %v13159_v14  ;;  %v21908_v18 = vadd.f32 %v16212_v26, %v21738_v49 }
 0x80d   : > { %v21914_v59 = vadd.f32 %v16156_v44, %v21731_v9  ;;  %16471 = vmatprep.mubr.f32.mxu0 %v21905_v2  ;;  %16587 = vmatprep.subr.mxu0 %v13142_v60  ;;  %v9844_v4 = vpop.f32.mrf.mxu1  ;;  %v11502_v44 = vld [vmem:[#allocation3 + $0x6a] sm:$0xff] }
 0x80e   : > { %v9650_v41 = vpop.f32.mrf.mxu0  ;;  %16555 = vmatmul.mubr.f32.gmra.mxu1 %v10916_v25  ;;  %16588 = vmatpush3.msra.mxu0 %v13142_v60  ;;  %v21917_v24 = vadd.f32 %v9844_v4, %v9571_v38  ;;  %v11192_v60 = vld [vmem:[#allocation3 + $0x39] sm:$0xff]  ;;  %v11193_v25 = vld [vmem:[#allocation3 + $0x49] sm:$0xff] }
 0x80f   : > { %v21920_v49 = vadd.f32 %v9650_v41, %v21741_v20  ;;  %16667 = vmatprep.subr.mxu1 %v13158_v19  ;;  %16669 = vmatprep.mubr.f32.mxu1 %v11497_v0  ;;  %v16215_v61 = vpop.f32.mrf.mxu1  ;;  %v11498_v20 = vld [vmem:[#allocation3 + $0x3a] sm:$0xff]  ;;  %v11194_v0 = vld [vmem:[#allocation3 + $0x51] sm:$0xff] }
 0x810   : > { %v16271_v9 = vpop.f32.mrf.mxu0  ;;  %16472 = vmatmul.mubr.f32.gmra.mxu0 %v21922_v12  ;;  %16668 = vmatpush3.msra.mxu1 %v13158_v19  ;;  %v21928_v31 = vadd.f32 %v16215_v61, %v21759_v58  ;;  %v11503_v4 = vld [vmem:[#allocation3 + $0x7a] sm:$0xff] }
 0x811   : > { %v21931_v17 = vadd.f32 %v16271_v9, %v21753_v55  ;;  %16474 = vmatprep.mubr.f32.mxu0 %v21925_v48  ;;  %v9854_v10 = vpop.f32.mrf.mxu1  ;;  %v11191_v55 = vld [vmem:[#allocation3 + $0x31] sm:$0xff]  ;;  %v11195_v9 = vld [vmem:[#allocation3 + $0x61] sm:$0xff] }
 0x812   : > { %v10081_v30 = vpop.f32.mrf.mxu0  ;;  %16670 = vmatmul.mubr.f32.vlgmr.msra.gmra.mxu1 %v11498_v20  ;;  %v21935_v53 = vadd.f32 %v9854_v10, %v21768_v27  ;;  %v11500_v27 = vld [vmem:[#allocation3 + $0x52] sm:$0xff]  ;;  %v11504_v10 = vld [vmem:[#allocation3 + $0x82] sm:$0xff] }
 0x813   : > { %v21938_v6 = vadd.f32 %v10081_v30, %v21762_v51  ;;  %16672 = vmatprep.mubr.f32.mxu1 %v11499_v32  ;;  %v16218_v58 = vpop.f32.mrf.mxu1  ;;  %v11505_v32 = vld [vmem:[#allocation3 + $0x92] sm:$0xff] }
 0x814   : > { %v16274_v42 = vpop.f32.mrf.mxu0  ;;  %16475 = vmatmul.mubr.f32.gmra.mxu0 %v21940_v23  ;;  %v21944_v47 = vadd.f32 %v16218_v58, %v21780_v40 }
 0x815   : > { %v21947_v43 = vadd.f32 %v16274_v42, %v21774_v16  ;;  %16589 = vmatprep.mubr.f32.mxu0 %v11191_v55  ;;  %v9864_v14 = vpop.f32.mrf.mxu1  ;;  %v11196_v42 = vld [vmem:[#allocation3 + $0x69] sm:$0xff] }
 0x816   : > { %v10091_v36 = vpop.f32.mrf.mxu0  ;;  %16673 = vmatmul.mubr.f32.gmra.mxu1 %v11500_v27  ;;  %v21950_v51 = vadd.f32 %v9864_v14, %v21789_v11  ;;  %v11197_v27 = vld [vmem:[#allocation3 + $0x79] sm:$0xff] }
 0x817   : > { %v21953_v33 = vadd.f32 %v10091_v36, %v21783_v62  ;;  %16675 = vmatprep.mubr.f32.mxu1 %v11501_v63  ;;  %v16221_v26 = vpop.f32.mrf.mxu1  ;;  %v11506_v36 = vld [vmem:[#allocation3 + $0x9a] sm:$0xff] }
 0x818   : > { %v16277_v40 = vpop.f32.mrf.mxu0  ;;  %16590 = vmatmul.mubr.f32.vlgmr.msra.gmra.mxu0 %v11192_v60  ;;  %v21956_v16 = vadd.f32 %v16221_v26, %v21801_v54  ;;  %v11507_v60 = vld [vmem:[#allocation3 + $0xaa] sm:$0xff] }
 0x819   : > { %v21959_v38 = vadd.f32 %v16277_v40, %v21795_v50  ;;  %16592 = vmatprep.mubr.f32.mxu0 %v11193_v25  ;;  %v9874_v11 = vpop.f32.mrf.mxu1  ;;  %v11198_v40 = vld [vmem:[#allocation3 + $0x81] sm:$0xff] }
 0x81a   : > { %v10101_v19 = vpop.f32.mrf.mxu0  ;;  %16676 = vmatmul.mubr.f32.gmra.mxu1 %v11502_v44  ;;  %v21962_v62 = vadd.f32 %v9874_v11, %v21810_v21  ;;  %v11199_v44 = vld [vmem:[#allocation3 + $0x91] sm:$0xff] }
 0x81b   : > { %v21965_v41 = vadd.f32 %v10101_v19, %v21804_v35  ;;  %16678 = vmatprep.mubr.f32.mxu1 %v11503_v4  ;;  %v16224_v61 = vpop.f32.mrf.mxu1  ;;  %v11508_v19 = vld [vmem:[#allocation3 + $0xb2] sm:$0xff] }
 0x81c   : > { %v16280_v54 = vpop.f32.mrf.mxu0  ;;  %16593 = vmatmul.mubr.f32.gmra.mxu0 %v11194_v0  ;;  %v21968_v50 = vadd.f32 %v16224_v61, %v21822_v28  ;;  %v11509_v0 = vld [vmem:[#allocation3 + $0xc2] sm:$0xff] }
 0x81d   : > { %v21971_v20 = vadd.f32 %v16280_v54, %v21816_v3  ;;  %16595 = vmatprep.mubr.f32.mxu0 %v11195_v9  ;;  %v9884_v21 = vpop.f32.mrf.mxu1  ;;  %v11200_v54 = vld [vmem:[#allocation3 + $0x99] sm:$0xff] }
 0x81e   : > { %v10111_v30 = vpop.f32.mrf.mxu0  ;;  %16679 = vmatmul.mubr.f32.gmra.mxu1 %v11504_v10  ;;  %v21974_v35 = vadd.f32 %v9884_v21, %v21831_v37  ;;  %v11201_v10 = vld [vmem:[#allocation3 + $0xa9] sm:$0xff] }
 0x81f   : > { %v21977_v58 = vadd.f32 %v10111_v30, %v21825_v5  ;;  %16681 = vmatprep.mubr.f32.mxu1 %v11505_v32  ;;  %v16227_v55 = vpop.f32.mrf.mxu1  ;;  %v11510_v30 = vld [vmem:[#allocation3 + $0xca] sm:$0xff] }
 0x820   : > { %v16283_v28 = vpop.f32.mrf.mxu0  ;;  %16596 = vmatmul.mubr.f32.gmra.mxu0 %v11196_v42  ;;  %v21980_v3 = vadd.f32 %v16227_v55, %v21843_v8  ;;  %v11511_v42 = vld [vmem:[#allocation3 + $0xda] sm:$0xff] }
 0x821   : > { %v21983_v14 = vadd.f32 %v16283_v28, %v21837_v15  ;;  %16598 = vmatprep.mubr.f32.mxu0 %v11197_v27  ;;  %v9894_v37 = vpop.f32.mrf.mxu1  ;;  %v11202_v28 = vld [vmem:[#allocation3 + $0xb1] sm:$0xff] }
 0x822   : > { %v10121_v63 = vpop.f32.mrf.mxu0  ;;  %16682 = vmatmul.mubr.f32.gmra.mxu1 %v11506_v36  ;;  %v21986_v5 = vadd.f32 %v9894_v37, %v21852_v22  ;;  %v11203_v36 = vld [vmem:[#allocation3 + $0xc1] sm:$0xff] }
 0x823   : > { %v21989_v26 = vadd.f32 %v10121_v63, %v21846_v57  ;;  %16684 = vmatprep.mubr.f32.mxu1 %v11507_v60  ;;  %v16230_v25 = vpop.f32.mrf.mxu1  ;;  %v11512_v63 = vld [vmem:[#allocation3 + $0xe2] sm:$0xff] }
 0x824   : > { %v16286_v8 = vpop.f32.mrf.mxu0  ;;  %16599 = vmatmul.mubr.f32.gmra.mxu0 %v11198_v40  ;;  %v21992_v15 = vadd.f32 %v16230_v25, %v21864_v13  ;;  %v11513_v40 = vld [vmem:[#allocation3 + $0xf2] sm:$0xff] }
 0x825   : > { %v21995_v11 = vadd.f32 %v16286_v8, %v21858_v34  ;;  %16601 = vmatprep.mubr.f32.mxu0 %v11199_v44  ;;  %v9904_v22 = vpop.f32.mrf.mxu1  ;;  %v11204_v8 = vld [vmem:[#allocation3 + $0xc9] sm:$0xff] }
 0x826   : > { %v10131_v4 = vpop.f32.mrf.mxu0  ;;  %16685 = vmatmul.mubr.f32.gmra.mxu1 %v11508_v19  ;;  %v21998_v57 = vadd.f32 %v9904_v22, %v21873_v29  ;;  %v11205_v19 = vld [vmem:[#allocation3 + $0xd9] sm:$0xff] }
 0x827   : > { %v22001_v61 = vadd.f32 %v10131_v4, %v21867_v1  ;;  %16687 = vmatprep.mubr.f32.mxu1 %v11509_v0  ;;  %v16233_v9 = vpop.f32.mrf.mxu1  ;;  %v11514_v4 = vld [vmem:[#allocation3 + $0xfa] sm:$0xff] }
 0x828   : > { %v16289_v13 = vpop.f32.mrf.mxu0  ;;  %16602 = vmatmul.mubr.f32.gmra.mxu0 %v11200_v54  ;;  %v22004_v34 = vadd.f32 %v16233_v9, %v21888_v39  ;;  %v11515_v54 = vld [vmem:[#allocation3 + $0x10a] sm:$0xff] }
 0x829   : > { %v22007_v21 = vadd.f32 %v16289_v13, %v21882_v46  ;;  %16604 = vmatprep.mubr.f32.mxu0 %v11201_v10  ;;  %v9914_v29 = vpop.f32.mrf.mxu1  ;;  %v11206_v13 = vld [vmem:[#allocation3 + $0xe1] sm:$0xff] }
 0x82a   : > { %v10141_v32 = vpop.f32.mrf.mxu0  ;;  %16688 = vmatmul.mubr.f32.gmra.mxu1 %v11510_v30  ;;  %v22010_v1 = vadd.f32 %v9914_v29, %v21898_v7  ;;  %v11207_v30 = vld [vmem:[#allocation3 + $0xf1] sm:$0xff] }
 0x82b   : > { %v22013_v55 = vadd.f32 %v10141_v32, %v21892_v45  ;;  %16690 = vmatprep.mubr.f32.mxu1 %v11511_v42  ;;  %v16236_v27 = vpop.f32.mrf.mxu1  ;;  %v11516_v32 = vld [vmem:[#allocation3 + $0x112] sm:$0xff] }
 0x82c   : > { %v16292_v39 = vpop.f32.mrf.mxu0  ;;  %16605 = vmatmul.mubr.f32.gmra.mxu0 %v11202_v28  ;;  %v22016_v46 = vadd.f32 %v16236_v27, %v21914_v59  ;;  %v11517_v28 = vld [vmem:[#allocation3 + $0x122] sm:$0xff] }
 0x82d   : > { %v22019_v37 = vadd.f32 %v16292_v39, %v21908_v18  ;;  %16607 = vmatprep.mubr.f32.mxu0 %v11203_v36  ;;  %v9924_v7 = vpop.f32.mrf.mxu1  ;;  %v11208_v39 = vld [vmem:[#allocation3 + $0xf9] sm:$0xff] }
 0x82e   : > { %v10151_v60 = vpop.f32.mrf.mxu0  ;;  %16691 = vmatmul.mubr.f32.gmra.mxu1 %v11512_v63  ;;  %v22022_v45 = vadd.f32 %v9924_v7, %v21920_v49  ;;  %v11209_v63 = vld [vmem:[#allocation3 + $0x109] sm:$0xff] }
 0x82f   : > { %v22025_v25 = vadd.f32 %v10151_v60, %v21917_v24  ;;  %16693 = vmatprep.mubr.f32.mxu1 %v11513_v40  ;;  %v16351_v44 = vpop.f32.mrf.mxu1  ;;  %v11518_v60 = vld [vmem:[#allocation3 + $0x12a] sm:$0xff] }
 0x830   : > { %v16295_v59 = vpop.f32.mrf.mxu0  ;;  %16608 = vmatmul.mubr.f32.gmra.mxu0 %v11204_v8  ;;  %v22028_v18 = vadd.f32 %v16351_v44, %v21931_v17  ;;  %v11519_v8 = vld [vmem:[#allocation3 + $0x13a] sm:$0xff] }
 0x831   : > { %v22031_v22 = vadd.f32 %v16295_v59, %v21928_v31  ;;  %16610 = vmatprep.mubr.f32.mxu0 %v11205_v19  ;;  %v10387_v49 = vpop.f32.mrf.mxu1  ;;  %v11210_v59 = vld [vmem:[#allocation3 + $0x111] sm:$0xff] }
 0x832   : > { %v10161_v0 = vpop.f32.mrf.mxu0  ;;  %16694 = vmatmul.mubr.f32.gmra.mxu1 %v11514_v4  ;;  %v22034_v24 = vadd.f32 %v10387_v49, %v21938_v6  ;;  %v11211_v4 = vld [vmem:[#allocation3 + $0x121] sm:$0xff] }
 0x833   : > { %v22037_v9 = vadd.f32 %v10161_v0, %v21935_v53  ;;  %16696 = vmatprep.mubr.f32.mxu1 %v11515_v54  ;;  %v16354_v10 = vpop.f32.mrf.mxu1  ;;  %v11520_v0 = vld [vmem:[#allocation3 + $0x142] sm:$0xff] }
 0x834   : > { %v16298_v17 = vpop.f32.mrf.mxu0  ;;  %16611 = vmatmul.mubr.f32.gmra.mxu0 %v11206_v13  ;;  %v22040_v31 = vadd.f32 %v16354_v10, %v21947_v43  ;;  %v11212_v10 = vld [vmem:[#allocation3 + $0x129] sm:$0xff] }
 0x835   : > { %v22043_v29 = vadd.f32 %v16298_v17, %v21944_v47  ;;  %16613 = vmatprep.mubr.f32.mxu0 %v11207_v30  ;;  %v10397_v6 = vpop.f32.mrf.mxu1  ;;  %v11213_v30 = vld [vmem:[#allocation3 + $0x139] sm:$0xff] }
 0x836   : > { %v10171_v42 = vpop.f32.mrf.mxu0  ;;  %16697 = vmatmul.mubr.f32.gmra.mxu1 %v11516_v32  ;;  %v22046_v53 = vadd.f32 %v10397_v6, %v21953_v33 }
 0x837   : > { %v22049_v27 = vadd.f32 %v10171_v42, %v21950_v51  ;;  %16699 = vmatprep.mubr.f32.mxu1 %v11517_v28  ;;  %v16357_v36 = vpop.f32.mrf.mxu1  ;;  %v11214_v42 = vld [vmem:[#allocation3 + $0x141] sm:$0xff] }
 0x838   : > { %v16301_v43 = vpop.f32.mrf.mxu0  ;;  %16614 = vmatmul.mubr.f32.gmra.mxu0 %v11208_v39  ;;  %v22052_v47 = vadd.f32 %v16357_v36, %v21959_v38  ;;  %v11215_v39 = vld [vmem:[#allocation3 + $0x151] sm:$0xff] }
 0x839   : > { %v22055_v7 = vadd.f32 %v16301_v43, %v21956_v16  ;;  %16616 = vmatprep.mubr.f32.mxu0 %v11209_v63  ;;  %v10407_v33 = vpop.f32.mrf.mxu1 }
 0x83a   : > { %v10181_v40 = vpop.f32.mrf.mxu0  ;;  %16700 = vmatmul.mubr.f32.gmra.mxu1 %v11518_v60  ;;  %v22058_v51 = vadd.f32 %v10407_v33, %v21965_v41 }
 0x83b   : > { %v22061_v44 = vadd.f32 %v10181_v40, %v21962_v62  ;;  %16702 = vmatprep.mubr.f32.mxu1 %v11519_v8  ;;  %v16360_v19 = vpop.f32.mrf.mxu1 }
 0x83c   : > { %v16304_v38 = vpop.f32.mrf.mxu0  ;;  %16617 = vmatmul.mubr.f32.gmra.mxu0 %v11210_v59  ;;  %v22064_v16 = vadd.f32 %v16360_v19, %v21971_v20  ;;  %v11219_v59 = vld [vmem:[#allocation3 + $0x181] sm:$0xff] }
 0x83d   : > { %v22067_v49 = vadd.f32 %v16304_v38, %v21968_v50  ;;  %16619 = vmatprep.mubr.f32.mxu0 %v11211_v4  ;;  %v10417_v41 = vpop.f32.mrf.mxu1  ;;  %v11220_v38 = vld [vmem:[#allocation3 + $0x189] sm:$0xff]  ;;  %v16896_v4 = vld [vmem:[#allocation2 + $0x1] sm:$0xff] }
 0x83e   : > { %v10191_v54 = vpop.f32.mrf.mxu0  ;;  %16703 = vmatmul.mubr.f32.gmra.mxu1 %v11520_v0  ;;  %v22070_v62 = vadd.f32 %v10417_v41, %v21977_v58 }
 0x83f   : > { %v22073_v13 = vadd.f32 %v10191_v54, %v21974_v35  ;;  %16705 = vmatprep.mubr.f32.mxu1 %v21879_v52  ;;  %v16363_v17 = vpop.f32.mrf.mxu1 }
 0x840   : > { %v16307_v20 = vpop.f32.mrf.mxu0  ;;  %16620 = vmatmul.mubr.f32.gmra.mxu0 %v11212_v10  ;;  %v22077_v50 = vadd.f32 %v16363_v17, %v21983_v14 }
 0x841   : > { %v22080_v32 = vadd.f32 %v16307_v20, %v21980_v3  ;;  %16622 = vmatprep.mubr.f32.mxu0 %v11213_v30  ;;  %v10427_v6 = vpop.f32.mrf.mxu1 }
 0x842   : > { %v10201_v58 = vpop.f32.mrf.mxu0  ;;  %16706 = vmatmul.mubr.f32.gmra.mxu1 %v21900_v56  ;;  %v22084_v35 = vadd.f32 %v10427_v6, %v21989_v26 }
 0x843   : > { %v22087_v52 = vadd.f32 %v10201_v58, %v21986_v5  ;;  %16708 = vmatprep.mubr.f32.mxu1 %v21905_v2  ;;  %v16366_v28 = vpop.f32.mrf.mxu1  ;;  %v11216_v2 = vld [vmem:[#allocation3 + $0x159] sm:$0xff] }
 0x844   : > { %v16310_v14 = vpop.f32.mrf.mxu0  ;;  %16623 = vmatmul.mubr.f32.gmra.mxu0 %v11214_v42  ;;  %v22091_v3 = vadd.f32 %v16366_v28, %v21995_v11  ;;  %v11217_v11 = vld [vmem:[#allocation3 + $0x169] sm:$0xff] }
 0x845   : > { %v10267_v36 = vadd.f32 %v16310_v14, %v21992_v15  ;;  %16625 = vmatprep.mubr.f32.mxu0 %v11215_v39  ;;  %v10437_v56 = vpop.f32.mrf.mxu1  ;;  %v11527_v15 = vld [vmem:[#allocation3 + $0x19a] sm:$0xff] }
 0x846   : > { %v10211_v43 = vpop.f32.mrf.mxu0  ;;  %16709 = vmatmul.mubr.f32.gmra.mxu1 %v21922_v12  ;;  %v22096_v5 = vadd.f32 %v10437_v56, %v22001_v61 }
 0x847   : > { %v10266_v26 = vadd.f32 %v10211_v43, %v21998_v57  ;;  %16711 = vmatprep.mubr.f32.mxu1 %v21925_v48  ;;  %v16369_v63 = vpop.f32.mrf.mxu1  ;;  %v11218_v57 = vld [vmem:[#allocation3 + $0x171] sm:$0xff]  ;;  %v11528_v48 = vld [vmem:[#allocation3 + $0x1a2] sm:$0xff] }
 0x848   : > { %v16313_v60 = vpop.f32.mrf.mxu0  ;;  %16626 = vmatmul.mubr.f32.gmra.mxu0 %v11216_v2  ;;  %v22101_v33 = vadd.f32 %v16369_v63, %v22007_v21 }
 0x849   : > { %v10269_v40 = vadd.f32 %v16313_v60, %v22004_v34  ;;  %16628 = vmatprep.mubr.f32.mxu0 %v11217_v11  ;;  %v10447_v12 = vpop.f32.mrf.mxu1 }
 0x84a   : > { %16712 = vmatmul.mubr.f32.gmra.mxu1 %v21940_v23  ;;  %v22106_v61 = vadd.f32 %v10447_v12, %v22013_v55 }
 0x84b   : > { %v16372_v8 = vpop.f32.mrf.mxu1  ;;  %16714 = vmatprep.mubr.f32.mxu1 %v11527_v15 }
 0x84c   : > { %16629 = vmatmul.mubr.f32.gmra.mxu0 %v11218_v57  ;;  %v22109_v19 = vadd.f32 %v16372_v8, %v22019_v37 }
 0x84d   : > { %16631 = vmatprep.mubr.f32.mxu0 %v11219_v59  ;;  %v10457_v21 = vpop.f32.mrf.mxu1 }
 0x84e   : > { %v22112_v34 = vadd.f32 %v10457_v21, %v22025_v25  ;;  %16715 = vmatmul.mubr.f32.gmra.mxu1 %v11528_v48 }
 0x84f   : > { %v16375_v23 = vpop.f32.mrf.mxu1 }
 0x850   : > { %16632 = vmatmul.mubr.f32.gmra.mxu0 %v11220_v38  ;;  %v22115_v55 = vadd.f32 %v16375_v23, %v22031_v22 }
 0x851   : > { %16634 = vmatprep.mubr.f32.mxu0 %v16896_v4  ;;  %v10467_v0 = vpop.f32.mrf.mxu1 }
 0x852   : > { %v22118_v41 = vadd.f32 %v10467_v0, %v22037_v9 }
 0x853   : > { %v16378_v37 = vpop.f32.mrf.mxu1 }
 0x854   : > { %16635 = vmatmul.mubr.f32.gmra.mxu0 %v16896_v4  ;;  %v22121_v54 = vadd.f32 %v16378_v37, %v22043_v29 }
 0x855   : > { %v10477_v25 = vpop.f32.mrf.mxu1 }
 0x856   : > { %v22124_v10 = vadd.f32 %v10477_v25, %v22049_v27 }
 0x857   : > { %v16381_v17 = vpop.f32.mrf.mxu1 }
 0x858   : > { %v22127_v20 = vadd.f32 %v16381_v17, %v22055_v7 }
 0x859   : > { %v10487_v22 = vpop.f32.mrf.mxu1 }
 0x85a   : > { %v22130_v30 = vadd.f32 %v10487_v22, %v22061_v44  ;;  %v10221_v44 = vpop.f32.mrf.mxu0 }
 0x85b   : > { %v16384_v6 = vpop.f32.mrf.mxu1  ;;  %v10268_v2 = vadd.f32 %v10221_v44, %v22010_v1 }
 0x85c   : > { %v22133_v9 = vadd.f32 %v16384_v6, %v22067_v49  ;;  %v16922_v49 = vmov 0  }
 0x85d   : > { %v10497_v58 = vpop.f32.mrf.mxu1  ;;  %16746 = vset.pattern.permute.xlu1 %v16922_v49  ;;  %16747 = vset.pattern.permute.xlu0 %v16922_v49 }
 0x85e   : > { %v22136_v29 = vadd.f32 %v10497_v58, %v22073_v13 }
 0x85f   : > { %v16387_v42 = vpop.f32.mrf.mxu1 }
 0x860   : > { %v22139_v27 = vadd.f32 %v16387_v42, %v22080_v32 }
 0x861   : > { %v10507_v28 = vpop.f32.mrf.mxu1 }
 0x862   : > { %23010 = vst [vmem:[#allocation94_spill] sm:$0xff] %v22139_v27  ;;  %v22142_v7 = vadd.f32 %v10507_v28, %v22087_v52 }
 0x863   : > { %v16390_v14 = vpop.f32.mrf.mxu1 }
 0x864   : > { %v22144_v39 = vadd.f32 %v16390_v14, %v10267_v36 }
 0x865   : > { %v10517_v56 = vpop.f32.mrf.mxu1 }
 0x866   : > { %23011 = vst [vmem:[#allocation55_spill] sm:$0xff] %v22144_v39  ;;  %v22146_v43 = vadd.f32 %v10517_v56, %v10266_v26 }
 0x867   : > { %v16393_v13 = vpop.f32.mrf.mxu1 }
 0x868   : > { %v22149_v63 = vadd.f32 %v16393_v13, %v10269_v40 }
 0x869   : > { %v10527_v32 = vpop.f32.mrf.mxu1 }
 0x86a   : > { %23012 = vst [vmem:[#allocation41_spill] sm:$0xff] %v22149_v63  ;;  %v22151_v60 = vadd.f32 %v10527_v32, %v10268_v2 }
 0x88c   : > { %v16396_v52 = vpop.f32.mrf.mxu1 }
 0x88e   : > { %v10537_v11 = vpop.f32.mrf.mxu1 }
 0x890   : > { %v22153_v15 = vpop.f32.mrf.mxu1 }
 0x892   : > { %v22155_v36 = vpop.f32.mrf.mxu1 }
 0x894   : > { %v16316_v12 = vpop.f32.mrf.mxu0  ;;  %v22157_v26 = vpop.f32.mrf.mxu1 }
 0x895   : > { %v10271_v57 = vadd.f32 %v16316_v12, %v22016_v46 }
 0x896   : > { %v10231_v8 = vpop.f32.mrf.mxu0  ;;  %v22160_v48 = vpop.f32.mrf.mxu1 }
 0x897   : > { %v22162_v1 = vadd.f32 %v16396_v52, %v10271_v57  ;;  %v10270_v40 = vadd.f32 %v10231_v8, %v22022_v45 }
 0x898   : > { %v22165_v59 = vpop.f32.mrf.mxu0  ;;  %v16517_v21 = vpop.f32.mrf.mxu1 }
 0x899   : > { %23013 = vst [vmem:[#allocation57_spill] sm:$0xff] %v22162_v1  ;;  %v22167_v38 = vadd.f32 %v10537_v11, %v10270_v40 }
 0x89a   : > { %v22169_v23 = vpop.f32.mrf.mxu0  ;;  %v11020_v4 = vpop.f32.mrf.mxu1 }
 0x89c   : > { %v22171_v0 = vpop.f32.mrf.mxu0 }
 0x89e   : > { %v22173_v37 = vpop.f32.mrf.mxu0  ;;  %v16520_v46 = vpop.f32.mrf.mxu1 }
 0x8a0   : > { %v16437_v25 = vpop.f32.mrf.mxu0  ;;  %v11030_v17 = vpop.f32.mrf.mxu1 }
 0x8a1   : > { %v10857_v22 = vadd.f32 %v16437_v25, %v22052_v47 }
 0x8a2   : > { %v10713_v6 = vpop.f32.mrf.mxu0  ;;  %v22176_v58 = vpop.f32.mrf.mxu1 }
 0x8a3   : > { %v22178_v45 = vadd.f32 %v16517_v21, %v10857_v22  ;;  %v10856_v42 = vadd.f32 %v10713_v6, %v22058_v51 }
 0x8a4   : > { %v16440_v28 = vpop.f32.mrf.mxu0  ;;  %v11040_v14 = vpop.f32.mrf.mxu1 }
 0x8a5   : > { %v22181_v44 = vadd.f32 %v11020_v4, %v10856_v42  ;;  %v10859_v56 = vadd.f32 %v16440_v28, %v22064_v16 }
 0x8a6   : > { %v10723_v49 = vpop.f32.mrf.mxu0  ;;  %v22184_v13 = vpop.f32.mrf.mxu1 }
 0x8a7   : > { %v22186_v2 = vadd.f32 %v16520_v46, %v10859_v56  ;;  %v10858_v47 = vadd.f32 %v10723_v49, %v22070_v62 }
 0x8a8   : > { %v22189_v32 = vpop.f32.mrf.mxu0  ;;  %v11050_v52 = vpop.f32.mrf.mxu1 }
 0x8a9   : > { %v22191_v11 = vadd.f32 %v11030_v17, %v10858_v47 }
 0x8aa   : > { %v10733_v12 = vpop.f32.mrf.mxu0  ;;  %v22193_v51 = vpop.f32.mrf.mxu1 }
 0x8ab   : > { %v10860_v57 = vadd.f32 %v10733_v12, %v22084_v35 }
 0x8ac   : > { %v22196_v8 = vpop.f32.mrf.mxu0  ;;  %v11060_v16 = vpop.f32.mrf.mxu1 }
 0x8ad   : > { %v22198_v40 = vadd.f32 %v11040_v14, %v10860_v57 }
 0x8ae   : > { %v10743_v21 = vpop.f32.mrf.mxu0  ;;  %v22200_v4 = vpop.f32.mrf.mxu1 }
 0x8af   : > { %v10862_v62 = vadd.f32 %v10743_v21, %v22096_v5 }
 0x8b0   : > { %v22203_v46 = vpop.f32.mrf.mxu0  ;;  %v11070_v25 = vpop.f32.mrf.mxu1 }
 0x8b1   : > { %v22205_v17 = vadd.f32 %v11050_v52, %v10862_v62 }
 0x8b2   : > { %v10753_v22 = vpop.f32.mrf.mxu0  ;;  %v22207_v6 = vpop.f32.mrf.mxu1 }
 0x8b3   : > { %v10864_v35 = vadd.f32 %v10753_v22, %v22106_v61 }
 0x8b4   : > { %v22210_v42 = vpop.f32.mrf.mxu0  ;;  %v11080_v28 = vpop.f32.mrf.mxu1 }
 0x8b5   : > { %v22212_v14 = vadd.f32 %v11060_v16, %v10864_v35 }
 0x8b6   : > { %v10763_v56 = vpop.f32.mrf.mxu0  ;;  %v22214_v49 = vpop.f32.mrf.mxu1 }
 0x8b7   : > { %v10866_v5 = vadd.f32 %v10763_v56, %v22112_v34 }
 0x8b8   : > { %v22217_v47 = vpop.f32.mrf.mxu0  ;;  %v11090_v12 = vpop.f32.mrf.mxu1 }
 0x8b9   : > { %v22219_v52 = vadd.f32 %v11070_v25, %v10866_v5 }
 0x8ba   : > { %v10773_v57 = vpop.f32.mrf.mxu0  ;;  %v22221_v21 = vpop.f32.mrf.mxu1 }
 0x8bb   : > { %v10868_v61 = vadd.f32 %v10773_v57, %v22118_v41 }
 0x8bc   : > { %v22224_v62 = vpop.f32.mrf.mxu0  ;;  %v11100_v22 = vpop.f32.mrf.mxu1 }
 0x8bd   : > { %v22226_v16 = vadd.f32 %v11080_v28, %v10868_v61 }
 0x8be   : > { %v10783_v35 = vpop.f32.mrf.mxu0  ;;  %v22228_v1 = vpop.f32.mrf.mxu1 }
 0x8bf   : > { %23014 = vst [vmem:[#allocation10_spill] sm:$0xff] %v22226_v16  ;;  %23015 = vst [vmem:[#allocation95_spill] sm:$0xff] %v22228_v1  ;;  %v10870_v34 = vadd.f32 %v10783_v35, %v22124_v10 }
 0x8c0   : > { %v22231_v56 = vpop.f32.mrf.mxu0  ;;  %v11110_v63 = vpop.f32.mrf.mxu1 }
 0x8c1   : > { %v22233_v25 = vadd.f32 %v11090_v12, %v10870_v34 }
 0x8c2   : > { %v10793_v5 = vpop.f32.mrf.mxu0  ;;  %v22235_v39 = vpop.f32.mrf.mxu1 }
 0x8c3   : > { %23016 = vst [vmem:[#allocation56_spill] sm:$0xff] %v22233_v25  ;;  %23017 = vst [vmem:[#allocation32_spill] sm:$0xff] %v22235_v39  ;;  %v10872_v41 = vadd.f32 %v10793_v5, %v22130_v30 }
 0x8c4   : > { %v22238_v57 = vpop.f32.mrf.mxu0  ;;  %v11120_v27 = vpop.f32.mrf.mxu1 }
 0x8c5   : > { %v22240_v28 = vadd.f32 %v11100_v22, %v10872_v41 }
 0x8c6   : > { %v10803_v61 = vpop.f32.mrf.mxu0  ;;  %v22242_v16 = vpop.f32.mrf.mxu1 }
 0x8c7   : > { %23018 = vst [vmem:[#allocation60_spill] sm:$0xff] %v22240_v28  ;;  %23019 = vst [vmem:[#allocation40_spill] sm:$0xff] %v22242_v16  ;;  %v10874_v10 = vadd.f32 %v10803_v61, %v22136_v29 }
 0x8c8   : > { %v22245_v35 = vpop.f32.mrf.mxu0  ;;  %v11130_v1 = vpop.f32.mrf.mxu1 }
 0x8c9   : > { %v22247_v12 = vadd.f32 %v11110_v63, %v10874_v10 }
 0x8ca   : > { %v10813_v34 = vpop.f32.mrf.mxu0  ;;  %v22249_v25 = vpop.f32.mrf.mxu1 }
 0x8cb   : > { %23020 = vst [vmem:[#allocation96_spill] sm:$0xff] %v22247_v12  ;;  %23021 = vst [vmem:[#allocation59_spill] sm:$0xff] %v22249_v25  ;;  %v10876_v30 = vadd.f32 %v10813_v34, %v22142_v7  ;;  %v10853_v7 = vadd.f32 %v22165_v59, %v22028_v18 }
 0x8cc   : > { %v22252_v5 = vpop.f32.mrf.mxu0  ;;  %v11140_v39 = vpop.f32.mrf.mxu1 }
 0x8cd   : > { %v22254_v22 = vadd.f32 %v11120_v27, %v10876_v30  ;;  %v10852_v30 = vadd.f32 %v22169_v23, %v22034_v24 }
 0x8ce   : > { %v10823_v41 = vpop.f32.mrf.mxu0  ;;  %v22256_v28 = vpop.f32.mrf.mxu1 }
 0x8cf   : > { %23022 = vst [vmem:[#allocation27_spill] sm:$0xff] %v22254_v22  ;;  %23023 = vst [vmem:[#allocation63_spill] sm:$0xff] %v22256_v28  ;;  %v10878_v29 = vadd.f32 %v10823_v41, %v22146_v43 }
 0x8d0   : > { %v22259_v61 = vpop.f32.mrf.mxu0  ;;  %v11150_v16 = vpop.f32.mrf.mxu1 }
 0x8d1   : > { %v22261_v63 = vadd.f32 %v11130_v1, %v10878_v29  ;;  %v11160_v1 = vadd.f32 %v22153_v15, %v10853_v7  ;;  %v10855_v29 = vadd.f32 %v22171_v0, %v22040_v31 }
 0x8d2   : > { %v10833_v10 = vpop.f32.mrf.mxu0  ;;  %v16671_v12 = vpop.f32.mrf.mxu1 }
 0x8d3   : > { %23024 = vst [vmem:[#allocation21_spill] sm:$0xff] %v22261_v63  ;;  %v10880_v34 = vadd.f32 %v10833_v10, %v22151_v60  ;;  %v11159_v60 = vadd.f32 %v22155_v36, %v10852_v30  ;;  %v10854_v10 = vadd.f32 %v22173_v37, %v22046_v53  ;;  %v11162_v15 = vadd.f32 %v22157_v26, %v10855_v29 }
 0x8d4   : > { %v22266_v25 = vpop.f32.mrf.mxu0  ;;  %v11612_v27 = vpop.f32.mrf.mxu1 }
 0x8d5   : > { %23025 = vst [vmem:[#allocation97_spill] sm:$0xff] %v22266_v25  ;;  %v22270_v28 = vadd.f32 %v11140_v39, %v10880_v34  ;;  %v22281_v39 = vld [vmem:[#allocation4] ss:$0 sm:$0xff] }
 0x8d6   : > { %v10843_v43 = vpop.f32.mrf.mxu0  ;;  %v16674_v41 = vpop.f32.mrf.mxu1 }
 0x8d7   : > { %23026 = vst [vmem:[#allocation62_spill] sm:$0xff] %v22270_v28  ;;  %v10882_v63 = vadd.f32 %v10843_v43, %v22167_v38  ;;  %v11161_v43 = vadd.f32 %v22160_v48, %v10854_v10  ;;  %v10861_v48 = vadd.f32 %v22189_v32, %v22077_v50  ;;  %v10863_v50 = vadd.f32 %v22196_v8, %v22091_v3 }
 0x8d8   : > { %v16591_v18 = vpop.f32.mrf.mxu0  ;;  %v11622_v59 = vpop.f32.mrf.mxu1 }
 0x8d9   : > { %v22279_v22 = vadd.f32 %v11150_v16, %v10882_v63  ;;  %v11466_v24 = vadd.f32 %v16591_v18, %v11160_v1 }
 0x8da   : > { %v11306_v23 = vpop.f32.mrf.mxu0  ;;  %v16677_v34 = vpop.f32.mrf.mxu1 }
 0x8db   : > { %23027 = vst [vmem:[#allocation43_spill] sm:$0xff] %v22279_v22  ;;  %v11772_v7 = vadd.f32 %v16671_v12, %v11466_v24  ;;  %v11465_v31 = vadd.f32 %v11306_v23, %v11159_v60 }
 0x8dc   : > { %v16594_v0 = vpop.f32.mrf.mxu0  ;;  %v11632_v38 = vpop.f32.mrf.mxu1 }
 0x8dd   : > { %v11811_v36 = vadd.f32 %v22281_v39, %v11772_v7  ;;  %v11771_v30 = vadd.f32 %v11612_v27, %v11465_v31  ;;  %v11468_v28 = vadd.f32 %v16594_v0, %v11162_v15 }
 0x8de   : > { %v11316_v53 = vpop.f32.mrf.mxu0  ;;  %v16680_v37 = vpop.f32.mrf.mxu1 }
 0x8df   : > { %v11843_v16 = vmax.f32 %v11811_v36, 0.0  ;;  %v11810_v63 = vadd.f32 %v22281_v39, %v11771_v30  ;;  %v11774_v1 = vadd.f32 %v16674_v41, %v11468_v28  ;;  %v11467_v18 = vadd.f32 %v11316_v53, %v11161_v43 }
 0x8e0   : > { %v16597_v22 = vpop.f32.mrf.mxu0  ;;  %v11642_v25 = vpop.f32.mrf.mxu1  ;;  %v10865_v30 = vadd.f32 %v22203_v46, %v22101_v33  ;;  %v10867_v33 = vadd.f32 %v22210_v42, %v22109_v19  ;;  %v10869_v19 = vadd.f32 %v22217_v47, %v22115_v55  ;;  %v10871_v55 = vadd.f32 %v22224_v62, %v22121_v54 }
 0x8e1   : > { %v11842_v26 = vmax.f32 %v11810_v63, 0.0  ;;  %v11813_v12 = vadd.f32 %v22281_v39, %v11774_v1  ;;  %v11773_v29 = vadd.f32 %v11622_v59, %v11467_v18  ;;  %v11470_v60 = vadd.f32 %v16597_v22, %v22178_v45  ;;  %11916 = vperm.xlu1 %16746, %v11843_v16  }
 0x8e2   : > { %v11326_v27 = vpop.f32.mrf.mxu0  ;;  %v16683_v10 = vpop.f32.mrf.mxu1  ;;  %v11168_v59 = vadd.f32 %v22176_v58, %v10861_v48  ;;  %v11170_v63 = vadd.f32 %v22184_v13, %v10863_v50  ;;  %v10873_v54 = vadd.f32 %v22231_v56, %v22127_v20  ;;  %v10875_v20 = vadd.f32 %v22238_v57, %v22133_v9  ;;  %v23030_v9 = vld [vmem:[#allocation94_spill] sm:$0xff] }
 0x8e3   : > { %v11845_v24 = vmax.f32 %v11813_v12, 0.0  ;;  %v11812_v23 = vadd.f32 %v22281_v39, %v11773_v29  ;;  %v11776_v15 = vadd.f32 %v16677_v34, %v11470_v60  ;;  %v11469_v28 = vadd.f32 %v11326_v27, %v22181_v44  ;;  %11911 = vperm.xlu0 %16747, %v11842_v26  }
 0x8e4   : > { %v16600_v41 = vpop.f32.mrf.mxu0  ;;  %v11652_v7 = vpop.f32.mrf.mxu1  ;;  %v11172_v29 = vadd.f32 %v22193_v51, %v10865_v30  ;;  %v11174_v51 = vadd.f32 %v22200_v4, %v10867_v33  ;;  %v11176_v4 = vadd.f32 %v22207_v6, %v10869_v19  ;;  %v11178_v6 = vadd.f32 %v22214_v49, %v10871_v55  ;;  %v23032_v55 = vld [vmem:[#allocation32_spill] sm:$0xff] }
 0x8e5   : > { %11926 = vperm.xlu1 %16746, %v11845_v24   ;;  %v11472_v45 = vadd.f32 %v16600_v41, %v22186_v2  ;;  %v11844_v32 = vmax.f32 %v11812_v23, 0.0  ;;  %v11815_v0 = vadd.f32 %v22281_v39, %v11776_v15  ;;  %v11775_v43 = vadd.f32 %v11632_v38, %v11469_v28 }
 0x8e6   : > { %v11336_v22 = vpop.f32.mrf.mxu0  ;;  %v16686_v31 = vpop.f32.mrf.mxu1  ;;  %v11180_v49 = vadd.f32 %v22221_v21, %v10873_v54  ;;  %v23029_v21 = vld [vmem:[#allocation95_spill] sm:$0xff]  ;;  %v10877_v57 = vadd.f32 %v22245_v35, %v23030_v9  ;;  %v23035_v54 = vld [vmem:[#allocation41_spill] sm:$0xff] }
 0x8e7   : > { %v11778_v53 = vadd.f32 %v16680_v37, %v11472_v45  ;;  %v11471_v58 = vadd.f32 %v11336_v22, %v22191_v11  ;;  %v11847_v1 = vmax.f32 %v11815_v0, 0.0  ;;  %v11814_v3 = vadd.f32 %v22281_v39, %v11775_v43  ;;  %v23033_v35 = vld [vmem:[#allocation55_spill] sm:$0xff] }
 0x8e8   : > { %v16603_v34 = vpop.f32.mrf.mxu0  ;;  %v11662_v36 = vpop.f32.mrf.mxu1  ;;  %v11182_v19 = vadd.f32 %v23029_v21, %v10875_v20 }
 0x8e9   : > { %v11474_v44 = vadd.f32 %v16603_v34, %v11168_v59  ;;  %11921 = vperm.xlu1 %16746, %v11844_v32   ;;  %v11817_v11 = vadd.f32 %v22281_v39, %v11778_v53  ;;  %v11777_v46 = vadd.f32 %v11642_v25, %v11471_v58  ;;  %v11846_v60 = vmax.f32 %v11814_v3, 0.0 }
 0x8ea   : > { %v11346_v2 = vpop.f32.mrf.mxu0  ;;  %v16689_v16 = vpop.f32.mrf.mxu1 }
 0x8eb   : > { %v11780_v8 = vadd.f32 %v16683_v10, %v11474_v44  ;;  %v11473_v27 = vadd.f32 %v11346_v2, %v22198_v40  ;;  %v11849_v42 = vmax.f32 %v11817_v11, 0.0  ;;  %v11816_v25 = vadd.f32 %v22281_v39, %v11777_v46 }
 0x8ec   : > { %v16606_v18 = vpop.f32.mrf.mxu0  ;;  %v11672_v38 = vpop.f32.mrf.mxu1 }
 0x8ed   : > { %v11819_v26 = vadd.f32 %v22281_v39, %v11780_v8  ;;  %v11476_v12 = vadd.f32 %v16606_v18, %v11170_v63  ;;  %11936 = vperm.xlu1 %16746, %v11847_v1   ;;  %v11779_v45 = vadd.f32 %v11652_v7, %v11473_v27  ;;  %v11848_v47 = vmax.f32 %v11816_v25, 0.0 }
 0x8ee   : > { %v11356_v37 = vpop.f32.mrf.mxu0  ;;  %v16692_v13 = vpop.f32.mrf.mxu1 }
 0x8ef   : > { %v11851_v48 = vmax.f32 %v11819_v26, 0.0  ;;  %v11782_v10 = vadd.f32 %v16686_v31, %v11476_v12  ;;  %v11475_v22 = vadd.f32 %v11356_v37, %v22205_v17  ;;  %v11818_v17 = vadd.f32 %v22281_v39, %v11779_v45 }
 0x8f0   : > { %v16609_v24 = vpop.f32.mrf.mxu0  ;;  %v11682_v23 = vpop.f32.mrf.mxu1 }
 0x8f1   : > { %v11821_v15 = vadd.f32 %v22281_v39, %v11782_v10  ;;  %v11478_v28 = vadd.f32 %v16609_v24, %v11172_v29  ;;  %11931 = vperm.xlu1 %16746, %v11846_v60   ;;  %11956 = vperm.xlu0 %16747, %v11851_v48   ;;  %v11781_v30 = vadd.f32 %v11662_v36, %v11475_v22  ;;  %v11850_v36 = vmax.f32 %v11818_v17, 0.0  ;;  %v23028_v48 = vld [vmem:[#allocation10_spill] sm:$0xff] }
 0x8f2   : > { %v11366_v41 = vpop.f32.mrf.mxu0  ;;  %v16695_v59 = vpop.f32.mrf.mxu1 }
 0x8f3   : > { %v11853_v40 = vmax.f32 %v11821_v15, 0.0  ;;  %v11784_v31 = vadd.f32 %v16689_v16, %v11478_v28  ;;  %v11477_v34 = vadd.f32 %v11366_v41, %v22212_v14  ;;  %v11820_v18 = vadd.f32 %v22281_v39, %v11781_v30 }
 0x8f4   : > { %v16612_v50 = vpop.f32.mrf.mxu0  ;;  %v11692_v32 = vpop.f32.mrf.mxu1 }
 0x8f5   : > { %v11823_v0 = vadd.f32 %v22281_v39, %v11784_v31  ;;  %v11480_v43 = vadd.f32 %v16612_v50, %v11174_v51  ;;  %11946 = vperm.xlu1 %16746, %v11849_v42   ;;  %11966 = vperm.xlu0 %16747, %v11853_v40   ;;  %v11783_v14 = vadd.f32 %v11672_v38, %v11477_v34  ;;  %v23031_v40 = vld [vmem:[#allocation56_spill] sm:$0xff] }
 0x8f6   : > { %v11376_v7 = vpop.f32.mrf.mxu0  ;;  %v16698_v44 = vpop.f32.mrf.mxu1  ;;  %v10879_v34 = vadd.f32 %v22252_v5, %v23033_v35  ;;  %v23036_v5 = vld [vmem:[#allocation40_spill] sm:$0xff] }
 0x8f7   : > { %v11855_v53 = vmax.f32 %v11823_v0, 0.0  ;;  %v11786_v58 = vadd.f32 %v16692_v13, %v11480_v43  ;;  %v11479_v62 = vadd.f32 %v11376_v7, %v22219_v52  ;;  %v11822_v52 = vadd.f32 %v22281_v39, %v11783_v14 }
 0x8f8   : > { %v16615_v2 = vpop.f32.mrf.mxu0  ;;  %v11702_v16 = vpop.f32.mrf.mxu1  ;;  %v11852_v13 = vmax.f32 %v11820_v18, 0.0  ;;  %v10881_v14 = vadd.f32 %v22259_v61, %v23035_v54  ;;  %v23037_v18 = vld [vmem:[#allocation96_spill] sm:$0xff] }
 0x8f9   : > { %v11825_v63 = vadd.f32 %v22281_v39, %v11786_v58  ;;  %v11482_v1 = vadd.f32 %v16615_v2, %v11176_v4  ;;  %11941 = vperm.xlu1 %16746, %v11848_v47   ;;  %11976 = vperm.xlu0 %16747, %v11855_v53   ;;  %v11785_v56 = vadd.f32 %v11682_v23, %v11479_v62  ;;  %v11854_v23 = vmax.f32 %v11822_v52, 0.0  ;;  %v23038_v52 = vld [vmem:[#allocation59_spill] sm:$0xff] }
 0x8fa   : > { %v11386_v3 = vpop.f32.mrf.mxu0  ;;  %v16701_v8 = vpop.f32.mrf.mxu1  ;;  %v11184_v47 = vadd.f32 %v23032_v55, %v10877_v57  ;;  %v11188_v61 = vadd.f32 %v23038_v52, %v10881_v14  ;;  %v13177_v52 = vld [vmem:[%s17015_s23 + $0x61] sm:$0xff] }
 0x8fb   : > { %v11857_v26 = vmax.f32 %v11825_v63, 0.0  ;;  %v11788_v12 = vadd.f32 %v16695_v59, %v11482_v1  ;;  %v11481_v27 = vadd.f32 %v11386_v3, %v23028_v48  ;;  %v11824_v42 = vadd.f32 %v22281_v39, %v11785_v56 }
 0x8fc   : > { %v16618_v29 = vpop.f32.mrf.mxu0  ;;  %v11712_v33 = vpop.f32.mrf.mxu1 }
 0x8fd   : > { %v11827_v11 = vadd.f32 %v22281_v39, %v11788_v12  ;;  %v11484_v46 = vadd.f32 %v16618_v29, %v11178_v6  ;;  %11951 = vperm.xlu1 %16746, %v11850_v36   ;;  %11986 = vperm.xlu0 %16747, %v11857_v26   ;;  %v11787_v59 = vadd.f32 %v11692_v32, %v11481_v27  ;;  %v11856_v7 = vmax.f32 %v11824_v42, 0.0  ;;  %v23041_v27 = vld [vmem:[#allocation27_spill] sm:$0xff] }
 0x8fe   : > { %v11396_v38 = vpop.f32.mrf.mxu0  ;;  %v16704_v37 = vpop.f32.mrf.mxu1 }
 0x8ff   : > { %v11859_v60 = vmax.f32 %v11827_v11, 0.0  ;;  %v11790_v10 = vadd.f32 %v16698_v44, %v11484_v46  ;;  %v11483_v22 = vadd.f32 %v11396_v38, %v23031_v40  ;;  %v23034_v44 = vld [vmem:[#allocation60_spill] sm:$0xff]  ;;  %v11826_v53 = vadd.f32 %v22281_v39, %v11787_v59  ;;  %v23043_v59 = vld [vmem:[#allocation63_spill] sm:$0xff] }
 0x900   : > { %v16621_v24 = vpop.f32.mrf.mxu0  ;;  %v11722_v15 = vpop.f32.mrf.mxu1 }
 0x901   : > { %v11829_v28 = vadd.f32 %v22281_v39, %v11790_v10  ;;  %v11486_v51 = vadd.f32 %v16621_v24, %v11180_v49  ;;  %11961 = vperm.xlu1 %16746, %v11852_v13   ;;  %11996 = vperm.xlu0 %16747, %v11859_v60   ;;  %v11789_v58 = vadd.f32 %v11702_v16, %v11483_v22  ;;  %v11858_v29 = vmax.f32 %v11826_v53, 0.0  ;;  %v23040_v13 = vld [vmem:[#allocation97_spill] sm:$0xff] }
 0x902   : > { %v11406_v25 = vpop.f32.mrf.mxu0  ;;  %v16707_v41 = vpop.f32.mrf.mxu1 }
 0x903   : > { %v11861_v45 = vmax.f32 %v11829_v28, 0.0  ;;  %v11792_v31 = vadd.f32 %v16701_v8, %v11486_v51  ;;  %v11485_v17 = vadd.f32 %v11406_v25, %v23034_v44  ;;  %v11186_v8 = vadd.f32 %v23036_v5, %v10879_v34 }
 0x904   : > { %v16624_v50 = vpop.f32.mrf.mxu0  ;;  %v11732_v0 = vpop.f32.mrf.mxu1  ;;  %v11828_v16 = vadd.f32 %v22281_v39, %v11789_v58 }
 0x905   : > { %v11831_v43 = vadd.f32 %v22281_v39, %v11792_v31  ;;  %v11488_v4 = vadd.f32 %v16624_v50, %v11182_v19  ;;  %11971 = vperm.xlu1 %16746, %v11854_v23   ;;  %12006 = vperm.xlu0 %16747, %v11861_v45   ;;  %v11791_v36 = vadd.f32 %v11712_v33, %v11485_v17  ;;  %v23042_v19 = vld [vmem:[#allocation21_spill] sm:$0xff] }
 0x906   : > { %v11416_v32 = vpop.f32.mrf.mxu0  ;;  %v16710_v30 = vpop.f32.mrf.mxu1  ;;  %v11860_v28 = vmax.f32 %v11828_v16, 0.0 }
 0x907   : > { %v11863_v2 = vmax.f32 %v11831_v43, 0.0  ;;  %v11794_v63 = vadd.f32 %v16704_v37, %v11488_v4  ;;  %v11487_v26 = vadd.f32 %v11416_v32, %v23037_v18  ;;  %v23039_v37 = vld [vmem:[#allocation57_spill] sm:$0xff]  ;;  %v11830_v60 = vadd.f32 %v22281_v39, %v11791_v36 }
 0x908   : > { %v16627_v1 = vpop.f32.mrf.mxu0  ;;  %v11742_v6 = vpop.f32.mrf.mxu1  ;;  %v10883_v33 = vadd.f32 %v23040_v13, %v23039_v37 }
 0x909   : > { %v11833_v62 = vadd.f32 %v22281_v39, %v11794_v63  ;;  %v11490_v3 = vadd.f32 %v16627_v1, %v11184_v47  ;;  %11981 = vperm.xlu1 %16746, %v11856_v7   ;;  %12016 = vperm.xlu0 %16747, %v11863_v2   ;;  %v11793_v48 = vadd.f32 %v11722_v15, %v11487_v26  ;;  %v11862_v40 = vmax.f32 %v11830_v60, 0.0  ;;  %v23044_v47 = vld [vmem:[#allocation62_spill] sm:$0xff]  ;;  %v23045_v63 = vld [vmem:[#allocation43_spill] sm:$0xff]  ;;  %v13176_v26 = vld [vmem:[%s17015_s23 + $0x51] sm:$0xff] }
 0x90a   : > { %v11426_v12 = vpop.f32.mrf.mxu0  ;;  %v16713_v20 = vpop.f32.mrf.mxu1  ;;  %v11190_v45 = vadd.f32 %v23043_v59, %v10883_v33  ;;  %v13179_v33 = vld [vmem:[%s17015_s23 + $0x79] sm:$0xff]  ;;  %v13184_v60 = vld [vmem:[%s17015_s23 + $0xb1] sm:$0xff] }
 0x90b   : > { %v11865_v11 = vmax.f32 %v11833_v62, 0.0  ;;  %v11796_v46 = vadd.f32 %v16707_v41, %v11490_v3  ;;  %v11489_v10 = vadd.f32 %v11426_v12, %v23041_v27  ;;  %v11832_v15 = vadd.f32 %v22281_v39, %v11793_v48  ;;  %v13175_v12 = vld [vmem:[%s17015_s23 + $0x49] sm:$0xff] }
 0x90c   : > { %v16630_v49 = vpop.f32.mrf.mxu0  ;;  %v11752_v23 = vpop.f32.mrf.mxu1 }
 0x90d   : > { %v11835_v56 = vadd.f32 %v22281_v39, %v11796_v46  ;;  %v11492_v38 = vadd.f32 %v16630_v49, %v11186_v8  ;;  %11991 = vperm.xlu1 %16746, %v11858_v29   ;;  %12026 = vperm.xlu0 %16747, %v11865_v11   ;;  %v11795_v22 = vadd.f32 %v11732_v0, %v11489_v10  ;;  %v11864_v32 = vmax.f32 %v11832_v15, 0.0  ;;  %v13178_v11 = vld [vmem:[%s17015_s23 + $0x69] sm:$0xff]  ;;  %v13190_v15 = vld [vmem:[%s17015_s23 + $0xf9] sm:$0xff] }
 0x90e   : > { %v11436_v24 = vpop.f32.mrf.mxu0  ;;  %v16716_v50 = vpop.f32.mrf.mxu1 }
 0x90f   : > { %v11867_v51 = vmax.f32 %v11835_v56, 0.0  ;;  %v11798_v21 = vadd.f32 %v16710_v30, %v11492_v38  ;;  %v11491_v9 = vadd.f32 %v11436_v24, %v23042_v19  ;;  %v11834_v30 = vadd.f32 %v22281_v39, %v11795_v22  ;;  %v13180_v38 = vld [vmem:[%s17015_s23 + $0x81] sm:$0xff] }
 0x910   : > { %v16633_v57 = vpop.f32.mrf.mxu0  ;;  %v11762_v0 = vpop.f32.mrf.mxu1 }
 0x911   : > { %v11837_v42 = vadd.f32 %v22281_v39, %v11798_v21  ;;  %v11797_v25 = vadd.f32 %v11742_v6, %v11491_v9  ;;  %v11494_v41 = vadd.f32 %v16633_v57, %v11188_v61  ;;  %12001 = vperm.xlu1 %16746, %v11860_v28   ;;  %12036 = vperm.xlu0 %16747, %v11867_v51   ;;  %v11866_v62 = vmax.f32 %v11834_v30, 0.0  ;;  %v13182_v28 = vld [vmem:[%s17015_s23 + $0x99] sm:$0xff]  ;;  %v13186_v51 = vld [vmem:[%s17015_s23 + $0xc9] sm:$0xff] }
 0x912   : > { %v11446_v31 = vpop.f32.mrf.mxu0 }
 0x913   : > { %v11869_v43 = vmax.f32 %v11837_v42, 0.0  ;;  %v11836_v4 = vadd.f32 %v22281_v39, %v11797_v25  ;;  %v11800_v55 = vadd.f32 %v16713_v20, %v11494_v41  ;;  %v11493_v35 = vadd.f32 %v11446_v31, %v23044_v47  ;;  %v13188_v42 = vld [vmem:[%s17015_s23 + $0xe1] sm:$0xff] }
 0x914   : > { %v16636_v34 = vpop.f32.mrf.mxu0 }
 0x915   : > { %v11839_v7 = vadd.f32 %v22281_v39, %v11800_v55  ;;  %v11799_v44 = vadd.f32 %v11752_v23, %v11493_v35  ;;  %v11496_v17 = vadd.f32 %v16636_v34, %v11190_v45  ;;  %12011 = vperm.xlu1 %16746, %v11862_v40   ;;  %12046 = vperm.xlu0 %16747, %v11869_v43   ;;  %v11868_v8 = vmax.f32 %v11836_v4, 0.0  ;;  %v13181_v23 = vld [vmem:[%s17015_s23 + $0x91] sm:$0xff]  ;;  %v13183_v40 = vld [vmem:[%s17015_s23 + $0xa9] sm:$0xff]  ;;  %v13185_v4 = vld [vmem:[%s17015_s23 + $0xc1] sm:$0xff] }
 0x916   : > { %v11456_v53 = vpop.f32.mrf.mxu0  ;;  %v13192_v55 = vld [vmem:[%s17015_s23 + $0x111] sm:$0xff] }
 0x917   : > { %v11871_v58 = vmax.f32 %v11839_v7, 0.0  ;;  %v11838_v2 = vadd.f32 %v22281_v39, %v11799_v44  ;;  %v11495_v1 = vadd.f32 %v11456_v53, %v23045_v63  ;;  %v11802_v6 = vadd.f32 %v16716_v50, %v11496_v17  ;;  %v13187_v44 = vld [vmem:[%s17015_s23 + $0xd9] sm:$0xff]  ;;  %v13194_v17 = vld [vmem:[%s17015_s23 + $0x129] sm:$0xff] }
 0x919   : > { %v11841_v54 = vadd.f32 %v22281_v39, %v11802_v6  ;;  %v11801_v14 = vadd.f32 %v11762_v0, %v11495_v1  ;;  %12021 = vperm.xlu1 %16746, %v11864_v32   ;;  %12056 = vperm.xlu0 %16747, %v11871_v58   ;;  %v11870_v36 = vmax.f32 %v11838_v2, 0.0  ;;  %v13189_v58 = vld [vmem:[%s17015_s23 + $0xf1] sm:$0xff]  ;;  %v13196_v2 = vld [vmem:[%s17015_s23 + $0x141] sm:$0xff] }
 0x91b   : > { %v11873_v3 = vmax.f32 %v11841_v54, 0.0  ;;  %v11840_v5 = vadd.f32 %v22281_v39, %v11801_v14  ;;  %v13191_v14 = vld [vmem:[%s17015_s23 + $0x109] sm:$0xff] }
 0x91d   : > { %12031 = vperm.xlu1 %16746, %v11866_v62   ;;  %12066 = vperm.xlu0 %16747, %v11873_v3   ;;  %v11872_v18 = vmax.f32 %v11840_v5, 0.0  ;;  %v13198_v62 = vld [vmem:[%s17015_s23 + $0x159] sm:$0xff] }
 0x921   : > { %12041 = vperm.xlu1 %16746, %v11868_v8  }
 0x925   : > { %12051 = vperm.xlu1 %16746, %v11870_v36  }
 0x929   : > { %12061 = vperm.xlu1 %16746, %v11872_v18   ;;  %v13193_v18 = vld [vmem:[%s17015_s23 + $0x121] sm:$0xff] }
 0x95c   : > { %v11917_v39 = vpop.permute.xlu1 %11916 }
 0x95d   : > { %v12070_v29 = vmul.f32 %v13176_v26, %v11917_v39  ;;  %v13200_v26 = vld [vmem:[%s17015_s23 + $0x171] sm:$0xff] }
 0x95e   : > { %v11912_v16 = vpop.permute.xlu0 %11911 }
 0x95f   : > { %12102 = vst.msk [vmem:[%s22374_s10 + $0x8] sm:$0xff] %vm478_vm1, %v12070_v29  ;;  %v12069_v46 = vmul.f32 %v13175_v12, %v11912_v16 }
 0x960   : > { %v11927_v49 = vpop.permute.xlu1 %11926 }
 0x961   : > { %12101 = vst.msk [vmem:[%s22374_s10] sm:$0xff] %vm478_vm1, %v12069_v46  ;;  %v12072_v20 = vmul.f32 %v13178_v11, %v11927_v49  ;;  %v13195_v11 = vld [vmem:[%s17015_s23 + $0x139] sm:$0xff]  ;;  %v13202_v46 = vld [vmem:[%s17015_s23 + $0x189] sm:$0xff] }
 0x963   : > { %12104 = vst.msk [vmem:[%s22374_s10 + $0x18] sm:$0xff] %vm478_vm1, %v12072_v20 }
 0x964   : > { %v11922_v61 = vpop.permute.xlu1 %11921 }
 0x965   : > { %v12071_v56 = vmul.f32 %v13177_v52, %v11922_v61 }
 0x967   : > { %12103 = vst.msk [vmem:[%s22374_s10 + $0x10] sm:$0xff] %vm478_vm1, %v12071_v56  ;;  %v13197_v56 = vld [vmem:[%s17015_s23 + $0x151] sm:$0xff] }
 0x968   : > { %v11937_v37 = vpop.permute.xlu1 %11936 }
 0x969   : > { %v12074_v13 = vmul.f32 %v13180_v38, %v11937_v37  ;;  %v13204_v38 = vld [vmem:[%s17015_s23 + $0x1a1] sm:$0xff] }
 0x96b   : > { %12106 = vst.msk [vmem:[%s22374_s10 + $0x28] sm:$0xff] %vm478_vm1, %v12074_v13 }
 0x96c   : > { %v11932_v48 = vpop.permute.xlu1 %11931  ;;  %v11957_v27 = vpop.permute.xlu0 %11956 }
 0x96d   : > { %v12073_v10 = vmul.f32 %v13179_v33, %v11932_v48  ;;  %v12078_v24 = vmul.f32 %v13184_v60, %v11957_v27  ;;  %v13199_v48 = vld [vmem:[%s17015_s23 + $0x169] sm:$0xff]  ;;  %v13206_v27 = vld [vmem:[%s17015_s23 + $0x1b9] sm:$0xff] }
 0x96f   : > { %12105 = vst.msk [vmem:[%s22374_s10 + $0x20] sm:$0xff] %vm478_vm1, %v12073_v10  ;;  %12110 = vst.msk [vmem:[%s22374_s10 + $0x48] sm:$0xff] %vm478_vm1, %v12078_v24 }
 0x970   : > { %v11947_v21 = vpop.permute.xlu1 %11946  ;;  %v11967_v19 = vpop.permute.xlu0 %11966 }
 0x971   : > { %v12076_v9 = vmul.f32 %v13182_v28, %v11947_v21  ;;  %v12080_v57 = vmul.f32 %v13186_v51, %v11967_v19  ;;  %v13201_v21 = vld [vmem:[%s17015_s23 + $0x181] sm:$0xff] }
 0x973   : > { %12108 = vst.msk [vmem:[%s22374_s10 + $0x38] sm:$0xff] %vm478_vm1, %v12076_v9  ;;  %12112 = vst.msk [vmem:[%s22374_s10 + $0x58] sm:$0xff] %vm478_vm1, %v12080_v57  ;;  %v13203_v57 = vld [vmem:[%s17015_s23 + $0x199] sm:$0xff] }
 0x974   : > { %v11942_v25 = vpop.permute.xlu1 %11941  ;;  %v11977_v41 = vpop.permute.xlu0 %11976 }
 0x975   : > { %v12075_v59 = vmul.f32 %v13181_v23, %v11942_v25  ;;  %v12082_v45 = vmul.f32 %v13188_v42, %v11977_v41  ;;  %v13205_v25 = vld [vmem:[%s17015_s23 + $0x1b1] sm:$0xff] }
 0x977   : > { %12107 = vst.msk [vmem:[%s22374_s10 + $0x30] sm:$0xff] %vm478_vm1, %v12075_v59  ;;  %12114 = vst.msk [vmem:[%s22374_s10 + $0x68] sm:$0xff] %vm478_vm1, %v12082_v45 }
 0x978   : > { %v11952_v22 = vpop.permute.xlu1 %11951  ;;  %v11987_v31 = vpop.permute.xlu0 %11986 }
 0x979   : > { %v12077_v50 = vmul.f32 %v13183_v40, %v11952_v22  ;;  %v12084_v43 = vmul.f32 %v13190_v15, %v11987_v31 }
 0x97b   : > { %12109 = vst.msk [vmem:[%s22374_s10 + $0x40] sm:$0xff] %vm478_vm1, %v12077_v50  ;;  %12116 = vst.msk [vmem:[%s22374_s10 + $0x78] sm:$0xff] %vm478_vm1, %v12084_v43 }
 0x97c   : > { %v11962_v47 = vpop.permute.xlu1 %11961  ;;  %v11997_v35 = vpop.permute.xlu0 %11996 }
 0x97d   : > { %v12079_v34 = vmul.f32 %v13185_v4, %v11962_v47  ;;  %v12086_v7 = vmul.f32 %v13192_v55, %v11997_v35 }
 0x97f   : > { %12111 = vst.msk [vmem:[%s22374_s10 + $0x50] sm:$0xff] %vm478_vm1, %v12079_v34  ;;  %12118 = vst.msk [vmem:[%s22374_s10 + $0x88] sm:$0xff] %vm478_vm1, %v12086_v7 }
 0x980   : > { %v11972_v32 = vpop.permute.xlu1 %11971  ;;  %v12007_v30 = vpop.permute.xlu0 %12006 }
 0x981   : > { %v12081_v53 = vmul.f32 %v13187_v44, %v11972_v32  ;;  %v12088_v0 = vmul.f32 %v13194_v17, %v12007_v30 }
 0x983   : > { %12113 = vst.msk [vmem:[%s22374_s10 + $0x60] sm:$0xff] %vm478_vm1, %v12081_v53  ;;  %12120 = vst.msk [vmem:[%s22374_s10 + $0x98] sm:$0xff] %vm478_vm1, %v12088_v0 }
 0x984   : > { %v11982_v63 = vpop.permute.xlu1 %11981  ;;  %v12017_v1 = vpop.permute.xlu0 %12016 }
 0x985   : > { %v12083_v6 = vmul.f32 %v13189_v58, %v11982_v63  ;;  %v12090_v54 = vmul.f32 %v13196_v2, %v12017_v1 }
 0x987   : > { %12115 = vst.msk [vmem:[%s22374_s10 + $0x70] sm:$0xff] %vm478_vm1, %v12083_v6  ;;  %12122 = vst.msk [vmem:[%s22374_s10 + $0xa8] sm:$0xff] %vm478_vm1, %v12090_v54 }
 0x988   : > { %v11992_v3 = vpop.permute.xlu1 %11991  ;;  %v12027_v5 = vpop.permute.xlu0 %12026 }
 0x989   : > { %v12085_v8 = vmul.f32 %v13191_v14, %v11992_v3  ;;  %v12092_v36 = vmul.f32 %v13198_v62, %v12027_v5 }
 0x98b   : > { %12117 = vst.msk [vmem:[%s22374_s10 + $0x80] sm:$0xff] %vm478_vm1, %v12085_v8  ;;  %12124 = vst.msk [vmem:[%s22374_s10 + $0xb8] sm:$0xff] %vm478_vm1, %v12092_v36 }
 0x98c   : > { %v12002_v39 = vpop.permute.xlu1 %12001  ;;  %v12037_v12 = vpop.permute.xlu0 %12036 }
 0x98d   : > { %v12087_v29 = vmul.f32 %v13193_v18, %v12002_v39  ;;  %v12094_v16 = vmul.f32 %v13200_v26, %v12037_v12 }
 0x98f   : > { %12119 = vst.msk [vmem:[%s22374_s10 + $0x90] sm:$0xff] %vm478_vm1, %v12087_v29  ;;  %12126 = vst.msk [vmem:[%s22374_s10 + $0xc8] sm:$0xff] %vm478_vm1, %v12094_v16 }
 0x990   : > { %v12012_v49 = vpop.permute.xlu1 %12011  ;;  %v12047_v20 = vpop.permute.xlu0 %12046 }
 0x991   : > { %v12089_v52 = vmul.f32 %v13195_v11, %v12012_v49  ;;  %v12096_v61 = vmul.f32 %v13202_v46, %v12047_v20 }
 0x993   : > { %12121 = vst.msk [vmem:[%s22374_s10 + $0xa0] sm:$0xff] %vm478_vm1, %v12089_v52  ;;  %12128 = vst.msk [vmem:[%s22374_s10 + $0xd8] sm:$0xff] %vm478_vm1, %v12096_v61 }
 0x994   : > { %v12022_v37 = vpop.permute.xlu1 %12021  ;;  %v12057_v13 = vpop.permute.xlu0 %12056 }
 0x995   : > { %v12091_v33 = vmul.f32 %v13197_v56, %v12022_v37  ;;  %v12098_v60 = vmul.f32 %v13204_v38, %v12057_v13 }
 0x997   : > { %12123 = vst.msk [vmem:[%s22374_s10 + $0xb0] sm:$0xff] %vm478_vm1, %v12091_v33  ;;  %12130 = vst.msk [vmem:[%s22374_s10 + $0xe8] sm:$0xff] %vm478_vm1, %v12098_v60 }
 0x998   : > { %v12032_v10 = vpop.permute.xlu1 %12031  ;;  %v12067_v24 = vpop.permute.xlu0 %12066 }
 0x999   : > { %v12093_v28 = vmul.f32 %v13199_v48, %v12032_v10  ;;  %v12100_v51 = vmul.f32 %v13206_v27, %v12067_v24 }
 0x99b   : > { %12125 = vst.msk [vmem:[%s22374_s10 + $0xc0] sm:$0xff] %vm478_vm1, %v12093_v28  ;;  %12132 = vst.msk [vmem:[%s22374_s10 + $0xf8] sm:$0xff] %vm478_vm1, %v12100_v51 }
 0x99c   : > { %v12042_v19 = vpop.permute.xlu1 %12041 }
 0x99d   : > { %v12095_v9 = vmul.f32 %v13201_v21, %v12042_v19 }
 0x99f   : > { %12127 = vst.msk [vmem:[%s22374_s10 + $0xd0] sm:$0xff] %vm478_vm1, %v12095_v9 }
 0x9a0   : > { %v12052_v23 = vpop.permute.xlu1 %12051 }
 0x9a1   : > { %v12097_v42 = vmul.f32 %v13203_v57, %v12052_v23 }
 0x9a3   : > { %12129 = vst.msk [vmem:[%s22374_s10 + $0xe0] sm:$0xff] %vm478_vm1, %v12097_v42 }
 0x9a4   : > { %v12062_v41 = vpop.permute.xlu1 %12061 }
 0x9a5   : > { %v12099_v59 = vmul.f32 %v13205_v25, %v12062_v41 }
 0x9a7   : > { %12131 = vst.msk [vmem:[%s22374_s10 + $0xf0] sm:$0xff] %vm478_vm1, %v12099_v59 }
 0x9a8 PF: > { %s21_s13 = sadd.s32 1, %s16919_s13   ;;  %s23046_s11 = smov %s16915_s12 }
 0x9a9   : > { %p18_p5 = scmp.ge.s32.totalorder %s21_s13, 4   ;;  %s23047_s12 = smov %s23049_s8 }
 0x9ab   :  { %20 = sbr.rel (!%p18_p5) target bundleno = 3 (0x3), region = 124 }

</bundles_post_ra>
